<compile_context>
chip_gen: v5e
topology: v5e:2x2
jax: 0.10.0
libtpu: 0.0.40
codegen_flags: <defaults>
</compile_context>

<pallas_src>
import functools

import jax
import jax.numpy as jnp
from jax.experimental import pallas as pl
from jax.experimental.pallas import tpu as pltpu

DIM = 64


def _roundup(x, m):
    return ((x + m - 1) // m) * m


def _tile_cap():
    """Row-tile cap: 512 everywhere (fits v7x 64 MiB VMEM comfortably),
    1024 when the chip reports a big (128 MiB-class) VMEM."""
    try:
        if pltpu.get_tpu_info().vmem_capacity_bytes >= (96 << 20):
            return 1024
    except Exception:
        pass
    return 512


# ----------------------------------------------------------------------------
# Pallas kernel: fused  out = leaky_relu( X @ W + b )   (leaky optional)
# Per grid step: X tile (TM, K) bf16, W (K, N) bf16 resident, b (1, N) f32,
# out tile (TM, N) f32.  Matmul accumulates in f32 on the MXU.
# ----------------------------------------------------------------------------
def _matmul_bias_act_kernel(x_ref, w_ref, b_ref, o_ref, *, leaky_slope):
    acc = jnp.dot(x_ref[...], w_ref[...], preferred_element_type=jnp.float32)
    acc = acc + b_ref[...]
    if leaky_slope is not None:
        acc = jnp.where(acc > 0, acc, leaky_slope * acc)
    o_ref[...] = acc.astype(o_ref.dtype)


def pallas_matmul_bias_act(x, w, b, leaky_slope=None, tm=None):
    """x: (M, K) f32, w: (K, N) f32, b: (N,) f32 -> (M, N) f32.

    Tiled over M with a 1-D "parallel" grid; X/W fed to the MXU as bf16 with
    f32 accumulation.  K is zero-padded to a multiple of 16, M to a multiple
    of the row tile (padded rows sliced off afterwards).
    """
    M, K = x.shape
    Kw, N = w.shape
    assert K == Kw

    # Pad contraction dim so W's sublane dim is aligned (conv1: 25 -> 32).
    Kp = _roundup(K, 16)
    if Kp != K:
        x = jnp.pad(x, ((0, 0), (0, Kp - K)))
        w = jnp.pad(w, ((0, Kp - K), (0, 0)))

    # Row tile: whole (rounded) M for small problems, else the per-chip cap.
    cap = _tile_cap()
    if tm is None:
        tm = _roundup(M, 16) if M <= cap else cap
    Mp = _roundup(M, tm)
    if Mp != M:
        x = jnp.pad(x, ((0, Mp - M), (0, 0)))

    xb = x.astype(jnp.bfloat16)
    wb = w.astype(jnp.bfloat16)
    b2 = b.reshape(1, N).astype(jnp.float32)

    grid = (Mp // tm,)
    cost = pl.CostEstimate(
        flops=2 * Mp * N * Kp,
        transcendentals=0,
        bytes_accessed=Mp * Kp * 2 + Kp * N * 2 + N * 4 + Mp * N * 4,
    )
    kernel = functools.partial(_matmul_bias_act_kernel, leaky_slope=leaky_slope)

    out = pl.pallas_call(
        kernel,
        out_shape=jax.ShapeDtypeStruct((Mp, N), jnp.float32),
        grid=grid,
        in_specs=[
            pl.BlockSpec((tm, Kp), lambda i: (i, 0)),   # X tile, streamed over M
            pl.BlockSpec((Kp, N), lambda i: (0, 0)),    # W resident
            pl.BlockSpec((1, N), lambda i: (0, 0)),     # bias resident
        ],
        out_specs=pl.BlockSpec((tm, N), lambda i: (i, 0)),
        compiler_params=pltpu.CompilerParams(
            dimension_semantics=("parallel",),
        ),
        cost_estimate=cost,
    )(xb, wb, b2)

    return out[:M] if Mp != M else out


# ----------------------------------------------------------------------------
# im2col glue (pure JAX), channels-last: NHWC input -> (B*Ho*Wo, k*k*Cin)
# patch matrix with feature order (kh, kw, Cin).
# ----------------------------------------------------------------------------
def im2col_nhwc(x, k=5, stride=2, pad=2):
    B, H, W, C = x.shape
    xp = jnp.pad(x, ((0, 0), (pad, pad), (pad, pad), (0, 0)))
    Ho = (H + 2 * pad - k) // stride + 1
    Wo = (W + 2 * pad - k) // stride + 1
    patches = []
    for i in range(k):
        for j in range(k):
            patches.append(
                xp[:,
                   i: i + stride * (Ho - 1) + 1: stride,
                   j: j + stride * (Wo - 1) + 1: stride,
                   :]  # (B, Ho, Wo, C)
            )
    # (B, Ho, Wo, k*k, C) -> (B*Ho*Wo, k*k*C); feature order = (kh, kw, C)
    p = jnp.stack(patches, axis=3).reshape(B * Ho * Wo, k * k * C)
    return p, Ho, Wo


def conv2d_lrelu(x, w, b, slope=0.2, k=5, stride=2, pad=2):
    """x: (B, H, W, Cin) NHWC; w: (Cout, Cin, k, k) PyTorch layout; b: (Cout,).
    Returns (B, Ho, Wo, Cout) NHWC (no layout round trips)."""
    B, H, W, Cin = x.shape
    Cout = w.shape[0]
    cols, Ho, Wo = im2col_nhwc(x, k=k, stride=stride, pad=pad)   # (B*Ho*Wo, k*k*Cin)
    # Reorder weight to (kh, kw, Cin, Cout) to match the patch feature order.
    w2 = jnp.transpose(w, (2, 3, 1, 0)).reshape(k * k * Cin, Cout)
    out = pallas_matmul_bias_act(cols, w2, b, leaky_slope=slope)  # (B*Ho*Wo, Cout)
    return out.reshape(B, Ho, Wo, Cout)


# ----------------------------------------------------------------------------
# WassNet parameters (deterministic synthetic init) and forward
# ----------------------------------------------------------------------------
def init_params(key):
    ks = jax.random.split(key, 8)

    def uniform(k, shape, fan_in):
        bound = 1.0 / jnp.sqrt(fan_in)
        return jax.random.uniform(k, shape, jnp.float32, -bound, bound)

    p = {}
    # Conv2d(1, 64, 5)
    p["w1"] = uniform(ks[0], (DIM, 1, 5, 5), 1 * 25)
    p["b1"] = uniform(ks[1], (DIM,), 1 * 25)
    # Conv2d(64, 128, 5)
    p["w2"] = uniform(ks[2], (2 * DIM, DIM, 5, 5), DIM * 25)
    p["b2"] = uniform(ks[3], (2 * DIM,), DIM * 25)
    # Conv2d(128, 256, 5)
    p["w3"] = uniform(ks[4], (4 * DIM, 2 * DIM, 5, 5), 2 * DIM * 25)
    p["b3"] = uniform(ks[5], (4 * DIM,), 2 * DIM * 25)
    # Linear(4*4*4*DIM, 1)
    p["wo"] = uniform(ks[6], (1, 4 * 4 * 4 * DIM), 4 * 4 * 4 * DIM)
    p["bo"] = uniform(ks[7], (1,), 4 * 4 * 4 * DIM)
    return p


@jax.jit
def wassnet_forward(params, x):
    # input.view(-1, 1, 28, 28); C=1 so NCHW -> NHWC is a pure reshape.
    x = x.reshape(-1, 28, 28, 1).astype(jnp.float32)
    out = conv2d_lrelu(x, params["w1"], params["b1"])      # (B, 14, 14,  64)
    out = conv2d_lrelu(out, params["w2"], params["b2"])    # (B,  7,  7, 128)
    out = conv2d_lrelu(out, params["w3"], params["b3"])    # (B,  4,  4, 256)
    B = out.shape[0]
    flat = out.reshape(B, 4 * 4 * 4 * DIM)                 # NHWC flatten (h, w, c)

    # Permute the tiny Linear weight from torch's NCHW-flatten order (c,h,w)
    # to our NHWC-flatten order (h,w,c) instead of transposing the activation.
    wo = params["wo"].reshape(1, 4 * DIM, 4, 4)            # (1, c, h, w)
    wo = jnp.transpose(wo, (0, 2, 3, 1)).reshape(1, -1)    # (1, h*w*c)
    wo_t = wo.T                                            # (4096, 1)

    # Lane-dense output: pad N from 1 -> 128 with zero columns, slice col 0.
    NP = 128
    wo_pad = jnp.pad(wo_t, ((0, 0), (0, NP - 1)))
    bo_pad = jnp.pad(params["bo"], ((0, NP - 1),))
    y = pallas_matmul_bias_act(flat, wo_pad, bo_pad, leaky_slope=None)  # (B, 128)
    return y[:, 0]                                         # (B,)


if __name__ == "__main__":
    key = jax.random.PRNGKey(0)
    k_in, k_par = jax.random.split(key)
    batch = 2
    x = jax.random.normal(k_in, (batch, 1, 28, 28), jnp.float32)
    params = init_params(k_par)

    out = wassnet_forward(params, x)
    jax.block_until_ready(out)
    assert out.shape == (batch,), out.shape
    print("KERNEL_OK")
</pallas_src>

<mosaic_0001>
module attributes {stable_mosaic.version = 11 : i64} {
  func.func @_matmul_bias_act_kernel(%arg0: i32, %arg1: memref<400x32xbf16, #tpu.memory_space<vmem>>, %arg2: memref<32x64xbf16, #tpu.memory_space<vmem>>, %arg3: memref<1x64xf32, #tpu.memory_space<vmem>>, %arg4: memref<400x64xf32, #tpu.memory_space<vmem>>) attributes {dimension_semantics = [#tpu.dimension_semantics<parallel>], iteration_bounds = array<i64: 1>, scalar_prefetch = 0 : i64, scratch_operands = 0 : i64, tpu.core_type = #tpu.core_type<tc>, window_params = [{transform_indices = @transform_0, window_bounds = array<i64: 400, 32>}, {pipeline_mode = #tpu.pipeline_mode<synchronous>, transform_indices = @transform_1, window_bounds = array<i64: 32, 64>}, {pipeline_mode = #tpu.pipeline_mode<synchronous>, transform_indices = @transform_2, window_bounds = array<i64: 1, 64>}, {transform_indices = @transform_3, window_bounds = array<i64: 400, 64>}]} {
    %c0 = arith.constant 0 : index
    %c0_0 = arith.constant 0 : index
    %0 = vector.load %arg1[%c0, %c0_0] : memref<400x32xbf16, #tpu.memory_space<vmem>>, vector<400x32xbf16>
    %c0_1 = arith.constant 0 : index
    %c0_2 = arith.constant 0 : index
    %1 = vector.load %arg2[%c0_1, %c0_2] : memref<32x64xbf16, #tpu.memory_space<vmem>>, vector<32x64xbf16>
    %cst = arith.constant dense<0.000000e+00> : vector<400x64xf32>
    %2 = tpu.matmul %0, %1, %cst {dimension_numbers = #tpu.dot_dimension_numbers<[1], [0], [0], [1], [0, 0, 1, 1], [], []>} : vector<400x32xbf16>, vector<32x64xbf16>, vector<400x64xf32> -> vector<400x64xf32>
    %c0_3 = arith.constant 0 : index
    %c0_4 = arith.constant 0 : index
    %3 = vector.load %arg3[%c0_3, %c0_4] : memref<1x64xf32, #tpu.memory_space<vmem>>, vector<1x64xf32>
    %4 = vector.broadcast %3 : vector<1x64xf32> to vector<400x64xf32>
    %5 = arith.addf %2, %4 : vector<400x64xf32>
    %cst_5 = arith.constant 0.000000e+00 : f32
    %6 = vector.broadcast %cst_5 : f32 to vector<400x64xf32>
    %7 = arith.cmpf ogt, %5, %6 : vector<400x64xf32>
    %cst_6 = arith.constant 2.000000e-01 : f32
    %8 = vector.broadcast %cst_6 : f32 to vector<400x64xf32>
    %9 = arith.mulf %8, %5 : vector<400x64xf32>
    %10 = arith.select %7, %5, %9 : vector<400x64xi1>, vector<400x64xf32>
    %c0_7 = arith.constant 0 : index
    %c0_8 = arith.constant 0 : index
    %11 = vector.load %arg4[%c0_7, %c0_8] : memref<400x64xf32, #tpu.memory_space<vmem>>, vector<400x64xf32>
    tpu.vector_store %arg4[%c0_7, %c0_8], %10 {strides = array<i32>} : memref<400x64xf32, #tpu.memory_space<vmem>>, vector<400x64xf32>,
    return
  }
  func.func @transform_0(%arg0: i32) -> (i32, i32) {
    %c0_i32 = arith.constant 0 : i32
    %c0_i32_0 = arith.constant 0 : i32
    return %arg0, %c0_i32 : i32, i32
  }
  func.func @transform_1(%arg0: i32) -> (i32, i32) {
    %c0_i32 = arith.constant 0 : i32
    %c0_i32_0 = arith.constant 0 : i32
    %c0_i32_1 = arith.constant 0 : i32
    return %c0_i32, %c0_i32_0 : i32, i32
  }
  func.func @transform_2(%arg0: i32) -> (i32, i32) {
    %c0_i32 = arith.constant 0 : i32
    %c0_i32_0 = arith.constant 0 : i32
    %c0_i32_1 = arith.constant 0 : i32
    return %c0_i32, %c0_i32_0 : i32, i32
  }
  func.func @transform_3(%arg0: i32) -> (i32, i32) {
    %c0_i32 = arith.constant 0 : i32
    %c0_i32_0 = arith.constant 0 : i32
    return %arg0, %c0_i32 : i32, i32
  }
}

module attributes {stable_mosaic.version = 11 : i64} {
  func.func @_matmul_bias_act_kernel(%arg0: i32, %arg1: memref<112x1600xbf16, #tpu.memory_space<vmem>>, %arg2: memref<1600x128xbf16, #tpu.memory_space<vmem>>, %arg3: memref<1x128xf32, #tpu.memory_space<vmem>>, %arg4: memref<112x128xf32, #tpu.memory_space<vmem>>) attributes {dimension_semantics = [#tpu.dimension_semantics<parallel>], iteration_bounds = array<i64: 1>, scalar_prefetch = 0 : i64, scratch_operands = 0 : i64, tpu.core_type = #tpu.core_type<tc>, window_params = [{transform_indices = @transform_0, window_bounds = array<i64: 112, 1600>}, {pipeline_mode = #tpu.pipeline_mode<synchronous>, transform_indices = @transform_1, window_bounds = array<i64: 1600, 128>}, {pipeline_mode = #tpu.pipeline_mode<synchronous>, transform_indices = @transform_2, window_bounds = array<i64: 1, 128>}, {transform_indices = @transform_3, window_bounds = array<i64: 112, 128>}]} {
    %c0 = arith.constant 0 : index
    %c0_0 = arith.constant 0 : index
    %0 = vector.load %arg1[%c0, %c0_0] : memref<112x1600xbf16, #tpu.memory_space<vmem>>, vector<112x1600xbf16>
    %c0_1 = arith.constant 0 : index
    %c0_2 = arith.constant 0 : index
    %1 = vector.load %arg2[%c0_1, %c0_2] : memref<1600x128xbf16, #tpu.memory_space<vmem>>, vector<1600x128xbf16>
    %cst = arith.constant dense<0.000000e+00> : vector<112x128xf32>
    %2 = tpu.matmul %0, %1, %cst {dimension_numbers = #tpu.dot_dimension_numbers<[1], [0], [0], [1], [0, 0, 1, 1], [], []>} : vector<112x1600xbf16>, vector<1600x128xbf16>, vector<112x128xf32> -> vector<112x128xf32>
    %c0_3 = arith.constant 0 : index
    %c0_4 = arith.constant 0 : index
    %3 = vector.load %arg3[%c0_3, %c0_4] : memref<1x128xf32, #tpu.memory_space<vmem>>, vector<1x128xf32>
    %4 = vector.broadcast %3 : vector<1x128xf32> to vector<112x128xf32>
    %5 = arith.addf %2, %4 : vector<112x128xf32>
    %cst_5 = arith.constant 0.000000e+00 : f32
    %6 = vector.broadcast %cst_5 : f32 to vector<112x128xf32>
    %7 = arith.cmpf ogt, %5, %6 : vector<112x128xf32>
    %cst_6 = arith.constant 2.000000e-01 : f32
    %8 = vector.broadcast %cst_6 : f32 to vector<112x128xf32>
    %9 = arith.mulf %8, %5 : vector<112x128xf32>
    %10 = arith.select %7, %5, %9 : vector<112x128xi1>, vector<112x128xf32>
    %c0_7 = arith.constant 0 : index
    %c0_8 = arith.constant 0 : index
    %11 = vector.load %arg4[%c0_7, %c0_8] : memref<112x128xf32, #tpu.memory_space<vmem>>, vector<112x128xf32>
    tpu.vector_store %arg4[%c0_7, %c0_8], %10 {strides = array<i32>} : memref<112x128xf32, #tpu.memory_space<vmem>>, vector<112x128xf32>,
    return
  }
  func.func @transform_0(%arg0: i32) -> (i32, i32) {
    %c0_i32 = arith.constant 0 : i32
    %c0_i32_0 = arith.constant 0 : i32
    return %arg0, %c0_i32 : i32, i32
  }
  func.func @transform_1(%arg0: i32) -> (i32, i32) {
    %c0_i32 = arith.constant 0 : i32
    %c0_i32_0 = arith.constant 0 : i32
    %c0_i32_1 = arith.constant 0 : i32
    return %c0_i32, %c0_i32_0 : i32, i32
  }
  func.func @transform_2(%arg0: i32) -> (i32, i32) {
    %c0_i32 = arith.constant 0 : i32
    %c0_i32_0 = arith.constant 0 : i32
    %c0_i32_1 = arith.constant 0 : i32
    return %c0_i32, %c0_i32_0 : i32, i32
  }
  func.func @transform_3(%arg0: i32) -> (i32, i32) {
    %c0_i32 = arith.constant 0 : i32
    %c0_i32_0 = arith.constant 0 : i32
    return %arg0, %c0_i32 : i32, i32
  }
}

module attributes {stable_mosaic.version = 11 : i64} {
  func.func @_matmul_bias_act_kernel(%arg0: i32, %arg1: memref<32x3200xbf16, #tpu.memory_space<vmem>>, %arg2: memref<3200x256xbf16, #tpu.memory_space<vmem>>, %arg3: memref<1x256xf32, #tpu.memory_space<vmem>>, %arg4: memref<32x256xf32, #tpu.memory_space<vmem>>) attributes {dimension_semantics = [#tpu.dimension_semantics<parallel>], iteration_bounds = array<i64: 1>, scalar_prefetch = 0 : i64, scratch_operands = 0 : i64, tpu.core_type = #tpu.core_type<tc>, window_params = [{transform_indices = @transform_0, window_bounds = array<i64: 32, 3200>}, {pipeline_mode = #tpu.pipeline_mode<synchronous>, transform_indices = @transform_1, window_bounds = array<i64: 3200, 256>}, {pipeline_mode = #tpu.pipeline_mode<synchronous>, transform_indices = @transform_2, window_bounds = array<i64: 1, 256>}, {transform_indices = @transform_3, window_bounds = array<i64: 32, 256>}]} {
    %c0 = arith.constant 0 : index
    %c0_0 = arith.constant 0 : index
    %0 = vector.load %arg1[%c0, %c0_0] : memref<32x3200xbf16, #tpu.memory_space<vmem>>, vector<32x3200xbf16>
    %c0_1 = arith.constant 0 : index
    %c0_2 = arith.constant 0 : index
    %1 = vector.load %arg2[%c0_1, %c0_2] : memref<3200x256xbf16, #tpu.memory_space<vmem>>, vector<3200x256xbf16>
    %cst = arith.constant dense<0.000000e+00> : vector<32x256xf32>
    %2 = tpu.matmul %0, %1, %cst {dimension_numbers = #tpu.dot_dimension_numbers<[1], [0], [0], [1], [0, 0, 1, 1], [], []>} : vector<32x3200xbf16>, vector<3200x256xbf16>, vector<32x256xf32> -> vector<32x256xf32>
    %c0_3 = arith.constant 0 : index
    %c0_4 = arith.constant 0 : index
    %3 = vector.load %arg3[%c0_3, %c0_4] : memref<1x256xf32, #tpu.memory_space<vmem>>, vector<1x256xf32>
    %4 = vector.broadcast %3 : vector<1x256xf32> to vector<32x256xf32>
    %5 = arith.addf %2, %4 : vector<32x256xf32>
    %cst_5 = arith.constant 0.000000e+00 : f32
    %6 = vector.broadcast %cst_5 : f32 to vector<32x256xf32>
    %7 = arith.cmpf ogt, %5, %6 : vector<32x256xf32>
    %cst_6 = arith.constant 2.000000e-01 : f32
    %8 = vector.broadcast %cst_6 : f32 to vector<32x256xf32>
    %9 = arith.mulf %8, %5 : vector<32x256xf32>
    %10 = arith.select %7, %5, %9 : vector<32x256xi1>, vector<32x256xf32>
    %c0_7 = arith.constant 0 : index
    %c0_8 = arith.constant 0 : index
    %11 = vector.load %arg4[%c0_7, %c0_8] : memref<32x256xf32, #tpu.memory_space<vmem>>, vector<32x256xf32>
    tpu.vector_store %arg4[%c0_7, %c0_8], %10 {strides = array<i32>} : memref<32x256xf32, #tpu.memory_space<vmem>>, vector<32x256xf32>,
    return
  }
  func.func @transform_0(%arg0: i32) -> (i32, i32) {
    %c0_i32 = arith.constant 0 : i32
    %c0_i32_0 = arith.constant 0 : i32
    return %arg0, %c0_i32 : i32, i32
  }
  func.func @transform_1(%arg0: i32) -> (i32, i32) {
    %c0_i32 = arith.constant 0 : i32
    %c0_i32_0 = arith.constant 0 : i32
    %c0_i32_1 = arith.constant 0 : i32
    return %c0_i32, %c0_i32_0 : i32, i32
  }
  func.func @transform_2(%arg0: i32) -> (i32, i32) {
    %c0_i32 = arith.constant 0 : i32
    %c0_i32_0 = arith.constant 0 : i32
    %c0_i32_1 = arith.constant 0 : i32
    return %c0_i32, %c0_i32_0 : i32, i32
  }
  func.func @transform_3(%arg0: i32) -> (i32, i32) {
    %c0_i32 = arith.constant 0 : i32
    %c0_i32_0 = arith.constant 0 : i32
    return %arg0, %c0_i32 : i32, i32
  }
}

module attributes {stable_mosaic.version = 11 : i64} {
  func.func @_matmul_bias_act_kernel(%arg0: i32, %arg1: memref<16x4096xbf16, #tpu.memory_space<vmem>>, %arg2: memref<4096x128xbf16, #tpu.memory_space<vmem>>, %arg3: memref<1x128xf32, #tpu.memory_space<vmem>>, %arg4: memref<16x128xf32, #tpu.memory_space<vmem>>) attributes {dimension_semantics = [#tpu.dimension_semantics<parallel>], iteration_bounds = array<i64: 1>, scalar_prefetch = 0 : i64, scratch_operands = 0 : i64, tpu.core_type = #tpu.core_type<tc>, window_params = [{transform_indices = @transform_0, window_bounds = array<i64: 16, 4096>}, {pipeline_mode = #tpu.pipeline_mode<synchronous>, transform_indices = @transform_1, window_bounds = array<i64: 4096, 128>}, {pipeline_mode = #tpu.pipeline_mode<synchronous>, transform_indices = @transform_2, window_bounds = array<i64: 1, 128>}, {transform_indices = @transform_3, window_bounds = array<i64: 16, 128>}]} {
    %c0 = arith.constant 0 : index
    %c0_0 = arith.constant 0 : index
    %0 = vector.load %arg1[%c0, %c0_0] : memref<16x4096xbf16, #tpu.memory_space<vmem>>, vector<16x4096xbf16>
    %c0_1 = arith.constant 0 : index
    %c0_2 = arith.constant 0 : index
    %1 = vector.load %arg2[%c0_1, %c0_2] : memref<4096x128xbf16, #tpu.memory_space<vmem>>, vector<4096x128xbf16>
    %cst = arith.constant dense<0.000000e+00> : vector<16x128xf32>
    %2 = tpu.matmul %0, %1, %cst {dimension_numbers = #tpu.dot_dimension_numbers<[1], [0], [0], [1], [0, 0, 1, 1], [], []>} : vector<16x4096xbf16>, vector<4096x128xbf16>, vector<16x128xf32> -> vector<16x128xf32>
    %c0_3 = arith.constant 0 : index
    %c0_4 = arith.constant 0 : index
    %3 = vector.load %arg3[%c0_3, %c0_4] : memref<1x128xf32, #tpu.memory_space<vmem>>, vector<1x128xf32>
    %4 = vector.broadcast %3 : vector<1x128xf32> to vector<16x128xf32>
    %5 = arith.addf %2, %4 : vector<16x128xf32>
    %c0_5 = arith.constant 0 : index
    %c0_6 = arith.constant 0 : index
    %6 = vector.load %arg4[%c0_5, %c0_6] : memref<16x128xf32, #tpu.memory_space<vmem>>, vector<16x128xf32>
    tpu.vector_store %arg4[%c0_5, %c0_6], %5 {strides = array<i32>} : memref<16x128xf32, #tpu.memory_space<vmem>>, vector<16x128xf32>,
    return
  }
  func.func @transform_0(%arg0: i32) -> (i32, i32) {
    %c0_i32 = arith.constant 0 : i32
    %c0_i32_0 = arith.constant 0 : i32
    return %arg0, %c0_i32 : i32, i32
  }
  func.func @transform_1(%arg0: i32) -> (i32, i32) {
    %c0_i32 = arith.constant 0 : i32
    %c0_i32_0 = arith.constant 0 : i32
    %c0_i32_1 = arith.constant 0 : i32
    return %c0_i32, %c0_i32_0 : i32, i32
  }
  func.func @transform_2(%arg0: i32) -> (i32, i32) {
    %c0_i32 = arith.constant 0 : i32
    %c0_i32_0 = arith.constant 0 : i32
    %c0_i32_1 = arith.constant 0 : i32
    return %c0_i32, %c0_i32_0 : i32, i32
  }
  func.func @transform_3(%arg0: i32) -> (i32, i32) {
    %c0_i32 = arith.constant 0 : i32
    %c0_i32_0 = arith.constant 0 : i32
    return %arg0, %c0_i32 : i32, i32
  }
}

</mosaic_0001>

<bundles_post_ra>
// kernel: wassnet_forward.4
= control target key start
LH: loop header
LB: loop body
LE: loop exit
PB: predicated region body
PF: predicated region fallthrough
CT: control target
= control target key end

     0   :  { %vm210_vm0 = vcmask 261120   ;;  %vm570_vm2 = vcmask 523264   ;;  %s1173_s1 = inlined_call_operand.vmem [shape: bf16[32,64], index: 1, kind: input, shape index: {}]   ;;  %s1174_s0 = inlined_call_operand.vmem [shape: bf16[400,32], index: 0, kind: input, shape index: {}]   ;;  %s1175_s2 = inlined_call_operand.vmem [shape: f32[1,64], index: 2, kind: input, shape index: {}]   ;;  %s1176_s3 = inlined_call_operand.vmem [shape: f32[400,64], index: 3, kind: output, shape index: {}]  }
   0x1   :  { %v784_v0 = vld [vmem:[%s1173_s1 + $0x8] sm:$0xff]  ;;  %v783_v1 = vld [vmem:[%s1173_s1] sm:$0xff]  ;;  %v764_v2 = vld [vmem:[%s1174_s0 + $0x30] sm:$0xff] }
   0x2   :  { %785 = vmatpush.bf16.msra.mxu1 %v784_v0  ;;  %786 = vmatpush.bf16.msra.mxu2 %v784_v0  ;;  %v771_v3 = vld [vmem:[%s1174_s0 + $0x68] sm:$0xff]  ;;  %v758_v4 = vld [vmem:[%s1174_s0] sm:$0xff]  ;;  %v765_v6 = vld [vmem:[%s1174_s0 + $0x38] sm:$0xff] }
   0x3   :  { %292 = vmatpush.bf16.msra.mxu0 %v784_v0  ;;  %787 = vmatpush.bf16.msra.mxu3 %v784_v0  ;;  %v778_v5 = vld [vmem:[%s1174_s0 + $0xa0] sm:$0xff]  ;;  %v772_v7 = vld [vmem:[%s1174_s0 + $0x70] sm:$0xff]  ;;  %v759_v8 = vld [vmem:[%s1174_s0 + $0x8] sm:$0xff] }
   0x4   :  { %v779_v9 = vld [vmem:[%s1174_s0 + $0xa8] sm:$0xff]  ;;  %v766_v10 = vld [vmem:[%s1174_s0 + $0x40] sm:$0xff]  ;;  %v773_v11 = vld [vmem:[%s1174_s0 + $0x78] sm:$0xff] }
   0x5   :  { %v760_v12 = vld [vmem:[%s1174_s0 + $0x10] sm:$0xff]  ;;  %v767_v14 = vld [vmem:[%s1174_s0 + $0x48] sm:$0xff]  ;;  %v774_v15 = vld [vmem:[%s1174_s0 + $0x80] sm:$0xff] }
   0x6   :  { %788 = vmatpush.bf16.msra.mxu1 %v783_v1  ;;  %789 = vmatpush.bf16.msra.mxu2 %v783_v1  ;;  %v780_v13 = vld [vmem:[%s1174_s0 + $0xb0] sm:$0xff]  ;;  %v761_v16 = vld [vmem:[%s1174_s0 + $0x18] sm:$0xff]  ;;  %v775_v19 = vld [vmem:[%s1174_s0 + $0x88] sm:$0xff] }
   0x7   :  { %293 = vmatpush.bf16.msra.mxu0 %v783_v1  ;;  %790 = vmatpush.bf16.msra.mxu3 %v783_v1  ;;  %v781_v17 = vld [vmem:[%s1174_s0 + $0xb8] sm:$0xff]  ;;  %v768_v18 = vld [vmem:[%s1174_s0 + $0x50] sm:$0xff]  ;;  %v762_v20 = vld [vmem:[%s1174_s0 + $0x20] sm:$0xff] }
   0x8   :  { %v782_v21 = vld [vmem:[%s1174_s0 + $0xc0] sm:$0xff]  ;;  %v769_v22 = vld [vmem:[%s1174_s0 + $0x58] sm:$0xff]  ;;  %v776_v23 = vld [vmem:[%s1174_s0 + $0x90] sm:$0xff] }
   0x9   :  { %739 = vmatmul.msk.bf16.vlgmr.msra.gmra.mxu1 %vm210_vm0, %v764_v2  ;;  %746 = vmatmul.msk.bf16.vlgmr.msra.gmra.mxu2 %vm210_vm0, %v771_v3  ;;  %v763_v24 = vld [vmem:[%s1174_s0 + $0x28] sm:$0xff]  ;;  %v770_v25 = vld [vmem:[%s1174_s0 + $0x60] sm:$0xff]  ;;  %v777_v26 = vld [vmem:[%s1174_s0 + $0x98] sm:$0xff] }
   0xa   :  { %733 = vmatmul.msk.bf16.vlgmr.msra.gmra.mxu0 %vm210_vm0, %v758_v4  ;;  %753 = vmatmul.msk.bf16.vlgmr.msra.gmra.mxu3 %vm210_vm0, %v778_v5  ;;  %v921_v27 = vld [vmem:[%s1175_s2] ss:$0 sm:$0xff] }
  0x19   :  { %740 = vmatmul.msk.bf16.gmra.mxu1 %vm210_vm0, %v765_v6  ;;  %747 = vmatmul.msk.bf16.gmra.mxu2 %vm210_vm0, %v772_v7 }
  0x1a   :  { %734 = vmatmul.msk.bf16.gmra.mxu0 %vm210_vm0, %v759_v8  ;;  %754 = vmatmul.msk.bf16.gmra.mxu3 %vm210_vm0, %v779_v9 }
  0x29   :  { %741 = vmatmul.msk.bf16.gmra.mxu1 %vm210_vm0, %v766_v10  ;;  %748 = vmatmul.msk.bf16.gmra.mxu2 %vm210_vm0, %v773_v11 }
  0x2a   :  { %735 = vmatmul.msk.bf16.gmra.mxu0 %vm210_vm0, %v760_v12  ;;  %755 = vmatmul.msk.bf16.gmra.mxu3 %vm210_vm0, %v780_v13 }
  0x39   :  { %742 = vmatmul.msk.bf16.gmra.mxu1 %vm210_vm0, %v767_v14  ;;  %749 = vmatmul.msk.bf16.gmra.mxu2 %vm210_vm0, %v774_v15 }
  0x3a   :  { %736 = vmatmul.msk.bf16.gmra.mxu0 %vm210_vm0, %v761_v16  ;;  %756 = vmatmul.msk.bf16.gmra.mxu3 %vm210_vm0, %v781_v17 }
  0x49   :  { %743 = vmatmul.msk.bf16.gmra.mxu1 %vm210_vm0, %v768_v18  ;;  %750 = vmatmul.msk.bf16.gmra.mxu2 %vm210_vm0, %v775_v19 }
  0x4a   :  { %737 = vmatmul.msk.bf16.gmra.mxu0 %vm210_vm0, %v762_v20  ;;  %757 = vmatmul.msk.bf16.gmra.mxu3 %vm210_vm0, %v782_v21 }
  0x59   :  { %744 = vmatmul.msk.bf16.gmra.mxu1 %vm210_vm0, %v769_v22  ;;  %751 = vmatmul.msk.bf16.gmra.mxu2 %vm210_vm0, %v776_v23 }
  0x5a   :  { %738 = vmatmul.msk.bf16.gmra.mxu0 %vm210_vm0, %v763_v24 }
  0x69   :  { %745 = vmatmul.msk.bf16.gmra.mxu1 %vm210_vm0, %v770_v25  ;;  %752 = vmatmul.msk.bf16.gmra.mxu2 %vm210_vm0, %v777_v26 }
  0x86   :  { %v325_v28 = vpop.f32.mrf.mxu1 }
  0x87   :  { %v326_v29 = vadd.f32 %v921_v27, %v325_v28  ;;  %v295_v30 = vpop.f32.mrf.mxu0 }
  0x88   :  { %v296_v31 = vadd.f32 %v921_v27, %v295_v30 }
  0x89   :  { %vm432_vm1 = vcmp.gt.f32.partialorder %v326_v29, 0.0  ;;  %v482_v32 = vmul.f32 0.2, %v326_v29 }
  0x8a   :  { %vm420_vm3 = vcmp.gt.f32.partialorder %v296_v31, 0.0  ;;  %v470_v33 = vmul.f32 0.2, %v296_v31 }
  0x8b   :  { %v532_v34 = vsel %vm432_vm1, %v326_v29, %v482_v32 }
  0x8c   :  { %583 = vst.msk [vmem:[%s1176_s3 + $0x60] sm:$0xff] %vm570_vm2, %v532_v34  ;;  %v360_v35 = vpop.f32.mrf.mxu2  ;;  %v520_v36 = vsel %vm420_vm3, %v296_v31, %v470_v33 }
  0x8d   :  { %v361_v37 = vadd.f32 %v921_v27, %v360_v35  ;;  %571 = vst.msk [vmem:[%s1176_s3] sm:$0xff] %vm570_vm2, %v520_v36  ;;  %v395_v38 = vpop.f32.mrf.mxu3 }
  0x8e   :  { %v327_v39 = vpop.f32.mrf.mxu1  ;;  %v396_v40 = vadd.f32 %v921_v27, %v395_v38 }
  0x8f   :  { %vm446_vm4 = vcmp.gt.f32.partialorder %v361_v37, 0.0  ;;  %v496_v41 = vmul.f32 0.2, %v361_v37  ;;  %v328_v42 = vadd.f32 %v921_v27, %v327_v39  ;;  %v297_v43 = vpop.f32.mrf.mxu0 }
  0x90   :  { %v298_v44 = vadd.f32 %v921_v27, %v297_v43  ;;  %vm460_vm5 = vcmp.gt.f32.partialorder %v396_v40, 0.0  ;;  %v510_v45 = vmul.f32 0.2, %v396_v40 }
  0x91   :  { %v546_v46 = vsel %vm446_vm4, %v361_v37, %v496_v41  ;;  %vm433_vm6 = vcmp.gt.f32.partialorder %v328_v42, 0.0  ;;  %v483_v47 = vmul.f32 0.2, %v328_v42 }
  0x92   :  { %597 = vst.msk [vmem:[%s1176_s3 + $0xd0] sm:$0xff] %vm570_vm2, %v546_v46  ;;  %vm421_vm7 = vcmp.gt.f32.partialorder %v298_v44, 0.0  ;;  %v471_v48 = vmul.f32 0.2, %v298_v44  ;;  %v560_v49 = vsel %vm460_vm5, %v396_v40, %v510_v45 }
  0x93   :  { %v533_v50 = vsel %vm433_vm6, %v328_v42, %v483_v47  ;;  %611 = vst.msk [vmem:[%s1176_s3 + $0x140] sm:$0xff] %vm570_vm2, %v560_v49 }
  0x94   :  { %584 = vst.msk [vmem:[%s1176_s3 + $0x68] sm:$0xff] %vm570_vm2, %v533_v50  ;;  %v362_v51 = vpop.f32.mrf.mxu2  ;;  %v521_v52 = vsel %vm421_vm7, %v298_v44, %v471_v48 }
  0x95   :  { %v363_v53 = vadd.f32 %v921_v27, %v362_v51  ;;  %572 = vst.msk [vmem:[%s1176_s3 + $0x8] sm:$0xff] %vm570_vm2, %v521_v52  ;;  %v397_v54 = vpop.f32.mrf.mxu3 }
  0x96   :  { %v330_v55 = vpop.f32.mrf.mxu1  ;;  %v398_v56 = vadd.f32 %v921_v27, %v397_v54 }
  0x97   :  { %vm447_vm8 = vcmp.gt.f32.partialorder %v363_v53, 0.0  ;;  %v497_v57 = vmul.f32 0.2, %v363_v53  ;;  %v331_v58 = vadd.f32 %v921_v27, %v330_v55  ;;  %v300_v59 = vpop.f32.mrf.mxu0 }
  0x98   :  { %v301_v60 = vadd.f32 %v921_v27, %v300_v59  ;;  %vm461_vm9 = vcmp.gt.f32.partialorder %v398_v56, 0.0  ;;  %v511_v61 = vmul.f32 0.2, %v398_v56 }
  0x99   :  { %v547_v62 = vsel %vm447_vm8, %v363_v53, %v497_v57  ;;  %vm434_vm10 = vcmp.gt.f32.partialorder %v331_v58, 0.0  ;;  %v484_v63 = vmul.f32 0.2, %v331_v58 }
  0x9a   :  { %598 = vst.msk [vmem:[%s1176_s3 + $0xd8] sm:$0xff] %vm570_vm2, %v547_v62  ;;  %vm422_vm11 = vcmp.gt.f32.partialorder %v301_v60, 0.0  ;;  %v472_v0 = vmul.f32 0.2, %v301_v60  ;;  %v561_v1 = vsel %vm461_vm9, %v398_v56, %v511_v61 }
  0x9b   :  { %v534_v2 = vsel %vm434_vm10, %v331_v58, %v484_v63  ;;  %612 = vst.msk [vmem:[%s1176_s3 + $0x148] sm:$0xff] %vm570_vm2, %v561_v1 }
  0x9c   :  { %585 = vst.msk [vmem:[%s1176_s3 + $0x70] sm:$0xff] %vm570_vm2, %v534_v2  ;;  %v365_v3 = vpop.f32.mrf.mxu2  ;;  %v522_v4 = vsel %vm422_vm11, %v301_v60, %v472_v0 }
  0x9d   :  { %v366_v5 = vadd.f32 %v921_v27, %v365_v3  ;;  %573 = vst.msk [vmem:[%s1176_s3 + $0x10] sm:$0xff] %vm570_vm2, %v522_v4  ;;  %v400_v6 = vpop.f32.mrf.mxu3 }
  0x9e   :  { %v332_v7 = vpop.f32.mrf.mxu1  ;;  %v401_v8 = vadd.f32 %v921_v27, %v400_v6 }
  0x9f   :  { %vm448_vm12 = vcmp.gt.f32.partialorder %v366_v5, 0.0  ;;  %v498_v9 = vmul.f32 0.2, %v366_v5  ;;  %v333_v10 = vadd.f32 %v921_v27, %v332_v7  ;;  %v302_v11 = vpop.f32.mrf.mxu0 }
  0xa0   :  { %v303_v12 = vadd.f32 %v921_v27, %v302_v11  ;;  %vm462_vm13 = vcmp.gt.f32.partialorder %v401_v8, 0.0  ;;  %v512_v13 = vmul.f32 0.2, %v401_v8 }
  0xa1   :  { %v548_v14 = vsel %vm448_vm12, %v366_v5, %v498_v9  ;;  %vm435_vm14 = vcmp.gt.f32.partialorder %v333_v10, 0.0  ;;  %v485_v15 = vmul.f32 0.2, %v333_v10 }
  0xa2   :  { %599 = vst.msk [vmem:[%s1176_s3 + $0xe0] sm:$0xff] %vm570_vm2, %v548_v14  ;;  %vm423_vm15 = vcmp.gt.f32.partialorder %v303_v12, 0.0  ;;  %v473_v16 = vmul.f32 0.2, %v303_v12  ;;  %v562_v17 = vsel %vm462_vm13, %v401_v8, %v512_v13 }
  0xa3   :  { %v535_v18 = vsel %vm435_vm14, %v333_v10, %v485_v15  ;;  %613 = vst.msk [vmem:[%s1176_s3 + $0x150] sm:$0xff] %vm570_vm2, %v562_v17 }
  0xa4   :  { %586 = vst.msk [vmem:[%s1176_s3 + $0x78] sm:$0xff] %vm570_vm2, %v535_v18  ;;  %v367_v19 = vpop.f32.mrf.mxu2  ;;  %v523_v20 = vsel %vm423_vm15, %v303_v12, %v473_v16 }
  0xa5   :  { %v368_v21 = vadd.f32 %v921_v27, %v367_v19  ;;  %574 = vst.msk [vmem:[%s1176_s3 + $0x18] sm:$0xff] %vm570_vm2, %v523_v20  ;;  %v402_v22 = vpop.f32.mrf.mxu3 }
  0xa6   :  { %v335_v23 = vpop.f32.mrf.mxu1  ;;  %v403_v24 = vadd.f32 %v921_v27, %v402_v22 }
  0xa7   :  { %vm449_vm0 = vcmp.gt.f32.partialorder %v368_v21, 0.0  ;;  %v499_v25 = vmul.f32 0.2, %v368_v21  ;;  %v336_v26 = vadd.f32 %v921_v27, %v335_v23  ;;  %v305_v28 = vpop.f32.mrf.mxu0 }
  0xa8   :  { %v306_v29 = vadd.f32 %v921_v27, %v305_v28  ;;  %vm463_vm1 = vcmp.gt.f32.partialorder %v403_v24, 0.0  ;;  %v513_v30 = vmul.f32 0.2, %v403_v24 }
  0xa9   :  { %v549_v31 = vsel %vm449_vm0, %v368_v21, %v499_v25  ;;  %vm436_vm3 = vcmp.gt.f32.partialorder %v336_v26, 0.0  ;;  %v486_v32 = vmul.f32 0.2, %v336_v26 }
  0xaa   :  { %600 = vst.msk [vmem:[%s1176_s3 + $0xe8] sm:$0xff] %vm570_vm2, %v549_v31  ;;  %vm424_vm4 = vcmp.gt.f32.partialorder %v306_v29, 0.0  ;;  %v474_v33 = vmul.f32 0.2, %v306_v29  ;;  %v563_v34 = vsel %vm463_vm1, %v403_v24, %v513_v30 }
  0xab   :  { %v536_v35 = vsel %vm436_vm3, %v336_v26, %v486_v32  ;;  %614 = vst.msk [vmem:[%s1176_s3 + $0x158] sm:$0xff] %vm570_vm2, %v563_v34 }
  0xac   :  { %587 = vst.msk [vmem:[%s1176_s3 + $0x80] sm:$0xff] %vm570_vm2, %v536_v35  ;;  %v370_v36 = vpop.f32.mrf.mxu2  ;;  %v524_v37 = vsel %vm424_vm4, %v306_v29, %v474_v33 }
  0xad   :  { %v371_v38 = vadd.f32 %v921_v27, %v370_v36  ;;  %575 = vst.msk [vmem:[%s1176_s3 + $0x20] sm:$0xff] %vm570_vm2, %v524_v37  ;;  %v405_v39 = vpop.f32.mrf.mxu3 }
  0xae   :  { %v337_v40 = vpop.f32.mrf.mxu1  ;;  %v406_v41 = vadd.f32 %v921_v27, %v405_v39 }
  0xaf   :  { %vm450_vm5 = vcmp.gt.f32.partialorder %v371_v38, 0.0  ;;  %v500_v42 = vmul.f32 0.2, %v371_v38  ;;  %v338_v43 = vadd.f32 %v921_v27, %v337_v40  ;;  %v307_v44 = vpop.f32.mrf.mxu0 }
  0xb0   :  { %v308_v45 = vadd.f32 %v921_v27, %v307_v44  ;;  %vm464_vm6 = vcmp.gt.f32.partialorder %v406_v41, 0.0  ;;  %v514_v46 = vmul.f32 0.2, %v406_v41 }
  0xb1   :  { %v550_v47 = vsel %vm450_vm5, %v371_v38, %v500_v42  ;;  %vm437_vm7 = vcmp.gt.f32.partialorder %v338_v43, 0.0  ;;  %v487_v48 = vmul.f32 0.2, %v338_v43 }
  0xb2   :  { %601 = vst.msk [vmem:[%s1176_s3 + $0xf0] sm:$0xff] %vm570_vm2, %v550_v47  ;;  %vm425_vm8 = vcmp.gt.f32.partialorder %v308_v45, 0.0  ;;  %v475_v49 = vmul.f32 0.2, %v308_v45  ;;  %v564_v50 = vsel %vm464_vm6, %v406_v41, %v514_v46 }
  0xb3   :  { %v537_v51 = vsel %vm437_vm7, %v338_v43, %v487_v48  ;;  %615 = vst.msk [vmem:[%s1176_s3 + $0x160] sm:$0xff] %vm570_vm2, %v564_v50 }
  0xb4   :  { %588 = vst.msk [vmem:[%s1176_s3 + $0x88] sm:$0xff] %vm570_vm2, %v537_v51  ;;  %v372_v52 = vpop.f32.mrf.mxu2  ;;  %v525_v53 = vsel %vm425_vm8, %v308_v45, %v475_v49 }
  0xb5   :  { %v373_v54 = vadd.f32 %v921_v27, %v372_v52  ;;  %576 = vst.msk [vmem:[%s1176_s3 + $0x28] sm:$0xff] %vm570_vm2, %v525_v53  ;;  %v407_v55 = vpop.f32.mrf.mxu3 }
  0xb6   :  { %v340_v56 = vpop.f32.mrf.mxu1  ;;  %v408_v57 = vadd.f32 %v921_v27, %v407_v55 }
  0xb7   :  { %vm451_vm9 = vcmp.gt.f32.partialorder %v373_v54, 0.0  ;;  %v501_v58 = vmul.f32 0.2, %v373_v54  ;;  %v341_v59 = vadd.f32 %v921_v27, %v340_v56  ;;  %v310_v60 = vpop.f32.mrf.mxu0 }
  0xb8   :  { %v311_v61 = vadd.f32 %v921_v27, %v310_v60  ;;  %vm465_vm10 = vcmp.gt.f32.partialorder %v408_v57, 0.0  ;;  %v515_v62 = vmul.f32 0.2, %v408_v57 }
  0xb9   :  { %v551_v63 = vsel %vm451_vm9, %v373_v54, %v501_v58  ;;  %vm438_vm11 = vcmp.gt.f32.partialorder %v341_v59, 0.0  ;;  %v488_v0 = vmul.f32 0.2, %v341_v59 }
  0xba   :  { %602 = vst.msk [vmem:[%s1176_s3 + $0xf8] sm:$0xff] %vm570_vm2, %v551_v63  ;;  %vm426_vm12 = vcmp.gt.f32.partialorder %v311_v61, 0.0  ;;  %v476_v1 = vmul.f32 0.2, %v311_v61  ;;  %v565_v2 = vsel %vm465_vm10, %v408_v57, %v515_v62 }
  0xbb   :  { %v538_v3 = vsel %vm438_vm11, %v341_v59, %v488_v0  ;;  %616 = vst.msk [vmem:[%s1176_s3 + $0x168] sm:$0xff] %vm570_vm2, %v565_v2 }
  0xbc   :  { %589 = vst.msk [vmem:[%s1176_s3 + $0x90] sm:$0xff] %vm570_vm2, %v538_v3  ;;  %v375_v4 = vpop.f32.mrf.mxu2  ;;  %v526_v5 = vsel %vm426_vm12, %v311_v61, %v476_v1 }
  0xbd   :  { %v376_v6 = vadd.f32 %v921_v27, %v375_v4  ;;  %577 = vst.msk [vmem:[%s1176_s3 + $0x30] sm:$0xff] %vm570_vm2, %v526_v5  ;;  %v410_v7 = vpop.f32.mrf.mxu3 }
  0xbe   :  { %v342_v8 = vpop.f32.mrf.mxu1  ;;  %v411_v9 = vadd.f32 %v921_v27, %v410_v7 }
  0xbf   :  { %vm452_vm13 = vcmp.gt.f32.partialorder %v376_v6, 0.0  ;;  %v502_v10 = vmul.f32 0.2, %v376_v6  ;;  %v343_v11 = vadd.f32 %v921_v27, %v342_v8  ;;  %v312_v12 = vpop.f32.mrf.mxu0 }
  0xc0   :  { %v313_v13 = vadd.f32 %v921_v27, %v312_v12  ;;  %vm466_vm14 = vcmp.gt.f32.partialorder %v411_v9, 0.0  ;;  %v516_v14 = vmul.f32 0.2, %v411_v9 }
  0xc1   :  { %v552_v15 = vsel %vm452_vm13, %v376_v6, %v502_v10  ;;  %vm439_vm15 = vcmp.gt.f32.partialorder %v343_v11, 0.0  ;;  %v489_v16 = vmul.f32 0.2, %v343_v11 }
  0xc2   :  { %603 = vst.msk [vmem:[%s1176_s3 + $0x100] sm:$0xff] %vm570_vm2, %v552_v15  ;;  %vm427_vm0 = vcmp.gt.f32.partialorder %v313_v13, 0.0  ;;  %v477_v17 = vmul.f32 0.2, %v313_v13  ;;  %v566_v18 = vsel %vm466_vm14, %v411_v9, %v516_v14 }
  0xc3   :  { %v539_v19 = vsel %vm439_vm15, %v343_v11, %v489_v16  ;;  %617 = vst.msk [vmem:[%s1176_s3 + $0x170] sm:$0xff] %vm570_vm2, %v566_v18 }
  0xc4   :  { %590 = vst.msk [vmem:[%s1176_s3 + $0x98] sm:$0xff] %vm570_vm2, %v539_v19  ;;  %v377_v20 = vpop.f32.mrf.mxu2  ;;  %v527_v21 = vsel %vm427_vm0, %v313_v13, %v477_v17 }
  0xc5   :  { %v378_v22 = vadd.f32 %v921_v27, %v377_v20  ;;  %578 = vst.msk [vmem:[%s1176_s3 + $0x38] sm:$0xff] %vm570_vm2, %v527_v21  ;;  %v412_v23 = vpop.f32.mrf.mxu3 }
  0xc6   :  { %v345_v24 = vpop.f32.mrf.mxu1  ;;  %v413_v25 = vadd.f32 %v921_v27, %v412_v23 }
  0xc7   :  { %vm453_vm1 = vcmp.gt.f32.partialorder %v378_v22, 0.0  ;;  %v503_v26 = vmul.f32 0.2, %v378_v22  ;;  %v346_v28 = vadd.f32 %v921_v27, %v345_v24  ;;  %v315_v29 = vpop.f32.mrf.mxu0 }
  0xc8   :  { %v316_v30 = vadd.f32 %v921_v27, %v315_v29  ;;  %vm467_vm3 = vcmp.gt.f32.partialorder %v413_v25, 0.0  ;;  %v517_v31 = vmul.f32 0.2, %v413_v25 }
  0xc9   :  { %v553_v32 = vsel %vm453_vm1, %v378_v22, %v503_v26  ;;  %vm440_vm4 = vcmp.gt.f32.partialorder %v346_v28, 0.0  ;;  %v490_v33 = vmul.f32 0.2, %v346_v28 }
  0xca   :  { %604 = vst.msk [vmem:[%s1176_s3 + $0x108] sm:$0xff] %vm570_vm2, %v553_v32  ;;  %vm428_vm5 = vcmp.gt.f32.partialorder %v316_v30, 0.0  ;;  %v478_v34 = vmul.f32 0.2, %v316_v30  ;;  %v567_v35 = vsel %vm467_vm3, %v413_v25, %v517_v31 }
  0xcb   :  { %v540_v36 = vsel %vm440_vm4, %v346_v28, %v490_v33  ;;  %618 = vst.msk [vmem:[%s1176_s3 + $0x178] sm:$0xff] %vm570_vm2, %v567_v35 }
  0xcc   :  { %591 = vst.msk [vmem:[%s1176_s3 + $0xa0] sm:$0xff] %vm570_vm2, %v540_v36  ;;  %v380_v37 = vpop.f32.mrf.mxu2  ;;  %v528_v38 = vsel %vm428_vm5, %v316_v30, %v478_v34 }
  0xcd   :  { %v381_v39 = vadd.f32 %v921_v27, %v380_v37  ;;  %579 = vst.msk [vmem:[%s1176_s3 + $0x40] sm:$0xff] %vm570_vm2, %v528_v38  ;;  %v415_v40 = vpop.f32.mrf.mxu3 }
  0xce   :  { %v347_v41 = vpop.f32.mrf.mxu1  ;;  %v416_v42 = vadd.f32 %v921_v27, %v415_v40 }
  0xcf   :  { %vm454_vm6 = vcmp.gt.f32.partialorder %v381_v39, 0.0  ;;  %v504_v43 = vmul.f32 0.2, %v381_v39  ;;  %v348_v44 = vadd.f32 %v921_v27, %v347_v41  ;;  %v317_v45 = vpop.f32.mrf.mxu0 }
  0xd0   :  { %v318_v46 = vadd.f32 %v921_v27, %v317_v45  ;;  %vm468_vm7 = vcmp.gt.f32.partialorder %v416_v42, 0.0  ;;  %v518_v47 = vmul.f32 0.2, %v416_v42 }
  0xd1   :  { %v554_v48 = vsel %vm454_vm6, %v381_v39, %v504_v43  ;;  %vm441_vm8 = vcmp.gt.f32.partialorder %v348_v44, 0.0  ;;  %v491_v49 = vmul.f32 0.2, %v348_v44 }
  0xd2   :  { %605 = vst.msk [vmem:[%s1176_s3 + $0x110] sm:$0xff] %vm570_vm2, %v554_v48  ;;  %vm429_vm9 = vcmp.gt.f32.partialorder %v318_v46, 0.0  ;;  %v479_v50 = vmul.f32 0.2, %v318_v46  ;;  %v568_v51 = vsel %vm468_vm7, %v416_v42, %v518_v47 }
  0xd3   :  { %v541_v52 = vsel %vm441_vm8, %v348_v44, %v491_v49  ;;  %619 = vst.msk [vmem:[%s1176_s3 + $0x180] sm:$0xff] %vm570_vm2, %v568_v51 }
  0xd4   :  { %592 = vst.msk [vmem:[%s1176_s3 + $0xa8] sm:$0xff] %vm570_vm2, %v541_v52  ;;  %v382_v53 = vpop.f32.mrf.mxu2  ;;  %v529_v54 = vsel %vm429_vm9, %v318_v46, %v479_v50 }
  0xd5   :  { %v383_v55 = vadd.f32 %v921_v27, %v382_v53  ;;  %580 = vst.msk [vmem:[%s1176_s3 + $0x48] sm:$0xff] %vm570_vm2, %v529_v54  ;;  %v417_v56 = vpop.f32.mrf.mxu3 }
  0xd6   :  { %v350_v57 = vpop.f32.mrf.mxu1  ;;  %v418_v58 = vadd.f32 %v921_v27, %v417_v56 }
  0xd7   :  { %vm455_vm10 = vcmp.gt.f32.partialorder %v383_v55, 0.0  ;;  %v505_v59 = vmul.f32 0.2, %v383_v55  ;;  %v351_v60 = vadd.f32 %v921_v27, %v350_v57  ;;  %v320_v61 = vpop.f32.mrf.mxu0 }
  0xd8   :  { %v321_v62 = vadd.f32 %v921_v27, %v320_v61  ;;  %vm469_vm11 = vcmp.gt.f32.partialorder %v418_v58, 0.0  ;;  %v519_v63 = vmul.f32 0.2, %v418_v58 }
  0xd9   :  { %v555_v0 = vsel %vm455_vm10, %v383_v55, %v505_v59  ;;  %vm442_vm12 = vcmp.gt.f32.partialorder %v351_v60, 0.0  ;;  %v492_v1 = vmul.f32 0.2, %v351_v60 }
  0xda   :  { %606 = vst.msk [vmem:[%s1176_s3 + $0x118] sm:$0xff] %vm570_vm2, %v555_v0  ;;  %vm430_vm13 = vcmp.gt.f32.partialorder %v321_v62, 0.0  ;;  %v480_v2 = vmul.f32 0.2, %v321_v62  ;;  %v569_v3 = vsel %vm469_vm11, %v418_v58, %v519_v63 }
  0xdb   :  { %v542_v4 = vsel %vm442_vm12, %v351_v60, %v492_v1  ;;  %620 = vst.msk [vmem:[%s1176_s3 + $0x188] sm:$0xff] %vm570_vm2, %v569_v3 }
  0xdc   :  { %593 = vst.msk [vmem:[%s1176_s3 + $0xb0] sm:$0xff] %vm570_vm2, %v542_v4  ;;  %v385_v5 = vpop.f32.mrf.mxu2  ;;  %v530_v6 = vsel %vm430_vm13, %v321_v62, %v480_v2 }
  0xdd   :  { %v386_v7 = vadd.f32 %v921_v27, %v385_v5  ;;  %581 = vst.msk [vmem:[%s1176_s3 + $0x50] sm:$0xff] %vm570_vm2, %v530_v6 }
  0xde   :  { %v352_v8 = vpop.f32.mrf.mxu1 }
  0xdf   :  { %vm456_vm14 = vcmp.gt.f32.partialorder %v386_v7, 0.0  ;;  %v506_v9 = vmul.f32 0.2, %v386_v7  ;;  %v353_v10 = vadd.f32 %v921_v27, %v352_v8  ;;  %v322_v11 = vpop.f32.mrf.mxu0 }
  0xe0   :  { %v323_v12 = vadd.f32 %v921_v27, %v322_v11 }
  0xe1   :  { %v556_v13 = vsel %vm456_vm14, %v386_v7, %v506_v9  ;;  %vm443_vm15 = vcmp.gt.f32.partialorder %v353_v10, 0.0  ;;  %v493_v14 = vmul.f32 0.2, %v353_v10 }
  0xe2   :  { %607 = vst.msk [vmem:[%s1176_s3 + $0x120] sm:$0xff] %vm570_vm2, %v556_v13  ;;  %vm431_vm0 = vcmp.gt.f32.partialorder %v323_v12, 0.0  ;;  %v481_v15 = vmul.f32 0.2, %v323_v12 }
  0xe3   :  { %v543_v16 = vsel %vm443_vm15, %v353_v10, %v493_v14 }
  0xe4   :  { %594 = vst.msk [vmem:[%s1176_s3 + $0xb8] sm:$0xff] %vm570_vm2, %v543_v16  ;;  %v387_v17 = vpop.f32.mrf.mxu2  ;;  %v531_v18 = vsel %vm431_vm0, %v323_v12, %v481_v15 }
  0xe5   :  { %v388_v19 = vadd.f32 %v921_v27, %v387_v17  ;;  %582 = vst.msk [vmem:[%s1176_s3 + $0x58] sm:$0xff] %vm570_vm2, %v531_v18 }
  0xe6   :  { %v355_v20 = vpop.f32.mrf.mxu1 }
  0xe7   :  { %vm457_vm1 = vcmp.gt.f32.partialorder %v388_v19, 0.0  ;;  %v507_v21 = vmul.f32 0.2, %v388_v19  ;;  %v356_v22 = vadd.f32 %v921_v27, %v355_v20 }
  0xe9   :  { %v557_v23 = vsel %vm457_vm1, %v388_v19, %v507_v21  ;;  %vm444_vm3 = vcmp.gt.f32.partialorder %v356_v22, 0.0  ;;  %v494_v24 = vmul.f32 0.2, %v356_v22 }
  0xea   :  { %608 = vst.msk [vmem:[%s1176_s3 + $0x128] sm:$0xff] %vm570_vm2, %v557_v23 }
  0xeb   :  { %v544_v25 = vsel %vm444_vm3, %v356_v22, %v494_v24 }
  0xec   :  { %595 = vst.msk [vmem:[%s1176_s3 + $0xc0] sm:$0xff] %vm570_vm2, %v544_v25  ;;  %v390_v26 = vpop.f32.mrf.mxu2 }
  0xed   :  { %v391_v28 = vadd.f32 %v921_v27, %v390_v26 }
  0xee   :  { %v357_v29 = vpop.f32.mrf.mxu1 }
  0xef   :  { %vm458_vm4 = vcmp.gt.f32.partialorder %v391_v28, 0.0  ;;  %v508_v30 = vmul.f32 0.2, %v391_v28  ;;  %v358_v31 = vadd.f32 %v921_v27, %v357_v29 }
  0xf1   :  { %v558_v32 = vsel %vm458_vm4, %v391_v28, %v508_v30  ;;  %vm445_vm5 = vcmp.gt.f32.partialorder %v358_v31, 0.0  ;;  %v495_v33 = vmul.f32 0.2, %v358_v31 }
  0xf2   :  { %609 = vst.msk [vmem:[%s1176_s3 + $0x130] sm:$0xff] %vm570_vm2, %v558_v32 }
  0xf3   :  { %v545_v34 = vsel %vm445_vm5, %v358_v31, %v495_v33 }
  0xf4   :  { %596 = vst.msk [vmem:[%s1176_s3 + $0xc8] sm:$0xff] %vm570_vm2, %v545_v34  ;;  %v392_v35 = vpop.f32.mrf.mxu2 }
  0xf5   :  { %v393_v36 = vadd.f32 %v921_v27, %v392_v35 }
  0xf7   :  { %vm459_vm6 = vcmp.gt.f32.partialorder %v393_v36, 0.0  ;;  %v509_v37 = vmul.f32 0.2, %v393_v36 }
  0xf9   :  { %v559_v38 = vsel %vm459_vm6, %v393_v36, %v509_v37 }
  0xfa   :  { %610 = vst.msk [vmem:[%s1176_s3 + $0x138] sm:$0xff] %vm570_vm2, %v559_v38 }

// kernel: wassnet_forward.5
= control target key start
LH: loop header
LB: loop body
LE: loop exit
PB: predicated region body
PF: predicated region fallthrough
CT: control target
= control target key end

     0   :  { %vm1372_vm0 = vcmask 523264   ;;  %s4073_s1 = inlined_call_operand.vmem [shape: bf16[1600,128], index: 1, kind: input, shape index: {}]   ;;  %s4074_s2 = inlined_call_operand.vmem [shape: f32[1,128], index: 2, kind: input, shape index: {}]   ;;  %s4075_s0 = inlined_call_operand.vmem [shape: bf16[112,1600], index: 0, kind: input, shape index: {}]   ;;  %s4076_s3 = inlined_call_operand.vmem [shape: f32[112,128], index: 3, kind: output, shape index: {}]  }
   0x1   :  { %v2895_v0 = vld [vmem:[%s4073_s1 + $0x38] sm:$0xff]  ;;  %v2894_v1 = vld [vmem:[%s4073_s1 + $0x30] sm:$0xff]  ;;  %v2893_v2 = vld [vmem:[%s4073_s1 + $0x28] sm:$0xff] }
   0x2   :  { %2988 = vmatpush.bf16.msra.mxu1 %v2895_v0  ;;  %2989 = vmatpush.bf16.msra.mxu2 %v2895_v0  ;;  %v2892_v3 = vld [vmem:[%s4073_s1 + $0x20] sm:$0xff]  ;;  %v2891_v4 = vld [vmem:[%s4073_s1 + $0x18] sm:$0xff]  ;;  %v2890_v5 = vld [vmem:[%s4073_s1 + $0x10] sm:$0xff] }
   0x3   :  { %2990 = vmatpush.bf16.msra.mxu3 %v2895_v0  ;;  %1394 = vmatpush.bf16.msra.mxu0 %v2895_v0  ;;  %v2889_v6 = vld [vmem:[%s4073_s1 + $0x8] sm:$0xff]  ;;  %v2888_v7 = vld [vmem:[%s4073_s1] sm:$0xff]  ;;  %v2132_v8 = vld [vmem:[%s4075_s0 + $0xd0] sm:$0xf] }
   0x4   :  { %v2829_v9 = vld [vmem:[%s4075_s0 + $0x100] sm:$0xf0]  ;;  %v2236_v10 = vld [vmem:[%s4075_s0 + $0x1a0] sm:$0xf]  ;;  %v2855_v11 = vld [vmem:[%s4075_s0 + $0x1d0] sm:$0xf0] }
   0x5   :  { %v2919_v12 = vld [vmem:[%s4073_s1 + $0xf8] sm:$0xff]  ;;  %v2028_v13 = vld [vmem:[%s4075_s0] sm:$0xf]  ;;  %v2803_v14 = vld [vmem:[%s4075_s0 + $0x30] sm:$0xf0]  ;;  %v2133_v18 = vor.u32 %v2829_v9, %v2132_v8  ;;  %v2237_v19 = vor.u32 %v2855_v11, %v2236_v10 }
   0x6   :  { %2991 = vmatpush.bf16.msra.mxu1 %v2894_v1  ;;  %2992 = vmatpush.bf16.msra.mxu2 %v2894_v1  ;;  %v2911_v15 = vld [vmem:[%s4073_s1 + $0xb8] sm:$0xff]  ;;  %v2340_v16 = vld [vmem:[%s4075_s0 + $0x270] sm:$0xf]  ;;  %v2881_v17 = vld [vmem:[%s4075_s0 + $0x2a0] sm:$0xf0]  ;;  %v2029_v21 = vor.u32 %v2803_v14, %v2028_v13 }
   0x7   :  { %2993 = vmatpush.bf16.msra.mxu3 %v2894_v1  ;;  %1395 = vmatpush.bf16.msra.mxu0 %v2894_v1  ;;  %v2903_v20 = vld [vmem:[%s4073_s1 + $0x78] sm:$0xff]  ;;  %v2341_v23 = vor.u32 %v2881_v17, %v2340_v16  ;;  %v2918_v24 = vld [vmem:[%s4073_s1 + $0xf0] sm:$0xff]  ;;  %v2917_v28 = vld [vmem:[%s4073_s1 + $0xe8] sm:$0xff] }
   0x8   :  { %v2927_v22 = vld [vmem:[%s4073_s1 + $0x138] sm:$0xff]  ;;  %v2910_v25 = vld [vmem:[%s4073_s1 + $0xb0] sm:$0xff]  ;;  %v2909_v29 = vld [vmem:[%s4073_s1 + $0xa8] sm:$0xff] }
   0x9   :  { %v2902_v26 = vld [vmem:[%s4073_s1 + $0x70] sm:$0xff]  ;;  %v2901_v30 = vld [vmem:[%s4073_s1 + $0x68] sm:$0xff]  ;;  %v2916_v32 = vld [vmem:[%s4073_s1 + $0xe0] sm:$0xff] }
   0xa   :  { %2994 = vmatpush.bf16.msra.mxu1 %v2893_v2  ;;  %2995 = vmatpush.bf16.msra.mxu2 %v2893_v2  ;;  %v2926_v27 = vld [vmem:[%s4073_s1 + $0x130] sm:$0xff]  ;;  %v2925_v31 = vld [vmem:[%s4073_s1 + $0x128] sm:$0xff]  ;;  %v2908_v33 = vld [vmem:[%s4073_s1 + $0xa0] sm:$0xff] }
   0xb   :  { %2996 = vmatpush.bf16.msra.mxu3 %v2893_v2  ;;  %1396 = vmatpush.bf16.msra.mxu0 %v2893_v2  ;;  %v2900_v34 = vld [vmem:[%s4073_s1 + $0x60] sm:$0xff]  ;;  %v2184_v35 = vld [vmem:[%s4075_s0 + $0x138] sm:$0xf]  ;;  %v2842_v36 = vld [vmem:[%s4075_s0 + $0x168] sm:$0xf0] }
   0xc   :  { %v2288_v37 = vld [vmem:[%s4075_s0 + $0x208] sm:$0xf]  ;;  %v2868_v38 = vld [vmem:[%s4075_s0 + $0x238] sm:$0xf0]  ;;  %v2924_v39 = vld [vmem:[%s4073_s1 + $0x120] sm:$0xff]  ;;  %v2185_v44 = vor.u32 %v2842_v36, %v2184_v35 }
   0xd   :  { %v2080_v40 = vld [vmem:[%s4075_s0 + $0x68] sm:$0xf]  ;;  %v2816_v41 = vld [vmem:[%s4075_s0 + $0x98] sm:$0xf0]  ;;  %v2289_v45 = vor.u32 %v2868_v38, %v2288_v37  ;;  %v2914_v49 = vld [vmem:[%s4073_s1 + $0xd0] sm:$0xff] }
   0xe   :  { %2997 = vmatpush.bf16.msra.mxu1 %v2892_v3  ;;  %2998 = vmatpush.bf16.msra.mxu2 %v2892_v3  ;;  %v2915_v42 = vld [vmem:[%s4073_s1 + $0xd8] sm:$0xff]  ;;  %v2081_v47 = vor.u32 %v2816_v41, %v2080_v40  ;;  %v2906_v50 = vld [vmem:[%s4073_s1 + $0x90] sm:$0xff]  ;;  %v2913_v53 = vld [vmem:[%s4073_s1 + $0xc8] sm:$0xff] }
   0xf   :  { %2999 = vmatpush.bf16.msra.mxu3 %v2892_v3  ;;  %1397 = vmatpush.bf16.msra.mxu0 %v2892_v3  ;;  %v2907_v43 = vld [vmem:[%s4073_s1 + $0x98] sm:$0xff]  ;;  %v2898_v51 = vld [vmem:[%s4073_s1 + $0x50] sm:$0xff]  ;;  %v2905_v54 = vld [vmem:[%s4073_s1 + $0x88] sm:$0xff] }
  0x10   :  { %v2899_v46 = vld [vmem:[%s4073_s1 + $0x58] sm:$0xff]  ;;  %v2922_v52 = vld [vmem:[%s4073_s1 + $0x110] sm:$0xff]  ;;  %v2897_v55 = vld [vmem:[%s4073_s1 + $0x48] sm:$0xff] }
  0x11   :  { %v2923_v48 = vld [vmem:[%s4073_s1 + $0x118] sm:$0xff]  ;;  %v2912_v56 = vld [vmem:[%s4073_s1 + $0xc0] sm:$0xff]  ;;  %v2921_v57 = vld [vmem:[%s4073_s1 + $0x108] sm:$0xff] }
  0x12   :  { %3000 = vmatpush.bf16.msra.mxu1 %v2891_v4  ;;  %3001 = vmatpush.bf16.msra.mxu2 %v2891_v4  ;;  %v2904_v58 = vld [vmem:[%s4073_s1 + $0x80] sm:$0xff]  ;;  %v2798_v60 = vld [vmem:[%s4075_s0 + $0xc] sm:$0xf]  ;;  %v2943_v63 = vld [vmem:[%s4073_s1 + $0x1b8] sm:$0xff] }
  0x13   :  { %3002 = vmatpush.bf16.msra.mxu3 %v2891_v4  ;;  %1398 = vmatpush.bf16.msra.mxu0 %v2891_v4  ;;  %v2896_v59 = vld [vmem:[%s4073_s1 + $0x40] sm:$0xff]  ;;  %v2951_v0 = vld [vmem:[%s4073_s1 + $0x1f8] sm:$0xff]  ;;  %v2036_v2 = vld [vmem:[%s4075_s0 + $0x8] sm:$0xf] }
  0x14   :  { %v2038_v61 = vld [vmem:[%s4075_s0 + $0x3c] sm:$0xf0]  ;;  %v2797_v62 = vld [vmem:[%s4075_s0 + $0x4] sm:$0xf]  ;;  %v2030_v1 = vld [vmem:[%s4075_s0 + $0x34] sm:$0xf0] }
  0x15   :  { %v2804_v3 = vld [vmem:[%s4075_s0 + $0x38] sm:$0xf0]  ;;  %v2041_v4 = vor.u32 %v2798_v60, %v2038_v61  ;;  %v2033_v10 = vor.u32 %v2797_v62, %v2030_v1  ;;  %v2942_v13 = vld [vmem:[%s4073_s1 + $0x1b0] sm:$0xff]  ;;  %v2941_v17 = vld [vmem:[%s4073_s1 + $0x1a8] sm:$0xff] }
  0x16   :  { %3003 = vmatpush.bf16.msra.mxu1 %v2890_v5  ;;  %3004 = vmatpush.bf16.msra.mxu2 %v2890_v5  ;;  %v2935_v8 = vld [vmem:[%s4073_s1 + $0x178] sm:$0xff]  ;;  %v2037_v11 = vor.u32 %v2804_v3, %v2036_v2  ;;  %v2950_v14 = vld [vmem:[%s4073_s1 + $0x1f0] sm:$0xff]  ;;  %v2932_v35 = vld [vmem:[%s4073_s1 + $0x160] sm:$0xff] }
  0x17   :  { %3005 = vmatpush.bf16.msra.mxu3 %v2890_v5  ;;  %1399 = vmatpush.bf16.msra.mxu0 %v2890_v5  ;;  %v2920_v5 = vld [vmem:[%s4073_s1 + $0x100] sm:$0xff]  ;;  %v2959_v9 = vld [vmem:[%s4073_s1 + $0x238] sm:$0xff]  ;;  %v2958_v16 = vld [vmem:[%s4073_s1 + $0x230] sm:$0xff] }
  0x18   :  { %v2956_v36 = vld [vmem:[%s4073_s1 + $0x220] sm:$0xff]  ;;  %v2939_v37 = vld [vmem:[%s4073_s1 + $0x198] sm:$0xff]  ;;  %v2142_v41 = vld [vmem:[%s4075_s0 + $0x10c] sm:$0xf0] }
  0x19   :  { %v2947_v38 = vld [vmem:[%s4073_s1 + $0x1d8] sm:$0xff]  ;;  %v2192_v60 = vld [vmem:[%s4075_s0 + $0x140] sm:$0xf]  ;;  %v2843_v61 = vld [vmem:[%s4075_s0 + $0x170] sm:$0xf0] }
  0x1a   :  { %3006 = vmatpush.bf16.msra.mxu1 %v2889_v6  ;;  %3007 = vmatpush.bf16.msra.mxu2 %v2889_v6  ;;  %v2824_v40 = vld [vmem:[%s4075_s0 + $0xdc] sm:$0xf]  ;;  %v2193_v2 = vor.u32 %v2843_v61, %v2192_v60 }
  0x1b   :  { %3008 = vmatpush.bf16.msra.mxu3 %v2889_v6  ;;  %1400 = vmatpush.bf16.msra.mxu0 %v2889_v6  ;;  %v2044_v6 = vld [vmem:[%s4075_s0 + $0x10] sm:$0xf] }
  0x1e   :  { %3009 = vmatpush.bf16.msra.mxu1 %v2888_v7  ;;  %3010 = vmatpush.bf16.msra.mxu2 %v2888_v7 }
  0x1f   :  { %3011 = vmatpush.bf16.msra.mxu3 %v2888_v7  ;;  %1401 = vmatpush.bf16.msra.mxu0 %v2888_v7  ;;  %v2805_v7 = vld [vmem:[%s4075_s0 + $0x40] sm:$0xf0] }
  0x21   :  { %1412 = vmatmul.bf16.vlgmr.msra.gmra.mxu1 %v2133_v18  ;;  %1422 = vmatmul.bf16.vlgmr.msra.gmra.mxu2 %v2237_v19  ;;  %v2949_v18 = vld [vmem:[%s4073_s1 + $0x1e8] sm:$0xff] }
  0x22   :  { %1482 = vmatpush.bf16.msrb.mxu2 %v2911_v15  ;;  %1438 = vmatpush.bf16.msrb.mxu1 %v2903_v20  ;;  %v2934_v15 = vld [vmem:[%s4073_s1 + $0x170] sm:$0xff]  ;;  %v2933_v19 = vld [vmem:[%s4073_s1 + $0x168] sm:$0xff] }
  0x23   :  { %1526 = vmatpush.bf16.msrb.mxu3 %v2919_v12  ;;  %1402 = vmatmul.bf16.vlgmr.msra.gmra.mxu0 %v2029_v21  ;;  %v2045_v12 = vor.u32 %v2805_v7, %v2044_v6  ;;  %v2957_v20 = vld [vmem:[%s4073_s1 + $0x228] sm:$0xff]  ;;  %v2940_v21 = vld [vmem:[%s4073_s1 + $0x1a0] sm:$0xff] }
  0x24   :  { %1570 = vmatpush.bf16.msrb.mxu0 %v2927_v22  ;;  %1432 = vmatmul.bf16.vlgmr.msra.gmra.mxu3 %v2341_v23  ;;  %v2948_v22 = vld [vmem:[%s4073_s1 + $0x1e0] sm:$0xff]  ;;  %v2811_v23 = vld [vmem:[%s4075_s0 + $0x74] sm:$0xf]  ;;  %v2945_v6 = vld [vmem:[%s4073_s1 + $0x1c8] sm:$0xff] }
  0x25   :  { %v2929_v7 = vld [vmem:[%s4073_s1 + $0x148] sm:$0xff] }
  0x26   :  { %1483 = vmatpush.bf16.msrb.mxu2 %v2910_v25  ;;  %1439 = vmatpush.bf16.msrb.mxu1 %v2902_v26  ;;  %v2810_v25 = vld [vmem:[%s4075_s0 + $0x6c] sm:$0xf]  ;;  %v2082_v26 = vld [vmem:[%s4075_s0 + $0x9c] sm:$0xf0] }
  0x27   :  { %1527 = vmatpush.bf16.msrb.mxu3 %v2918_v24  ;;  %v2090_v24 = vld [vmem:[%s4075_s0 + $0xa4] sm:$0xf0] }
  0x28   :  { %1571 = vmatpush.bf16.msrb.mxu0 %v2926_v27  ;;  %v2088_v27 = vld [vmem:[%s4075_s0 + $0x70] sm:$0xf] }
  0x2a   :  { %1484 = vmatpush.bf16.msrb.mxu2 %v2909_v29  ;;  %1440 = vmatpush.bf16.msrb.mxu1 %v2901_v30  ;;  %v2093_v29 = vor.u32 %v2811_v23, %v2090_v24  ;;  %v2096_v30 = vld [vmem:[%s4075_s0 + $0x78] sm:$0xf]  ;;  %v2928_v23 = vld [vmem:[%s4073_s1 + $0x140] sm:$0xff]  ;;  %v2863_v24 = vld [vmem:[%s4075_s0 + $0x214] sm:$0xf] }
  0x2b   :  { %1528 = vmatpush.bf16.msrb.mxu3 %v2917_v28  ;;  %v2817_v28 = vld [vmem:[%s4075_s0 + $0xa0] sm:$0xf0] }
  0x2c   :  { %1572 = vmatpush.bf16.msrb.mxu0 %v2925_v31  ;;  %v2818_v31 = vld [vmem:[%s4075_s0 + $0xa8] sm:$0xf0] }
  0x2e   :  { %1485 = vmatpush.bf16.msrb.mxu2 %v2908_v33  ;;  %1441 = vmatpush.bf16.msrb.mxu1 %v2900_v34  ;;  %v2089_v33 = vor.u32 %v2817_v28, %v2088_v27  ;;  %v2097_v34 = vor.u32 %v2818_v31, %v2096_v30  ;;  %v2290_v27 = vld [vmem:[%s4075_s0 + $0x23c] sm:$0xf0]  ;;  %v2296_v28 = vld [vmem:[%s4075_s0 + $0x210] sm:$0xf]  ;;  %v2304_v31 = vld [vmem:[%s4075_s0 + $0x218] sm:$0xf] }
  0x2f   :  { %1529 = vmatpush.bf16.msrb.mxu3 %v2916_v32  ;;  %v2085_v32 = vor.u32 %v2810_v25, %v2082_v26  ;;  %v2298_v25 = vld [vmem:[%s4075_s0 + $0x244] sm:$0xf0]  ;;  %v2862_v26 = vld [vmem:[%s4075_s0 + $0x20c] sm:$0xf] }
  0x30   :  { %1573 = vmatpush.bf16.msrb.mxu0 %v2924_v39  ;;  %v2931_v39 = vld [vmem:[%s4073_s1 + $0x158] sm:$0xff]  ;;  %v2301_v30 = vor.u32 %v2863_v24, %v2298_v25 }
  0x31   :  { %1417 = vmatmul.bf16.gmra.mxu1 %v2185_v44  ;;  %1427 = vmatmul.bf16.gmra.mxu2 %v2289_v45  ;;  %v2140_v44 = vld [vmem:[%s4075_s0 + $0xd8] sm:$0xf]  ;;  %v2830_v45 = vld [vmem:[%s4075_s0 + $0x108] sm:$0xf0] }
  0x32   :  { %1486 = vmatpush.bf16.msrb.mxu2 %v2907_v43  ;;  %1442 = vmatpush.bf16.msrb.mxu1 %v2899_v46  ;;  %v2134_v43 = vld [vmem:[%s4075_s0 + $0x104] sm:$0xf0]  ;;  %v2145_v46 = vor.u32 %v2824_v40, %v2142_v41  ;;  %v2876_v40 = vld [vmem:[%s4075_s0 + $0x27c] sm:$0xf]  ;;  %v2350_v41 = vld [vmem:[%s4075_s0 + $0x2ac] sm:$0xf0] }
  0x33   :  { %1530 = vmatpush.bf16.msrb.mxu3 %v2915_v42  ;;  %1407 = vmatmul.bf16.gmra.mxu0 %v2081_v47  ;;  %v2823_v42 = vld [vmem:[%s4075_s0 + $0xd4] sm:$0xf]  ;;  %v2148_v47 = vld [vmem:[%s4075_s0 + $0xe0] sm:$0xf] }
  0x34   :  { %1574 = vmatpush.bf16.msrb.mxu0 %v2923_v48  ;;  %v2831_v48 = vld [vmem:[%s4075_s0 + $0x110] sm:$0xf0] }
  0x36   :  { %1487 = vmatpush.bf16.msrb.mxu2 %v2906_v50  ;;  %1443 = vmatpush.bf16.msrb.mxu1 %v2898_v51  ;;  %v2141_v50 = vor.u32 %v2830_v45, %v2140_v44  ;;  %v2149_v51 = vor.u32 %v2831_v48, %v2148_v47  ;;  %v2342_v44 = vld [vmem:[%s4075_s0 + $0x2a4] sm:$0xf0]  ;;  %v2348_v45 = vld [vmem:[%s4075_s0 + $0x278] sm:$0xf]  ;;  %v2353_v47 = vor.u32 %v2876_v40, %v2350_v41  ;;  %v2356_v48 = vld [vmem:[%s4075_s0 + $0x280] sm:$0xf] }
  0x37   :  { %1531 = vmatpush.bf16.msrb.mxu3 %v2914_v49  ;;  %v2137_v49 = vor.u32 %v2823_v42, %v2134_v43  ;;  %v2987_v42 = vld [vmem:[%s4073_s1 + $0x318] sm:$0xff]  ;;  %v2875_v43 = vld [vmem:[%s4075_s0 + $0x274] sm:$0xf] }
  0x38   :  { %1575 = vmatpush.bf16.msrb.mxu0 %v2922_v52  ;;  %v2955_v52 = vld [vmem:[%s4073_s1 + $0x218] sm:$0xff] }
  0x3a   :  { %1488 = vmatpush.bf16.msrb.mxu2 %v2905_v54  ;;  %1444 = vmatpush.bf16.msrb.mxu1 %v2897_v55  ;;  %v2946_v54 = vld [vmem:[%s4073_s1 + $0x1d0] sm:$0xff] }
  0x3b   :  { %1532 = vmatpush.bf16.msrb.mxu3 %v2913_v53  ;;  %v2938_v53 = vld [vmem:[%s4073_s1 + $0x190] sm:$0xff] }
  0x3c   :  { %1576 = vmatpush.bf16.msrb.mxu0 %v2921_v57  ;;  %v2930_v55 = vld [vmem:[%s4073_s1 + $0x150] sm:$0xff]  ;;  %v2194_v57 = vld [vmem:[%s4075_s0 + $0x174] sm:$0xf0] }
  0x3e   :  { %1489 = vmatpush.bf16.msrb.mxu2 %v2904_v58  ;;  %1445 = vmatpush.bf16.msrb.mxu1 %v2896_v59  ;;  %v2836_v58 = vld [vmem:[%s4075_s0 + $0x13c] sm:$0xf]  ;;  %v2186_v59 = vld [vmem:[%s4075_s0 + $0x16c] sm:$0xf0] }
  0x3f   :  { %1533 = vmatpush.bf16.msrb.mxu3 %v2912_v56  ;;  %v2837_v56 = vld [vmem:[%s4075_s0 + $0x144] sm:$0xf]  ;;  %v2189_v1 = vor.u32 %v2836_v58, %v2186_v59  ;;  %v3487_v58 = vld [vmem:[%s4074_s2] ss:$0 sm:$0xff] }
  0x40   :  { %1577 = vmatpush.bf16.msrb.mxu0 %v2920_v5  ;;  %v2197_v62 = vor.u32 %v2837_v56, %v2194_v57  ;;  %v2937_v5 = vld [vmem:[%s4073_s1 + $0x188] sm:$0xff]  ;;  %v2982_v56 = vld [vmem:[%s4073_s1 + $0x2f0] sm:$0xff] }
  0x41   :  { %1446 = vmatmul.bf16.vlgmr.msrb.gmra.mxu1 %v2033_v10  ;;  %1490 = vmatmul.bf16.vlgmr.msrb.gmra.mxu2 %v2037_v11  ;;  %v2849_v10 = vld [vmem:[%s4075_s0 + $0x1a4] sm:$0xf]  ;;  %v2238_v11 = vld [vmem:[%s4075_s0 + $0x1d4] sm:$0xf0]  ;;  %v2966_v57 = vld [vmem:[%s4073_s1 + $0x270] sm:$0xff] }
  0x42   :  { %1658 = vmatpush.bf16.msra.mxu2 %v2943_v63  ;;  %1534 = vmatmul.bf16.vlgmr.msrb.gmra.mxu3 %v2041_v4  ;;  %v2200_v63 = vld [vmem:[%s4075_s0 + $0x148] sm:$0xf]  ;;  %v2954_v4 = vld [vmem:[%s4073_s1 + $0x210] sm:$0xff] }
  0x43   :  { %1702 = vmatpush.bf16.msra.mxu3 %v2951_v0  ;;  %1614 = vmatpush.bf16.msra.mxu1 %v2935_v8  ;;  %v2844_v0 = vld [vmem:[%s4075_s0 + $0x178] sm:$0xf0]  ;;  %v2850_v8 = vld [vmem:[%s4075_s0 + $0x1ac] sm:$0xf] }
  0x44   :  { %1746 = vmatpush.bf16.msra.mxu0 %v2959_v9  ;;  %v2201_v3 = vor.u32 %v2844_v0, %v2200_v63  ;;  %v2246_v9 = vld [vmem:[%s4075_s0 + $0x1dc] sm:$0xf0] }
  0x45   :  { %1578 = vmatmul.bf16.vlgmr.msrb.gmra.mxu0 %v2045_v12  ;;  %v2244_v12 = vld [vmem:[%s4075_s0 + $0x1a8] sm:$0xf] }
  0x46   :  { %1659 = vmatpush.bf16.msra.mxu2 %v2942_v13  ;;  %v2856_v13 = vld [vmem:[%s4075_s0 + $0x1d8] sm:$0xf0] }
  0x47   :  { %1703 = vmatpush.bf16.msra.mxu3 %v2950_v14  ;;  %1615 = vmatpush.bf16.msra.mxu1 %v2934_v15  ;;  %v2249_v14 = vor.u32 %v2850_v8, %v2246_v9  ;;  %v2252_v15 = vld [vmem:[%s4075_s0 + $0x1b0] sm:$0xf]  ;;  %v2060_v8 = vld [vmem:[%s4075_s0 + $0x20] sm:$0xf]  ;;  %v2807_v9 = vld [vmem:[%s4075_s0 + $0x50] sm:$0xf0] }
  0x48   :  { %1747 = vmatpush.bf16.msra.mxu0 %v2958_v16  ;;  %v2857_v16 = vld [vmem:[%s4075_s0 + $0x1e0] sm:$0xf0] }
  0x4a   :  { %1660 = vmatpush.bf16.msra.mxu2 %v2941_v17  ;;  %v2241_v17 = vor.u32 %v2849_v10, %v2238_v11 }
  0x4b   :  { %1704 = vmatpush.bf16.msra.mxu3 %v2949_v18  ;;  %1616 = vmatpush.bf16.msra.mxu1 %v2933_v19  ;;  %v2245_v18 = vor.u32 %v2856_v13, %v2244_v12  ;;  %v2253_v19 = vor.u32 %v2857_v16, %v2252_v15  ;;  %v2061_v15 = vor.u32 %v2807_v9, %v2060_v8  ;;  %v2164_v8 = vld [vmem:[%s4075_s0 + $0xf0] sm:$0xf]  ;;  %v2833_v9 = vld [vmem:[%s4075_s0 + $0x120] sm:$0xf0] }
  0x4c   :  { %1748 = vmatpush.bf16.msra.mxu0 %v2957_v20  ;;  %v2953_v20 = vld [vmem:[%s4073_s1 + $0x208] sm:$0xff] }
  0x4e   :  { %1661 = vmatpush.bf16.msra.mxu2 %v2940_v21  ;;  %v2936_v21 = vld [vmem:[%s4073_s1 + $0x180] sm:$0xff] }
  0x4f   :  { %1705 = vmatpush.bf16.msra.mxu3 %v2948_v22  ;;  %1617 = vmatpush.bf16.msra.mxu1 %v2932_v35  ;;  %v2944_v22 = vld [vmem:[%s4073_s1 + $0x1c0] sm:$0xff] }
  0x50   :  { %1749 = vmatpush.bf16.msra.mxu0 %v2956_v36  ;;  %v2952_v35 = vld [vmem:[%s4073_s1 + $0x200] sm:$0xff] }
  0x51   :  { %1451 = vmatmul.bf16.gmra.mxu1 %v2085_v32  ;;  %1495 = vmatmul.bf16.gmra.mxu2 %v2089_v33  ;;  %v2870_v32 = vld [vmem:[%s4075_s0 + $0x248] sm:$0xf0]  ;;  %v2293_v33 = vor.u32 %v2862_v26, %v2290_v27  ;;  %v2986_v26 = vld [vmem:[%s4073_s1 + $0x310] sm:$0xff]  ;;  %v2813_v27 = vld [vmem:[%s4075_s0 + $0x84] sm:$0xf] }
  0x52   :  { %1539 = vmatmul.bf16.gmra.mxu3 %v2093_v29  ;;  %1662 = vmatpush.bf16.msra.mxu2 %v2939_v37  ;;  %v2869_v29 = vld [vmem:[%s4075_s0 + $0x240] sm:$0xf0]  ;;  %v2305_v36 = vor.u32 %v2870_v32, %v2304_v31  ;;  %v2975_v37 = vld [vmem:[%s4073_s1 + $0x2b8] sm:$0xff]  ;;  %v2104_v31 = vld [vmem:[%s4075_s0 + $0x80] sm:$0xf] }
  0x53   :  { %1706 = vmatpush.bf16.msra.mxu3 %v2947_v38  ;;  %1618 = vmatpush.bf16.msra.mxu1 %v2931_v39  ;;  %v2983_v38 = vld [vmem:[%s4073_s1 + $0x2f8] sm:$0xff]  ;;  %v2819_v32 = vld [vmem:[%s4075_s0 + $0xb0] sm:$0xf0] }
  0x54   :  { %1750 = vmatpush.bf16.msra.mxu0 %v2955_v52  ;;  %v2967_v39 = vld [vmem:[%s4073_s1 + $0x278] sm:$0xff]  ;;  %v2105_v41 = vor.u32 %v2819_v32, %v2104_v31 }
  0x55   :  { %1583 = vmatmul.bf16.gmra.mxu0 %v2097_v34  ;;  %v2297_v34 = vor.u32 %v2869_v29, %v2296_v28  ;;  %v2106_v28 = vld [vmem:[%s4075_s0 + $0xb4] sm:$0xf0]  ;;  %v2812_v29 = vld [vmem:[%s4075_s0 + $0x7c] sm:$0xf] }
  0x56   :  { %1663 = vmatpush.bf16.msra.mxu2 %v2938_v53 }
  0x57   :  { %1707 = vmatpush.bf16.msra.mxu3 %v2946_v54  ;;  %1619 = vmatpush.bf16.msra.mxu1 %v2930_v55  ;;  %v2974_v55 = vld [vmem:[%s4073_s1 + $0x2b0] sm:$0xff] }
  0x58   :  { %1751 = vmatpush.bf16.msra.mxu0 %v2954_v4  ;;  %v2046_v4 = vld [vmem:[%s4075_s0 + $0x44] sm:$0xf0] }
  0x5a   :  { %1664 = vmatpush.bf16.msra.mxu2 %v2937_v5  ;;  %v2052_v5 = vld [vmem:[%s4075_s0 + $0x18] sm:$0xf] }
  0x5b   :  { %1708 = vmatpush.bf16.msra.mxu3 %v2945_v6  ;;  %1620 = vmatpush.bf16.msra.mxu1 %v2929_v7  ;;  %v2806_v6 = vld [vmem:[%s4075_s0 + $0x48] sm:$0xf0] }
  0x5c   :  { %1752 = vmatpush.bf16.msra.mxu0 %v2953_v20  ;;  %v2053_v13 = vor.u32 %v2806_v6, %v2052_v5  ;;  %v2981_v20 = vld [vmem:[%s4073_s1 + $0x2e8] sm:$0xff]  ;;  %v2971_v5 = vld [vmem:[%s4073_s1 + $0x298] sm:$0xff] }
  0x5d   :  { %v2979_v6 = vld [vmem:[%s4073_s1 + $0x2d8] sm:$0xff] }
  0x5e   :  { %1665 = vmatpush.bf16.msra.mxu2 %v2936_v21  ;;  %v2965_v21 = vld [vmem:[%s4073_s1 + $0x268] sm:$0xff] }
  0x5f   :  { %1709 = vmatpush.bf16.msra.mxu3 %v2944_v22  ;;  %1621 = vmatpush.bf16.msra.mxu1 %v2928_v23 }
  0x60   :  { %1753 = vmatpush.bf16.msra.mxu0 %v2952_v35  ;;  %v2112_v35 = vld [vmem:[%s4075_s0 + $0x88] sm:$0xf] }
  0x61   :  { %1456 = vmatmul.bf16.gmra.mxu1 %v2137_v49  ;;  %1500 = vmatmul.bf16.gmra.mxu2 %v2141_v50  ;;  %v2883_v49 = vld [vmem:[%s4075_s0 + $0x2b0] sm:$0xf0]  ;;  %v2345_v50 = vor.u32 %v2875_v43, %v2342_v44 }
  0x62   :  { %1544 = vmatmul.bf16.gmra.mxu3 %v2145_v46  ;;  %1834 = vmatpush.bf16.msrb.mxu2 %v2975_v37  ;;  %v2882_v46 = vld [vmem:[%s4075_s0 + $0x2a8] sm:$0xf0]  ;;  %v2357_v53 = vor.u32 %v2883_v49, %v2356_v48 }
  0x63   :  { %1878 = vmatpush.bf16.msrb.mxu3 %v2983_v38  ;;  %1790 = vmatpush.bf16.msrb.mxu1 %v2967_v39 }
  0x64   :  { %1926 = vmatpush.bf16.msrb.mxu0 %v2987_v42 }
  0x65   :  { %1588 = vmatmul.bf16.gmra.mxu0 %v2149_v51  ;;  %v2349_v51 = vor.u32 %v2882_v46, %v2348_v45  ;;  %v2980_v46 = vld [vmem:[%s4073_s1 + $0x2e0] sm:$0xff] }
  0x66   :  { %1835 = vmatpush.bf16.msrb.mxu2 %v2974_v55 }
  0x67   :  { %1879 = vmatpush.bf16.msrb.mxu3 %v2982_v56  ;;  %1791 = vmatpush.bf16.msrb.mxu1 %v2966_v57  ;;  %v2826_v57 = vld [vmem:[%s4075_s0 + $0xec] sm:$0xf] }
  0x68   :  { %1927 = vmatpush.bf16.msrb.mxu0 %v2986_v26 }
  0x6b   :  { %1880 = vmatpush.bf16.msrb.mxu3 %v2981_v20  ;;  %1792 = vmatpush.bf16.msrb.mxu1 %v2965_v21  ;;  %v2165_v20 = vor.u32 %v2833_v9, %v2164_v8 }
  0x6f   :  { %1881 = vmatpush.bf16.msrb.mxu3 %v2980_v46  ;;  %v2978_v46 = vld [vmem:[%s4073_s1 + $0x2d0] sm:$0xff] }
  0x71   :  { %1461 = vmatmul.bf16.gmra.mxu1 %v2189_v1  ;;  %1505 = vmatmul.bf16.gmra.mxu2 %v2193_v2  ;;  %v2800_v1 = vld [vmem:[%s4075_s0 + $0x1c] sm:$0xf]  ;;  %v2054_v2 = vld [vmem:[%s4075_s0 + $0x4c] sm:$0xf0] }
  0x72   :  { %1549 = vmatmul.bf16.gmra.mxu3 %v2197_v62  ;;  %v2057_v7 = vor.u32 %v2800_v1, %v2054_v2  ;;  %v2156_v1 = vld [vmem:[%s4075_s0 + $0xe8] sm:$0xf] }
  0x73   :  { %1882 = vmatpush.bf16.msrb.mxu3 %v2979_v6 }
  0x75   :  { %1593 = vmatmul.bf16.gmra.mxu0 %v2201_v3  ;;  %v2799_v3 = vld [vmem:[%s4075_s0 + $0x14] sm:$0xf] }
  0x76   :  { %v2049_v12 = vor.u32 %v2799_v3, %v2046_v4  ;;  %v2832_v4 = vld [vmem:[%s4075_s0 + $0x118] sm:$0xf0] }
  0x77   :  { %1883 = vmatpush.bf16.msrb.mxu3 %v2978_v46 }
  0x81   :  { %1466 = vmatmul.bf16.gmra.mxu1 %v2241_v17  ;;  %1510 = vmatmul.bf16.gmra.mxu2 %v2245_v18 }
  0x82   :  { %1554 = vmatmul.bf16.gmra.mxu3 %v2249_v14 }
  0x85   :  { %1598 = vmatmul.bf16.gmra.mxu0 %v2253_v19  ;;  %v2973_v19 = vld [vmem:[%s4073_s1 + $0x2a8] sm:$0xff] }
  0x86   :  { %1836 = vmatpush.bf16.msrb.mxu2 %v2973_v19 }
  0x91   :  { %1471 = vmatmul.bf16.gmra.mxu1 %v2293_v33  ;;  %1515 = vmatmul.bf16.gmra.mxu2 %v2297_v34  ;;  %v2972_v33 = vld [vmem:[%s4073_s1 + $0x2a0] sm:$0xff]  ;;  %v2109_v34 = vor.u32 %v2813_v27, %v2106_v28  ;;  %v2963_v27 = vld [vmem:[%s4073_s1 + $0x258] sm:$0xff] }
  0x92   :  { %1559 = vmatmul.bf16.gmra.mxu3 %v2301_v30  ;;  %v2098_v30 = vld [vmem:[%s4075_s0 + $0xac] sm:$0xf0]  ;;  %1837 = vmatpush.bf16.msrb.mxu2 %v2972_v33 }
  0x93   :  { %v2101_v40 = vor.u32 %v2812_v29, %v2098_v30 }
  0x95   :  { %1603 = vmatmul.bf16.gmra.mxu0 %v2305_v36  ;;  %v2820_v36 = vld [vmem:[%s4075_s0 + $0xb8] sm:$0xf0] }
  0x96   :  { %v2113_v43 = vor.u32 %v2820_v36, %v2112_v35  ;;  %1838 = vmatpush.bf16.msrb.mxu2 %v2971_v5 }
  0x9e   :  { %v3471_v52 = vpop.f32.mrf.mxu1 }
  0xa0   :  { %v3473_v54 = vpop.f32.mrf.mxu0 }
  0xa1   :  { %1476 = vmatmul.bf16.gmra.mxu1 %v2345_v50  ;;  %1520 = vmatmul.bf16.gmra.mxu2 %v2349_v51  ;;  %v1404_v38 = vadd.f32 %v3487_v58, %v3473_v54 }
  0xa2   :  { %1564 = vmatmul.bf16.gmra.mxu3 %v2353_v47  ;;  %v2964_v47 = vld [vmem:[%s4073_s1 + $0x260] sm:$0xff] }
  0xa3   :  { %1793 = vmatpush.bf16.msrb.mxu1 %v2964_v47  ;;  %v2962_v47 = vld [vmem:[%s4073_s1 + $0x250] sm:$0xff] }
  0xa4   :  { %v1423_v59 = vpop.f32.mrf.mxu2 }
  0xa5   :  { %1608 = vmatmul.bf16.gmra.mxu0 %v2357_v53  ;;  %v3490_v60 = vadd.f32 %v3487_v58, %v1423_v59  ;;  %v2158_v59 = vld [vmem:[%s4075_s0 + $0x11c] sm:$0xf0] }
  0xa6   :  { %v3492_v61 = vpop.f32.mrf.mxu1 }
  0xa7   :  { %v1433_v62 = vpop.f32.mrf.mxu3  ;;  %1794 = vmatpush.bf16.msrb.mxu1 %v2963_v27  ;;  %v1416_v6 = vadd.f32 %v3487_v58, %v3492_v61  ;;  %v2262_v61 = vld [vmem:[%s4075_s0 + $0x1ec] sm:$0xf0]  ;;  %v2961_v27 = vld [vmem:[%s4073_s1 + $0x248] sm:$0xff] }
  0xa8   :  { %v3494_v63 = vpop.f32.mrf.mxu0  ;;  %v3497_v0 = vadd.f32 %v3487_v58, %v1433_v62  ;;  %v2825_v62 = vld [vmem:[%s4075_s0 + $0xe4] sm:$0xf] }
  0xa9   :  { %v1406_v50 = vadd.f32 %v3487_v58, %v3494_v63  ;;  %v2150_v63 = vld [vmem:[%s4075_s0 + $0x114] sm:$0xf0] }
  0xab   :  { %1795 = vmatpush.bf16.msrb.mxu1 %v2962_v47 }
  0xac   :  { %v1425_v10 = vpop.f32.mrf.mxu2 }
  0xad   :  { %v3524_v11 = vadd.f32 %v3487_v58, %v1425_v10 }
  0xae   :  { %v3526_v14 = vpop.f32.mrf.mxu1 }
  0xaf   :  { %v1435_v16 = vpop.f32.mrf.mxu3  ;;  %1796 = vmatpush.bf16.msrb.mxu1 %v2961_v27 }
  0xb0   :  { %v3528_v17 = vpop.f32.mrf.mxu0  ;;  %v3531_v18 = vadd.f32 %v3487_v58, %v1435_v16  ;;  %v2157_v16 = vor.u32 %v2832_v4, %v2156_v1 }
  0xb1   :  { %1622 = vmatmul.bf16.vlgmr.msra.gmra.mxu1 %v2049_v12  ;;  %1666 = vmatmul.bf16.vlgmr.msra.gmra.mxu2 %v2053_v13  ;;  %v1409_v12 = vadd.f32 %v3487_v58, %v3528_v17  ;;  %v2985_v17 = vld [vmem:[%s4073_s1 + $0x308] sm:$0xff] }
  0xb2   :  { %1710 = vmatmul.bf16.vlgmr.msra.gmra.mxu3 %v2057_v7  ;;  %v2161_v7 = vor.u32 %v2826_v57, %v2158_v59  ;;  %1928 = vmatpush.bf16.msrb.mxu0 %v2985_v17  ;;  %v2268_v17 = vld [vmem:[%s4075_s0 + $0x1c0] sm:$0xf] }
  0xb4   :  { %v1428_v22 = vpop.f32.mrf.mxu2 }
  0xb5   :  { %1754 = vmatmul.bf16.vlgmr.msra.gmra.mxu0 %v2061_v15  ;;  %v3543_v23 = vadd.f32 %v3487_v58, %v1428_v22  ;;  %v2153_v15 = vor.u32 %v2825_v62, %v2150_v63 }
  0xb6   :  { %v3545_v24 = vpop.f32.mrf.mxu1 }
  0xb7   :  { %v1421_v46 = vadd.f32 %v3487_v58, %v3545_v24  ;;  %v2864_v24 = vld [vmem:[%s4075_s0 + $0x21c] sm:$0xf] }
  0xb8   :  { %v3547_v25 = vpop.f32.mrf.mxu0 }
  0xb9   :  { %v1411_v31 = vadd.f32 %v3487_v58, %v3547_v25  ;;  %v2838_v25 = vld [vmem:[%s4075_s0 + $0x14c] sm:$0xf] }
  0xbc   :  { %v1430_v37 = vpop.f32.mrf.mxu2 }
  0xbd   :  { %v3582_v39 = vadd.f32 %v3487_v58, %v1430_v37  ;;  %v2970_v37 = vld [vmem:[%s4073_s1 + $0x290] sm:$0xff] }
  0xbe   :  { %v1447_v42 = vpop.f32.mrf.mxu1  ;;  %1839 = vmatpush.bf16.msrb.mxu2 %v2970_v37 }
  0xbf   :  { %v1448_v44 = vadd.f32 %v1447_v42, %v1404_v38  ;;  %v2839_v38 = vld [vmem:[%s4075_s0 + $0x154] sm:$0xf]  ;;  %v2208_v42 = vld [vmem:[%s4075_s0 + $0x150] sm:$0xf] }
  0xc1   :  { %1627 = vmatmul.bf16.gmra.mxu1 %v2101_v40  ;;  %1671 = vmatmul.bf16.gmra.mxu2 %v2105_v41  ;;  %v2210_v40 = vld [vmem:[%s4075_s0 + $0x184] sm:$0xf0]  ;;  %v2202_v41 = vld [vmem:[%s4075_s0 + $0x17c] sm:$0xf0] }
  0xc2   :  { %1715 = vmatmul.bf16.gmra.mxu3 %v2109_v34  ;;  %v1579_v45 = vpop.f32.mrf.mxu0 }
  0xc4   :  { %v1491_v49 = vpop.f32.mrf.mxu2 }
  0xc5   :  { %v1535_v48 = vpop.f32.mrf.mxu3  ;;  %1759 = vmatmul.bf16.gmra.mxu0 %v2113_v43  ;;  %v1492_v51 = vadd.f32 %v1491_v49, %v1448_v44  ;;  %v2216_v49 = vld [vmem:[%s4075_s0 + $0x158] sm:$0xf] }
  0xc6   :  { %v1449_v53 = vpop.f32.mrf.mxu1 }
  0xc7   :  { %v1536_v54 = vadd.f32 %v1535_v48, %v1492_v51  ;;  %v1450_v55 = vadd.f32 %v1449_v53, %v1406_v50  ;;  %v2213_v48 = vor.u32 %v2839_v38, %v2210_v40  ;;  %v2846_v50 = vld [vmem:[%s4075_s0 + $0x188] sm:$0xf0]  ;;  %v1414_v53 = vadd.f32 %v3487_v58, %v3471_v52 }
  0xc8   :  { %v2217_v59 = vor.u32 %v2846_v50, %v2216_v49 }
  0xc9   :  { %v3607_v2 = vadd.f32 %v1579_v45, %v1536_v54  ;;  %v2845_v45 = vld [vmem:[%s4075_s0 + $0x180] sm:$0xf0] }
  0xca   :  { %v1581_v56 = vpop.f32.mrf.mxu0 }
  0xcc   :  { %v1493_v10 = vpop.f32.mrf.mxu2 }
  0xcd   :  { %v1537_v3 = vpop.f32.mrf.mxu3  ;;  %v1494_v13 = vadd.f32 %v1493_v10, %v1450_v55  ;;  %v2205_v55 = vor.u32 %v2838_v25, %v2202_v41  ;;  %v2984_v41 = vld [vmem:[%s4073_s1 + $0x300] sm:$0xff] }
  0xce   :  { %v1452_v19 = vpop.f32.mrf.mxu1  ;;  %1929 = vmatpush.bf16.msrb.mxu0 %v2984_v41 }
  0xcf   :  { %v1538_v21 = vadd.f32 %v1537_v3, %v1494_v13  ;;  %v1453_v22 = vadd.f32 %v1452_v19, %v1409_v12  ;;  %v2969_v12 = vld [vmem:[%s4073_s1 + $0x288] sm:$0xff] }
  0xd0   :  { %v2977_v13 = vld [vmem:[%s4073_s1 + $0x2c8] sm:$0xff]  ;;  %1840 = vmatpush.bf16.msrb.mxu2 %v2969_v12 }
  0xd1   :  { %1632 = vmatmul.bf16.gmra.mxu1 %v2153_v15  ;;  %1676 = vmatmul.bf16.gmra.mxu2 %v2157_v16  ;;  %v3629_v28 = vadd.f32 %v1581_v56, %v1538_v21  ;;  %v2209_v56 = vor.u32 %v2845_v45, %v2208_v42  ;;  %v2852_v15 = vld [vmem:[%s4075_s0 + $0x1bc] sm:$0xf]  ;;  %v2851_v16 = vld [vmem:[%s4075_s0 + $0x1b4] sm:$0xf]  ;;  %v2254_v19 = vld [vmem:[%s4075_s0 + $0x1e4] sm:$0xf0] }
  0xd2   :  { %1720 = vmatmul.bf16.gmra.mxu3 %v2161_v7  ;;  %v1584_v26 = vpop.f32.mrf.mxu0 }
  0xd3   :  { %1884 = vmatpush.bf16.msrb.mxu3 %v2977_v13 }
  0xd4   :  { %v1496_v30 = vpop.f32.mrf.mxu2 }
  0xd5   :  { %v1540_v29 = vpop.f32.mrf.mxu3  ;;  %1764 = vmatmul.bf16.gmra.mxu0 %v2165_v20  ;;  %v1497_v32 = vadd.f32 %v1496_v30, %v1453_v22  ;;  %v2260_v22 = vld [vmem:[%s4075_s0 + $0x1b8] sm:$0xf]  ;;  %v2859_v30 = vld [vmem:[%s4075_s0 + $0x1f0] sm:$0xf0] }
  0xd6   :  { %v1454_v33 = vpop.f32.mrf.mxu1  ;;  %v2269_v37 = vor.u32 %v2859_v30, %v2268_v17  ;;  %v2878_v17 = vld [vmem:[%s4075_s0 + $0x28c] sm:$0xf]  ;;  %v2877_v30 = vld [vmem:[%s4075_s0 + $0x284] sm:$0xf] }
  0xd7   :  { %v1541_v34 = vadd.f32 %v1540_v29, %v1497_v32  ;;  %v1455_v35 = vadd.f32 %v1454_v33, %v1411_v31  ;;  %v2265_v29 = vor.u32 %v2852_v15, %v2262_v61  ;;  %v1419_v32 = vadd.f32 %v3487_v58, %v3526_v14  ;;  %v2968_v14 = vld [vmem:[%s4073_s1 + $0x280] sm:$0xff]  ;;  %v2314_v58 = vld [vmem:[%s4075_s0 + $0x254] sm:$0xf0] }
  0xd8   :  { %1841 = vmatpush.bf16.msrb.mxu2 %v2968_v14 }
  0xd9   :  { %v3654_v43 = vadd.f32 %v1584_v26, %v1541_v34  ;;  %v2858_v26 = vld [vmem:[%s4075_s0 + $0x1e8] sm:$0xf0]  ;;  %v2257_v34 = vor.u32 %v2851_v16, %v2254_v19 }
  0xda   :  { %v1586_v36 = vpop.f32.mrf.mxu0 }
  0xdc   :  { %v1498_v51 = vpop.f32.mrf.mxu2 }
  0xdd   :  { %v1542_v44 = vpop.f32.mrf.mxu3  ;;  %v1499_v54 = vadd.f32 %v1498_v51, %v1455_v35  ;;  %v2261_v35 = vor.u32 %v2858_v26, %v2260_v22 }
  0xde   :  { %v1457_v57 = vpop.f32.mrf.mxu1 }
  0xdf   :  { %v1543_v62 = vadd.f32 %v1542_v44, %v1499_v54  ;;  %v1458_v63 = vadd.f32 %v1457_v57, %v1414_v53  ;;  %v2976_v53 = vld [vmem:[%s4073_s1 + $0x2c0] sm:$0xff] }
  0xe0   :  { %v2960_v54 = vld [vmem:[%s4073_s1 + $0x240] sm:$0xff]  ;;  %1885 = vmatpush.bf16.msrb.mxu3 %v2976_v53 }
  0xe1   :  { %1637 = vmatmul.bf16.gmra.mxu1 %v2205_v55  ;;  %1681 = vmatmul.bf16.gmra.mxu2 %v2209_v56  ;;  %v3673_v3 = vadd.f32 %v1586_v36, %v1543_v62  ;;  %v2865_v55 = vld [vmem:[%s4075_s0 + $0x224] sm:$0xf]  ;;  %v2312_v62 = vld [vmem:[%s4075_s0 + $0x220] sm:$0xf] }
  0xe2   :  { %1725 = vmatmul.bf16.gmra.mxu3 %v2213_v48  ;;  %v1589_v1 = vpop.f32.mrf.mxu0  ;;  %1797 = vmatpush.bf16.msrb.mxu1 %v2960_v54 }
  0xe4   :  { %v1501_v5 = vpop.f32.mrf.mxu2 }
  0xe5   :  { %v1545_v4 = vpop.f32.mrf.mxu3  ;;  %1769 = vmatmul.bf16.gmra.mxu0 %v2217_v59  ;;  %v1502_v52 = vadd.f32 %v1501_v5, %v1458_v63  ;;  %v2306_v59 = vld [vmem:[%s4075_s0 + $0x24c] sm:$0xf0]  ;;  %v2871_v63 = vld [vmem:[%s4075_s0 + $0x250] sm:$0xf0]  ;;  %v2872_v5 = vld [vmem:[%s4075_s0 + $0x258] sm:$0xf0] }
  0xe6   :  { %v1459_v7 = vpop.f32.mrf.mxu1 }
  0xe7   :  { %v1546_v8 = vadd.f32 %v1545_v4, %v1502_v52  ;;  %v1460_v9 = vadd.f32 %v1459_v7, %v1416_v6  ;;  %v2320_v4 = vld [vmem:[%s4075_s0 + $0x228] sm:$0xf]  ;;  %v2309_v7 = vor.u32 %v2864_v24, %v2306_v59  ;;  %v2802_v24 = vld [vmem:[%s4075_s0 + $0x2c] sm:$0xf] }
  0xe9   :  { %v3695_v20 = vadd.f32 %v1589_v1, %v1546_v8  ;;  %v2317_v1 = vor.u32 %v2865_v55, %v2314_v58  ;;  %v2313_v8 = vor.u32 %v2871_v63, %v2312_v62  ;;  %v2068_v63 = vld [vmem:[%s4075_s0 + $0x28] sm:$0xf] }
  0xea   :  { %v1591_v10 = vpop.f32.mrf.mxu0 }
  0xec   :  { %v1503_v31 = vpop.f32.mrf.mxu2 }
  0xed   :  { %v1547_v21 = vpop.f32.mrf.mxu3  ;;  %v1504_v33 = vadd.f32 %v1503_v31, %v1460_v9 }
  0xee   :  { %v1462_v36 = vpop.f32.mrf.mxu1 }
  0xef   :  { %v1548_v38 = vadd.f32 %v1547_v21, %v1504_v33  ;;  %v1463_v40 = vadd.f32 %v1462_v36, %v1419_v32  ;;  %v2364_v33 = vld [vmem:[%s4075_s0 + $0x288] sm:$0xf]  ;;  %v2372_v36 = vld [vmem:[%s4075_s0 + $0x290] sm:$0xf] }
  0xf1   :  { %1642 = vmatmul.bf16.gmra.mxu1 %v2257_v34  ;;  %1686 = vmatmul.bf16.gmra.mxu2 %v2261_v35  ;;  %v3717_v42 = vadd.f32 %v1591_v10, %v1548_v38  ;;  %v2321_v10 = vor.u32 %v2872_v5, %v2320_v4  ;;  %v2884_v34 = vld [vmem:[%s4075_s0 + $0x2b8] sm:$0xf0]  ;;  %v2076_v5 = vld [vmem:[%s4075_s0 + $0x30] sm:$0xf] }
  0xf2   :  { %1730 = vmatmul.bf16.gmra.mxu3 %v2265_v29  ;;  %v1594_v25 = vpop.f32.mrf.mxu0  ;;  %v2365_v41 = vor.u32 %v2884_v34, %v2364_v33  ;;  %v2120_v34 = vld [vmem:[%s4075_s0 + $0x90] sm:$0xf] }
  0xf4   :  { %v1506_v45 = vpop.f32.mrf.mxu2 }
  0xf5   :  { %v1550_v44 = vpop.f32.mrf.mxu3  ;;  %1774 = vmatmul.bf16.gmra.mxu0 %v2269_v37  ;;  %v1507_v47 = vadd.f32 %v1506_v45, %v1463_v40  ;;  %v2885_v37 = vld [vmem:[%s4075_s0 + $0x2c0] sm:$0xf0] }
  0xf6   :  { %v1464_v48 = vpop.f32.mrf.mxu1  ;;  %v2373_v14 = vor.u32 %v2885_v37, %v2372_v36  ;;  %v2128_v37 = vld [vmem:[%s4075_s0 + $0x98] sm:$0xf] }
  0xf7   :  { %v1551_v49 = vadd.f32 %v1550_v44, %v1507_v47  ;;  %v1465_v50 = vadd.f32 %v1464_v48, %v1421_v46 }
  0xf9   :  { %v3739_v56 = vadd.f32 %v1594_v25, %v1551_v49 }
  0xfa   :  { %v1596_v51 = vpop.f32.mrf.mxu0 }
  0xfc   :  { %v1508_v6 = vpop.f32.mrf.mxu2 }
  0xfd   :  { %v1552_v57 = vpop.f32.mrf.mxu3  ;;  %v1509_v52 = vadd.f32 %v1508_v6, %v1465_v50  ;;  %v2809_v6 = vld [vmem:[%s4075_s0 + $0x60] sm:$0xf0] }
  0xfe   :  { %v1467_v9 = vpop.f32.mrf.mxu1 }
  0xff   :  { %v1553_v12 = vadd.f32 %v1552_v57, %v1509_v52  ;;  %v1468_v13 = vadd.f32 %v1467_v9, %v3490_v60  ;;  %v2366_v60 = vld [vmem:[%s4075_s0 + $0x2bc] sm:$0xf0]  ;;  %v2801_v57 = vld [vmem:[%s4075_s0 + $0x24] sm:$0xf] }
 0x100   :  { %v2369_v35 = vor.u32 %v2878_v17, %v2366_v60 }
 0x101   :  { %1647 = vmatmul.bf16.gmra.mxu1 %v2309_v7  ;;  %1691 = vmatmul.bf16.gmra.mxu2 %v2313_v8  ;;  %v3757_v61 = vadd.f32 %v1596_v51, %v1553_v12  ;;  %v2077_v12 = vor.u32 %v2809_v6, %v2076_v5  ;;  %v2180_v6 = vld [vmem:[%s4075_s0 + $0x100] sm:$0xf] }
 0x102   :  { %1735 = vmatmul.bf16.gmra.mxu3 %v2317_v1  ;;  %v1599_v15 = vpop.f32.mrf.mxu0  ;;  %v2808_v1 = vld [vmem:[%s4075_s0 + $0x58] sm:$0xf0] }
 0x103   :  { %v2069_v9 = vor.u32 %v2808_v1, %v2068_v63  ;;  %v2172_v1 = vld [vmem:[%s4075_s0 + $0xf8] sm:$0xf] }
 0x104   :  { %v1511_v19 = vpop.f32.mrf.mxu2 }
 0x105   :  { %v1555_v16 = vpop.f32.mrf.mxu3  ;;  %1779 = vmatmul.bf16.gmra.mxu0 %v2321_v10  ;;  %v1512_v21 = vadd.f32 %v1511_v19, %v1468_v13 }
 0x106   :  { %v1469_v22 = vpop.f32.mrf.mxu1 }
 0x107   :  { %v1556_v26 = vadd.f32 %v1555_v16, %v1512_v21  ;;  %v1470_v27 = vadd.f32 %v1469_v22, %v3524_v11  ;;  %v2358_v11 = vld [vmem:[%s4075_s0 + $0x2b4] sm:$0xf0] }
 0x108   :  { %v2361_v25 = vor.u32 %v2877_v30, %v2358_v11  ;;  %v2122_v30 = vld [vmem:[%s4075_s0 + $0xc4] sm:$0xf0] }
 0x109   :  { %v3769_v31 = vadd.f32 %v1599_v15, %v1556_v26 }
 0x10a   :  { %v1601_v29 = vpop.f32.mrf.mxu0 }
 0x10c   :  { %v1513_v38 = vpop.f32.mrf.mxu2 }
 0x10d   :  { %v1557_v32 = vpop.f32.mrf.mxu3  ;;  %v1514_v40 = vadd.f32 %v1513_v38, %v1470_v27  ;;  %v2822_v38 = vld [vmem:[%s4075_s0 + $0xc8] sm:$0xf0] }
 0x10e   :  { %v1472_v44 = vpop.f32.mrf.mxu1 }
 0x10f   :  { %v1558_v45 = vadd.f32 %v1557_v32, %v1514_v40  ;;  %v1473_v46 = vadd.f32 %v1472_v44, %v3543_v23  ;;  %v2070_v23 = vld [vmem:[%s4075_s0 + $0x5c] sm:$0xf0]  ;;  %v2814_v32 = vld [vmem:[%s4075_s0 + $0x8c] sm:$0xf] }
 0x110   :  { %v2073_v4 = vor.u32 %v2802_v24, %v2070_v23 }
 0x111   :  { %1652 = vmatmul.bf16.gmra.mxu1 %v2361_v25  ;;  %1696 = vmatmul.bf16.gmra.mxu2 %v2365_v41  ;;  %v3787_v48 = vadd.f32 %v1601_v29, %v1558_v45  ;;  %v2129_v45 = vor.u32 %v2822_v38, %v2128_v37  ;;  %v2232_v38 = vld [vmem:[%s4075_s0 + $0x168] sm:$0xf] }
 0x112   :  { %1740 = vmatmul.bf16.gmra.mxu3 %v2369_v35  ;;  %v1604_v47 = vpop.f32.mrf.mxu0  ;;  %v2821_v35 = vld [vmem:[%s4075_s0 + $0xc0] sm:$0xf0] }
 0x113   :  { %v2121_v44 = vor.u32 %v2821_v35, %v2120_v34  ;;  %v2224_v35 = vld [vmem:[%s4075_s0 + $0x160] sm:$0xf] }
 0x114   :  { %v1516_v50 = vpop.f32.mrf.mxu2 }
 0x115   :  { %v1560_v49 = vpop.f32.mrf.mxu3  ;;  %1784 = vmatmul.bf16.gmra.mxu0 %v2373_v14  ;;  %v1517_v51 = vadd.f32 %v1516_v50, %v1473_v46 }
 0x116   :  { %v1474_v53 = vpop.f32.mrf.mxu1 }
 0x117   :  { %v1561_v54 = vadd.f32 %v1560_v49, %v1517_v51  ;;  %v1475_v55 = vadd.f32 %v1474_v53, %v3582_v39  ;;  %v2062_v39 = vld [vmem:[%s4075_s0 + $0x54] sm:$0xf0] }
 0x118   :  { %v2065_v8 = vor.u32 %v2801_v57, %v2062_v39  ;;  %v2174_v57 = vld [vmem:[%s4075_s0 + $0x12c] sm:$0xf0] }
 0x119   :  { %v3799_v59 = vadd.f32 %v1604_v47, %v1561_v54 }
 0x11a   :  { %v1606_v58 = vpop.f32.mrf.mxu0 }
 0x11c   :  { %v1518_v52 = vpop.f32.mrf.mxu2 }
 0x11d   :  { %v1562_v62 = vpop.f32.mrf.mxu3  ;;  %v1519_v7 = vadd.f32 %v1518_v52, %v1475_v55  ;;  %v2835_v52 = vld [vmem:[%s4075_s0 + $0x130] sm:$0xf0] }
 0x11e   :  { %v1477_v10 = vpop.f32.mrf.mxu1 }
 0x11f   :  { %v1563_v13 = vadd.f32 %v1562_v62, %v1519_v7  ;;  %v1478_v15 = vadd.f32 %v1477_v10, %v3497_v0  ;;  %v2815_v0 = vld [vmem:[%s4075_s0 + $0x94] sm:$0xf] }
 0x120   :  { %v2125_v36 = vor.u32 %v2815_v0, %v2122_v30  ;;  %v2827_v62 = vld [vmem:[%s4075_s0 + $0xf4] sm:$0xf] }
 0x121   :  { %1798 = vmatmul.bf16.vlgmr.msrb.gmra.mxu1 %v2065_v8  ;;  %1842 = vmatmul.bf16.vlgmr.msrb.gmra.mxu2 %v2069_v9  ;;  %v3817_v19 = vadd.f32 %v1606_v58, %v1563_v13  ;;  %v2181_v13 = vor.u32 %v2835_v52, %v2180_v6  ;;  %v2284_v52 = vld [vmem:[%s4075_s0 + $0x1d0] sm:$0xf] }
 0x122   :  { %1886 = vmatmul.bf16.vlgmr.msrb.gmra.mxu3 %v2073_v4  ;;  %v1609_v16 = vpop.f32.mrf.mxu0  ;;  %v2834_v4 = vld [vmem:[%s4075_s0 + $0x128] sm:$0xf0] }
 0x123   :  { %v2173_v10 = vor.u32 %v2834_v4, %v2172_v1  ;;  %v2276_v4 = vld [vmem:[%s4075_s0 + $0x1c8] sm:$0xf] }
 0x124   :  { %v1521_v22 = vpop.f32.mrf.mxu2 }
 0x125   :  { %v1565_v21 = vpop.f32.mrf.mxu3  ;;  %2790 = vmatmul.msk.bf16.vlgmr.msrb.gmra.mxu0 %vm1372_vm0, %v2077_v12  ;;  %v1522_v26 = vadd.f32 %v1521_v22, %v1478_v15 }
 0x126   :  { %v1479_v27 = vpop.f32.mrf.mxu1 }
 0x127   :  { %v1566_v29 = vadd.f32 %v1565_v21, %v1522_v26  ;;  %v1480_v17 = vadd.f32 %v1479_v27, %v3531_v18  ;;  %v2114_v18 = vld [vmem:[%s4075_s0 + $0xbc] sm:$0xf0] }
 0x128   :  { %v2117_v41 = vor.u32 %v2814_v32, %v2114_v18  ;;  %v2226_v32 = vld [vmem:[%s4075_s0 + $0x194] sm:$0xf0] }
 0x129   :  { %v3830_v11 = vadd.f32 %v1609_v16, %v1566_v29 }
 0x12a   :  { %v1611_v60 = vpop.f32.mrf.mxu0 }
 0x12c   :  { %v1523_v40 = vpop.f32.mrf.mxu2 }
 0x12d   :  { %v1567_v33 = vpop.f32.mrf.mxu3  ;;  %v1524_v25 = vadd.f32 %v1523_v40, %v1480_v17  ;;  %v2848_v40 = vld [vmem:[%s4075_s0 + $0x198] sm:$0xf0] }
 0x12e   :  { %v1623_v14 = vpop.f32.mrf.mxu1 }
 0x12f   :  { %v1568_v46 = vadd.f32 %v1567_v33, %v1524_v25  ;;  %v1624_v47 = vadd.f32 %v1623_v14, %v3607_v2  ;;  %v2828_v2 = vld [vmem:[%s4075_s0 + $0xfc] sm:$0xf] }
 0x130   :  { %v2177_v5 = vor.u32 %v2828_v2, %v2174_v57  ;;  %v2840_v33 = vld [vmem:[%s4075_s0 + $0x15c] sm:$0xf] }
 0x131   :  { %1803 = vmatmul.bf16.gmra.mxu1 %v2117_v41  ;;  %1847 = vmatmul.bf16.gmra.mxu2 %v2121_v44  ;;  %v3848_v50 = vadd.f32 %v1611_v60, %v1568_v46  ;;  %v2233_v46 = vor.u32 %v2848_v40, %v2232_v38  ;;  %v2336_v40 = vld [vmem:[%s4075_s0 + $0x238] sm:$0xf] }
 0x132   :  { %1891 = vmatmul.bf16.gmra.mxu3 %v2125_v36  ;;  %v1755_v49 = vpop.f32.mrf.mxu0  ;;  %v2847_v36 = vld [vmem:[%s4075_s0 + $0x190] sm:$0xf0] }
 0x133   :  { %v2225_v14 = vor.u32 %v2847_v36, %v2224_v35  ;;  %v2328_v36 = vld [vmem:[%s4075_s0 + $0x230] sm:$0xf] }
 0x134   :  { %v1667_v53 = vpop.f32.mrf.mxu2 }
 0x135   :  { %v1711_v51 = vpop.f32.mrf.mxu3  ;;  %2791 = vmatmul.msk.bf16.gmra.mxu0 %vm1372_vm0, %v2129_v45  ;;  %v1668_v54 = vadd.f32 %v1667_v53, %v1624_v47 }
 0x136   :  { %v1625_v55 = vpop.f32.mrf.mxu1 }
 0x137   :  { %v1712_v58 = vadd.f32 %v1711_v51, %v1668_v54  ;;  %v1626_v24 = vadd.f32 %v1625_v55, %v3629_v28  ;;  %v2166_v28 = vld [vmem:[%s4075_s0 + $0x124] sm:$0xf0] }
 0x138   :  { %v2169_v9 = vor.u32 %v2827_v62, %v2166_v28  ;;  %v2278_v62 = vld [vmem:[%s4075_s0 + $0x1fc] sm:$0xf0] }
 0x139   :  { %v3861_v39 = vadd.f32 %v1755_v49, %v1712_v58 }
 0x13a   :  { %v1757_v23 = vpop.f32.mrf.mxu0 }
 0x13c   :  { %v1669_v7 = vpop.f32.mrf.mxu2 }
 0x13d   :  { %v1713_v63 = vpop.f32.mrf.mxu3  ;;  %v1670_v8 = vadd.f32 %v1669_v7, %v1626_v24  ;;  %v2861_v7 = vld [vmem:[%s4075_s0 + $0x200] sm:$0xf0] }
 0x13e   :  { %v1628_v12 = vpop.f32.mrf.mxu1 }
 0x13f   :  { %v1714_v15 = vadd.f32 %v1713_v63, %v1670_v8  ;;  %v1629_v16 = vadd.f32 %v1628_v12, %v3654_v43  ;;  %v2841_v43 = vld [vmem:[%s4075_s0 + $0x164] sm:$0xf] }
 0x140   :  { %v2229_v37 = vor.u32 %v2841_v43, %v2226_v32  ;;  %v2853_v63 = vld [vmem:[%s4075_s0 + $0x1c4] sm:$0xf] }
 0x141   :  { %1808 = vmatmul.bf16.gmra.mxu1 %v2169_v9  ;;  %1852 = vmatmul.bf16.gmra.mxu2 %v2173_v10  ;;  %v3879_v22 = vadd.f32 %v1757_v23, %v1714_v15  ;;  %v2285_v15 = vor.u32 %v2861_v7, %v2284_v52  ;;  %v2388_v7 = vld [vmem:[%s4075_s0 + $0x2a0] sm:$0xf] }
 0x142   :  { %1896 = vmatmul.bf16.gmra.mxu3 %v2177_v5  ;;  %v1760_v21 = vpop.f32.mrf.mxu0  ;;  %v2860_v5 = vld [vmem:[%s4075_s0 + $0x1f8] sm:$0xf0] }
 0x143   :  { %v2277_v12 = vor.u32 %v2860_v5, %v2276_v4  ;;  %v2380_v5 = vld [vmem:[%s4075_s0 + $0x298] sm:$0xf] }
 0x144   :  { %v1672_v27 = vpop.f32.mrf.mxu2 }
 0x145   :  { %v1716_v26 = vpop.f32.mrf.mxu3  ;;  %2792 = vmatmul.msk.bf16.gmra.mxu0 %vm1372_vm0, %v2181_v13  ;;  %v1673_v29 = vadd.f32 %v1672_v27, %v1629_v16 }
 0x146   :  { %v1630_v17 = vpop.f32.mrf.mxu1 }
 0x147   :  { %v1717_v60 = vadd.f32 %v1716_v26, %v1673_v29  ;;  %v1631_v0 = vadd.f32 %v1630_v17, %v3673_v3  ;;  %v2218_v3 = vld [vmem:[%s4075_s0 + $0x18c] sm:$0xf0] }
 0x148   :  { %v2221_v44 = vor.u32 %v2840_v33, %v2218_v3  ;;  %v2330_v33 = vld [vmem:[%s4075_s0 + $0x264] sm:$0xf0] }
 0x149   :  { %v3892_v18 = vadd.f32 %v1760_v21, %v1717_v60 }
 0x14a   :  { %v1762_v30 = vpop.f32.mrf.mxu0 }
 0x14c   :  { %v1674_v25 = vpop.f32.mrf.mxu2 }
 0x14d   :  { %v1718_v34 = vpop.f32.mrf.mxu3  ;;  %v1675_v41 = vadd.f32 %v1674_v25, %v1631_v0  ;;  %v2874_v25 = vld [vmem:[%s4075_s0 + $0x268] sm:$0xf0] }
 0x14e   :  { %v1633_v45 = vpop.f32.mrf.mxu1 }
 0x14f   :  { %v1719_v47 = vadd.f32 %v1718_v34, %v1675_v41  ;;  %v1634_v49 = vadd.f32 %v1633_v45, %v3695_v20  ;;  %v2854_v20 = vld [vmem:[%s4075_s0 + $0x1cc] sm:$0xf] }
 0x150   :  { %v2281_v6 = vor.u32 %v2854_v20, %v2278_v62  ;;  %v2866_v34 = vld [vmem:[%s4075_s0 + $0x22c] sm:$0xf] }
 0x151   :  { %1813 = vmatmul.bf16.gmra.mxu1 %v2221_v44  ;;  %1857 = vmatmul.bf16.gmra.mxu2 %v2225_v14  ;;  %v3910_v53 = vadd.f32 %v1762_v30, %v1719_v47  ;;  %v2337_v47 = vor.u32 %v2874_v25, %v2336_v40 }
 0x152   :  { %1901 = vmatmul.bf16.gmra.mxu3 %v2229_v37  ;;  %v1765_v51 = vpop.f32.mrf.mxu0  ;;  %v2873_v37 = vld [vmem:[%s4075_s0 + $0x260] sm:$0xf0] }
 0x153   :  { %v2329_v45 = vor.u32 %v2873_v37, %v2328_v36 }
 0x154   :  { %v1677_v55 = vpop.f32.mrf.mxu2 }
 0x155   :  { %v1721_v54 = vpop.f32.mrf.mxu3  ;;  %2793 = vmatmul.msk.bf16.gmra.mxu0 %vm1372_vm0, %v2233_v46  ;;  %v1678_v58 = vadd.f32 %v1677_v55, %v1634_v49 }
 0x156   :  { %v1635_v24 = vpop.f32.mrf.mxu1 }
 0x157   :  { %v1722_v23 = vadd.f32 %v1721_v54, %v1678_v58  ;;  %v1636_v2 = vadd.f32 %v1635_v24, %v3717_v42  ;;  %v2270_v42 = vld [vmem:[%s4075_s0 + $0x1f4] sm:$0xf0] }
 0x158   :  { %v2273_v10 = vor.u32 %v2853_v63, %v2270_v42  ;;  %v2382_v63 = vld [vmem:[%s4075_s0 + $0x2cc] sm:$0xf0] }
 0x159   :  { %v3923_v28 = vadd.f32 %v1765_v51, %v1722_v23 }
 0x15a   :  { %v1767_v57 = vpop.f32.mrf.mxu0 }
 0x15c   :  { %v1679_v8 = vpop.f32.mrf.mxu2 }
 0x15d   :  { %v1723_v1 = vpop.f32.mrf.mxu3  ;;  %v1680_v9 = vadd.f32 %v1679_v8, %v1636_v2  ;;  %v2887_v8 = vld [vmem:[%s4075_s0 + $0x2d0] sm:$0xf0] }
 0x15e   :  { %v1638_v13 = vpop.f32.mrf.mxu1 }
 0x15f   :  { %v1724_v16 = vadd.f32 %v1723_v1, %v1680_v9  ;;  %v1639_v21 = vadd.f32 %v1638_v13, %v3739_v56  ;;  %v2867_v56 = vld [vmem:[%s4075_s0 + $0x234] sm:$0xf] }
 0x160   :  { %v2333_v38 = vor.u32 %v2867_v56, %v2330_v33  ;;  %v2879_v1 = vld [vmem:[%s4075_s0 + $0x294] sm:$0xf] }
 0x161   :  { %1818 = vmatmul.bf16.gmra.mxu1 %v2273_v10  ;;  %1862 = vmatmul.bf16.gmra.mxu2 %v2277_v12  ;;  %v3941_v27 = vadd.f32 %v1767_v57, %v1724_v16  ;;  %v2389_v16 = vor.u32 %v2887_v8, %v2388_v7 }
 0x162   :  { %1906 = vmatmul.bf16.gmra.mxu3 %v2281_v6  ;;  %v1770_v26 = vpop.f32.mrf.mxu0  ;;  %v2886_v6 = vld [vmem:[%s4075_s0 + $0x2c8] sm:$0xf0] }
 0x163   :  { %v2381_v13 = vor.u32 %v2886_v6, %v2380_v5 }
 0x164   :  { %v1682_v17 = vpop.f32.mrf.mxu2 }
 0x165   :  { %v1726_v29 = vpop.f32.mrf.mxu3  ;;  %2794 = vmatmul.msk.bf16.gmra.mxu0 %vm1372_vm0, %v2285_v15  ;;  %v1683_v60 = vadd.f32 %v1682_v17, %v1639_v21 }
 0x166   :  { %v1640_v0 = vpop.f32.mrf.mxu1 }
 0x167   :  { %v1727_v30 = vadd.f32 %v1726_v29, %v1683_v60  ;;  %v1641_v43 = vadd.f32 %v1640_v0, %v3757_v61  ;;  %v2322_v61 = vld [vmem:[%s4075_s0 + $0x25c] sm:$0xf0] }
 0x168   :  { %v2325_v14 = vor.u32 %v2866_v34, %v2322_v61 }
 0x169   :  { %v3954_v3 = vadd.f32 %v1770_v26, %v1727_v30 }
 0x16a   :  { %v1772_v32 = vpop.f32.mrf.mxu0 }
 0x16c   :  { %v1684_v41 = vpop.f32.mrf.mxu2 }
 0x16d   :  { %v1728_v35 = vpop.f32.mrf.mxu3  ;;  %v1685_v44 = vadd.f32 %v1684_v41, %v1641_v43 }
 0x16e   :  { %v1643_v46 = vpop.f32.mrf.mxu1 }
 0x16f   :  { %v1729_v49 = vadd.f32 %v1728_v35, %v1685_v44  ;;  %v1644_v51 = vadd.f32 %v1643_v46, %v3769_v31  ;;  %v2880_v31 = vld [vmem:[%s4075_s0 + $0x29c] sm:$0xf] }
 0x170   :  { %v2385_v52 = vor.u32 %v2880_v31, %v2382_v63 }
 0x171   :  { %1823 = vmatmul.bf16.gmra.mxu1 %v2325_v14  ;;  %1867 = vmatmul.bf16.gmra.mxu2 %v2329_v45  ;;  %v3972_v55 = vadd.f32 %v1772_v32, %v1729_v49 }
 0x172   :  { %1911 = vmatmul.bf16.gmra.mxu3 %v2333_v38  ;;  %v1775_v54 = vpop.f32.mrf.mxu0 }
 0x174   :  { %v1687_v24 = vpop.f32.mrf.mxu2 }
 0x175   :  { %v1731_v58 = vpop.f32.mrf.mxu3  ;;  %2795 = vmatmul.msk.bf16.gmra.mxu0 %vm1372_vm0, %v2337_v47  ;;  %v1688_v23 = vadd.f32 %v1687_v24, %v1644_v51 }
 0x176   :  { %v1645_v2 = vpop.f32.mrf.mxu1 }
 0x177   :  { %v1732_v57 = vadd.f32 %v1731_v58, %v1688_v23  ;;  %v1646_v20 = vadd.f32 %v1645_v2, %v3787_v48  ;;  %v2374_v48 = vld [vmem:[%s4075_s0 + $0x2c4] sm:$0xf0] }
 0x178   :  { %v2377_v12 = vor.u32 %v2879_v1, %v2374_v48 }
 0x179   :  { %v3985_v42 = vadd.f32 %v1775_v54, %v1732_v57 }
 0x17a   :  { %v1777_v62 = vpop.f32.mrf.mxu0 }
 0x17c   :  { %v1689_v9 = vpop.f32.mrf.mxu2 }
 0x17d   :  { %v1733_v4 = vpop.f32.mrf.mxu3  ;;  %v1690_v10 = vadd.f32 %v1689_v9, %v1646_v20 }
 0x17e   :  { %v1648_v15 = vpop.f32.mrf.mxu1 }
 0x17f   :  { %v1734_v21 = vadd.f32 %v1733_v4, %v1690_v10  ;;  %v1649_v26 = vadd.f32 %v1648_v15, %v3799_v59 }
 0x181   :  { %1828 = vmatmul.bf16.gmra.mxu1 %v2377_v12  ;;  %1872 = vmatmul.bf16.gmra.mxu2 %v2381_v13  ;;  %v4003_v17 = vadd.f32 %v1777_v62, %v1734_v21 }
 0x182   :  { %1916 = vmatmul.bf16.gmra.mxu3 %v2385_v52  ;;  %v1780_v29 = vpop.f32.mrf.mxu0 }
 0x184   :  { %v1692_v0 = vpop.f32.mrf.mxu2 }
 0x185   :  { %v1736_v60 = vpop.f32.mrf.mxu3  ;;  %2796 = vmatmul.msk.bf16.gmra.mxu0 %vm1372_vm0, %v2389_v16  ;;  %v1693_v30 = vadd.f32 %v1692_v0, %v1649_v26 }
 0x186   :  { %v1650_v43 = vpop.f32.mrf.mxu1 }
 0x187   :  { %v1737_v32 = vadd.f32 %v1736_v60, %v1693_v30  ;;  %v1651_v56 = vadd.f32 %v1650_v43, %v3817_v19 }
 0x189   :  { %v4007_v34 = vadd.f32 %v1780_v29, %v1737_v32 }
 0x18a   :  { %v1782_v33 = vpop.f32.mrf.mxu0 }
 0x18c   :  { %v1694_v59 = vpop.f32.mrf.mxu2 }
 0x18d   :  { %v1738_v35 = vpop.f32.mrf.mxu3  ;;  %v1695_v61 = vadd.f32 %v1694_v59, %v1651_v56 }
 0x18e   :  { %v1653_v36 = vpop.f32.mrf.mxu1 }
 0x18f   :  { %v1739_v37 = vadd.f32 %v1738_v35, %v1695_v61  ;;  %v1654_v38 = vadd.f32 %v1653_v36, %v3830_v11 }
 0x191   :  { %v4010_v25 = vadd.f32 %v1782_v33, %v1739_v37 }
 0x192   :  { %v1785_v40 = vpop.f32.mrf.mxu0 }
 0x194   :  { %v1697_v44 = vpop.f32.mrf.mxu2 }
 0x195   :  { %v1741_v41 = vpop.f32.mrf.mxu3  ;;  %v1698_v14 = vadd.f32 %v1697_v44, %v1654_v38 }
 0x196   :  { %v1655_v45 = vpop.f32.mrf.mxu1 }
 0x197   :  { %v1742_v46 = vadd.f32 %v1741_v41, %v1698_v14  ;;  %v1656_v19 = vadd.f32 %v1655_v45, %v3848_v50 }
 0x199   :  { %v4013_v49 = vadd.f32 %v1785_v40, %v1742_v46 }
 0x19a   :  { %v1787_v47 = vpop.f32.mrf.mxu0 }
 0x19c   :  { %v1699_v54 = vpop.f32.mrf.mxu2 }
 0x19d   :  { %v1743_v51 = vpop.f32.mrf.mxu3  ;;  %v1700_v58 = vadd.f32 %v1699_v54, %v1656_v19 }
 0x19e   :  { %v1799_v24 = vpop.f32.mrf.mxu1 }
 0x19f   :  { %v1744_v23 = vadd.f32 %v1743_v51, %v1700_v58  ;;  %v1800_v20 = vadd.f32 %v1799_v24, %v3861_v39 }
 0x1a1   :  { %v4015_v11 = vadd.f32 %v1787_v47, %v1744_v23 }
 0x1a2   :  { %v1931_v2 = vpop.f32.mrf.mxu0 }
 0x1a4   :  { %v1843_v62 = vpop.f32.mrf.mxu2 }
 0x1a5   :  { %v1887_v57 = vpop.f32.mrf.mxu3  ;;  %v1844_v31 = vadd.f32 %v1843_v62, %v1800_v20 }
 0x1a6   :  { %v1801_v63 = vpop.f32.mrf.mxu1 }
 0x1a7   :  { %v1888_v1 = vadd.f32 %v1887_v57, %v1844_v31  ;;  %v1802_v6 = vadd.f32 %v1801_v63, %v3879_v22 }
 0x1a9   :  { %v1932_v50 = vadd.f32 %v1931_v2, %v1888_v1 }
 0x1aa   :  { %v1933_v4 = vpop.f32.mrf.mxu0 }
 0x1ab   :  { %vm1966_vm1 = vcmp.gt.f32.partialorder %v1932_v50, 0.0  ;;  %v1980_v5 = vmul.f32 0.2, %v1932_v50 }
 0x1ac   :  { %v1845_v52 = vpop.f32.mrf.mxu2 }
 0x1ad   :  { %v1889_v48 = vpop.f32.mrf.mxu3  ;;  %v1994_v7 = vsel %vm1966_vm1, %v1932_v50, %v1980_v5  ;;  %v1846_v8 = vadd.f32 %v1845_v52, %v1802_v6 }
 0x1ae   :  { %2008 = vst [vmem:[%s4076_s3] sm:$0xff] %v1994_v7  ;;  %v1804_v9 = vpop.f32.mrf.mxu1 }
 0x1af   :  { %v1890_v39 = vadd.f32 %v1889_v48, %v1846_v8  ;;  %v1805_v16 = vadd.f32 %v1804_v9, %v3892_v18 }
 0x1b1   :  { %v1934_v12 = vadd.f32 %v1933_v4, %v1890_v39 }
 0x1b2   :  { %v1936_v10 = vpop.f32.mrf.mxu0 }
 0x1b3   :  { %vm1967_vm2 = vcmp.gt.f32.partialorder %v1934_v12, 0.0  ;;  %v1981_v15 = vmul.f32 0.2, %v1934_v12 }
 0x1b4   :  { %v1848_v21 = vpop.f32.mrf.mxu2 }
 0x1b5   :  { %v1892_v13 = vpop.f32.mrf.mxu3  ;;  %v1995_v26 = vsel %vm1967_vm2, %v1934_v12, %v1981_v15  ;;  %v1849_v29 = vadd.f32 %v1848_v21, %v1805_v16 }
 0x1b6   :  { %2009 = vst [vmem:[%s4076_s3 + $0x8] sm:$0xff] %v1995_v26  ;;  %v1806_v22 = vpop.f32.mrf.mxu1 }
 0x1b7   :  { %v1893_v60 = vadd.f32 %v1892_v13, %v1849_v29  ;;  %v1807_v56 = vadd.f32 %v1806_v22, %v3910_v53 }
 0x1b9   :  { %v1937_v30 = vadd.f32 %v1936_v10, %v1893_v60 }
 0x1ba   :  { %v1938_v0 = vpop.f32.mrf.mxu0 }
 0x1bb   :  { %vm1968_vm3 = vcmp.gt.f32.partialorder %v1937_v30, 0.0  ;;  %v1982_v32 = vmul.f32 0.2, %v1937_v30 }
 0x1bc   :  { %v1850_v33 = vpop.f32.mrf.mxu2 }
 0x1bd   :  { %v1894_v43 = vpop.f32.mrf.mxu3  ;;  %v1996_v35 = vsel %vm1968_vm3, %v1937_v30, %v1982_v32  ;;  %v1851_v59 = vadd.f32 %v1850_v33, %v1807_v56 }
 0x1be   :  { %2010 = vst [vmem:[%s4076_s3 + $0x10] sm:$0xff] %v1996_v35  ;;  %v1809_v18 = vpop.f32.mrf.mxu1 }
 0x1bf   :  { %v1895_v61 = vadd.f32 %v1894_v43, %v1851_v59  ;;  %v1810_v41 = vadd.f32 %v1809_v18, %v3923_v28 }
 0x1c1   :  { %v1939_v37 = vadd.f32 %v1938_v0, %v1895_v61 }
 0x1c2   :  { %v1941_v36 = vpop.f32.mrf.mxu0 }
 0x1c3   :  { %vm1969_vm4 = vcmp.gt.f32.partialorder %v1939_v37, 0.0  ;;  %v1983_v40 = vmul.f32 0.2, %v1939_v37 }
 0x1c4   :  { %v1853_v44 = vpop.f32.mrf.mxu2 }
 0x1c5   :  { %v1897_v38 = vpop.f32.mrf.mxu3  ;;  %v1997_v14 = vsel %vm1969_vm4, %v1939_v37, %v1983_v40  ;;  %v1854_v45 = vadd.f32 %v1853_v44, %v1810_v41 }
 0x1c6   :  { %2011 = vst [vmem:[%s4076_s3 + $0x18] sm:$0xff] %v1997_v14  ;;  %v1811_v53 = vpop.f32.mrf.mxu1 }
 0x1c7   :  { %v1898_v46 = vadd.f32 %v1897_v38, %v1854_v45  ;;  %v1812_v58 = vadd.f32 %v1811_v53, %v3941_v27 }
 0x1c9   :  { %v1942_v47 = vadd.f32 %v1941_v36, %v1898_v46 }
 0x1ca   :  { %v1943_v19 = vpop.f32.mrf.mxu0 }
 0x1cb   :  { %vm1970_vm5 = vcmp.gt.f32.partialorder %v1942_v47, 0.0  ;;  %v1984_v54 = vmul.f32 0.2, %v1942_v47 }
 0x1cc   :  { %v1855_v24 = vpop.f32.mrf.mxu2 }
 0x1cd   :  { %v1899_v51 = vpop.f32.mrf.mxu3  ;;  %v1998_v23 = vsel %vm1970_vm5, %v1942_v47, %v1984_v54  ;;  %v1856_v2 = vadd.f32 %v1855_v24, %v1812_v58 }
 0x1ce   :  { %2012 = vst [vmem:[%s4076_s3 + $0x20] sm:$0xff] %v1998_v23  ;;  %v1814_v28 = vpop.f32.mrf.mxu1 }
 0x1cf   :  { %v1900_v57 = vadd.f32 %v1899_v51, %v1856_v2  ;;  %v1815_v1 = vadd.f32 %v1814_v28, %v3954_v3 }
 0x1d1   :  { %v1944_v62 = vadd.f32 %v1943_v19, %v1900_v57 }
 0x1d2   :  { %v1946_v20 = vpop.f32.mrf.mxu0 }
 0x1d3   :  { %vm1971_vm6 = vcmp.gt.f32.partialorder %v1944_v62, 0.0  ;;  %v1985_v63 = vmul.f32 0.2, %v1944_v62 }
 0x1d4   :  { %v1858_v4 = vpop.f32.mrf.mxu2 }
 0x1d5   :  { %v1902_v31 = vpop.f32.mrf.mxu3  ;;  %v1999_v50 = vsel %vm1971_vm6, %v1944_v62, %v1985_v63  ;;  %v1859_v48 = vadd.f32 %v1858_v4, %v1815_v1 }
 0x1d6   :  { %2013 = vst [vmem:[%s4076_s3 + $0x28] sm:$0xff] %v1999_v50  ;;  %v1816_v27 = vpop.f32.mrf.mxu1 }
 0x1d7   :  { %v1903_v5 = vadd.f32 %v1902_v31, %v1859_v48  ;;  %v1817_v9 = vadd.f32 %v1816_v27, %v3972_v55 }
 0x1d9   :  { %v1947_v52 = vadd.f32 %v1946_v20, %v1903_v5 }
 0x1da   :  { %v1948_v6 = vpop.f32.mrf.mxu0 }
 0x1db   :  { %vm1972_vm7 = vcmp.gt.f32.partialorder %v1947_v52, 0.0  ;;  %v1986_v8 = vmul.f32 0.2, %v1947_v52 }
 0x1dc   :  { %v1860_v39 = vpop.f32.mrf.mxu2 }
 0x1dd   :  { %v1904_v7 = vpop.f32.mrf.mxu3  ;;  %v2000_v10 = vsel %vm1972_vm7, %v1947_v52, %v1986_v8  ;;  %v1861_v12 = vadd.f32 %v1860_v39, %v1817_v9 }
 0x1de   :  { %2014 = vst [vmem:[%s4076_s3 + $0x30] sm:$0xff] %v2000_v10  ;;  %v1819_v3 = vpop.f32.mrf.mxu1 }
 0x1df   :  { %v1905_v13 = vadd.f32 %v1904_v7, %v1861_v12  ;;  %v1820_v29 = vadd.f32 %v1819_v3, %v3985_v42 }
 0x1e1   :  { %v1949_v16 = vadd.f32 %v1948_v6, %v1905_v13 }
 0x1e2   :  { %v1951_v15 = vpop.f32.mrf.mxu0 }
 0x1e3   :  { %vm1973_vm8 = vcmp.gt.f32.partialorder %v1949_v16, 0.0  ;;  %v1987_v26 = vmul.f32 0.2, %v1949_v16 }
 0x1e4   :  { %v1863_v22 = vpop.f32.mrf.mxu2 }
 0x1e5   :  { %v1907_v21 = vpop.f32.mrf.mxu3  ;;  %v2001_v60 = vsel %vm1973_vm8, %v1949_v16, %v1987_v26  ;;  %v1864_v0 = vadd.f32 %v1863_v22, %v1820_v29 }
 0x1e6   :  { %2015 = vst [vmem:[%s4076_s3 + $0x38] sm:$0xff] %v2001_v60  ;;  %v1821_v55 = vpop.f32.mrf.mxu1 }
 0x1e7   :  { %v1908_v30 = vadd.f32 %v1907_v21, %v1864_v0  ;;  %v1822_v35 = vadd.f32 %v1821_v55, %v4003_v17 }
 0x1e9   :  { %v1952_v32 = vadd.f32 %v1951_v15, %v1908_v30 }
 0x1ea   :  { %v1953_v43 = vpop.f32.mrf.mxu0 }
 0x1eb   :  { %vm1974_vm9 = vcmp.gt.f32.partialorder %v1952_v32, 0.0  ;;  %v1988_v33 = vmul.f32 0.2, %v1952_v32 }
 0x1ec   :  { %v1865_v59 = vpop.f32.mrf.mxu2 }
 0x1ed   :  { %v1909_v56 = vpop.f32.mrf.mxu3  ;;  %v2002_v18 = vsel %vm1974_vm9, %v1952_v32, %v1988_v33  ;;  %v1866_v61 = vadd.f32 %v1865_v59, %v1822_v35 }
 0x1ee   :  { %2016 = vst [vmem:[%s4076_s3 + $0x40] sm:$0xff] %v2002_v18  ;;  %v1824_v42 = vpop.f32.mrf.mxu1 }
 0x1ef   :  { %v1910_v36 = vadd.f32 %v1909_v56, %v1866_v61  ;;  %v1825_v44 = vadd.f32 %v1824_v42, %v4007_v34 }
 0x1f1   :  { %v1954_v37 = vadd.f32 %v1953_v43, %v1910_v36 }
 0x1f2   :  { %v1956_v38 = vpop.f32.mrf.mxu0 }
 0x1f3   :  { %vm1975_vm10 = vcmp.gt.f32.partialorder %v1954_v37, 0.0  ;;  %v1989_v41 = vmul.f32 0.2, %v1954_v37 }
 0x1f4   :  { %v1868_v14 = vpop.f32.mrf.mxu2 }
 0x1f5   :  { %v1912_v40 = vpop.f32.mrf.mxu3  ;;  %v2003_v45 = vsel %vm1975_vm10, %v1954_v37, %v1989_v41  ;;  %v1869_v53 = vadd.f32 %v1868_v14, %v1825_v44 }
 0x1f6   :  { %2017 = vst [vmem:[%s4076_s3 + $0x48] sm:$0xff] %v2003_v45  ;;  %v1826_v17 = vpop.f32.mrf.mxu1 }
 0x1f7   :  { %v1913_v46 = vadd.f32 %v1912_v40, %v1869_v53  ;;  %v1827_v54 = vadd.f32 %v1826_v17, %v4010_v25 }
 0x1f9   :  { %v1957_v19 = vadd.f32 %v1956_v38, %v1913_v46 }
 0x1fa   :  { %v1958_v58 = vpop.f32.mrf.mxu0 }
 0x1fb   :  { %vm1976_vm11 = vcmp.gt.f32.partialorder %v1957_v19, 0.0  ;;  %v1990_v51 = vmul.f32 0.2, %v1957_v19 }
 0x1fc   :  { %v1870_v24 = vpop.f32.mrf.mxu2 }
 0x1fd   :  { %v1914_v47 = vpop.f32.mrf.mxu3  ;;  %v2004_v23 = vsel %vm1976_vm11, %v1957_v19, %v1990_v51  ;;  %v1871_v2 = vadd.f32 %v1870_v24, %v1827_v54 }
 0x1fe   :  { %2018 = vst [vmem:[%s4076_s3 + $0x50] sm:$0xff] %v2004_v23  ;;  %v1829_v34 = vpop.f32.mrf.mxu1 }
 0x1ff   :  { %v1915_v28 = vadd.f32 %v1914_v47, %v1871_v2  ;;  %v1830_v62 = vadd.f32 %v1829_v34, %v4013_v49 }
 0x201   :  { %v1959_v57 = vadd.f32 %v1958_v58, %v1915_v28 }
 0x202   :  { %v1961_v25 = vpop.f32.mrf.mxu0 }
 0x203   :  { %vm1977_vm12 = vcmp.gt.f32.partialorder %v1959_v57, 0.0  ;;  %v1991_v20 = vmul.f32 0.2, %v1959_v57 }
 0x204   :  { %v1873_v63 = vpop.f32.mrf.mxu2 }
 0x205   :  { %v1917_v31 = vpop.f32.mrf.mxu3  ;;  %v2005_v1 = vsel %vm1977_vm12, %v1959_v57, %v1991_v20  ;;  %v1874_v4 = vadd.f32 %v1873_v63, %v1830_v62 }
 0x206   :  { %2019 = vst [vmem:[%s4076_s3 + $0x58] sm:$0xff] %v2005_v1  ;;  %v1831_v48 = vpop.f32.mrf.mxu1 }
 0x207   :  { %v1918_v50 = vadd.f32 %v1917_v31, %v1874_v4  ;;  %v1832_v6 = vadd.f32 %v1831_v48, %v4015_v11 }
 0x209   :  { %v1962_v27 = vadd.f32 %v1961_v25, %v1918_v50 }
 0x20a   :  { %v1963_v39 = vpop.f32.mrf.mxu0 }
 0x20b   :  { %vm1978_vm13 = vcmp.gt.f32.partialorder %v1962_v27, 0.0  ;;  %v1992_v5 = vmul.f32 0.2, %v1962_v27 }
 0x20c   :  { %v1875_v52 = vpop.f32.mrf.mxu2 }
 0x20d   :  { %v2006_v7 = vsel %vm1978_vm13, %v1962_v27, %v1992_v5  ;;  %v1876_v8 = vadd.f32 %v1875_v52, %v1832_v6  ;;  %v1919_v49 = vpop.f32.mrf.mxu3 }
 0x20e   :  { %2020 = vst [vmem:[%s4076_s3 + $0x60] sm:$0xff] %v2006_v7 }
 0x20f   :  { %v1920_v9 = vadd.f32 %v1919_v49, %v1876_v8 }
 0x211   :  { %v1964_v10 = vadd.f32 %v1963_v39, %v1920_v9 }
 0x213   :  { %vm1979_vm14 = vcmp.gt.f32.partialorder %v1964_v10, 0.0  ;;  %v1993_v12 = vmul.f32 0.2, %v1964_v10 }
 0x215   :  { %v2007_v3 = vsel %vm1979_vm14, %v1964_v10, %v1993_v12 }
 0x216   :  { %2021 = vst [vmem:[%s4076_s3 + $0x68] sm:$0xff] %v2007_v3 }

// kernel: wassnet_forward.6
= control target key start
LH: loop header
LB: loop body
LE: loop exit
PB: predicated region body
PF: predicated region fallthrough
CT: control target
= control target key end

     0   :  { %s9098_s1 = inlined_call_operand.vmem [shape: bf16[3200,256], index: 1, kind: input, shape index: {}]   ;;  %s9099_s0 = inlined_call_operand.vmem [shape: bf16[32,3200], index: 0, kind: input, shape index: {}]   ;;  %s9100_s2 = inlined_call_operand.vmem [shape: f32[1,256], index: 2, kind: input, shape index: {}]   ;;  %s9101_s3 = inlined_call_operand.vmem [shape: f32[32,256], index: 3, kind: output, shape index: {}]  }
   0x1   :  { %v3968_v0 = vld [vmem:[%s9098_s1 + $0x70] sm:$0xf]  ;;  %v5575_v1 = vld [vmem:[%s9098_s1 + $0x74] sm:$0xf0]  ;;  %v3960_v11 = vld [vmem:[%s9098_s1 + $0x60] sm:$0xf] }
   0x2   :  { %v4032_v2 = vld [vmem:[%s9098_s1 + $0xf0] sm:$0xf]  ;;  %v3969_v3 = vor.u32 %v5575_v1, %v3968_v0  ;;  %v5591_v4 = vld [vmem:[%s9098_s1 + $0xf4] sm:$0xf0]  ;;  %v5573_v13 = vld [vmem:[%s9098_s1 + $0x64] sm:$0xf0] }
   0x3   :  { %v4096_v5 = vld [vmem:[%s9098_s1 + $0x170] sm:$0xf]  ;;  %v5607_v6 = vld [vmem:[%s9098_s1 + $0x174] sm:$0xf0]  ;;  %v4033_v7 = vor.u32 %v5591_v4, %v4032_v2  ;;  %v4024_v14 = vld [vmem:[%s9098_s1 + $0xe0] sm:$0xf]  ;;  %v3961_v16 = vor.u32 %v5573_v13, %v3960_v11 }
   0x4   :  { %v4097_v8 = vor.u32 %v5607_v6, %v4096_v5  ;;  %v4160_v9 = vld [vmem:[%s9098_s1 + $0x1f0] sm:$0xf]  ;;  %v5623_v10 = vld [vmem:[%s9098_s1 + $0x1f4] sm:$0xf0]  ;;  %2724 = vmatpush.bf16.msra.mxu0 %v3969_v3  ;;  %v5589_v15 = vld [vmem:[%s9098_s1 + $0xe4] sm:$0xf0] }
   0x5   :  { %v4161_v12 = vor.u32 %v5623_v10, %v4160_v9  ;;  %2743 = vmatpush.bf16.msra.mxu1 %v4033_v7  ;;  %v4025_v17 = vor.u32 %v5589_v15, %v4024_v14  ;;  %v4088_v18 = vld [vmem:[%s9098_s1 + $0x160] sm:$0xf]  ;;  %v5605_v19 = vld [vmem:[%s9098_s1 + $0x164] sm:$0xf0]  ;;  %v3952_v23 = vld [vmem:[%s9098_s1 + $0x50] sm:$0xf] }
   0x6   :  { %2762 = vmatpush.bf16.msra.mxu2 %v4097_v8  ;;  %v4152_v20 = vld [vmem:[%s9098_s1 + $0x1e0] sm:$0xf]  ;;  %v4089_v21 = vor.u32 %v5605_v19, %v4088_v18  ;;  %v5621_v22 = vld [vmem:[%s9098_s1 + $0x1e4] sm:$0xf0]  ;;  %v5571_v24 = vld [vmem:[%s9098_s1 + $0x54] sm:$0xf0] }
   0x7   :  { %2781 = vmatpush.bf16.msra.mxu3 %v4161_v12  ;;  %v4153_v25 = vor.u32 %v5621_v22, %v4152_v20  ;;  %v4016_v26 = vld [vmem:[%s9098_s1 + $0xd0] sm:$0xf]  ;;  %v5587_v27 = vld [vmem:[%s9098_s1 + $0xd4] sm:$0xf0]  ;;  %v3953_v29 = vor.u32 %v5571_v24, %v3952_v23  ;;  %v3944_v35 = vld [vmem:[%s9098_s1 + $0x40] sm:$0xf] }
   0x8   :  { %v4080_v28 = vld [vmem:[%s9098_s1 + $0x150] sm:$0xf]  ;;  %2725 = vmatpush.bf16.msra.mxu0 %v3961_v16  ;;  %v5603_v30 = vld [vmem:[%s9098_s1 + $0x154] sm:$0xf0]  ;;  %v4017_v33 = vor.u32 %v5587_v27, %v4016_v26  ;;  %v5569_v36 = vld [vmem:[%s9098_s1 + $0x44] sm:$0xf0] }
   0x9   :  { %v4144_v31 = vld [vmem:[%s9098_s1 + $0x1d0] sm:$0xf]  ;;  %v5619_v32 = vld [vmem:[%s9098_s1 + $0x1d4] sm:$0xf0]  ;;  %2744 = vmatpush.bf16.msra.mxu1 %v4025_v17  ;;  %v4081_v34 = vor.u32 %v5603_v30, %v4080_v28  ;;  %v4008_v37 = vld [vmem:[%s9098_s1 + $0xc0] sm:$0xf]  ;;  %v3945_v44 = vor.u32 %v5569_v36, %v3944_v35 }
   0xa   :  { %2763 = vmatpush.bf16.msra.mxu2 %v4089_v21  ;;  %v4145_v38 = vor.u32 %v5619_v32, %v4144_v31  ;;  %v5585_v39 = vld [vmem:[%s9098_s1 + $0xc4] sm:$0xf0]  ;;  %v4072_v40 = vld [vmem:[%s9098_s1 + $0x140] sm:$0xf]  ;;  %v3936_v47 = vld [vmem:[%s9098_s1 + $0x30] sm:$0xf] }
   0xb   :  { %2782 = vmatpush.bf16.msra.mxu3 %v4153_v25  ;;  %v5601_v41 = vld [vmem:[%s9098_s1 + $0x144] sm:$0xf0]  ;;  %v4136_v42 = vld [vmem:[%s9098_s1 + $0x1c0] sm:$0xf]  ;;  %v4009_v45 = vor.u32 %v5585_v39, %v4008_v37  ;;  %v5567_v48 = vld [vmem:[%s9098_s1 + $0x34] sm:$0xf0] }
   0xc   :  { %v5617_v43 = vld [vmem:[%s9098_s1 + $0x1c4] sm:$0xf0]  ;;  %2726 = vmatpush.bf16.msra.mxu0 %v3953_v29  ;;  %v4073_v46 = vor.u32 %v5601_v41, %v4072_v40  ;;  %v4000_v49 = vld [vmem:[%s9098_s1 + $0xb0] sm:$0xf]  ;;  %v5583_v51 = vld [vmem:[%s9098_s1 + $0xb4] sm:$0xf0]  ;;  %v3937_v56 = vor.u32 %v5567_v48, %v3936_v47 }
   0xd   :  { %2745 = vmatpush.bf16.msra.mxu1 %v4017_v33  ;;  %v4137_v50 = vor.u32 %v5617_v43, %v4136_v42  ;;  %v4064_v52 = vld [vmem:[%s9098_s1 + $0x130] sm:$0xf]  ;;  %v5599_v53 = vld [vmem:[%s9098_s1 + $0x134] sm:$0xf0]  ;;  %v4001_v57 = vor.u32 %v5583_v51, %v4000_v49  ;;  %v3928_v59 = vld [vmem:[%s9098_s1 + $0x20] sm:$0xf] }
   0xe   :  { %2764 = vmatpush.bf16.msra.mxu2 %v4081_v34  ;;  %v4128_v54 = vld [vmem:[%s9098_s1 + $0x1b0] sm:$0xf]  ;;  %v5615_v55 = vld [vmem:[%s9098_s1 + $0x1b4] sm:$0xf0]  ;;  %v4065_v58 = vor.u32 %v5599_v53, %v4064_v52  ;;  %v5565_v60 = vld [vmem:[%s9098_s1 + $0x24] sm:$0xf0] }
   0xf   :  { %2783 = vmatpush.bf16.msra.mxu3 %v4145_v38  ;;  %v3992_v61 = vld [vmem:[%s9098_s1 + $0xa0] sm:$0xf]  ;;  %v4129_v62 = vor.u32 %v5615_v55, %v4128_v54  ;;  %v5581_v63 = vld [vmem:[%s9098_s1 + $0xa4] sm:$0xf0]  ;;  %v3929_v4 = vor.u32 %v5565_v60, %v3928_v59  ;;  %v3920_v7 = vld [vmem:[%s9098_s1 + $0x10] sm:$0xf] }
  0x10   :  { %2727 = vmatpush.bf16.msra.mxu0 %v3945_v44  ;;  %v4056_v0 = vld [vmem:[%s9098_s1 + $0x120] sm:$0xf]  ;;  %v5597_v1 = vld [vmem:[%s9098_s1 + $0x124] sm:$0xf0]  ;;  %v3993_v5 = vor.u32 %v5581_v63, %v3992_v61  ;;  %v5563_v8 = vld [vmem:[%s9098_s1 + $0x14] sm:$0xf0] }
  0x11   :  { %2746 = vmatpush.bf16.msra.mxu1 %v4009_v45  ;;  %v4120_v2 = vld [vmem:[%s9098_s1 + $0x1a0] sm:$0xf]  ;;  %v5613_v3 = vld [vmem:[%s9098_s1 + $0x1a4] sm:$0xf0]  ;;  %v4057_v6 = vor.u32 %v5597_v1, %v4056_v0  ;;  %v3984_v9 = vld [vmem:[%s9098_s1 + $0x90] sm:$0xf]  ;;  %v3921_v17 = vor.u32 %v5563_v8, %v3920_v7 }
  0x12   :  { %2765 = vmatpush.bf16.msra.mxu2 %v4073_v46  ;;  %v4121_v10 = vor.u32 %v5613_v3, %v4120_v2  ;;  %v5579_v11 = vld [vmem:[%s9098_s1 + $0x94] sm:$0xf0]  ;;  %v4048_v12 = vld [vmem:[%s9098_s1 + $0x110] sm:$0xf]  ;;  %v3912_v16 = vld [vmem:[%s9098_s1] sm:$0xf] }
  0x13   :  { %2784 = vmatpush.bf16.msra.mxu3 %v4137_v50  ;;  %v5595_v13 = vld [vmem:[%s9098_s1 + $0x114] sm:$0xf0]  ;;  %v4112_v14 = vld [vmem:[%s9098_s1 + $0x190] sm:$0xf]  ;;  %v5561_v18 = vld [vmem:[%s9098_s1 + $0x4] sm:$0xf0]  ;;  %v3985_v21 = vor.u32 %v5579_v11, %v3984_v9 }
  0x14   :  { %2728 = vmatpush.bf16.msra.mxu0 %v3937_v56  ;;  %v5611_v15 = vld [vmem:[%s9098_s1 + $0x194] sm:$0xf0]  ;;  %v3976_v19 = vld [vmem:[%s9098_s1 + $0x80] sm:$0xf]  ;;  %v5577_v20 = vld [vmem:[%s9098_s1 + $0x84] sm:$0xf0]  ;;  %v4049_v22 = vor.u32 %v5595_v13, %v4048_v12  ;;  %v3913_v34 = vor.u32 %v5561_v18, %v3912_v16 }
  0x15   :  { %2747 = vmatpush.bf16.msra.mxu1 %v4001_v57  ;;  %v4040_v23 = vld [vmem:[%s9098_s1 + $0x100] sm:$0xf]  ;;  %v5593_v24 = vld [vmem:[%s9098_s1 + $0x104] sm:$0xf0]  ;;  %v4113_v26 = vor.u32 %v5611_v15, %v4112_v14  ;;  %v5522_v29 = vld [vmem:[%s9099_s0 + $0x60] sm:$0xf0]  ;;  %v3977_v38 = vor.u32 %v5577_v20, %v3976_v19 }
  0x16   :  { %2766 = vmatpush.bf16.msra.mxu2 %v4065_v58  ;;  %v4104_v25 = vld [vmem:[%s9098_s1 + $0x180] sm:$0xf]  ;;  %v5609_v27 = vld [vmem:[%s9098_s1 + $0x184] sm:$0xf0]  ;;  %v5510_v30 = vld [vmem:[%s9099_s0 + $0x4] sm:$0xf]  ;;  %v4041_v39 = vor.u32 %v5593_v24, %v4040_v23 }
  0x17   :  { %2785 = vmatpush.bf16.msra.mxu3 %v4129_v62  ;;  %v3712_v28 = vld [vmem:[%s9099_s0] sm:$0xf]  ;;  %v3714_v31 = vld [vmem:[%s9099_s0 + $0x64] sm:$0xf0]  ;;  %v4352_v32 = vld [vmem:[%s9098_s1 + $0x370] sm:$0xf]  ;;  %v4105_v43 = vor.u32 %v5609_v27, %v4104_v25 }
  0x18   :  { %2729 = vmatpush.bf16.msra.mxu0 %v3929_v4  ;;  %v5671_v33 = vld [vmem:[%s9098_s1 + $0x374] sm:$0xf0]  ;;  %v3720_v35 = vld [vmem:[%s9099_s0 + $0x8] sm:$0xf]  ;;  %v4288_v36 = vld [vmem:[%s9098_s1 + $0x2f0] sm:$0xf]  ;;  %v6234_v48 = vor.u32 %v5522_v29, %v3712_v28  ;;  %v6245_v53 = vor.u32 %v5510_v30, %v3714_v31 }
  0x19   :  { %2748 = vmatpush.bf16.msra.mxu1 %v3993_v5  ;;  %v5655_v37 = vld [vmem:[%s9098_s1 + $0x2f4] sm:$0xf0]  ;;  %v5523_v40 = vld [vmem:[%s9099_s0 + $0x68] sm:$0xf0]  ;;  %v3722_v42 = vld [vmem:[%s9099_s0 + $0x6c] sm:$0xf0]  ;;  %v4353_v44 = vor.u32 %v5671_v33, %v4352_v32 }
  0x1a   :  { %2767 = vmatpush.bf16.msra.mxu2 %v4057_v6  ;;  %v5511_v41 = vld [vmem:[%s9099_s0 + $0xc] sm:$0xf]  ;;  %v4224_v45 = vld [vmem:[%s9098_s1 + $0x270] sm:$0xf]  ;;  %v5639_v46 = vld [vmem:[%s9098_s1 + $0x274] sm:$0xf0]  ;;  %v4289_v49 = vor.u32 %v5655_v37, %v4288_v36  ;;  %v6247_v54 = vor.u32 %v5523_v40, %v3720_v35 }
  0x1b   :  { %2786 = vmatpush.bf16.msra.mxu3 %v4121_v10  ;;  %v4416_v47 = vld [vmem:[%s9098_s1 + $0x3f0] sm:$0xf]  ;;  %v5687_v50 = vld [vmem:[%s9098_s1 + $0x3f4] sm:$0xf0]  ;;  %v4344_v51 = vld [vmem:[%s9098_s1 + $0x360] sm:$0xf]  ;;  %v6255_v57 = vor.u32 %v5511_v41, %v3722_v42  ;;  %v4225_v58 = vor.u32 %v5639_v46, %v4224_v45 }
  0x1c   :  { %2730 = vmatpush.bf16.msra.mxu0 %v3921_v17  ;;  %v5669_v52 = vld [vmem:[%s9098_s1 + $0x364] sm:$0xf0]  ;;  %v4280_v55 = vld [vmem:[%s9098_s1 + $0x2e0] sm:$0xf]  ;;  %v4417_v59 = vor.u32 %v5687_v50, %v4416_v47  ;;  %v4336_v2 = vld [vmem:[%s9098_s1 + $0x350] sm:$0xf] }
  0x1d   :  { %2749 = vmatpush.bf16.msra.mxu1 %v3985_v21  ;;  %v5653_v56 = vld [vmem:[%s9098_s1 + $0x2e4] sm:$0xf0]  ;;  %v4345_v60 = vor.u32 %v5669_v52, %v4344_v51  ;;  %v4216_v61 = vld [vmem:[%s9098_s1 + $0x260] sm:$0xf]  ;;  %v5667_v3 = vld [vmem:[%s9098_s1 + $0x354] sm:$0xf0] }
  0x1e   :  { %2768 = vmatpush.bf16.msra.mxu2 %v4049_v22  ;;  %v5637_v62 = vld [vmem:[%s9098_s1 + $0x264] sm:$0xf0]  ;;  %v4408_v63 = vld [vmem:[%s9098_s1 + $0x3e0] sm:$0xf]  ;;  %v4281_v0 = vor.u32 %v5653_v56, %v4280_v55  ;;  %v4272_v4 = vld [vmem:[%s9098_s1 + $0x2d0] sm:$0xf]  ;;  %v4337_v8 = vor.u32 %v5667_v3, %v4336_v2 }
  0x1f   :  { %2787 = vmatpush.bf16.msra.mxu3 %v4113_v26  ;;  %v5685_v1 = vld [vmem:[%s9098_s1 + $0x3e4] sm:$0xf0]  ;;  %v5651_v5 = vld [vmem:[%s9098_s1 + $0x2d4] sm:$0xf0]  ;;  %v4217_v6 = vor.u32 %v5637_v62, %v4216_v61  ;;  %v4208_v9 = vld [vmem:[%s9098_s1 + $0x250] sm:$0xf] }
  0x20   :  { %2731 = vmatpush.bf16.msra.mxu0 %v3913_v34  ;;  %v4409_v7 = vor.u32 %v5685_v1, %v4408_v63  ;;  %v5635_v10 = vld [vmem:[%s9098_s1 + $0x254] sm:$0xf0]  ;;  %v4400_v11 = vld [vmem:[%s9098_s1 + $0x3d0] sm:$0xf]  ;;  %v4273_v12 = vor.u32 %v5651_v5, %v4272_v4  ;;  %v4328_v14 = vld [vmem:[%s9098_s1 + $0x340] sm:$0xf] }
  0x21   :  { %2750 = vmatpush.bf16.msra.mxu1 %v3977_v38  ;;  %v5683_v13 = vld [vmem:[%s9098_s1 + $0x3d4] sm:$0xf0]  ;;  %v5665_v15 = vld [vmem:[%s9098_s1 + $0x344] sm:$0xf0]  ;;  %v4264_v16 = vld [vmem:[%s9098_s1 + $0x2c0] sm:$0xf]  ;;  %v4209_v18 = vor.u32 %v5635_v10, %v4208_v9 }
  0x22   :  { %2769 = vmatpush.bf16.msra.mxu2 %v4041_v39  ;;  %v5649_v17 = vld [vmem:[%s9098_s1 + $0x2c4] sm:$0xf0]  ;;  %v4200_v19 = vld [vmem:[%s9098_s1 + $0x240] sm:$0xf]  ;;  %v4401_v22 = vor.u32 %v5683_v13, %v4400_v11  ;;  %v4329_v23 = vor.u32 %v5665_v15, %v4328_v14  ;;  %v5547_v26 = vld [vmem:[%s9099_s0 + $0x128] sm:$0xf0] }
  0x23   :  { %2788 = vmatpush.bf16.msra.mxu3 %v4105_v43  ;;  %2732 = vmatmul.bf16.vlgmr.msra.gmra.mxu0 %v6234_v48  ;;  %v5633_v20 = vld [vmem:[%s9098_s1 + $0x244] sm:$0xf0]  ;;  %v4392_v21 = vld [vmem:[%s9098_s1 + $0x3c0] sm:$0xf]  ;;  %v4265_v27 = vor.u32 %v5649_v17, %v4264_v16  ;;  %v5535_v28 = vld [vmem:[%s9099_s0 + $0xcc] sm:$0xf] }
  0x24   :  { %2751 = vmatmul.bf16.vlgmr.msra.gmra.mxu1 %v6245_v53  ;;  %2800 = vmatpush.bf16.msrb.mxu0 %v4225_v58  ;;  %v5681_v24 = vld [vmem:[%s9098_s1 + $0x3c4] sm:$0xf0]  ;;  %v3814_v29 = vld [vmem:[%s9099_s0 + $0x12c] sm:$0xf0]  ;;  %v5663_v31 = vld [vmem:[%s9098_s1 + $0x334] sm:$0xf0]  ;;  %v4201_v35 = vor.u32 %v5633_v20, %v4200_v19 }
  0x25   :  { %2819 = vmatpush.bf16.msrb.mxu1 %v4289_v49  ;;  %2770 = vmatmul.bf16.vlgmr.msra.gmra.mxu2 %v6247_v54  ;;  %v3812_v25 = vld [vmem:[%s9099_s0 + $0xc8] sm:$0xf]  ;;  %v4320_v30 = vld [vmem:[%s9098_s1 + $0x330] sm:$0xf]  ;;  %v5647_v34 = vld [vmem:[%s9098_s1 + $0x2b4] sm:$0xf0]  ;;  %v4393_v39 = vor.u32 %v5681_v24, %v4392_v21  ;;  %v6377_v50 = vor.u32 %v5535_v28, %v3814_v29 }
  0x26   :  { %2838 = vmatpush.bf16.msrb.mxu2 %v4353_v44  ;;  %2789 = vmatmul.bf16.vlgmr.msra.gmra.mxu3 %v6255_v57  ;;  %v3820_v32 = vld [vmem:[%s9099_s0 + $0xd0] sm:$0xf]  ;;  %v5548_v36 = vld [vmem:[%s9099_s0 + $0x130] sm:$0xf0]  ;;  %v3822_v38 = vld [vmem:[%s9099_s0 + $0x134] sm:$0xf0]  ;;  %v4321_v40 = vor.u32 %v5663_v31, %v4320_v30  ;;  %v6366_v44 = vor.u32 %v5547_v26, %v3812_v25 }
  0x27   :  { %2857 = vmatpush.bf16.msrb.mxu3 %v4417_v59  ;;  %v4256_v33 = vld [vmem:[%s9098_s1 + $0x2b0] sm:$0xf]  ;;  %v5536_v37 = vld [vmem:[%s9099_s0 + $0xd4] sm:$0xf]  ;;  %v5631_v42 = vld [vmem:[%s9098_s1 + $0x234] sm:$0xf0]  ;;  %v6379_v51 = vor.u32 %v5548_v36, %v3820_v32 }
  0x28   :  { %2801 = vmatpush.bf16.msrb.mxu0 %v4217_v6  ;;  %v4192_v41 = vld [vmem:[%s9098_s1 + $0x230] sm:$0xf]  ;;  %v4257_v45 = vor.u32 %v5647_v34, %v4256_v33  ;;  %v5679_v46 = vld [vmem:[%s9098_s1 + $0x3b4] sm:$0xf0]  ;;  %v4312_v47 = vld [vmem:[%s9098_s1 + $0x320] sm:$0xf]  ;;  %v6387_v56 = vor.u32 %v5536_v37, %v3822_v38 }
  0x29   :  { %2820 = vmatpush.bf16.msrb.mxu1 %v4281_v0  ;;  %v4384_v43 = vld [vmem:[%s9098_s1 + $0x3b0] sm:$0xf]  ;;  %v5661_v49 = vld [vmem:[%s9098_s1 + $0x324] sm:$0xf0]  ;;  %v4248_v52 = vld [vmem:[%s9098_s1 + $0x2a0] sm:$0xf]  ;;  %v4193_v58 = vor.u32 %v5631_v42, %v4192_v41 }
  0x2a   :  { %2839 = vmatpush.bf16.msrb.mxu2 %v4345_v60  ;;  %v5645_v55 = vld [vmem:[%s9098_s1 + $0x2a4] sm:$0xf0]  ;;  %v4385_v59 = vor.u32 %v5679_v46, %v4384_v43  ;;  %v4313_v60 = vor.u32 %v5661_v49, %v4312_v47  ;;  %v4184_v61 = vld [vmem:[%s9098_s1 + $0x220] sm:$0xf]  ;;  %v4304_v2 = vld [vmem:[%s9098_s1 + $0x310] sm:$0xf] }
  0x2b   :  { %2858 = vmatpush.bf16.msrb.mxu3 %v4409_v7  ;;  %v5629_v62 = vld [vmem:[%s9098_s1 + $0x224] sm:$0xf0]  ;;  %v4376_v63 = vld [vmem:[%s9098_s1 + $0x3a0] sm:$0xf]  ;;  %v4249_v0 = vor.u32 %v5645_v55, %v4248_v52  ;;  %v5659_v3 = vld [vmem:[%s9098_s1 + $0x314] sm:$0xf0] }
  0x2c   :  { %2802 = vmatpush.bf16.msrb.mxu0 %v4209_v18  ;;  %v5677_v1 = vld [vmem:[%s9098_s1 + $0x3a4] sm:$0xf0]  ;;  %v4240_v4 = vld [vmem:[%s9098_s1 + $0x290] sm:$0xf]  ;;  %v5643_v5 = vld [vmem:[%s9098_s1 + $0x294] sm:$0xf0]  ;;  %v4185_v6 = vor.u32 %v5629_v62, %v4184_v61  ;;  %v4305_v9 = vor.u32 %v5659_v3, %v4304_v2 }
  0x2d   :  { %2821 = vmatpush.bf16.msrb.mxu1 %v4273_v12  ;;  %v4176_v7 = vld [vmem:[%s9098_s1 + $0x210] sm:$0xf]  ;;  %v5627_v10 = vld [vmem:[%s9098_s1 + $0x214] sm:$0xf0]  ;;  %v4241_v13 = vor.u32 %v5643_v5, %v4240_v4  ;;  %v4296_v14 = vld [vmem:[%s9098_s1 + $0x300] sm:$0xf] }
  0x2e   :  { %2840 = vmatpush.bf16.msrb.mxu2 %v4337_v8  ;;  %v4377_v8 = vor.u32 %v5677_v1, %v4376_v63  ;;  %v4368_v11 = vld [vmem:[%s9098_s1 + $0x390] sm:$0xf]  ;;  %v5675_v12 = vld [vmem:[%s9098_s1 + $0x394] sm:$0xf0]  ;;  %v5657_v15 = vld [vmem:[%s9098_s1 + $0x304] sm:$0xf0]  ;;  %v4177_v20 = vor.u32 %v5627_v10, %v4176_v7 }
  0x2f   :  { %2859 = vmatpush.bf16.msrb.mxu3 %v4401_v22  ;;  %v4232_v16 = vld [vmem:[%s9098_s1 + $0x280] sm:$0xf]  ;;  %v5641_v17 = vld [vmem:[%s9098_s1 + $0x284] sm:$0xf0]  ;;  %v4608_v18 = vld [vmem:[%s9098_s1 + $0x570] sm:$0xf]  ;;  %v4369_v24 = vor.u32 %v5675_v12, %v4368_v11  ;;  %v4297_v25 = vor.u32 %v5657_v15, %v4296_v14 }
  0x30   :  { %2803 = vmatpush.bf16.msrb.mxu0 %v4201_v35  ;;  %v5735_v19 = vld [vmem:[%s9098_s1 + $0x574] sm:$0xf0]  ;;  %v4168_v21 = vld [vmem:[%s9098_s1 + $0x200] sm:$0xf]  ;;  %v4544_v22 = vld [vmem:[%s9098_s1 + $0x4f0] sm:$0xf]  ;;  %v4233_v29 = vor.u32 %v5641_v17, %v4232_v16 }
  0x31   :  { %2822 = vmatpush.bf16.msrb.mxu1 %v4265_v27  ;;  %v5625_v26 = vld [vmem:[%s9098_s1 + $0x204] sm:$0xf0]  ;;  %v4360_v27 = vld [vmem:[%s9098_s1 + $0x380] sm:$0xf]  ;;  %v3728_v30 = vld [vmem:[%s9099_s0 + $0x10] sm:$0xf]  ;;  %v4609_v34 = vor.u32 %v5735_v19, %v4608_v18 }
  0x32   :  { %2841 = vmatpush.bf16.msrb.mxu2 %v4329_v23  ;;  %v5719_v23 = vld [vmem:[%s9098_s1 + $0x4f4] sm:$0xf0]  ;;  %v5673_v28 = vld [vmem:[%s9098_s1 + $0x384] sm:$0xf0]  ;;  %v5524_v31 = vld [vmem:[%s9099_s0 + $0x70] sm:$0xf0]  ;;  %v4169_v42 = vor.u32 %v5625_v26, %v4168_v21 }
  0x33   :  { %2860 = vmatpush.bf16.msrb.mxu3 %v4393_v39  ;;  %2737 = vmatmul.bf16.gmra.mxu0 %v6366_v44  ;;  %v5512_v32 = vld [vmem:[%s9099_s0 + $0x14] sm:$0xf]  ;;  %v3730_v33 = vld [vmem:[%s9099_s0 + $0x74] sm:$0xf0]  ;;  %v4480_v35 = vld [vmem:[%s9098_s1 + $0x470] sm:$0xf]  ;;  %v4545_v38 = vor.u32 %v5719_v23, %v4544_v22  ;;  %v4361_v47 = vor.u32 %v5673_v28, %v4360_v27 }
  0x34   :  { %2756 = vmatmul.bf16.gmra.mxu1 %v6377_v50  ;;  %2804 = vmatpush.bf16.msrb.mxu0 %v4193_v58  ;;  %v5703_v36 = vld [vmem:[%s9098_s1 + $0x474] sm:$0xf0]  ;;  %v4672_v37 = vld [vmem:[%s9098_s1 + $0x5f0] sm:$0xf]  ;;  %v5733_v41 = vld [vmem:[%s9098_s1 + $0x564] sm:$0xf0]  ;;  %v6524_v1 = vor.u32 %v5512_v32, %v3730_v33 }
  0x35   :  { %2823 = vmatpush.bf16.msrb.mxu1 %v4257_v45  ;;  %2775 = vmatmul.bf16.gmra.mxu2 %v6379_v51  ;;  %v5751_v39 = vld [vmem:[%s9098_s1 + $0x5f4] sm:$0xf0]  ;;  %v5525_v45 = vld [vmem:[%s9099_s0 + $0x78] sm:$0xf0]  ;;  %v3738_v49 = vld [vmem:[%s9099_s0 + $0x7c] sm:$0xf0]  ;;  %v4481_v52 = vor.u32 %v5703_v36, %v4480_v35 }
  0x36   :  { %2842 = vmatpush.bf16.msrb.mxu2 %v4321_v40  ;;  %2794 = vmatmul.bf16.gmra.mxu3 %v6387_v56  ;;  %v4600_v40 = vld [vmem:[%s9098_s1 + $0x560] sm:$0xf]  ;;  %v3736_v43 = vld [vmem:[%s9099_s0 + $0x18] sm:$0xf]  ;;  %v5513_v46 = vld [vmem:[%s9099_s0 + $0x1c] sm:$0xf] }
  0x37   :  { %2861 = vmatpush.bf16.msrb.mxu3 %v4385_v59  ;;  %v4472_v55 = vld [vmem:[%s9098_s1 + $0x460] sm:$0xf]  ;;  %v5701_v58 = vld [vmem:[%s9098_s1 + $0x464] sm:$0xf0]  ;;  %v4673_v59 = vor.u32 %v5751_v39, %v4672_v37  ;;  %v4592_v3 = vld [vmem:[%s9098_s1 + $0x550] sm:$0xf]  ;;  %v6535_v5 = vor.u32 %v5525_v45, %v3736_v43 }
  0x38   :  { %2805 = vmatpush.bf16.msrb.mxu0 %v4185_v6  ;;  %v4536_v61 = vld [vmem:[%s9098_s1 + $0x4e0] sm:$0xf]  ;;  %v5717_v62 = vld [vmem:[%s9098_s1 + $0x4e4] sm:$0xf0]  ;;  %v5731_v4 = vld [vmem:[%s9098_s1 + $0x554] sm:$0xf0]  ;;  %v6537_v6 = vor.u32 %v5513_v46, %v3738_v49  ;;  %v4473_v7 = vor.u32 %v5701_v58, %v4472_v55 }
  0x39   :  { %2824 = vmatpush.bf16.msrb.mxu1 %v4249_v0  ;;  %v4664_v63 = vld [vmem:[%s9098_s1 + $0x5e0] sm:$0xf]  ;;  %v6522_v0 = vor.u32 %v5524_v31, %v3728_v30  ;;  %v5749_v2 = vld [vmem:[%s9098_s1 + $0x5e4] sm:$0xf0]  ;;  %v5699_v10 = vld [vmem:[%s9098_s1 + $0x454] sm:$0xf0]  ;;  %v4593_v12 = vor.u32 %v5731_v4, %v4592_v3 }
  0x3a   :  { %2843 = vmatpush.bf16.msrb.mxu2 %v4313_v60  ;;  %v4601_v60 = vor.u32 %v5733_v41, %v4600_v40  ;;  %v4665_v11 = vor.u32 %v5749_v2, %v4664_v63  ;;  %v5715_v14 = vld [vmem:[%s9098_s1 + $0x4d4] sm:$0xf0]  ;;  %v4656_v15 = vld [vmem:[%s9098_s1 + $0x5d0] sm:$0xf]  ;;  %v4584_v17 = vld [vmem:[%s9098_s1 + $0x540] sm:$0xf] }
  0x3b   :  { %2862 = vmatpush.bf16.msrb.mxu3 %v4377_v8  ;;  %v4537_v8 = vor.u32 %v5717_v62, %v4536_v61  ;;  %v5747_v16 = vld [vmem:[%s9098_s1 + $0x5d4] sm:$0xf0]  ;;  %v5729_v18 = vld [vmem:[%s9098_s1 + $0x544] sm:$0xf0]  ;;  %v4456_v21 = vld [vmem:[%s9098_s1 + $0x440] sm:$0xf] }
  0x3c   :  { %2806 = vmatpush.bf16.msrb.mxu0 %v4177_v20  ;;  %v5697_v22 = vld [vmem:[%s9098_s1 + $0x444] sm:$0xf0]  ;;  %v4657_v23 = vor.u32 %v5747_v16, %v4656_v15  ;;  %v4648_v27 = vld [vmem:[%s9098_s1 + $0x5c0] sm:$0xf]  ;;  %v5727_v30 = vld [vmem:[%s9098_s1 + $0x534] sm:$0xf0] }
  0x3d   :  { %2825 = vmatpush.bf16.msrb.mxu1 %v4241_v13  ;;  %v4528_v13 = vld [vmem:[%s9098_s1 + $0x4d0] sm:$0xf]  ;;  %v5713_v26 = vld [vmem:[%s9098_s1 + $0x4c4] sm:$0xf0]  ;;  %v4457_v31 = vor.u32 %v5697_v22, %v4456_v21  ;;  %v3828_v36 = vld [vmem:[%s9099_s0 + $0xd8] sm:$0xf] }
  0x3e   :  { %2844 = vmatpush.bf16.msrb.mxu2 %v4305_v9  ;;  %v4464_v9 = vld [vmem:[%s9098_s1 + $0x450] sm:$0xf]  ;;  %v4529_v20 = vor.u32 %v5715_v14, %v4528_v13  ;;  %v5745_v28 = vld [vmem:[%s9098_s1 + $0x5c4] sm:$0xf0]  ;;  %v5549_v37 = vld [vmem:[%s9099_s0 + $0x138] sm:$0xf0] }
  0x3f   :  { %2863 = vmatpush.bf16.msrb.mxu3 %v4369_v24  ;;  %v4465_v19 = vor.u32 %v5699_v10, %v4464_v9  ;;  %v4585_v24 = vor.u32 %v5729_v18, %v4584_v17  ;;  %v4448_v33 = vld [vmem:[%s9098_s1 + $0x430] sm:$0xf]  ;;  %v4649_v35 = vor.u32 %v5745_v28, %v4648_v27  ;;  %v3830_v39 = vld [vmem:[%s9099_s0 + $0x13c] sm:$0xf0]  ;;  %v5743_v45 = vld [vmem:[%s9098_s1 + $0x5b4] sm:$0xf0] }
  0x40   :  { %2807 = vmatpush.bf16.msrb.mxu0 %v4169_v42  ;;  %v4512_v41 = vld [vmem:[%s9098_s1 + $0x4b0] sm:$0xf]  ;;  %v5711_v42 = vld [vmem:[%s9098_s1 + $0x4b4] sm:$0xf0]  ;;  %v4568_v46 = vld [vmem:[%s9098_s1 + $0x520] sm:$0xf] }
  0x41   :  { %2826 = vmatpush.bf16.msrb.mxu1 %v4233_v29  ;;  %v4576_v29 = vld [vmem:[%s9098_s1 + $0x530] sm:$0xf]  ;;  %v3836_v49 = vld [vmem:[%s9099_s0 + $0xe0] sm:$0xf]  ;;  %v5538_v55 = vld [vmem:[%s9099_s0 + $0xe4] sm:$0xf] }
  0x42   :  { %2845 = vmatpush.bf16.msrb.mxu2 %v4297_v25  ;;  %v4520_v25 = vld [vmem:[%s9098_s1 + $0x4c0] sm:$0xf]  ;;  %v4577_v40 = vor.u32 %v5727_v30, %v4576_v29  ;;  %v4640_v43 = vld [vmem:[%s9098_s1 + $0x5b0] sm:$0xf]  ;;  %v3838_v58 = vld [vmem:[%s9099_s0 + $0x144] sm:$0xf0] }
  0x43   :  { %2864 = vmatpush.bf16.msrb.mxu3 %v4361_v47  ;;  %2808 = vmatmul.bf16.vlgmr.msrb.gmra.mxu0 %v6522_v0  ;;  %v4521_v32 = vor.u32 %v5713_v26, %v4520_v25  ;;  %v5725_v47 = vld [vmem:[%s9098_s1 + $0x524] sm:$0xf0]  ;;  %v4440_v61 = vld [vmem:[%s9098_s1 + $0x420] sm:$0xf]  ;;  %v4641_v63 = vor.u32 %v5743_v45, %v4640_v43  ;;  %v6669_v14 = vor.u32 %v5538_v55, %v3838_v58  ;;  %v4432_v17 = vld [vmem:[%s9098_s1 + $0x410] sm:$0xf] }
  0x44   :  { %2876 = vmatpush.bf16.msra.mxu0 %v4481_v52  ;;  %2827 = vmatmul.bf16.vlgmr.msrb.gmra.mxu1 %v6524_v1  ;;  %v5550_v52 = vld [vmem:[%s9099_s0 + $0x140] sm:$0xf0]  ;;  %v5693_v62 = vld [vmem:[%s9098_s1 + $0x424] sm:$0xf0]  ;;  %v4569_v2 = vor.u32 %v5725_v47, %v4568_v46  ;;  %v4504_v3 = vld [vmem:[%s9098_s1 + $0x4a0] sm:$0xf] }
  0x45   :  { %2895 = vmatpush.bf16.msra.mxu1 %v4545_v38  ;;  %2846 = vmatmul.bf16.vlgmr.msrb.gmra.mxu2 %v6535_v5  ;;  %v5537_v38 = vld [vmem:[%s9099_s0 + $0xdc] sm:$0xf]  ;;  %v5709_v4 = vld [vmem:[%s9098_s1 + $0x4a4] sm:$0xf0]  ;;  %v6667_v13 = vor.u32 %v5550_v52, %v3836_v49  ;;  %v4441_v15 = vor.u32 %v5693_v62, %v4440_v61  ;;  %v5691_v18 = vld [vmem:[%s9098_s1 + $0x414] sm:$0xf0] }
  0x46   :  { %2914 = vmatpush.bf16.msra.mxu2 %v4609_v34  ;;  %2865 = vmatmul.bf16.vlgmr.msrb.gmra.mxu3 %v6537_v6  ;;  %v5695_v34 = vld [vmem:[%s9098_s1 + $0x434] sm:$0xf0]  ;;  %v6656_v9 = vor.u32 %v5537_v38, %v3830_v39  ;;  %v5741_v10 = vld [vmem:[%s9098_s1 + $0x5a4] sm:$0xf0]  ;;  %v4505_v16 = vor.u32 %v5709_v4, %v4504_v3  ;;  %v4496_v21 = vld [vmem:[%s9098_s1 + $0x490] sm:$0xf]  ;;  %v4433_v29 = vor.u32 %v5691_v18, %v4432_v17 }
  0x47   :  { %2933 = vmatpush.bf16.msra.mxu3 %v4673_v59  ;;  %v4449_v59 = vor.u32 %v5695_v34, %v4448_v33  ;;  %v5707_v22 = vld [vmem:[%s9098_s1 + $0x494] sm:$0xf0]  ;;  %v4552_v25 = vld [vmem:[%s9098_s1 + $0x500] sm:$0xf]  ;;  %v5721_v26 = vld [vmem:[%s9098_s1 + $0x504] sm:$0xf0] }
  0x48   :  { %2877 = vmatpush.bf16.msra.mxu0 %v4473_v7  ;;  %v4632_v7 = vld [vmem:[%s9098_s1 + $0x5a0] sm:$0xf]  ;;  %v4864_v27 = vld [vmem:[%s9098_s1 + $0x770] sm:$0xf]  ;;  %v5799_v28 = vld [vmem:[%s9098_s1 + $0x774] sm:$0xf0]  ;;  %v4497_v30 = vor.u32 %v5707_v22, %v4496_v21 }
  0x49   :  { %2896 = vmatpush.bf16.msra.mxu1 %v4537_v8  ;;  %v6654_v8 = vor.u32 %v5549_v37, %v3828_v36  ;;  %v4488_v33 = vld [vmem:[%s9098_s1 + $0x480] sm:$0xf]  ;;  %v5705_v36 = vld [vmem:[%s9098_s1 + $0x484] sm:$0xf0]  ;;  %v4865_v39 = vor.u32 %v5799_v28, %v4864_v27  ;;  %v5783_v43 = vld [vmem:[%s9098_s1 + $0x6f4] sm:$0xf0] }
  0x4a   :  { %2915 = vmatpush.bf16.msra.mxu2 %v4601_v60  ;;  %v4513_v60 = vor.u32 %v5711_v42, %v4512_v41  ;;  %v4616_v37 = vld [vmem:[%s9098_s1 + $0x580] sm:$0xf]  ;;  %v5737_v38 = vld [vmem:[%s9098_s1 + $0x584] sm:$0xf0]  ;;  %v5767_v41 = vld [vmem:[%s9098_s1 + $0x674] sm:$0xf0]  ;;  %v4489_v49 = vor.u32 %v5705_v36, %v4488_v33 }
  0x4b   :  { %2934 = vmatpush.bf16.msra.mxu3 %v4665_v11  ;;  %v4560_v11 = vld [vmem:[%s9098_s1 + $0x510] sm:$0xf]  ;;  %v5815_v46 = vld [vmem:[%s9098_s1 + $0x7f4] sm:$0xf0]  ;;  %v4856_v52 = vld [vmem:[%s9098_s1 + $0x760] sm:$0xf]  ;;  %v4617_v58 = vor.u32 %v5737_v38, %v4616_v37 }
  0x4c   :  { %2878 = vmatpush.bf16.msra.mxu0 %v4465_v19  ;;  %v4633_v19 = vor.u32 %v5741_v10, %v4632_v7  ;;  %v4800_v42 = vld [vmem:[%s9098_s1 + $0x6f0] sm:$0xf]  ;;  %v5797_v55 = vld [vmem:[%s9098_s1 + $0x764] sm:$0xf0]  ;;  %v5514_v61 = vld [vmem:[%s9099_s0 + $0x24] sm:$0xf] }
  0x4d   :  { %2897 = vmatpush.bf16.msra.mxu1 %v4529_v20  ;;  %v4928_v45 = vld [vmem:[%s9098_s1 + $0x7f0] sm:$0xf]  ;;  %v4728_v4 = vld [vmem:[%s9098_s1 + $0x660] sm:$0xf]  ;;  %v5765_v7 = vld [vmem:[%s9098_s1 + $0x664] sm:$0xf0] }
  0x4e   :  { %2916 = vmatpush.bf16.msra.mxu2 %v4593_v12  ;;  %v5723_v12 = vld [vmem:[%s9098_s1 + $0x514] sm:$0xf0]  ;;  %v4929_v3 = vor.u32 %v5815_v46, %v4928_v45  ;;  %v3752_v10 = vld [vmem:[%s9099_s0 + $0x28] sm:$0xf]  ;;  %v4792_v17 = vld [vmem:[%s9098_s1 + $0x6e0] sm:$0xf] }
  0x4f   :  { %2935 = vmatpush.bf16.msra.mxu3 %v4657_v23  ;;  %v4561_v20 = vor.u32 %v5723_v12, %v4560_v11  ;;  %v4624_v23 = vld [vmem:[%s9098_s1 + $0x590] sm:$0xf]  ;;  %v5527_v11 = vld [vmem:[%s9099_s0 + $0x88] sm:$0xf0]  ;;  %v5781_v18 = vld [vmem:[%s9098_s1 + $0x6e4] sm:$0xf0] }
  0x50   :  { %2879 = vmatpush.bf16.msra.mxu0 %v4457_v31  ;;  %v4424_v31 = vld [vmem:[%s9098_s1 + $0x400] sm:$0xf]  ;;  %v5515_v12 = vld [vmem:[%s9099_s0 + $0x2c] sm:$0xf]  ;;  %v5813_v21 = vld [vmem:[%s9098_s1 + $0x7e4] sm:$0xf0]  ;;  %v6805_v28 = vor.u32 %v5527_v11, %v3752_v10 }
  0x51   :  { %2898 = vmatpush.bf16.msra.mxu1 %v4521_v32  ;;  %v5689_v32 = vld [vmem:[%s9098_s1 + $0x404] sm:$0xf0]  ;;  %v4848_v22 = vld [vmem:[%s9098_s1 + $0x750] sm:$0xf]  ;;  %v5763_v27 = vld [vmem:[%s9098_s1 + $0x654] sm:$0xf0] }
  0x52   :  { %2917 = vmatpush.bf16.msra.mxu2 %v4585_v24  ;;  %v5739_v24 = vld [vmem:[%s9098_s1 + $0x594] sm:$0xf0]  ;;  %v4425_v47 = vor.u32 %v5689_v32, %v4424_v31  ;;  %v4784_v32 = vld [vmem:[%s9098_s1 + $0x6d0] sm:$0xf]  ;;  %v4840_v38 = vld [vmem:[%s9098_s1 + $0x740] sm:$0xf] }
  0x53   :  { %2936 = vmatpush.bf16.msra.mxu3 %v4649_v35  ;;  %2813 = vmatmul.bf16.gmra.mxu0 %v6654_v8  ;;  %v4625_v34 = vor.u32 %v5739_v24, %v4624_v23  ;;  %v4553_v35 = vor.u32 %v5721_v26, %v4552_v25  ;;  %v5795_v25 = vld [vmem:[%s9098_s1 + $0x754] sm:$0xf0]  ;;  %v4720_v26 = vld [vmem:[%s9098_s1 + $0x650] sm:$0xf]  ;;  %v4776_v45 = vld [vmem:[%s9098_s1 + $0x6c0] sm:$0xf] }
  0x54   :  { %2880 = vmatpush.bf16.msra.mxu0 %v4449_v59  ;;  %2832 = vmatmul.bf16.gmra.mxu1 %v6656_v9  ;;  %v3744_v59 = vld [vmem:[%s9099_s0 + $0x20] sm:$0xf]  ;;  %v5779_v33 = vld [vmem:[%s9098_s1 + $0x6d4] sm:$0xf0]  ;;  %v4912_v36 = vld [vmem:[%s9098_s1 + $0x7d0] sm:$0xf] }
  0x55   :  { %2899 = vmatpush.bf16.msra.mxu1 %v4513_v60  ;;  %2851 = vmatmul.bf16.gmra.mxu2 %v6667_v13  ;;  %v5526_v60 = vld [vmem:[%s9099_s0 + $0x80] sm:$0xf0]  ;;  %v5811_v37 = vld [vmem:[%s9098_s1 + $0x7d4] sm:$0xf0]  ;;  %v5777_v46 = vld [vmem:[%s9098_s1 + $0x6c4] sm:$0xf0] }
  0x56   :  { %2918 = vmatpush.bf16.msra.mxu2 %v4577_v40  ;;  %2870 = vmatmul.bf16.gmra.mxu3 %v6669_v14  ;;  %v4736_v40 = vld [vmem:[%s9098_s1 + $0x670] sm:$0xf]  ;;  %v6792_v23 = vor.u32 %v5526_v60, %v3744_v59  ;;  %v5791_v59 = vld [vmem:[%s9098_s1 + $0x734] sm:$0xf0]  ;;  %v5539_v10 = vld [vmem:[%s9099_s0 + $0xec] sm:$0xf] }
  0x57   :  { %2937 = vmatpush.bf16.msra.mxu3 %v4641_v63  ;;  %v4737_v62 = vor.u32 %v5767_v41, %v4736_v40  ;;  %v3746_v63 = vld [vmem:[%s9099_s0 + $0x84] sm:$0xf0]  ;;  %v4712_v40 = vld [vmem:[%s9098_s1 + $0x640] sm:$0xf]  ;;  %v4704_v60 = vld [vmem:[%s9098_s1 + $0x630] sm:$0xf] }
  0x58   :  { %2881 = vmatpush.bf16.msra.mxu0 %v4441_v15  ;;  %v4857_v15 = vor.u32 %v5797_v55, %v4856_v52  ;;  %v6794_v24 = vor.u32 %v5514_v61, %v3746_v63  ;;  %v5761_v41 = vld [vmem:[%s9098_s1 + $0x644] sm:$0xf0]  ;;  %v4904_v52 = vld [vmem:[%s9098_s1 + $0x7c0] sm:$0xf]  ;;  %v5759_v61 = vld [vmem:[%s9098_s1 + $0x634] sm:$0xf0] }
  0x59   :  { %2900 = vmatpush.bf16.msra.mxu1 %v4505_v16  ;;  %v3754_v16 = vld [vmem:[%s9099_s0 + $0x8c] sm:$0xf0]  ;;  %v5809_v55 = vld [vmem:[%s9098_s1 + $0x7c4] sm:$0xf0] }
  0x5a   :  { %2919 = vmatpush.bf16.msra.mxu2 %v4569_v2  ;;  %v4801_v2 = vor.u32 %v5783_v43, %v4800_v42  ;;  %v4785_v42 = vor.u32 %v5779_v33, %v4784_v32  ;;  %v4913_v43 = vor.u32 %v5811_v37, %v4912_v36  ;;  %v4905_v63 = vor.u32 %v5809_v55, %v4904_v52  ;;  %v3846_v11 = vld [vmem:[%s9099_s0 + $0x14c] sm:$0xf0]  ;;  %v4760_v32 = vld [vmem:[%s9098_s1 + $0x6a0] sm:$0xf]  ;;  %v5773_v33 = vld [vmem:[%s9098_s1 + $0x6a4] sm:$0xf0] }
  0x5b   :  { %2938 = vmatpush.bf16.msra.mxu3 %v4633_v19  ;;  %v4729_v19 = vor.u32 %v5765_v7, %v4728_v4  ;;  %v3844_v4 = vld [vmem:[%s9099_s0 + $0xe8] sm:$0xf]  ;;  %v5551_v7 = vld [vmem:[%s9099_s0 + $0x148] sm:$0xf0]  ;;  %v4888_v36 = vld [vmem:[%s9098_s1 + $0x7a0] sm:$0xf] }
  0x5c   :  { %2882 = vmatpush.bf16.msra.mxu0 %v4433_v29  ;;  %v6807_v29 = vor.u32 %v5515_v12, %v3754_v16  ;;  %v4896_v16 = vld [vmem:[%s9098_s1 + $0x7b0] sm:$0xf]  ;;  %v5805_v37 = vld [vmem:[%s9098_s1 + $0x7a4] sm:$0xf0]  ;;  %v5771_v55 = vld [vmem:[%s9098_s1 + $0x694] sm:$0xf0] }
  0x5d   :  { %2901 = vmatpush.bf16.msra.mxu1 %v4497_v30  ;;  %v4793_v30 = vor.u32 %v5781_v18, %v4792_v17  ;;  %v5807_v17 = vld [vmem:[%s9098_s1 + $0x7b4] sm:$0xf0]  ;;  %v4824_v18 = vld [vmem:[%s9098_s1 + $0x720] sm:$0xf]  ;;  %v4752_v52 = vld [vmem:[%s9098_s1 + $0x690] sm:$0xf] }
  0x5e   :  { %2920 = vmatpush.bf16.msra.mxu2 %v4561_v20  ;;  %v4920_v20 = vld [vmem:[%s9098_s1 + $0x7e0] sm:$0xf] }
  0x5f   :  { %2939 = vmatpush.bf16.msra.mxu3 %v4625_v34  ;;  %v4921_v31 = vor.u32 %v5813_v21, %v4920_v20  ;;  %v4849_v34 = vor.u32 %v5795_v25, %v4848_v22  ;;  %v4696_v20 = vld [vmem:[%s9098_s1 + $0x620] sm:$0xf]  ;;  %v5757_v21 = vld [vmem:[%s9098_s1 + $0x624] sm:$0xf0]  ;;  %v3852_v22 = vld [vmem:[%s9099_s0 + $0xf0] sm:$0xf] }
  0x60   :  { %2883 = vmatpush.bf16.msra.mxu0 %v4425_v47  ;;  %v5552_v25 = vld [vmem:[%s9099_s0 + $0x150] sm:$0xf0] }
  0x61   :  { %2902 = vmatpush.bf16.msra.mxu1 %v4489_v49  ;;  %v4713_v49 = vor.u32 %v5761_v41, %v4712_v40  ;;  %v6926_v40 = vor.u32 %v5539_v10, %v3846_v11  ;;  %v5787_v41 = vld [vmem:[%s9098_s1 + $0x714] sm:$0xf0]  ;;  %v4992_v10 = vld [vmem:[%s9098_s1 + $0x870] sm:$0xf] }
  0x62   :  { %2921 = vmatpush.bf16.msra.mxu2 %v4553_v35  ;;  %v4721_v35 = vor.u32 %v5763_v27, %v4720_v26  ;;  %v5540_v26 = vld [vmem:[%s9099_s0 + $0xf4] sm:$0xf]  ;;  %v3854_v27 = vld [vmem:[%s9099_s0 + $0x154] sm:$0xf0] }
  0x63   :  { %2940 = vmatpush.bf16.msra.mxu3 %v4617_v58  ;;  %2884 = vmatmul.bf16.vlgmr.msra.gmra.mxu0 %v6792_v23  ;;  %v4832_v58 = vld [vmem:[%s9098_s1 + $0x730] sm:$0xf]  ;;  %v5831_v11 = vld [vmem:[%s9098_s1 + $0x874] sm:$0xf0] }
  0x64   :  { %2952 = vmatpush.bf16.msrb.mxu0 %v4737_v62  ;;  %2903 = vmatmul.bf16.vlgmr.msra.gmra.mxu1 %v6794_v24  ;;  %v4777_v62 = vor.u32 %v5777_v46, %v4776_v45  ;;  %v4833_v12 = vor.u32 %v5791_v59, %v4832_v58  ;;  %v6937_v45 = vor.u32 %v5552_v25, %v3852_v22  ;;  %v4880_v58 = vld [vmem:[%s9098_s1 + $0x790] sm:$0xf]  ;;  %v5847_v25 = vld [vmem:[%s9098_s1 + $0x8f4] sm:$0xf0] }
  0x65   :  { %2971 = vmatpush.bf16.msrb.mxu1 %v4801_v2  ;;  %2922 = vmatmul.bf16.vlgmr.msra.gmra.mxu2 %v6805_v28  ;;  %v4768_v2 = vld [vmem:[%s9098_s1 + $0x6b0] sm:$0xf]  ;;  %v6939_v46 = vor.u32 %v5540_v26, %v3854_v27  ;;  %v4993_v27 = vor.u32 %v5831_v11, %v4992_v10 }
  0x66   :  { %2990 = vmatpush.bf16.msrb.mxu2 %v4865_v39  ;;  %v5793_v39 = vld [vmem:[%s9098_s1 + $0x744] sm:$0xf0]  ;;  %2941 = vmatmul.bf16.vlgmr.msra.gmra.mxu3 %v6807_v29  ;;  %v5056_v22 = vld [vmem:[%s9098_s1 + $0x8f0] sm:$0xf] }
  0x67   :  { %3009 = vmatpush.bf16.msrb.mxu3 %v4929_v3  ;;  %v4841_v47 = vor.u32 %v5793_v39, %v4840_v38  ;;  %v5775_v3 = vld [vmem:[%s9098_s1 + $0x6b4] sm:$0xf0]  ;;  %v4816_v38 = vld [vmem:[%s9098_s1 + $0x710] sm:$0xf]  ;;  %v6924_v39 = vor.u32 %v5551_v7, %v3844_v4 }
  0x68   :  { %2953 = vmatpush.bf16.msrb.mxu0 %v4729_v19  ;;  %v5789_v19 = vld [vmem:[%s9098_s1 + $0x724] sm:$0xf0]  ;;  %v4817_v59 = vor.u32 %v5787_v41, %v4816_v38  ;;  %v5120_v4 = vld [vmem:[%s9098_s1 + $0x970] sm:$0xf]  ;;  %v5863_v7 = vld [vmem:[%s9098_s1 + $0x974] sm:$0xf0] }
  0x69   :  { %2972 = vmatpush.bf16.msrb.mxu1 %v4793_v30  ;;  %v4769_v30 = vor.u32 %v5775_v3, %v4768_v2  ;;  %v4680_v2 = vld [vmem:[%s9098_s1 + $0x600] sm:$0xf]  ;;  %v5753_v3 = vld [vmem:[%s9098_s1 + $0x604] sm:$0xf0]  ;;  %v5121_v26 = vor.u32 %v5863_v7, %v5120_v4  ;;  %v3760_v38 = vld [vmem:[%s9099_s0 + $0x30] sm:$0xf] }
  0x6a   :  { %2991 = vmatpush.bf16.msrb.mxu2 %v4857_v15  ;;  %v4705_v15 = vor.u32 %v5759_v61, %v4704_v60  ;;  %v5803_v61 = vld [vmem:[%s9098_s1 + $0x794] sm:$0xf0]  ;;  %v5528_v41 = vld [vmem:[%s9099_s0 + $0x90] sm:$0xf0]  ;;  %v5104_v4 = vld [vmem:[%s9098_s1 + $0x950] sm:$0xf] }
  0x6b   :  { %3010 = vmatpush.bf16.msrb.mxu3 %v4921_v31  ;;  %v4897_v31 = vor.u32 %v5807_v17, %v4896_v16  ;;  %v4744_v16 = vld [vmem:[%s9098_s1 + $0x680] sm:$0xf]  ;;  %v5769_v17 = vld [vmem:[%s9098_s1 + $0x684] sm:$0xf0]  ;;  %v5859_v7 = vld [vmem:[%s9098_s1 + $0x954] sm:$0xf0] }
  0x6c   :  { %2954 = vmatpush.bf16.msrb.mxu0 %v4721_v35  ;;  %v4697_v35 = vor.u32 %v5757_v21, %v4696_v20  ;;  %v4681_v20 = vor.u32 %v5753_v3, %v4680_v2  ;;  %v5801_v21 = vld [vmem:[%s9098_s1 + $0x784] sm:$0xf0]  ;;  %v5517_v2 = vld [vmem:[%s9099_s0 + $0x3c] sm:$0xf]  ;;  %v3770_v3 = vld [vmem:[%s9099_s0 + $0x9c] sm:$0xf0] }
  0x6d   :  { %2973 = vmatpush.bf16.msrb.mxu1 %v4785_v42  ;;  %v4688_v42 = vld [vmem:[%s9098_s1 + $0x610] sm:$0xf] }
  0x6e   :  { %2992 = vmatpush.bf16.msrb.mxu2 %v4849_v34  ;;  %v4825_v34 = vor.u32 %v5789_v19, %v4824_v18  ;;  %v4872_v18 = vld [vmem:[%s9098_s1 + $0x780] sm:$0xf] }
  0x6f   :  { %3011 = vmatpush.bf16.msrb.mxu3 %v4913_v43  ;;  %v5755_v43 = vld [vmem:[%s9098_s1 + $0x614] sm:$0xf0] }
  0x70   :  { %2955 = vmatpush.bf16.msrb.mxu0 %v4713_v49  ;;  %v4889_v49 = vor.u32 %v5805_v37, %v4888_v36  ;;  %v4689_v60 = vor.u32 %v5755_v43, %v4688_v42  ;;  %v4745_v36 = vor.u32 %v5769_v17, %v4744_v16  ;;  %v4873_v37 = vor.u32 %v5801_v21, %v4872_v18  ;;  %v5516_v42 = vld [vmem:[%s9099_s0 + $0x34] sm:$0xf]  ;;  %v3762_v43 = vld [vmem:[%s9099_s0 + $0x94] sm:$0xf0]  ;;  %v5040_v16 = vld [vmem:[%s9098_s1 + $0x8d0] sm:$0xf] }
  0x71   :  { %2974 = vmatpush.bf16.msrb.mxu1 %v4777_v62  ;;  %v4808_v62 = vld [vmem:[%s9098_s1 + $0x700] sm:$0xf]  ;;  %v7068_v17 = vor.u32 %v5528_v41, %v3760_v38  ;;  %v7070_v18 = vor.u32 %v5516_v42, %v3762_v43  ;;  %v5875_v21 = vld [vmem:[%s9098_s1 + $0x9d4] sm:$0xf0]  ;;  %v5873_v41 = vld [vmem:[%s9098_s1 + $0x9c4] sm:$0xf0] }
  0x72   :  { %2993 = vmatpush.bf16.msrb.mxu2 %v4841_v47  ;;  %v4761_v47 = vor.u32 %v5773_v33, %v4760_v32  ;;  %v5112_v32 = vld [vmem:[%s9098_s1 + $0x960] sm:$0xf]  ;;  %v5861_v33 = vld [vmem:[%s9098_s1 + $0x964] sm:$0xf0] }
  0x73   :  { %3012 = vmatpush.bf16.msrb.mxu3 %v4905_v63  ;;  %v5785_v63 = vld [vmem:[%s9098_s1 + $0x704] sm:$0xf0]  ;;  %2889 = vmatmul.bf16.gmra.mxu0 %v6924_v39  ;;  %v5160_v38 = vld [vmem:[%s9098_s1 + $0x9c0] sm:$0xf] }
  0x74   :  { %2956 = vmatpush.bf16.msrb.mxu0 %v4705_v15  ;;  %2908 = vmatmul.bf16.gmra.mxu1 %v6926_v40  ;;  %v4881_v15 = vor.u32 %v5803_v61, %v4880_v58  ;;  %v4809_v19 = vor.u32 %v5785_v63, %v4808_v62  ;;  %v5877_v61 = vld [vmem:[%s9098_s1 + $0x9e4] sm:$0xf0]  ;;  %v3768_v62 = vld [vmem:[%s9099_s0 + $0x38] sm:$0xf]  ;;  %v5529_v63 = vld [vmem:[%s9099_s0 + $0x98] sm:$0xf0] }
  0x75   :  { %2975 = vmatpush.bf16.msrb.mxu1 %v4769_v30  ;;  %2927 = vmatmul.bf16.gmra.mxu2 %v6937_v45  ;;  %v5184_v30 = vld [vmem:[%s9098_s1 + $0x9f0] sm:$0xf] }
  0x76   :  { %2994 = vmatpush.bf16.msrb.mxu2 %v4833_v12  ;;  %2946 = vmatmul.bf16.gmra.mxu3 %v6939_v46  ;;  %v4753_v12 = vor.u32 %v5771_v55, %v4752_v52  ;;  %v5048_v52 = vld [vmem:[%s9098_s1 + $0x8e0] sm:$0xf]  ;;  %v5113_v55 = vor.u32 %v5861_v33, %v5112_v32 }
  0x77   :  { %3013 = vmatpush.bf16.msrb.mxu3 %v4897_v31  ;;  %v5879_v31 = vld [vmem:[%s9098_s1 + $0x9f4] sm:$0xf0] }
  0x78   :  { %2957 = vmatpush.bf16.msrb.mxu0 %v4697_v35  ;;  %v5829_v35 = vld [vmem:[%s9098_s1 + $0x864] sm:$0xf0] }
  0x79   :  { %2976 = vmatpush.bf16.msrb.mxu1 %v4761_v47  ;;  %v5057_v47 = vor.u32 %v5847_v25, %v5056_v22  ;;  %v7081_v22 = vor.u32 %v5529_v63, %v3768_v62  ;;  %v7083_v25 = vor.u32 %v5517_v2, %v3770_v3  ;;  %v5152_v62 = vld [vmem:[%s9098_s1 + $0x9b0] sm:$0xf]  ;;  %v5871_v63 = vld [vmem:[%s9098_s1 + $0x9b4] sm:$0xf0] }
  0x7a   :  { %2995 = vmatpush.bf16.msrb.mxu2 %v4825_v34  ;;  %v4984_v34 = vld [vmem:[%s9098_s1 + $0x860] sm:$0xf] }
  0x7b   :  { %3014 = vmatpush.bf16.msrb.mxu3 %v4889_v49  ;;  %v5185_v49 = vor.u32 %v5879_v31, %v5184_v30  ;;  %v4985_v58 = vor.u32 %v5829_v35, %v4984_v34  ;;  %v5096_v30 = vld [vmem:[%s9098_s1 + $0x940] sm:$0xf]  ;;  %v5857_v31 = vld [vmem:[%s9098_s1 + $0x944] sm:$0xf0] }
  0x7c   :  { %2958 = vmatpush.bf16.msrb.mxu0 %v4689_v60  ;;  %v5176_v60 = vld [vmem:[%s9098_s1 + $0x9e0] sm:$0xf]  ;;  %v5825_v35 = vld [vmem:[%s9098_s1 + $0x844] sm:$0xf0]  ;;  %v5097_v42 = vor.u32 %v5857_v31, %v5096_v30 }
  0x7d   :  { %2977 = vmatpush.bf16.msrb.mxu1 %v4753_v12  ;;  %v5177_v11 = vor.u32 %v5877_v61, %v5176_v60  ;;  %v4976_v12 = vld [vmem:[%s9098_s1 + $0x850] sm:$0xf]  ;;  %v4968_v34 = vld [vmem:[%s9098_s1 + $0x840] sm:$0xf]  ;;  %v5839_v61 = vld [vmem:[%s9098_s1 + $0x8b4] sm:$0xf0] }
  0x7e   :  { %2996 = vmatpush.bf16.msrb.mxu2 %v4817_v59  ;;  %v5845_v59 = vld [vmem:[%s9098_s1 + $0x8e4] sm:$0xf0]  ;;  %v4969_v43 = vor.u32 %v5825_v35, %v4968_v34  ;;  %v5024_v60 = vld [vmem:[%s9098_s1 + $0x8b0] sm:$0xf]  ;;  %v5144_v30 = vld [vmem:[%s9098_s1 + $0x9a0] sm:$0xf] }
  0x7f   :  { %3015 = vmatpush.bf16.msrb.mxu3 %v4881_v15  ;;  %v5049_v10 = vor.u32 %v5845_v59, %v5048_v52  ;;  %v5827_v15 = vld [vmem:[%s9098_s1 + $0x854] sm:$0xf0]  ;;  %v5869_v31 = vld [vmem:[%s9098_s1 + $0x9a4] sm:$0xf0]  ;;  %v5542_v34 = vld [vmem:[%s9099_s0 + $0x104] sm:$0xf] }
  0x80   :  { %2959 = vmatpush.bf16.msrb.mxu0 %v4681_v20  ;;  %v5168_v20 = vld [vmem:[%s9098_s1 + $0x9d0] sm:$0xf]  ;;  %v5823_v59 = vld [vmem:[%s9098_s1 + $0x834] sm:$0xf0]  ;;  %v3870_v35 = vld [vmem:[%s9099_s0 + $0x164] sm:$0xf0] }
  0x81   :  { %2978 = vmatpush.bf16.msrb.mxu1 %v4745_v36  ;;  %v5169_v33 = vor.u32 %v5875_v21, %v5168_v20  ;;  %v5032_v36 = vld [vmem:[%s9098_s1 + $0x8c0] sm:$0xf]  ;;  %v5821_v21 = vld [vmem:[%s9098_s1 + $0x824] sm:$0xf0] }
  0x82   :  { %2997 = vmatpush.bf16.msrb.mxu2 %v4809_v19  ;;  %v5843_v19 = vld [vmem:[%s9098_s1 + $0x8d4] sm:$0xf0]  ;;  %v4952_v20 = vld [vmem:[%s9098_s1 + $0x820] sm:$0xf] }
  0x83   :  { %3016 = vmatpush.bf16.msrb.mxu3 %v4873_v37  ;;  %v5041_v32 = vor.u32 %v5843_v19, %v5040_v16  ;;  %2960 = vmatmul.bf16.vlgmr.msrb.gmra.mxu0 %v7068_v17  ;;  %v5841_v37 = vld [vmem:[%s9098_s1 + $0x8c4] sm:$0xf0]  ;;  %v5025_v16 = vor.u32 %v5839_v61, %v5024_v60  ;;  %v5153_v19 = vor.u32 %v5871_v63, %v5152_v62  ;;  %v5136_v60 = vld [vmem:[%s9098_s1 + $0x990] sm:$0xf]  ;;  %v5867_v61 = vld [vmem:[%s9098_s1 + $0x994] sm:$0xf0] }
  0x84   :  { %3028 = vmatpush.bf16.msra.mxu0 %v4993_v27  ;;  %v4977_v27 = vor.u32 %v5827_v15, %v4976_v12  ;;  %2979 = vmatmul.bf16.vlgmr.msrb.gmra.mxu1 %v7070_v18  ;;  %v5033_v52 = vor.u32 %v5841_v37, %v5032_v36  ;;  %v5541_v12 = vld [vmem:[%s9099_s0 + $0xfc] sm:$0xf]  ;;  %v3862_v15 = vld [vmem:[%s9099_s0 + $0x15c] sm:$0xf0]  ;;  %v4953_v37 = vor.u32 %v5821_v21, %v4952_v20  ;;  %v5865_v21 = vld [vmem:[%s9098_s1 + $0x984] sm:$0xf0] }
  0x85   :  { %3047 = vmatpush.bf16.msra.mxu1 %v5057_v47  ;;  %2998 = vmatmul.bf16.vlgmr.msrb.gmra.mxu2 %v7081_v22  ;;  %v5088_v47 = vld [vmem:[%s9098_s1 + $0x930] sm:$0xf]  ;;  %v7215_v63 = vor.u32 %v5542_v34, %v3870_v35  ;;  %v5128_v20 = vld [vmem:[%s9098_s1 + $0x980] sm:$0xf]  ;;  %v5911_v35 = vld [vmem:[%s9098_s1 + $0xaf4] sm:$0xf0] }
  0x86   :  { %3066 = vmatpush.bf16.msra.mxu2 %v5121_v26  ;;  %v5105_v26 = vor.u32 %v5859_v7, %v5104_v4  ;;  %3017 = vmatmul.bf16.vlgmr.msrb.gmra.mxu3 %v7083_v25  ;;  %v5080_v4 = vld [vmem:[%s9098_s1 + $0x920] sm:$0xf]  ;;  %v5853_v7 = vld [vmem:[%s9098_s1 + $0x924] sm:$0xf0] }
  0x87   :  { %3085 = vmatpush.bf16.msra.mxu3 %v5185_v49  ;;  %v5855_v49 = vld [vmem:[%s9098_s1 + $0x934] sm:$0xf0]  ;;  %v5081_v36 = vor.u32 %v5853_v7, %v5080_v4  ;;  %9118 = vst [vmem:[#allocation2_spill] sm:$0xff] %v7215_v63  ;;  %v5849_v7 = vld [vmem:[%s9098_s1 + $0x904] sm:$0xf0] }
  0x88   :  { %3029 = vmatpush.bf16.msra.mxu0 %v4985_v58  ;;  %v4960_v58 = vld [vmem:[%s9098_s1 + $0x830] sm:$0xf]  ;;  %v5089_v2 = vor.u32 %v5855_v49, %v5088_v47  ;;  %v5819_v49 = vld [vmem:[%s9098_s1 + $0x814] sm:$0xf0] }
  0x89   :  { %3048 = vmatpush.bf16.msra.mxu1 %v5049_v10  ;;  %v4961_v3 = vor.u32 %v5823_v59, %v4960_v58  ;;  %v3860_v10 = vld [vmem:[%s9099_s0 + $0xf8] sm:$0xf]  ;;  %v4944_v47 = vld [vmem:[%s9098_s1 + $0x810] sm:$0xf]  ;;  %v7202_v58 = vor.u32 %v5541_v12, %v3862_v15  ;;  %v5137_v15 = vor.u32 %v5867_v61, %v5136_v60  ;;  %v5240_v61 = vld [vmem:[%s9098_s1 + $0xa60] sm:$0xf] }
  0x8a   :  { %3067 = vmatpush.bf16.msra.mxu2 %v5113_v55  ;;  %v5161_v55 = vor.u32 %v5873_v41, %v5160_v38  ;;  %v5072_v38 = vld [vmem:[%s9098_s1 + $0x910] sm:$0xf]  ;;  %v5851_v41 = vld [vmem:[%s9098_s1 + $0x914] sm:$0xf0]  ;;  %v4945_v4 = vor.u32 %v5819_v49, %v4944_v47  ;;  %v5368_v49 = vld [vmem:[%s9098_s1 + $0xb60] sm:$0xf] }
  0x8b   :  { %3086 = vmatpush.bf16.msra.mxu3 %v5177_v11  ;;  %v5553_v11 = vld [vmem:[%s9099_s0 + $0x158] sm:$0xf0]  ;;  %v5835_v59 = vld [vmem:[%s9098_s1 + $0x894] sm:$0xf0] }
  0x8c   :  { %3030 = vmatpush.bf16.msra.mxu0 %v4977_v27  ;;  %v5837_v27 = vld [vmem:[%s9098_s1 + $0x8a4] sm:$0xf0] }
  0x8d   :  { %3049 = vmatpush.bf16.msra.mxu1 %v5041_v32  ;;  %v3868_v32 = vld [vmem:[%s9099_s0 + $0x100] sm:$0xf] }
  0x8e   :  { %3068 = vmatpush.bf16.msra.mxu2 %v5105_v26  ;;  %v5016_v26 = vld [vmem:[%s9098_s1 + $0x8a0] sm:$0xf] }
  0x8f   :  { %3087 = vmatpush.bf16.msra.mxu3 %v5169_v33  ;;  %v5554_v33 = vld [vmem:[%s9099_s0 + $0x160] sm:$0xf0] }
  0x90   :  { %3031 = vmatpush.bf16.msra.mxu0 %v4969_v43  ;;  %v5145_v43 = vor.u32 %v5869_v31, %v5144_v30  ;;  %v7213_v62 = vor.u32 %v5554_v33, %v3868_v32  ;;  %v5248_v30 = vld [vmem:[%s9098_s1 + $0xa70] sm:$0xf]  ;;  %v5895_v31 = vld [vmem:[%s9098_s1 + $0xa74] sm:$0xf0] }
  0x91   :  { %3050 = vmatpush.bf16.msra.mxu1 %v5033_v52  ;;  %v5008_v52 = vld [vmem:[%s9098_s1 + $0x890] sm:$0xf]  ;;  %v5249_v47 = vor.u32 %v5895_v31, %v5248_v30  ;;  %v5519_v30 = vld [vmem:[%s9099_s0 + $0x4c] sm:$0xf] }
  0x92   :  { %3069 = vmatpush.bf16.msra.mxu2 %v5097_v42  ;;  %v5017_v42 = vor.u32 %v5837_v27, %v5016_v26  ;;  %v5009_v12 = vor.u32 %v5835_v59, %v5008_v52  ;;  %v5376_v26 = vld [vmem:[%s9098_s1 + $0xb70] sm:$0xf]  ;;  %v5927_v27 = vld [vmem:[%s9098_s1 + $0xb74] sm:$0xf0]  ;;  %v5925_v52 = vld [vmem:[%s9098_s1 + $0xb64] sm:$0xf0] }
  0x93   :  { %3088 = vmatpush.bf16.msra.mxu3 %v5161_v55  ;;  %v7200_v55 = vor.u32 %v5553_v11, %v3860_v10  ;;  %v4936_v10 = vld [vmem:[%s9098_s1 + $0x800] sm:$0xf]  ;;  %v5817_v11 = vld [vmem:[%s9098_s1 + $0x804] sm:$0xf0]  ;;  %v5312_v32 = vld [vmem:[%s9098_s1 + $0xaf0] sm:$0xf] }
  0x94   :  { %3032 = vmatpush.bf16.msra.mxu0 %v4961_v3  ;;  %v5073_v3 = vor.u32 %v5851_v41, %v5072_v38  ;;  %2984 = vmatmul.bf16.gmra.mxu1 %v7202_v58  ;;  %v4937_v34 = vor.u32 %v5817_v11, %v4936_v10  ;;  %v5129_v41 = vor.u32 %v5865_v21, %v5128_v20  ;;  %v5941_v10 = vld [vmem:[%s9098_s1 + $0xbe4] sm:$0xf0] }
  0x95   :  { %3051 = vmatpush.bf16.msra.mxu1 %v5025_v16  ;;  %v5000_v16 = vld [vmem:[%s9098_s1 + $0x880] sm:$0xf]  ;;  %2965 = vmatmul.bf16.gmra.mxu0 %v7200_v55  ;;  %v5313_v59 = vor.u32 %v5911_v35, %v5312_v32  ;;  %v5369_v20 = vor.u32 %v5925_v52, %v5368_v49  ;;  %v5923_v35 = vld [vmem:[%s9098_s1 + $0xb54] sm:$0xf0]  ;;  %v5424_v49 = vld [vmem:[%s9098_s1 + $0xbd0] sm:$0xf] }
  0x96   :  { %3070 = vmatpush.bf16.msra.mxu2 %v5089_v2  ;;  %v5064_v2 = vld [vmem:[%s9098_s1 + $0x900] sm:$0xf]  ;;  %3022 = vmatmul.bf16.gmra.mxu3 %v7215_v63  ;;  %v5939_v52 = vld [vmem:[%s9098_s1 + $0xbd4] sm:$0xf0] }
  0x97   :  { %3089 = vmatpush.bf16.msra.mxu3 %v5153_v19  ;;  %v5833_v19 = vld [vmem:[%s9098_s1 + $0x884] sm:$0xf0]  ;;  %3003 = vmatmul.bf16.gmra.mxu2 %v7213_v62  ;;  %v5065_v33 = vor.u32 %v5849_v7, %v5064_v2  ;;  %v5432_v7 = vld [vmem:[%s9098_s1 + $0xbe0] sm:$0xf] }
  0x98   :  { %3033 = vmatpush.bf16.msra.mxu0 %v4953_v37  ;;  %v5943_v37 = vld [vmem:[%s9098_s1 + $0xbf4] sm:$0xf0]  ;;  %v5001_v38 = vor.u32 %v5833_v19, %v5000_v16  ;;  %v5893_v2 = vld [vmem:[%s9098_s1 + $0xa64] sm:$0xf0]  ;;  %v5518_v16 = vld [vmem:[%s9099_s0 + $0x44] sm:$0xf]  ;;  %v5433_v32 = vor.u32 %v5941_v10, %v5432_v7 }
  0x99   :  { %3052 = vmatpush.bf16.msra.mxu1 %v5017_v42  ;;  %v466_v42 = vld [vmem:[%s9100_s2] sm:$0x3]  ;;  %v3778_v19 = vld [vmem:[%s9099_s0 + $0xa4] sm:$0xf0]  ;;  %v5241_v21 = vor.u32 %v5893_v2, %v5240_v61 }
  0x9a   :  { %3071 = vmatpush.bf16.msra.mxu2 %v5081_v36  ;;  %v5440_v36 = vld [vmem:[%s9098_s1 + $0xbf0] sm:$0xf]  ;;  %v7296_v11 = vperm.slane %v466_v42, 0  ;;  %v5352_v7 = vld [vmem:[%s9098_s1 + $0xb40] sm:$0xf] }
  0x9b   :  { %3090 = vmatpush.bf16.msra.mxu3 %v5145_v43  ;;  %v5377_v43 = vor.u32 %v5927_v27, %v5376_v26  ;;  %v5441_v60 = vor.u32 %v5943_v37, %v5440_v36  ;;  %v3784_v26 = vld [vmem:[%s9099_s0 + $0x48] sm:$0xf]  ;;  %v5531_v27 = vld [vmem:[%s9099_s0 + $0xa8] sm:$0xf0]  ;;  %v5232_v36 = vld [vmem:[%s9098_s1 + $0xa50] sm:$0xf] }
  0x9c   :  { %3034 = vmatpush.bf16.msra.mxu0 %v4945_v4  ;;  %v5909_v4 = vld [vmem:[%s9098_s1 + $0xae4] sm:$0xf0]  ;;  %v5891_v37 = vld [vmem:[%s9098_s1 + $0xa54] sm:$0xf0]  ;;  %v7351_v61 = vor.u32 %v5531_v27, %v3784_v26  ;;  %v5416_v27 = vld [vmem:[%s9098_s1 + $0xbc0] sm:$0xf] }
  0x9d   :  { %3053 = vmatpush.bf16.msra.mxu1 %v5009_v12  ;;  %v3776_v12 = vld [vmem:[%s9099_s0 + $0x40] sm:$0xf]  ;;  %v5921_v10 = vld [vmem:[%s9098_s1 + $0xb44] sm:$0xf0] }
  0x9e   :  { %3072 = vmatpush.bf16.msra.mxu2 %v5073_v3  ;;  %v5304_v3 = vld [vmem:[%s9098_s1 + $0xae0] sm:$0xf]  ;;  %9121 = vst [vmem:[#allocation5_spill] sm:$0xff] %v7351_v61  ;;  %v5905_v26 = vld [vmem:[%s9098_s1 + $0xac4] sm:$0xf0] }
  0x9f   :  { %3091 = vmatpush.bf16.msra.mxu3 %v5137_v15  ;;  %v5530_v15 = vld [vmem:[%s9099_s0 + $0xa0] sm:$0xf0]  ;;  %v5305_v31 = vor.u32 %v5909_v4, %v5304_v3  ;;  %v5233_v4 = vor.u32 %v5891_v37, %v5232_v36 }
  0xa0   :  { %3035 = vmatpush.bf16.msra.mxu0 %v4937_v34  ;;  %v5360_v34 = vld [vmem:[%s9098_s1 + $0xb50] sm:$0xf]  ;;  %v7337_v42 = vor.u32 %v5530_v15, %v3776_v12 }
  0xa1   :  { %3054 = vmatpush.bf16.msra.mxu1 %v5001_v38  ;;  %v5296_v38 = vld [vmem:[%s9098_s1 + $0xad0] sm:$0xf]  ;;  %v5361_v3 = vor.u32 %v5923_v35, %v5360_v34  ;;  %v5919_v34 = vld [vmem:[%s9098_s1 + $0xb34] sm:$0xf0] }
  0xa2   :  { %3073 = vmatpush.bf16.msra.mxu2 %v5065_v33  ;;  %v3786_v33 = vld [vmem:[%s9099_s0 + $0xac] sm:$0xf0]  ;;  %9119 = vst [vmem:[#allocation3_spill] sm:$0xff] %v7337_v42 }
  0xa3   :  { %3092 = vmatpush.bf16.msra.mxu3 %v5129_v41  ;;  %v2733_v41 = vpop.f32.mrf.mxu0  ;;  %v7353_v2 = vor.u32 %v5519_v30, %v3786_v33  ;;  %v5937_v30 = vld [vmem:[%s9098_s1 + $0xbc4] sm:$0xf0]  ;;  %v5344_v33 = vld [vmem:[%s9098_s1 + $0xb30] sm:$0xf] }
  0xa4   :  { %3104 = vmatpush.bf16.msrb.mxu0 %v5249_v47  ;;  %v5907_v47 = vld [vmem:[%s9098_s1 + $0xad4] sm:$0xf0]  ;;  %v5417_v37 = vor.u32 %v5937_v30, %v5416_v27  ;;  %v5555_v27 = vld [vmem:[%s9099_s0 + $0x168] sm:$0xf0] }
  0xa5   :  { %3123 = vmatpush.bf16.msrb.mxu1 %v5313_v59  ;;  %v2734_v59 = vadd.f32 %v2733_v41, %v7296_v11  ;;  %9122 = vst [vmem:[#allocation6_spill] sm:$0xff] %v7353_v2  ;;  %v5297_v15 = vor.u32 %v5907_v47, %v5296_v38  ;;  %3036 = vmatmul.bf16.vlgmr.msra.gmra.mxu0 %v7337_v42  ;;  %v5216_v38 = vld [vmem:[%s9098_s1 + $0xa30] sm:$0xf]  ;;  %v5887_v41 = vld [vmem:[%s9098_s1 + $0xa34] sm:$0xf0] }
  0xa6   :  { %3142 = vmatpush.bf16.msrb.mxu2 %v5377_v43  ;;  %v7339_v43 = vor.u32 %v5518_v16, %v3778_v19  ;;  %v5425_v16 = vor.u32 %v5939_v52, %v5424_v49  ;;  %v5224_v19 = vld [vmem:[%s9098_s1 + $0xa40] sm:$0xf]  ;;  %3093 = vmatmul.bf16.vlgmr.msra.gmra.mxu3 %v7353_v2  ;;  %v5280_v47 = vld [vmem:[%s9098_s1 + $0xab0] sm:$0xf]  ;;  %v5543_v30 = vld [vmem:[%s9099_s0 + $0x10c] sm:$0xf] }
  0xa7   :  { %3161 = vmatpush.bf16.msrb.mxu3 %v5441_v60  ;;  %v2752_v60 = vpop.f32.mrf.mxu1  ;;  %3074 = vmatmul.bf16.vlgmr.msra.gmra.mxu2 %v7351_v61 }
  0xa8   :  { %9120 = vst [vmem:[#allocation4_spill] sm:$0xff] %v7339_v43  ;;  %3105 = vmatpush.bf16.msrb.mxu0 %v5241_v21  ;;  %v2753_v12 = vadd.f32 %v2752_v60, %v2734_v59  ;;  %v5288_v21 = vld [vmem:[%s9098_s1 + $0xac0] sm:$0xf]  ;;  %3055 = vmatmul.bf16.vlgmr.msra.gmra.mxu1 %v7339_v43  ;;  %v2771_v35 = vpop.f32.mrf.mxu2  ;;  %v5903_v60 = vld [vmem:[%s9098_s1 + $0xab4] sm:$0xf0] }
  0xa9   :  { %3124 = vmatpush.bf16.msrb.mxu1 %v5305_v31  ;;  %v5353_v31 = vor.u32 %v5921_v10, %v5352_v7  ;;  %v5289_v36 = vor.u32 %v5905_v26, %v5288_v21  ;;  %v2790_v52 = vpop.f32.mrf.mxu3  ;;  %v3876_v26 = vld [vmem:[%s9099_s0 + $0x108] sm:$0xf] }
  0xaa   :  { %3143 = vmatpush.bf16.msrb.mxu2 %v5369_v20  ;;  %v5889_v20 = vld [vmem:[%s9098_s1 + $0xa44] sm:$0xf0]  ;;  %v2772_v49 = vadd.f32 %v2771_v35, %v2753_v12  ;;  %v5345_v12 = vor.u32 %v5919_v34, %v5344_v33  ;;  %v5208_v34 = vld [vmem:[%s9098_s1 + $0xa20] sm:$0xf]  ;;  %v7473_v61 = vor.u32 %v5555_v27, %v3876_v26 }
  0xab   :  { %3162 = vmatpush.bf16.msrb.mxu3 %v5433_v32  ;;  %v5225_v32 = vor.u32 %v5889_v20, %v5224_v19  ;;  %v2735_v59 = vpop.f32.mrf.mxu0  ;;  %v5336_v19 = vld [vmem:[%s9098_s1 + $0xb20] sm:$0xf]  ;;  %v5917_v20 = vld [vmem:[%s9098_s1 + $0xb24] sm:$0xf0] }
  0xac   :  { %3106 = vmatpush.bf16.msrb.mxu0 %v5233_v4  ;;  %v5935_v4 = vld [vmem:[%s9098_s1 + $0xbb4] sm:$0xf0]  ;;  %v2736_v7 = vadd.f32 %v2735_v59, %v7296_v11  ;;  %v5885_v35 = vld [vmem:[%s9098_s1 + $0xa24] sm:$0xf0]  ;;  %9123 = vst [vmem:[#allocation7_spill] sm:$0xff] %v7473_v61 }
  0xad   :  { %3125 = vmatpush.bf16.msrb.mxu1 %v5297_v15  ;;  %v7408_v15 = vadd.f32 %v2790_v52, %v2772_v49  ;;  %v5556_v49 = vld [vmem:[%s9099_s0 + $0x170] sm:$0xf0]  ;;  %v3886_v59 = vld [vmem:[%s9099_s0 + $0x174] sm:$0xf0]  ;;  %v5320_v27 = vld [vmem:[%s9098_s1 + $0xb00] sm:$0xf] }
  0xae   :  { %3144 = vmatpush.bf16.msrb.mxu2 %v5361_v3  ;;  %v5408_v3 = vld [vmem:[%s9098_s1 + $0xbb0] sm:$0xf]  ;;  %v5544_v52 = vld [vmem:[%s9099_s0 + $0x114] sm:$0xf]  ;;  %v5913_v43 = vld [vmem:[%s9098_s1 + $0xb04] sm:$0xf0] }
  0xaf   :  { %3163 = vmatpush.bf16.msrb.mxu3 %v5425_v16  ;;  %v2754_v10 = vpop.f32.mrf.mxu1  ;;  %v5217_v16 = vor.u32 %v5887_v41, %v5216_v38  ;;  %v5409_v33 = vor.u32 %v5935_v4, %v5408_v3  ;;  %v5400_v38 = vld [vmem:[%s9098_s1 + $0xba0] sm:$0xf]  ;;  %v5933_v41 = vld [vmem:[%s9098_s1 + $0xba4] sm:$0xf0]  ;;  %v5209_v3 = vor.u32 %v5885_v35, %v5208_v34  ;;  %v5328_v4 = vld [vmem:[%s9098_s1 + $0xb10] sm:$0xf]  ;;  %v7489_v26 = vor.u32 %v5544_v52, %v3886_v59 }
  0xb0   :  { %3107 = vmatpush.bf16.msrb.mxu0 %v5225_v32  ;;  %v2755_v21 = vadd.f32 %v2754_v10, %v2736_v7  ;;  %v5281_v32 = vor.u32 %v5903_v60, %v5280_v47  ;;  %v3884_v47 = vld [vmem:[%s9099_s0 + $0x110] sm:$0xf]  ;;  %v5337_v60 = vor.u32 %v5917_v20, %v5336_v19  ;;  %v5915_v7 = vld [vmem:[%s9098_s1 + $0xb14] sm:$0xf0]  ;;  %v2773_v10 = vpop.f32.mrf.mxu2  ;;  %v5401_v63 = vor.u32 %v5933_v41, %v5400_v38 }
  0xb1   :  { %3126 = vmatpush.bf16.msrb.mxu1 %v5289_v36  ;;  %v5272_v36 = vld [vmem:[%s9098_s1 + $0xaa0] sm:$0xf]  ;;  %v5264_v19 = vld [vmem:[%s9098_s1 + $0xa90] sm:$0xf]  ;;  %v2792_v34 = vpop.f32.mrf.mxu3  ;;  %v7487_v41 = vor.u32 %v5556_v49, %v3884_v47  ;;  %9126 = vst [vmem:[#allocation10_spill] sm:$0xff] %v7489_v26 }
  0xb2   :  { %3145 = vmatpush.bf16.msrb.mxu2 %v5353_v31  ;;  %v3878_v31 = vld [vmem:[%s9099_s0 + $0x16c] sm:$0xf0]  ;;  %v2774_v20 = vadd.f32 %v2773_v10, %v2755_v21  ;;  %v5192_v47 = vld [vmem:[%s9098_s1 + $0xa00] sm:$0xf]  ;;  %v5881_v49 = vld [vmem:[%s9098_s1 + $0xa04] sm:$0xf0] }
  0xb3   :  { %3164 = vmatpush.bf16.msrb.mxu3 %v5417_v37  ;;  %v5901_v37 = vld [vmem:[%s9098_s1 + $0xaa4] sm:$0xf0]  ;;  %v2738_v35 = vpop.f32.mrf.mxu0  ;;  %9125 = vst [vmem:[#allocation9_spill] sm:$0xff] %v7487_v41 }
  0xb4   :  { %3108 = vmatpush.bf16.msrb.mxu0 %v5217_v16  ;;  %v5273_v2 = vor.u32 %v5901_v37, %v5272_v36  ;;  %v5883_v16 = vld [vmem:[%s9098_s1 + $0xa14] sm:$0xf0]  ;;  %v5392_v36 = vld [vmem:[%s9098_s1 + $0xb90] sm:$0xf]  ;;  %v2739_v21 = vadd.f32 %v2738_v35, %v7296_v11  ;;  %v5193_v35 = vor.u32 %v5881_v49, %v5192_v47 }
  0xb5   :  { %3127 = vmatpush.bf16.msrb.mxu1 %v5281_v32  ;;  %v7475_v32 = vor.u32 %v5543_v30, %v3878_v31  ;;  %v5931_v37 = vld [vmem:[%s9098_s1 + $0xb94] sm:$0xf0]  ;;  %v7494_v30 = vadd.f32 %v2792_v34, %v2774_v20  ;;  %v5329_v31 = vor.u32 %v5915_v7, %v5328_v4  ;;  %v5897_v4 = vld [vmem:[%s9098_s1 + $0xa84] sm:$0xf0]  ;;  %v5384_v7 = vld [vmem:[%s9098_s1 + $0xb80] sm:$0xf]  ;;  %3041 = vmatmul.bf16.gmra.mxu0 %v7473_v61 }
  0xb6   :  { %3146 = vmatpush.bf16.msrb.mxu2 %v5345_v12  ;;  %v5200_v12 = vld [vmem:[%s9098_s1 + $0xa10] sm:$0xf]  ;;  %3098 = vmatmul.bf16.gmra.mxu3 %v7489_v26  ;;  %v5574_v20 = vld [vmem:[%s9098_s1 + $0x74] sm:$0xf]  ;;  %v5321_v34 = vor.u32 %v5913_v43, %v5320_v27  ;;  %v5588_v26 = vld [vmem:[%s9098_s1 + $0xe4] sm:$0xf] }
  0xb7   :  { %3165 = vmatpush.bf16.msrb.mxu3 %v5409_v33  ;;  %9124 = vst [vmem:[#allocation8_spill] sm:$0xff] %v7475_v32  ;;  %v5899_v33 = vld [vmem:[%s9098_s1 + $0xa94] sm:$0xf0]  ;;  %v2757_v38 = vpop.f32.mrf.mxu1  ;;  %v5201_v10 = vor.u32 %v5883_v16, %v5200_v12  ;;  %v4034_v12 = vld [vmem:[%s9098_s1 + $0xf8] sm:$0xf0]  ;;  %3079 = vmatmul.bf16.gmra.mxu2 %v7487_v41 }
  0xb8   :  { %3109 = vmatpush.bf16.msrb.mxu0 %v5209_v3  ;;  %v2758_v52 = vadd.f32 %v2757_v38, %v2739_v21  ;;  %v5265_v59 = vor.u32 %v5899_v33, %v5264_v19  ;;  %v5256_v3 = vld [vmem:[%s9098_s1 + $0xa80] sm:$0xf]  ;;  %3060 = vmatmul.bf16.gmra.mxu1 %v7475_v32  ;;  %v5504_v16 = vld [vmem:[%s9098_s1 + $0xc70] sm:$0xf]  ;;  %v5959_v19 = vld [vmem:[%s9098_s1 + $0xc74] sm:$0xf0]  ;;  %v2776_v21 = vpop.f32.mrf.mxu2 }
  0xb9   :  { %3128 = vmatpush.bf16.msrb.mxu1 %v5273_v2  ;;  %v5590_v2 = vld [vmem:[%s9098_s1 + $0xf4] sm:$0xf]  ;;  %v3970_v33 = vld [vmem:[%s9098_s1 + $0x78] sm:$0xf0]  ;;  %v5257_v38 = vor.u32 %v5897_v4, %v5256_v3  ;;  %v2795_v43 = vpop.f32.mrf.mxu3  ;;  %v5505_v49 = vor.u32 %v5959_v19, %v5504_v16  ;;  %v4026_v41 = vld [vmem:[%s9098_s1 + $0xe8] sm:$0xf0] }
  0xba   :  { %3147 = vmatpush.bf16.msrb.mxu2 %v5337_v60  ;;  %v5393_v60 = vor.u32 %v5931_v37, %v5392_v36  ;;  %v5606_v36 = vld [vmem:[%s9098_s1 + $0x174] sm:$0xf]  ;;  %v4098_v37 = vld [vmem:[%s9098_s1 + $0x178] sm:$0xf0]  ;;  %v4037_v47 = vor.u32 %v5590_v2, %v4034_v12  ;;  %v5957_v3 = vld [vmem:[%s9098_s1 + $0xc64] sm:$0xf0] }
  0xbb   :  { %3166 = vmatpush.bf16.msrb.mxu3 %v5401_v63  ;;  %v5929_v63 = vld [vmem:[%s9098_s1 + $0xb84] sm:$0xf0]  ;;  %v2740_v27 = vpop.f32.mrf.mxu0  ;;  %v5572_v4 = vld [vmem:[%s9098_s1 + $0x64] sm:$0xf]  ;;  %v4090_v2 = vld [vmem:[%s9098_s1 + $0x168] sm:$0xf0] }
  0xbc   :  { %3110 = vmatpush.bf16.msrb.mxu0 %v5201_v10  ;;  %v2777_v10 = vadd.f32 %v2776_v21, %v2758_v52  ;;  %v2741_v32 = vadd.f32 %v2740_v27, %v7296_v11  ;;  %v5496_v52 = vld [vmem:[%s9098_s1 + $0xc60] sm:$0xf]  ;;  %v3962_v11 = vld [vmem:[%s9098_s1 + $0x68] sm:$0xf0]  ;;  %v3792_v16 = vld [vmem:[%s9099_s0 + $0x50] sm:$0xf] }
  0xbd   :  { %3129 = vmatpush.bf16.msrb.mxu1 %v5265_v59  ;;  %v3973_v59 = vor.u32 %v5574_v20, %v3970_v33  ;;  %v5532_v19 = vld [vmem:[%s9099_s0 + $0xb0] sm:$0xf0]  ;;  %v5533_v33 = vld [vmem:[%s9099_s0 + $0xb8] sm:$0xf0] }
  0xbe   :  { %3148 = vmatpush.bf16.msrb.mxu2 %v5329_v31  ;;  %v5385_v31 = vor.u32 %v5929_v63, %v5384_v7  ;;  %v7561_v7 = vadd.f32 %v2795_v43, %v2777_v10  ;;  %v5604_v63 = vld [vmem:[%s9098_s1 + $0x164] sm:$0xf]  ;;  %v5520_v20 = vld [vmem:[%s9099_s0 + $0x54] sm:$0xf]  ;;  %v5488_v10 = vld [vmem:[%s9098_s1 + $0xc50] sm:$0xf] }
  0xbf   :  { %3167 = vmatpush.bf16.msrb.mxu3 %v5393_v60  ;;  %v2759_v61 = vpop.f32.mrf.mxu1  ;;  %v4101_v60 = vor.u32 %v5606_v36, %v4098_v37  ;;  %v5521_v36 = vld [vmem:[%s9099_s0 + $0x5c] sm:$0xf]  ;;  %v3965_v37 = vor.u32 %v5572_v4, %v3962_v11  ;;  %v4093_v21 = vor.u32 %v5604_v63, %v4090_v2  ;;  %v5955_v43 = vld [vmem:[%s9098_s1 + $0xc54] sm:$0xf0]  ;;  %v5570_v27 = vld [vmem:[%s9098_s1 + $0x54] sm:$0xf] }
  0xc0   :  { %3111 = vmatpush.bf16.msrb.mxu0 %v5193_v35  ;;  %v2760_v12 = vadd.f32 %v2759_v61, %v2741_v32  ;;  %v4029_v61 = vor.u32 %v5588_v26, %v4026_v41  ;;  %v5497_v32 = vor.u32 %v5957_v3, %v5496_v52  ;;  %v3800_v35 = vld [vmem:[%s9099_s0 + $0x58] sm:$0xf]  ;;  %v3802_v41 = vld [vmem:[%s9099_s0 + $0xbc] sm:$0xf0]  ;;  %v5586_v26 = vld [vmem:[%s9098_s1 + $0xd4] sm:$0xf] }
  0xc1   :  { %3130 = vmatpush.bf16.msrb.mxu1 %v5257_v38  ;;  %v4018_v38 = vld [vmem:[%s9098_s1 + $0xd8] sm:$0xf0]  ;;  %v5602_v3 = vld [vmem:[%s9098_s1 + $0x154] sm:$0xf]  ;;  %v7624_v2 = vor.u32 %v5533_v33, %v3800_v35 }
  0xc2   :  { %3149 = vmatpush.bf16.msrb.mxu2 %v5321_v34  ;;  %v3794_v34 = vld [vmem:[%s9099_s0 + $0xb4] sm:$0xf0]  ;;  %v3954_v52 = vld [vmem:[%s9098_s1 + $0x58] sm:$0xf0] }
  0xc3   :  { %3168 = vmatpush.bf16.msrb.mxu3 %v5385_v31  ;;  %v2778_v31 = vpop.f32.mrf.mxu2  ;;  %v4082_v4 = vld [vmem:[%s9098_s1 + $0x158] sm:$0xf0]  ;;  %v2809_v11 = vpop.f32.mrf.mxu0  ;;  %9129 = vst [vmem:[#allocation13_spill] sm:$0xff] %v7624_v2  ;;  %v3957_v35 = vor.u32 %v5570_v27, %v3954_v52  ;;  %v5472_v52 = vld [vmem:[%s9098_s1 + $0xc30] sm:$0xf] }
  0xc4   :  { %3180 = vmatpush.bf16.msra.mxu0 %v5505_v49  ;;  %v2797_v49 = vpop.f32.mrf.mxu3  ;;  %v4085_v33 = vor.u32 %v5602_v3, %v4082_v4  ;;  %v4002_v27 = vld [vmem:[%s9098_s1 + $0xb8] sm:$0xf0]  ;;  %v5951_v3 = vld [vmem:[%s9098_s1 + $0xc34] sm:$0xf0]  ;;  %v5566_v4 = vld [vmem:[%s9098_s1 + $0x34] sm:$0xf] }
  0xc5   :  { %3199 = vmatpush.bf16.msra.mxu1 %v3973_v59  ;;  %v7611_v59 = vor.u32 %v5532_v19, %v3792_v16  ;;  %v2810_v19 = vadd.f32 %v2809_v11, %v7408_v15  ;;  %v5953_v15 = vld [vmem:[%s9098_s1 + $0xc44] sm:$0xf0] }
  0xc6   :  { %3218 = vmatpush.bf16.msra.mxu2 %v4037_v47  ;;  %v2779_v47 = vadd.f32 %v2778_v31, %v2760_v12  ;;  %v7626_v12 = vor.u32 %v5521_v36, %v3802_v41  ;;  %v5480_v36 = vld [vmem:[%s9098_s1 + $0xc40] sm:$0xf]  ;;  %v3946_v41 = vld [vmem:[%s9098_s1 + $0x48] sm:$0xf0] }
  0xc7   :  { %3237 = vmatpush.bf16.msra.mxu3 %v4101_v60  ;;  %9127 = vst [vmem:[#allocation11_spill] sm:$0xff] %v7611_v59  ;;  %v7613_v60 = vor.u32 %v5520_v20, %v3794_v34  ;;  %v2828_v63 = vpop.f32.mrf.mxu1  ;;  %v4021_v20 = vor.u32 %v5586_v26, %v4018_v38  ;;  %v5489_v34 = vor.u32 %v5955_v43, %v5488_v10  ;;  %v5600_v26 = vld [vmem:[%s9098_s1 + $0x144] sm:$0xf]  ;;  %v4074_v38 = vld [vmem:[%s9098_s1 + $0x148] sm:$0xf0] }
  0xc8   :  { %3181 = vmatpush.bf16.msra.mxu0 %v5497_v32  ;;  %9130 = vst [vmem:[#allocation14_spill] sm:$0xff] %v7626_v12  ;;  %v7628_v16 = vadd.f32 %v2797_v49, %v2779_v47  ;;  %v4010_v32 = vld [vmem:[%s9098_s1 + $0xc8] sm:$0xf0]  ;;  %3150 = vmatmul.bf16.vlgmr.msrb.gmra.mxu2 %v7624_v2  ;;  %v5481_v10 = vor.u32 %v5953_v15, %v5480_v36  ;;  %v5582_v43 = vld [vmem:[%s9098_s1 + $0xb4] sm:$0xf] }
  0xc9   :  { %9128 = vst [vmem:[#allocation12_spill] sm:$0xff] %v7613_v60  ;;  %3200 = vmatpush.bf16.msra.mxu1 %v3965_v37  ;;  %v5568_v37 = vld [vmem:[%s9098_s1 + $0x44] sm:$0xf]  ;;  %3112 = vmatmul.bf16.vlgmr.msrb.gmra.mxu0 %v7611_v59  ;;  %v4077_v49 = vor.u32 %v5600_v26, %v4074_v38  ;;  %v4005_v36 = vor.u32 %v5582_v43, %v4002_v27  ;;  %v5545_v38 = vld [vmem:[%s9099_s0 + $0x11c] sm:$0xf] }
  0xca   :  { %3219 = vmatpush.bf16.msra.mxu2 %v4029_v61  ;;  %v5584_v61 = vld [vmem:[%s9098_s1 + $0xc4] sm:$0xf]  ;;  %3131 = vmatmul.bf16.vlgmr.msrb.gmra.mxu1 %v7613_v60  ;;  %v3949_v47 = vor.u32 %v5568_v37, %v3946_v41  ;;  %v5473_v15 = vor.u32 %v5951_v3, %v5472_v52  ;;  %v3994_v41 = vld [vmem:[%s9098_s1 + $0xa8] sm:$0xf0]  ;;  %v5464_v27 = vld [vmem:[%s9098_s1 + $0xc20] sm:$0xf] }
  0xcb   :  { %3238 = vmatpush.bf16.msra.mxu3 %v4093_v21  ;;  %v2829_v21 = vadd.f32 %v2828_v63, %v2810_v19  ;;  %v4013_v31 = vor.u32 %v5584_v61, %v4010_v32  ;;  %v2847_v11 = vpop.f32.mrf.mxu2  ;;  %v3938_v19 = vld [vmem:[%s9098_s1 + $0x38] sm:$0xf0]  ;;  %v2811_v32 = vpop.f32.mrf.mxu0  ;;  %v5580_v37 = vld [vmem:[%s9098_s1 + $0xa4] sm:$0xf]  ;;  %v3930_v3 = vld [vmem:[%s9098_s1 + $0x28] sm:$0xf0] }
  0xcc   :  { %3169 = vmatmul.bf16.vlgmr.msrb.gmra.mxu3 %v7626_v12  ;;  %3182 = vmatpush.bf16.msra.mxu0 %v5489_v34  ;;  %v2866_v63 = vpop.f32.mrf.mxu3  ;;  %v4066_v34 = vld [vmem:[%s9098_s1 + $0x138] sm:$0xf0]  ;;  %v5456_v60 = vld [vmem:[%s9098_s1 + $0xc10] sm:$0xf] }
  0xcd   :  { %3201 = vmatpush.bf16.msra.mxu1 %v3957_v35  ;;  %v2848_v61 = vadd.f32 %v2847_v11, %v2829_v21  ;;  %v5557_v21 = vld [vmem:[%s9099_s0 + $0x178] sm:$0xf0]  ;;  %v4058_v11 = vld [vmem:[%s9098_s1 + $0x128] sm:$0xf0] }
  0xce   :  { %3220 = vmatpush.bf16.msra.mxu2 %v4021_v20  ;;  %v5598_v20 = vld [vmem:[%s9098_s1 + $0x134] sm:$0xf] }
  0xcf   :  { %3239 = vmatpush.bf16.msra.mxu3 %v4085_v33  ;;  %v2830_v35 = vpop.f32.mrf.mxu1  ;;  %v2812_v33 = vadd.f32 %v2811_v32, %v7494_v30  ;;  %v7690_v26 = vadd.f32 %v2866_v63, %v2848_v61  ;;  %v3892_v30 = vld [vmem:[%s9099_s0 + $0x118] sm:$0xf]  ;;  %v4069_v43 = vor.u32 %v5598_v20, %v4066_v34  ;;  %v3900_v63 = vld [vmem:[%s9099_s0 + $0x120] sm:$0xf]  ;;  %v5546_v20 = vld [vmem:[%s9099_s0 + $0x124] sm:$0xf]  ;;  %v3997_v61 = vor.u32 %v5580_v37, %v3994_v41 }
  0xd0   :  { %3183 = vmatpush.bf16.msra.mxu0 %v5481_v10  ;;  %v3941_v10 = vor.u32 %v5566_v4, %v3938_v19  ;;  %v5596_v4 = vld [vmem:[%s9098_s1 + $0x124] sm:$0xf]  ;;  %v3902_v34 = vld [vmem:[%s9099_s0 + $0x184] sm:$0xf0] }
  0xd1   :  { %3202 = vmatpush.bf16.msra.mxu1 %v3949_v47  ;;  %v5949_v47 = vld [vmem:[%s9098_s1 + $0xc24] sm:$0xf0]  ;;  %v2831_v52 = vadd.f32 %v2830_v35, %v2812_v33  ;;  %v5558_v19 = vld [vmem:[%s9099_s0 + $0x180] sm:$0xf0]  ;;  %v5578_v35 = vld [vmem:[%s9098_s1 + $0x94] sm:$0xf]  ;;  %v4061_v2 = vor.u32 %v5596_v4, %v4058_v11 }
  0xd2   :  { %3221 = vmatpush.bf16.msra.mxu2 %v4013_v31  ;;  %v3894_v31 = vld [vmem:[%s9099_s0 + $0x17c] sm:$0xf0]  ;;  %v5465_v32 = vor.u32 %v5949_v47, %v5464_v27  ;;  %v3986_v33 = vld [vmem:[%s9098_s1 + $0x98] sm:$0xf0]  ;;  %v7749_v27 = vor.u32 %v5557_v21, %v3892_v30  ;;  %v5594_v47 = vld [vmem:[%s9098_s1 + $0x114] sm:$0xf]  ;;  %v7762_v59 = vor.u32 %v5558_v19, %v3900_v63  ;;  %v7764_v30 = vor.u32 %v5546_v20, %v3902_v34 }
  0xd3   :  { %3240 = vmatpush.bf16.msra.mxu3 %v4077_v49  ;;  %v5564_v49 = vld [vmem:[%s9098_s1 + $0x24] sm:$0xf]  ;;  %v2849_v37 = vpop.f32.mrf.mxu2  ;;  %v2814_v4 = vpop.f32.mrf.mxu0  ;;  %v5448_v63 = vld [vmem:[%s9098_s1 + $0xc00] sm:$0xf]  ;;  %v5945_v19 = vld [vmem:[%s9098_s1 + $0xc04] sm:$0xf0] }
  0xd4   :  { %3184 = vmatpush.bf16.msra.mxu0 %v5473_v15  ;;  %v3933_v12 = vor.u32 %v5564_v49, %v3930_v3  ;;  %v5562_v15 = vld [vmem:[%s9098_s1 + $0x14] sm:$0xf]  ;;  %v2868_v41 = vpop.f32.mrf.mxu3  ;;  %v4050_v49 = vld [vmem:[%s9098_s1 + $0x118] sm:$0xf0]  ;;  %v2850_v3 = vadd.f32 %v2849_v37, %v2831_v52  ;;  %9132 = vst [vmem:[#allocation16_spill] sm:$0xff] %v7762_v59 }
  0xd5   :  { %3203 = vmatpush.bf16.msra.mxu1 %v3941_v10  ;;  %v7751_v10 = vor.u32 %v5545_v38, %v3894_v31  ;;  %9133 = vst [vmem:[#allocation17_spill] sm:$0xff] %v7764_v30  ;;  %v5576_v21 = vld [vmem:[%s9098_s1 + $0x84] sm:$0xf]  ;;  %v2815_v38 = vadd.f32 %v2814_v4, %v7561_v7  ;;  %v3989_v31 = vor.u32 %v5578_v35, %v3986_v33  ;;  %v3978_v52 = vld [vmem:[%s9098_s1 + $0x88] sm:$0xf0] }
  0xd6   :  { %3222 = vmatpush.bf16.msra.mxu2 %v4005_v36  ;;  %v5947_v36 = vld [vmem:[%s9098_s1 + $0xc14] sm:$0xf0]  ;;  %v7779_v20 = vadd.f32 %v2868_v41, %v2850_v3  ;;  %v4053_v34 = vor.u32 %v5594_v47, %v4050_v49  ;;  %v4290_v33 = vld [vmem:[%s9098_s1 + $0x2f8] sm:$0xf0]  ;;  %v5638_v37 = vld [vmem:[%s9098_s1 + $0x274] sm:$0xf]  ;;  %v3981_v41 = vor.u32 %v5576_v21, %v3978_v52 }
  0xd7   :  { %3241 = vmatpush.bf16.msra.mxu3 %v4069_v43  ;;  %9131 = vst [vmem:[#allocation15_spill] sm:$0xff] %v7751_v10  ;;  %v3922_v43 = vld [vmem:[%s9098_s1 + $0x18] sm:$0xf0]  ;;  %v2833_v11 = vpop.f32.mrf.mxu1  ;;  %v5457_v42 = vor.u32 %v5947_v36, %v5456_v60  ;;  %v5560_v60 = vld [vmem:[%s9098_s1 + $0x4] sm:$0xf] }
  0xd8   :  { %3185 = vmatpush.bf16.msra.mxu0 %v5465_v32  ;;  %v3925_v7 = vor.u32 %v5562_v15, %v3922_v43  ;;  %v5592_v32 = vld [vmem:[%s9098_s1 + $0x104] sm:$0xf]  ;;  %v2834_v35 = vadd.f32 %v2833_v11, %v2815_v38  ;;  %3155 = vmatmul.bf16.gmra.mxu2 %v7762_v59  ;;  %v5622_v36 = vld [vmem:[%s9098_s1 + $0x1f4] sm:$0xf]  ;;  %v4162_v15 = vld [vmem:[%s9098_s1 + $0x1f8] sm:$0xf0]  ;;  %v5449_v43 = vor.u32 %v5945_v19, %v5448_v63 }
  0xd9   :  { %3204 = vmatpush.bf16.msra.mxu1 %v3933_v12  ;;  %3117 = vmatmul.bf16.gmra.mxu0 %v7749_v27  ;;  %v5654_v12 = vld [vmem:[%s9098_s1 + $0x2f4] sm:$0xf]  ;;  %v4226_v47 = vld [vmem:[%s9098_s1 + $0x278] sm:$0xf0]  ;;  %v5652_v52 = vld [vmem:[%s9098_s1 + $0x2e4] sm:$0xf] }
  0xda   :  { %3223 = vmatpush.bf16.msra.mxu2 %v3997_v61  ;;  %v3914_v61 = vld [vmem:[%s9098_s1 + $0x8] sm:$0xf0]  ;;  %3136 = vmatmul.bf16.gmra.mxu1 %v7751_v10  ;;  %v5670_v49 = vld [vmem:[%s9098_s1 + $0x374] sm:$0xf]  ;;  %v4354_v3 = vld [vmem:[%s9098_s1 + $0x378] sm:$0xf0]  ;;  %v4293_v21 = vor.u32 %v5654_v12, %v4290_v33  ;;  %v4229_v10 = vor.u32 %v5638_v37, %v4226_v47 }
  0xdb   :  { %3242 = vmatpush.bf16.msra.mxu3 %v4061_v2  ;;  %v4042_v2 = vld [vmem:[%s9098_s1 + $0x108] sm:$0xf0]  ;;  %v3917_v4 = vor.u32 %v5560_v60, %v3914_v61  ;;  %v2852_v38 = vpop.f32.mrf.mxu2  ;;  %v5636_v61 = vld [vmem:[%s9098_s1 + $0x264] sm:$0xf]  ;;  %v4274_v47 = vld [vmem:[%s9098_s1 + $0x2d8] sm:$0xf0] }
  0xdc   :  { %3174 = vmatmul.bf16.gmra.mxu3 %v7764_v30  ;;  %3186 = vmatpush.bf16.msra.mxu0 %v5457_v42  ;;  %v4045_v11 = vor.u32 %v5592_v32, %v4042_v2  ;;  %v2871_v42 = vpop.f32.mrf.mxu3  ;;  %v4282_v63 = vld [vmem:[%s9098_s1 + $0x2e8] sm:$0xf0]  ;;  %v2853_v19 = vadd.f32 %v2852_v38, %v2834_v35  ;;  %v2816_v30 = vpop.f32.mrf.mxu0  ;;  %v5668_v2 = vld [vmem:[%s9098_s1 + $0x364] sm:$0xf] }
  0xdd   :  { %3205 = vmatpush.bf16.msra.mxu1 %v3925_v7  ;;  %v4357_v7 = vor.u32 %v5670_v49, %v4354_v3  ;;  %v4154_v60 = vld [vmem:[%s9098_s1 + $0x1e8] sm:$0xf0]  ;;  %v2817_v32 = vadd.f32 %v2816_v30, %v7628_v16  ;;  %v4285_v16 = vor.u32 %v5652_v52, %v4282_v63  ;;  %v5534_v37 = vld [vmem:[%s9099_s0 + $0xc0] sm:$0xf0]  ;;  %v5618_v49 = vld [vmem:[%s9098_s1 + $0x1d4] sm:$0xf] }
  0xde   :  { %3224 = vmatpush.bf16.msra.mxu2 %v3989_v31  ;;  %v4165_v31 = vor.u32 %v5622_v36, %v4162_v15  ;;  %v4218_v35 = vld [vmem:[%s9098_s1 + $0x268] sm:$0xf0]  ;;  %v7846_v33 = vadd.f32 %v2871_v42, %v2853_v19  ;;  %v3808_v15 = vld [vmem:[%s9099_s0 + $0x60] sm:$0xf]  ;;  %v4146_v3 = vld [vmem:[%s9098_s1 + $0x1d8] sm:$0xf0] }
  0xdf   :  { %3243 = vmatpush.bf16.msra.mxu3 %v4053_v34  ;;  %v2835_v59 = vpop.f32.mrf.mxu1  ;;  %v5620_v34 = vld [vmem:[%s9098_s1 + $0x1e4] sm:$0xf]  ;;  %v4346_v12 = vld [vmem:[%s9098_s1 + $0x368] sm:$0xf0]  ;;  %v7869_v38 = vor.u32 %v5534_v37, %v3808_v15  ;;  %v4210_v42 = vld [vmem:[%s9098_s1 + $0x258] sm:$0xf0] }
  0xe0   :  { %3187 = vmatpush.bf16.msra.mxu0 %v5449_v43  ;;  %v2836_v36 = vadd.f32 %v2835_v59, %v2817_v32  ;;  %v4157_v30 = vor.u32 %v5620_v34, %v4154_v60  ;;  %v4349_v43 = vor.u32 %v5668_v2, %v4346_v12  ;;  %v5650_v59 = vld [vmem:[%s9098_s1 + $0x2d4] sm:$0xf]  ;;  %v4149_v60 = vor.u32 %v5618_v49, %v4146_v3  ;;  %v4266_v32 = vld [vmem:[%s9098_s1 + $0x2c8] sm:$0xf0]  ;;  %v5664_v37 = vld [vmem:[%s9098_s1 + $0x344] sm:$0xf] }
  0xe1   :  { %3206 = vmatpush.bf16.msra.mxu1 %v3917_v4  ;;  %v4277_v34 = vor.u32 %v5650_v59, %v4274_v47  ;;  %v4202_v15 = vld [vmem:[%s9098_s1 + $0x248] sm:$0xf0]  ;;  %v5646_v59 = vld [vmem:[%s9098_s1 + $0x2b4] sm:$0xf]  ;;  %v4258_v47 = vld [vmem:[%s9098_s1 + $0x2b8] sm:$0xf0] }
  0xe2   :  { %3225 = vmatpush.bf16.msra.mxu2 %v3981_v41  ;;  %v4221_v41 = vor.u32 %v5636_v61, %v4218_v35  ;;  %v5648_v61 = vld [vmem:[%s9098_s1 + $0x2c4] sm:$0xf] }
  0xe3   :  { %3244 = vmatpush.bf16.msra.mxu3 %v4045_v11  ;;  %v2854_v4 = vpop.f32.mrf.mxu2 }
  0xe4   :  { %3256 = vmatpush.bf16.msrb.mxu0 %v4165_v31  ;;  %v2873_v11 = vpop.f32.mrf.mxu3  ;;  %v4338_v31 = vld [vmem:[%s9098_s1 + $0x358] sm:$0xf0]  ;;  %v2855_v52 = vadd.f32 %v2854_v4, %v2836_v36  ;;  %v2885_v63 = vpop.f32.mrf.mxu0  ;;  %v5616_v36 = vld [vmem:[%s9098_s1 + $0x1c4] sm:$0xf] }
  0xe5   :  { %3275 = vmatpush.bf16.msrb.mxu1 %v4229_v10  ;;  %v5634_v10 = vld [vmem:[%s9098_s1 + $0x254] sm:$0xf] }
  0xe6   :  { %3294 = vmatpush.bf16.msrb.mxu2 %v4293_v21  ;;  %v5666_v21 = vld [vmem:[%s9098_s1 + $0x354] sm:$0xf]  ;;  %v7887_v35 = vadd.f32 %v2873_v11, %v2855_v52  ;;  %v4213_v2 = vor.u32 %v5634_v10, %v4210_v42  ;;  %v4194_v42 = vld [vmem:[%s9098_s1 + $0x238] sm:$0xf0] }
  0xe7   :  { %3313 = vmatpush.bf16.msrb.mxu3 %v4357_v7  ;;  %v2904_v19 = vpop.f32.mrf.mxu1  ;;  %v2886_v7 = vadd.f32 %v2885_v63, %v7690_v26  ;;  %v4341_v12 = vor.u32 %v5666_v21, %v4338_v31  ;;  %v4138_v26 = vld [vmem:[%s9098_s1 + $0x1c8] sm:$0xf0]  ;;  %v5630_v10 = vld [vmem:[%s9098_s1 + $0x234] sm:$0xf]  ;;  %v4322_v31 = vld [vmem:[%s9098_s1 + $0x338] sm:$0xf0] }
  0xe8   :  { %3257 = vmatpush.bf16.msrb.mxu0 %v4157_v30  ;;  %3226 = vmatmul.bf16.vlgmr.msra.gmra.mxu2 %v6245_v53  ;;  %v5614_v53 = vld [vmem:[%s9098_s1 + $0x1b4] sm:$0xf] }
  0xe9   :  { %3276 = vmatpush.bf16.msrb.mxu1 %v4221_v41  ;;  %v2905_v30 = vadd.f32 %v2904_v19, %v2886_v7  ;;  %3188 = vmatmul.bf16.vlgmr.msra.gmra.mxu0 %v7869_v38  ;;  %v4330_v41 = vld [vmem:[%s9098_s1 + $0x348] sm:$0xf0]  ;;  %v5662_v21 = vld [vmem:[%s9098_s1 + $0x334] sm:$0xf] }
  0xea   :  { %3295 = vmatpush.bf16.msrb.mxu2 %v4285_v16  ;;  %v5632_v16 = vld [vmem:[%s9098_s1 + $0x244] sm:$0xf]  ;;  %3207 = vmatmul.bf16.vlgmr.msra.gmra.mxu1 %v6234_v48  ;;  %v4141_v48 = vor.u32 %v5616_v36, %v4138_v26  ;;  %v4333_v3 = vor.u32 %v5664_v37, %v4330_v41  ;;  %v4325_v36 = vor.u32 %v5662_v21, %v4322_v31  ;;  %v4122_v26 = vld [vmem:[%s9098_s1 + $0x1a8] sm:$0xf0] }
  0xeb   :  { %3314 = vmatpush.bf16.msrb.mxu3 %v4349_v43  ;;  %v4269_v43 = vor.u32 %v5648_v61, %v4266_v32  ;;  %v4205_v49 = vor.u32 %v5632_v16, %v4202_v15  ;;  %v2923_v4 = vpop.f32.mrf.mxu2  ;;  %v5644_v61 = vld [vmem:[%s9098_s1 + $0x2a4] sm:$0xf]  ;;  %v4250_v32 = vld [vmem:[%s9098_s1 + $0x2a8] sm:$0xf0] }
  0xec   :  { %3245 = vmatmul.bf16.vlgmr.msra.gmra.mxu3 %v6247_v54  ;;  %3258 = vmatpush.bf16.msrb.mxu0 %v4149_v60  ;;  %v4130_v54 = vld [vmem:[%s9098_s1 + $0x1b8] sm:$0xf0]  ;;  %v2942_v11 = vpop.f32.mrf.mxu3  ;;  %v2924_v52 = vadd.f32 %v2923_v4, %v2905_v30  ;;  %v2887_v63 = vpop.f32.mrf.mxu0  ;;  %v5628_v16 = vld [vmem:[%s9098_s1 + $0x224] sm:$0xf]  ;;  %v4186_v15 = vld [vmem:[%s9098_s1 + $0x228] sm:$0xf0] }
  0xed   :  { %3277 = vmatpush.bf16.msrb.mxu1 %v4213_v2  ;;  %v2888_v7 = vadd.f32 %v2887_v63, %v7779_v20  ;;  %v4133_v60 = vor.u32 %v5614_v53, %v4130_v54  ;;  %v5612_v20 = vld [vmem:[%s9098_s1 + $0x1a4] sm:$0xf]  ;;  %v4314_v41 = vld [vmem:[%s9098_s1 + $0x328] sm:$0xf0]  ;;  %v4189_v53 = vor.u32 %v5628_v16, %v4186_v15  ;;  %v4114_v4 = vld [vmem:[%s9098_s1 + $0x198] sm:$0xf0] }
  0xee   :  { %3296 = vmatpush.bf16.msrb.mxu2 %v4277_v34  ;;  %v4261_v34 = vor.u32 %v5646_v59, %v4258_v47  ;;  %v7942_v2 = vadd.f32 %v2942_v11, %v2924_v52  ;;  %v5660_v37 = vld [vmem:[%s9098_s1 + $0x324] sm:$0xf]  ;;  %v4253_v59 = vor.u32 %v5644_v61, %v4250_v32  ;;  %v4125_v47 = vor.u32 %v5612_v20, %v4122_v26  ;;  %v5626_v11 = vld [vmem:[%s9098_s1 + $0x214] sm:$0xf]  ;;  %v4178_v52 = vld [vmem:[%s9098_s1 + $0x218] sm:$0xf0] }
  0xef   :  { %3315 = vmatpush.bf16.msrb.mxu3 %v4341_v12  ;;  %v2906_v19 = vpop.f32.mrf.mxu1  ;;  %v4197_v12 = vor.u32 %v5630_v10, %v4194_v42  ;;  %v4317_v54 = vor.u32 %v5660_v37, %v4314_v41  ;;  %v5610_v10 = vld [vmem:[%s9098_s1 + $0x194] sm:$0xf]  ;;  %v5640_v61 = vld [vmem:[%s9098_s1 + $0x284] sm:$0xf]  ;;  %v4234_v20 = vld [vmem:[%s9098_s1 + $0x288] sm:$0xf0] }
  0xf0   :  { %3259 = vmatpush.bf16.msrb.mxu0 %v4141_v48  ;;  %v2907_v30 = vadd.f32 %v2906_v19, %v2888_v7  ;;  %v5559_v48 = vld [vmem:[%s9099_s0 + $0x188] sm:$0xf0]  ;;  %v5658_v63 = vld [vmem:[%s9098_s1 + $0x314] sm:$0xf]  ;;  %v4306_v19 = vld [vmem:[%s9098_s1 + $0x318] sm:$0xf0] }
  0xf1   :  { %3278 = vmatpush.bf16.msrb.mxu1 %v4205_v49  ;;  %v5642_v49 = vld [vmem:[%s9098_s1 + $0x294] sm:$0xf]  ;;  %v5608_v26 = vld [vmem:[%s9098_s1 + $0x184] sm:$0xf]  ;;  %v4106_v16 = vld [vmem:[%s9098_s1 + $0x188] sm:$0xf0]  ;;  %v4309_v15 = vor.u32 %v5658_v63, %v4306_v19 }
  0xf2   :  { %3297 = vmatpush.bf16.msrb.mxu2 %v4269_v43  ;;  %v3908_v43 = vld [vmem:[%s9099_s0 + $0x128] sm:$0xf]  ;;  %v5624_v37 = vld [vmem:[%s9098_s1 + $0x204] sm:$0xf]  ;;  %v4170_v41 = vld [vmem:[%s9098_s1 + $0x208] sm:$0xf0] }
  0xf3   :  { %3316 = vmatpush.bf16.msrb.mxu3 %v4333_v3  ;;  %v4242_v3 = vld [vmem:[%s9098_s1 + $0x298] sm:$0xf0]  ;;  %v2925_v42 = vpop.f32.mrf.mxu2  ;;  %v7983_v31 = vor.u32 %v5559_v48, %v3908_v43  ;;  %v5656_v43 = vld [vmem:[%s9098_s1 + $0x304] sm:$0xf] }
  0xf4   :  { %3260 = vmatpush.bf16.msrb.mxu0 %v4133_v60  ;;  %v2944_v21 = vpop.f32.mrf.mxu3  ;;  %v2926_v7 = vadd.f32 %v2925_v42, %v2907_v30 }
  0xf5   :  { %3279 = vmatpush.bf16.msrb.mxu1 %v4197_v12  ;;  %v4245_v12 = vor.u32 %v5642_v49, %v4242_v3  ;;  %v4546_v49 = vld [vmem:[%s9098_s1 + $0x4f8] sm:$0xf0] }
  0xf6   :  { %3298 = vmatpush.bf16.msrb.mxu2 %v4261_v34  ;;  %v2890_v34 = vpop.f32.mrf.mxu0  ;;  %v8007_v30 = vadd.f32 %v2944_v21, %v2926_v7  ;;  %v4418_v3 = vld [vmem:[%s9098_s1 + $0x3f8] sm:$0xf0]  ;;  %v5716_v7 = vld [vmem:[%s9098_s1 + $0x4e4] sm:$0xf] }
  0xf7   :  { %3317 = vmatpush.bf16.msrb.mxu3 %v4325_v36  ;;  %v2909_v60 = vpop.f32.mrf.mxu1  ;;  %v2891_v32 = vadd.f32 %v2890_v34, %v7846_v33  ;;  %v4117_v36 = vor.u32 %v5610_v10, %v4114_v4  ;;  %v4181_v33 = vor.u32 %v5626_v11, %v4178_v52  ;;  %v4109_v10 = vor.u32 %v5608_v26, %v4106_v16  ;;  %v4610_v4 = vld [vmem:[%s9098_s1 + $0x578] sm:$0xf0]  ;;  %v4538_v34 = vld [vmem:[%s9098_s1 + $0x4e8] sm:$0xf0]  ;;  %v5700_v16 = vld [vmem:[%s9098_s1 + $0x464] sm:$0xf] }
  0xf8   :  { %3261 = vmatpush.bf16.msrb.mxu0 %v4125_v47  ;;  %v5718_v47 = vld [vmem:[%s9098_s1 + $0x4f4] sm:$0xf]  ;;  %3231 = vmatmul.bf16.gmra.mxu2 %v6377_v50  ;;  %v4482_v50 = vld [vmem:[%s9098_s1 + $0x478] sm:$0xf0]  ;;  %v4173_v11 = vor.u32 %v5624_v37, %v4170_v41  ;;  %v4410_v26 = vld [vmem:[%s9098_s1 + $0x3e8] sm:$0xf0] }
  0xf9   :  { %3280 = vmatpush.bf16.msrb.mxu1 %v4189_v53  ;;  %v2910_v48 = vadd.f32 %v2909_v60, %v2891_v32  ;;  %3193 = vmatmul.bf16.gmra.mxu0 %v7983_v31  ;;  %v5702_v53 = vld [vmem:[%s9098_s1 + $0x474] sm:$0xf]  ;;  %v4549_v63 = vor.u32 %v5718_v47, %v4546_v49  ;;  %v5732_v37 = vld [vmem:[%s9098_s1 + $0x564] sm:$0xf]  ;;  %v4602_v41 = vld [vmem:[%s9098_s1 + $0x568] sm:$0xf0] }
  0xfa   :  { %3299 = vmatpush.bf16.msrb.mxu2 %v4253_v59  ;;  %3212 = vmatmul.bf16.gmra.mxu1 %v6366_v44  ;;  %v4298_v59 = vld [vmem:[%s9098_s1 + $0x308] sm:$0xf0]  ;;  %v5686_v44 = vld [vmem:[%s9098_s1 + $0x3f4] sm:$0xf]  ;;  %v4605_v49 = vor.u32 %v5732_v37, %v4602_v41 }
  0xfb   :  { %3318 = vmatpush.bf16.msrb.mxu3 %v4317_v54  ;;  %v4237_v54 = vor.u32 %v5640_v61, %v4234_v20  ;;  %v4301_v42 = vor.u32 %v5656_v43, %v4298_v59  ;;  %v2928_v21 = vpop.f32.mrf.mxu2  ;;  %v4421_v19 = vor.u32 %v5686_v44, %v4418_v3  ;;  %v5684_v20 = vld [vmem:[%s9098_s1 + $0x3e4] sm:$0xf]  ;;  %v5714_v44 = vld [vmem:[%s9098_s1 + $0x4d4] sm:$0xf]  ;;  %v4530_v3 = vld [vmem:[%s9098_s1 + $0x4d8] sm:$0xf0] }
  0xfc   :  { %3250 = vmatmul.bf16.gmra.mxu3 %v6379_v51  ;;  %3262 = vmatpush.bf16.msrb.mxu0 %v4117_v36  ;;  %v5734_v51 = vld [vmem:[%s9098_s1 + $0x574] sm:$0xf]  ;;  %v2947_v52 = vpop.f32.mrf.mxu3  ;;  %v2929_v60 = vadd.f32 %v2928_v21, %v2910_v48  ;;  %v4413_v59 = vor.u32 %v5684_v20, %v4410_v26  ;;  %v5680_v20 = vld [vmem:[%s9098_s1 + $0x3c4] sm:$0xf]  ;;  %v4586_v37 = vld [vmem:[%s9098_s1 + $0x548] sm:$0xf0] }
  0xfd   :  { %3281 = vmatpush.bf16.msrb.mxu1 %v4181_v33  ;;  %v4613_v36 = vor.u32 %v5734_v51, %v4610_v4  ;;  %v4466_v4 = vld [vmem:[%s9098_s1 + $0x458] sm:$0xf0]  ;;  %v5696_v26 = vld [vmem:[%s9098_s1 + $0x444] sm:$0xf]  ;;  %v5710_v41 = vld [vmem:[%s9098_s1 + $0x4b4] sm:$0xf] }
  0xfe   :  { %3300 = vmatpush.bf16.msrb.mxu2 %v4245_v12  ;;  %v2892_v61 = vpop.f32.mrf.mxu0  ;;  %v4485_v12 = vor.u32 %v5702_v53, %v4482_v50  ;;  %v8074_v43 = vadd.f32 %v2947_v52, %v2929_v60  ;;  %v5682_v53 = vld [vmem:[%s9098_s1 + $0x3d4] sm:$0xf]  ;;  %v5712_v60 = vld [vmem:[%s9098_s1 + $0x4c4] sm:$0xf] }
  0xff   :  { %3319 = vmatpush.bf16.msrb.mxu3 %v4309_v15  ;;  %v2911_v32 = vpop.f32.mrf.mxu1  ;;  %v2893_v33 = vadd.f32 %v2892_v61, %v7887_v35  ;;  %v4474_v15 = vld [vmem:[%s9098_s1 + $0x468] sm:$0xf0]  ;;  %v4541_v35 = vor.u32 %v5716_v7, %v4538_v34  ;;  %v4533_v7 = vor.u32 %v5714_v44, %v4530_v3  ;;  %v4450_v3 = vld [vmem:[%s9098_s1 + $0x438] sm:$0xf0] }
 0x100   :  { %3263 = vmatpush.bf16.msrb.mxu0 %v4109_v10  ;;  %v4477_v47 = vor.u32 %v5700_v16, %v4474_v15  ;;  %v5698_v10 = vld [vmem:[%s9098_s1 + $0x454] sm:$0xf]  ;;  %v4522_v61 = vld [vmem:[%s9098_s1 + $0x4c8] sm:$0xf0]  ;;  %v5728_v15 = vld [vmem:[%s9098_s1 + $0x544] sm:$0xf] }
 0x101   :  { %3282 = vmatpush.bf16.msrb.mxu1 %v4173_v11  ;;  %v2912_v48 = vadd.f32 %v2911_v32, %v2893_v33  ;;  %v5730_v11 = vld [vmem:[%s9098_s1 + $0x554] sm:$0xf]  ;;  %v4458_v33 = vld [vmem:[%s9098_s1 + $0x448] sm:$0xf0] }
 0x102   :  { %3301 = vmatpush.bf16.msrb.mxu2 %v4237_v54  ;;  %v4402_v54 = vld [vmem:[%s9098_s1 + $0x3d8] sm:$0xf0] }
 0x103   :  { %3320 = vmatpush.bf16.msrb.mxu3 %v4301_v42  ;;  %v2930_v50 = vpop.f32.mrf.mxu2  ;;  %v4594_v42 = vld [vmem:[%s9098_s1 + $0x558] sm:$0xf0]  ;;  %v4405_v34 = vor.u32 %v5682_v53, %v4402_v54  ;;  %v5726_v53 = vld [vmem:[%s9098_s1 + $0x534] sm:$0xf] }
 0x104   :  { %3332 = vmatpush.bf16.msra.mxu0 %v4421_v19  ;;  %v2949_v51 = vpop.f32.mrf.mxu3  ;;  %v2931_v21 = vadd.f32 %v2930_v50, %v2912_v48  ;;  %v4514_v48 = vld [vmem:[%s9098_s1 + $0x4b8] sm:$0xf0] }
 0x105   :  { %3351 = vmatpush.bf16.msra.mxu1 %v4485_v12  ;;  %v4469_v12 = vor.u32 %v5698_v10, %v4466_v4  ;;  %v4578_v54 = vld [vmem:[%s9098_s1 + $0x538] sm:$0xf0] }
 0x106   :  { %3370 = vmatpush.bf16.msra.mxu2 %v4549_v63  ;;  %v2961_v52 = vpop.f32.mrf.mxu0  ;;  %v8107_v32 = vadd.f32 %v2949_v51, %v2931_v21  ;;  %v5708_v21 = vld [vmem:[%s9098_s1 + $0x4a4] sm:$0xf] }
 0x107   :  { %3389 = vmatpush.bf16.msra.mxu3 %v4613_v36  ;;  %v2980_v63 = vpop.f32.mrf.mxu1  ;;  %v2962_v19 = vadd.f32 %v2961_v52, %v7942_v2  ;;  %v4597_v36 = vor.u32 %v5730_v11, %v4594_v42  ;;  %v4394_v2 = vld [vmem:[%s9098_s1 + $0x3c8] sm:$0xf0]  ;;  %v4517_v11 = vor.u32 %v5710_v41, %v4514_v48  ;;  %v5690_v41 = vld [vmem:[%s9098_s1 + $0x414] sm:$0xf] }
 0x108   :  { %3333 = vmatpush.bf16.msra.mxu0 %v4413_v59  ;;  %3302 = vmatmul.bf16.vlgmr.msrb.gmra.mxu2 %v6524_v1  ;;  %v4589_v59 = vor.u32 %v5728_v15, %v4586_v37  ;;  %v5678_v1 = vld [vmem:[%s9098_s1 + $0x3b4] sm:$0xf]  ;;  %v4506_v52 = vld [vmem:[%s9098_s1 + $0x4a8] sm:$0xf0] }
 0x109   :  { %3352 = vmatpush.bf16.msra.mxu1 %v4477_v47  ;;  %v2981_v16 = vadd.f32 %v2980_v63, %v2962_v19  ;;  %3264 = vmatmul.bf16.vlgmr.msrb.gmra.mxu0 %v6255_v57  ;;  %v4525_v57 = vor.u32 %v5712_v60, %v4522_v61  ;;  %v5694_v47 = vld [vmem:[%s9098_s1 + $0x434] sm:$0xf]  ;;  %v5692_v60 = vld [vmem:[%s9098_s1 + $0x424] sm:$0xf] }
 0x10a   :  { %3371 = vmatpush.bf16.msra.mxu2 %v4541_v35  ;;  %3283 = vmatmul.bf16.vlgmr.msrb.gmra.mxu1 %v6522_v0  ;;  %v4397_v0 = vor.u32 %v5680_v20, %v4394_v2  ;;  %v4461_v35 = vor.u32 %v5696_v26, %v4458_v33  ;;  %v4453_v19 = vor.u32 %v5694_v47, %v4450_v3  ;;  %v4570_v20 = vld [vmem:[%s9098_s1 + $0x528] sm:$0xf0]  ;;  %v4498_v33 = vld [vmem:[%s9098_s1 + $0x498] sm:$0xf0]  ;;  %v5704_v3 = vld [vmem:[%s9098_s1 + $0x484] sm:$0xf] }
 0x10b   :  { %3390 = vmatpush.bf16.msra.mxu3 %v4605_v49  ;;  %v2999_v49 = vpop.f32.mrf.mxu2  ;;  %v4509_v2 = vor.u32 %v5708_v21, %v4506_v52  ;;  %v5688_v21 = vld [vmem:[%s9098_s1 + $0x404] sm:$0xf]  ;;  %v4426_v52 = vld [vmem:[%s9098_s1 + $0x408] sm:$0xf0] }
 0x10c   :  { %3321 = vmatmul.bf16.vlgmr.msrb.gmra.mxu3 %v6535_v5  ;;  %3334 = vmatpush.bf16.msra.mxu0 %v4405_v34  ;;  %v4386_v5 = vld [vmem:[%s9098_s1 + $0x3b8] sm:$0xf0]  ;;  %v3018_v44 = vpop.f32.mrf.mxu3  ;;  %v3000_v10 = vadd.f32 %v2999_v49, %v2981_v16  ;;  %v4378_v34 = vld [vmem:[%s9098_s1 + $0x3a8] sm:$0xf0]  ;;  %v5706_v16 = vld [vmem:[%s9098_s1 + $0x494] sm:$0xf] }
 0x10d   :  { %3353 = vmatpush.bf16.msra.mxu1 %v4469_v12  ;;  %v4389_v42 = vor.u32 %v5678_v1, %v4386_v5  ;;  %v4442_v12 = vld [vmem:[%s9098_s1 + $0x428] sm:$0xf0]  ;;  %v5722_v1 = vld [vmem:[%s9098_s1 + $0x514] sm:$0xf]  ;;  %v4562_v5 = vld [vmem:[%s9098_s1 + $0x518] sm:$0xf0] }
 0x10e   :  { %3372 = vmatpush.bf16.msra.mxu2 %v4533_v7  ;;  %v2963_v50 = vpop.f32.mrf.mxu0  ;;  %v8162_v63 = vadd.f32 %v3018_v44, %v3000_v10  ;;  %v4581_v7 = vor.u32 %v5726_v53, %v4578_v54  ;;  %v4445_v15 = vor.u32 %v5692_v60, %v4442_v12  ;;  %v4501_v54 = vor.u32 %v5706_v16, %v4498_v33  ;;  %v4802_v60 = vld [vmem:[%s9098_s1 + $0x6f8] sm:$0xf0] }
 0x10f   :  { %3391 = vmatpush.bf16.msra.mxu3 %v4597_v36  ;;  %v2982_v51 = vpop.f32.mrf.mxu1  ;;  %v2964_v4 = vadd.f32 %v2963_v50, %v8007_v30  ;;  %v5676_v30 = vld [vmem:[%s9098_s1 + $0x3a4] sm:$0xf]  ;;  %v4490_v50 = vld [vmem:[%s9098_s1 + $0x488] sm:$0xf0] }
 0x110   :  { %3335 = vmatpush.bf16.msra.mxu0 %v4397_v0  ;;  %v5724_v36 = vld [vmem:[%s9098_s1 + $0x524] sm:$0xf]  ;;  %v4381_v26 = vor.u32 %v5676_v30, %v4378_v34  ;;  %v4370_v0 = vld [vmem:[%s9098_s1 + $0x398] sm:$0xf0]  ;;  %v4554_v30 = vld [vmem:[%s9098_s1 + $0x508] sm:$0xf0]  ;;  %v4493_v12 = vor.u32 %v5704_v3, %v4490_v50 }
 0x111   :  { %3354 = vmatpush.bf16.msra.mxu1 %v4461_v35  ;;  %v2983_v61 = vadd.f32 %v2982_v51, %v2964_v4  ;;  %v4573_v37 = vor.u32 %v5724_v36, %v4570_v20  ;;  %v5672_v51 = vld [vmem:[%s9098_s1 + $0x384] sm:$0xf]  ;;  %v4362_v4 = vld [vmem:[%s9098_s1 + $0x388] sm:$0xf0]  ;;  %v5782_v34 = vld [vmem:[%s9098_s1 + $0x6f4] sm:$0xf] }
 0x112   :  { %3373 = vmatpush.bf16.msra.mxu2 %v4525_v57  ;;  %v5674_v57 = vld [vmem:[%s9098_s1 + $0x394] sm:$0xf]  ;;  %v4365_v36 = vor.u32 %v5672_v51, %v4362_v4  ;;  %v4866_v20 = vld [vmem:[%s9098_s1 + $0x778] sm:$0xf0]  ;;  %v4730_v3 = vld [vmem:[%s9098_s1 + $0x668] sm:$0xf0] }
 0x113   :  { %3392 = vmatpush.bf16.msra.mxu3 %v4589_v59  ;;  %v3001_v48 = vpop.f32.mrf.mxu2  ;;  %v4434_v59 = vld [vmem:[%s9098_s1 + $0x418] sm:$0xf0]  ;;  %v4373_v10 = vor.u32 %v5674_v57, %v4370_v0  ;;  %v5780_v57 = vld [vmem:[%s9098_s1 + $0x6e4] sm:$0xf]  ;;  %v4794_v0 = vld [vmem:[%s9098_s1 + $0x6e8] sm:$0xf0] }
 0x114   :  { %3336 = vmatpush.bf16.msra.mxu0 %v4389_v42  ;;  %v3020_v35 = vpop.f32.mrf.mxu3  ;;  %v3002_v47 = vadd.f32 %v3001_v48, %v2983_v61  ;;  %v4565_v42 = vor.u32 %v5722_v1, %v4562_v5  ;;  %v5766_v61 = vld [vmem:[%s9098_s1 + $0x674] sm:$0xf]  ;;  %v5748_v5 = vld [vmem:[%s9098_s1 + $0x5e4] sm:$0xf] }
 0x115   :  { %3355 = vmatpush.bf16.msra.mxu1 %v4453_v19  ;;  %v5720_v19 = vld [vmem:[%s9098_s1 + $0x504] sm:$0xf] }
 0x116   :  { %3374 = vmatpush.bf16.msra.mxu2 %v4517_v11  ;;  %v2966_v49 = vpop.f32.mrf.mxu0  ;;  %v8219_v11 = vadd.f32 %v3020_v35, %v3002_v47  ;;  %v4666_v47 = vld [vmem:[%s9098_s1 + $0x5e8] sm:$0xf0] }
 0x117   :  { %3393 = vmatpush.bf16.msra.mxu3 %v4581_v7  ;;  %v2985_v44 = vpop.f32.mrf.mxu1  ;;  %v2967_v53 = vadd.f32 %v2966_v49, %v8074_v43  ;;  %v4437_v43 = vor.u32 %v5690_v41, %v4434_v59  ;;  %v5764_v49 = vld [vmem:[%s9098_s1 + $0x664] sm:$0xf]  ;;  %v4669_v51 = vor.u32 %v5748_v5, %v4666_v47  ;;  %v5758_v47 = vld [vmem:[%s9098_s1 + $0x634] sm:$0xf] }
 0x118   :  { %3337 = vmatpush.bf16.msra.mxu0 %v4381_v26  ;;  %3307 = vmatmul.bf16.gmra.mxu2 %v6656_v9  ;;  %v4738_v9 = vld [vmem:[%s9098_s1 + $0x678] sm:$0xf0]  ;;  %v4557_v26 = vor.u32 %v5720_v19, %v4554_v30  ;;  %v4733_v4 = vor.u32 %v5764_v49, %v4730_v3 }
 0x119   :  { %3356 = vmatpush.bf16.msra.mxu1 %v4445_v15  ;;  %v2986_v7 = vadd.f32 %v2985_v44, %v2967_v53  ;;  %3269 = vmatmul.bf16.gmra.mxu0 %v6387_v56  ;;  %v5750_v56 = vld [vmem:[%s9098_s1 + $0x5f4] sm:$0xf]  ;;  %v4805_v15 = vor.u32 %v5782_v34, %v4802_v60  ;;  %v4741_v59 = vor.u32 %v5766_v61, %v4738_v9  ;;  %v5796_v53 = vld [vmem:[%s9098_s1 + $0x764] sm:$0xf]  ;;  %v4658_v19 = vld [vmem:[%s9098_s1 + $0x5d8] sm:$0xf0] }
 0x11a   :  { %3375 = vmatpush.bf16.msra.mxu2 %v4509_v2  ;;  %3288 = vmatmul.bf16.gmra.mxu1 %v6654_v8  ;;  %v4674_v8 = vld [vmem:[%s9098_s1 + $0x5f8] sm:$0xf0]  ;;  %v4429_v2 = vor.u32 %v5688_v21, %v4426_v52  ;;  %v5746_v52 = vld [vmem:[%s9098_s1 + $0x5d4] sm:$0xf] }
 0x11b   :  { %3394 = vmatpush.bf16.msra.mxu3 %v4573_v37  ;;  %v3004_v16 = vpop.f32.mrf.mxu2  ;;  %v4677_v37 = vor.u32 %v5750_v56, %v4674_v8  ;;  %v4786_v21 = vld [vmem:[%s9098_s1 + $0x6d8] sm:$0xf0]  ;;  %v5794_v56 = vld [vmem:[%s9098_s1 + $0x754] sm:$0xf] }
 0x11c   :  { %3326 = vmatmul.bf16.gmra.mxu3 %v6667_v13  ;;  %3338 = vmatpush.bf16.msra.mxu0 %v4373_v10  ;;  %v5798_v13 = vld [vmem:[%s9098_s1 + $0x774] sm:$0xf]  ;;  %v3023_v33 = vpop.f32.mrf.mxu3  ;;  %v3005_v41 = vadd.f32 %v3004_v16, %v2986_v7  ;;  %v4722_v60 = vld [vmem:[%s9098_s1 + $0x658] sm:$0xf0] }
 0x11d   :  { %3357 = vmatpush.bf16.msra.mxu1 %v4437_v43  ;;  %v4869_v1 = vor.u32 %v5798_v13, %v4866_v20  ;;  %v5762_v7 = vld [vmem:[%s9098_s1 + $0x654] sm:$0xf]  ;;  %v4850_v8 = vld [vmem:[%s9098_s1 + $0x758] sm:$0xf0]  ;;  %v4661_v13 = vor.u32 %v5746_v52, %v4658_v19  ;;  %v5776_v20 = vld [vmem:[%s9098_s1 + $0x6c4] sm:$0xf] }
 0x11e   :  { %3376 = vmatpush.bf16.msra.mxu2 %v4501_v54  ;;  %v2968_v48 = vpop.f32.mrf.mxu0  ;;  %v4858_v54 = vld [vmem:[%s9098_s1 + $0x768] sm:$0xf0]  ;;  %v8286_v10 = vadd.f32 %v3023_v33, %v3005_v41  ;;  %v4725_v16 = vor.u32 %v5762_v7, %v4722_v60  ;;  %v4853_v33 = vor.u32 %v5794_v56, %v4850_v8  ;;  %v5792_v41 = vld [vmem:[%s9098_s1 + $0x744] sm:$0xf]  ;;  %v4706_v3 = vld [vmem:[%s9098_s1 + $0x638] sm:$0xf0] }
 0x11f   :  { %3395 = vmatpush.bf16.msra.mxu3 %v4565_v42  ;;  %v2987_v35 = vpop.f32.mrf.mxu1  ;;  %v2969_v44 = vadd.f32 %v2968_v48, %v8107_v32  ;;  %v4797_v32 = vor.u32 %v5780_v57, %v4794_v0  ;;  %v4861_v43 = vor.u32 %v5796_v53, %v4858_v54  ;;  %v5778_v42 = vld [vmem:[%s9098_s1 + $0x6d4] sm:$0xf]  ;;  %v5760_v57 = vld [vmem:[%s9098_s1 + $0x644] sm:$0xf]  ;;  %v4714_v0 = vld [vmem:[%s9098_s1 + $0x648] sm:$0xf0] }
 0x120   :  { %3339 = vmatpush.bf16.msra.mxu0 %v4365_v36  ;;  %v4789_v9 = vor.u32 %v5778_v42, %v4786_v21  ;;  %v4842_v48 = vld [vmem:[%s9098_s1 + $0x748] sm:$0xf0]  ;;  %v5790_v53 = vld [vmem:[%s9098_s1 + $0x734] sm:$0xf]  ;;  %v4834_v54 = vld [vmem:[%s9098_s1 + $0x738] sm:$0xf0]  ;;  %v4709_v21 = vor.u32 %v5758_v47, %v4706_v3 }
 0x121   :  { %3358 = vmatpush.bf16.msra.mxu1 %v4429_v2  ;;  %v2988_v50 = vadd.f32 %v2987_v35, %v2969_v44  ;;  %v4778_v2 = vld [vmem:[%s9098_s1 + $0x6c8] sm:$0xf0]  ;;  %v5774_v35 = vld [vmem:[%s9098_s1 + $0x6b4] sm:$0xf]  ;;  %v4845_v5 = vor.u32 %v5792_v41, %v4842_v48  ;;  %v4837_v52 = vor.u32 %v5790_v53, %v4834_v54  ;;  %v5740_v19 = vld [vmem:[%s9098_s1 + $0x5a4] sm:$0xf] }
 0x122   :  { %3377 = vmatpush.bf16.msra.mxu2 %v4493_v12  ;;  %v4762_v42 = vld [vmem:[%s9098_s1 + $0x6a8] sm:$0xf0]  ;;  %v5788_v60 = vld [vmem:[%s9098_s1 + $0x724] sm:$0xf]  ;;  %v5786_v41 = vld [vmem:[%s9098_s1 + $0x714] sm:$0xf] }
 0x123   :  { %3396 = vmatpush.bf16.msra.mxu3 %v4557_v26  ;;  %v3006_v30 = vpop.f32.mrf.mxu2  ;;  %v4634_v7 = vld [vmem:[%s9098_s1 + $0x5a8] sm:$0xf0]  ;;  %v4818_v48 = vld [vmem:[%s9098_s1 + $0x718] sm:$0xf0]  ;;  %v5752_v53 = vld [vmem:[%s9098_s1 + $0x604] sm:$0xf] }
 0x124   :  { %3408 = vmatpush.bf16.msrb.mxu0 %v4677_v37  ;;  %v3025_v34 = vpop.f32.mrf.mxu3  ;;  %v3007_v61 = vadd.f32 %v3006_v30, %v2988_v50  ;;  %v4650_v37 = vld [vmem:[%s9098_s1 + $0x5c8] sm:$0xf0]  ;;  %v5756_v30 = vld [vmem:[%s9098_s1 + $0x624] sm:$0xf]  ;;  %v4821_v3 = vor.u32 %v5786_v41, %v4818_v48 }
 0x125   :  { %3427 = vmatpush.bf16.msrb.mxu1 %v4741_v59  ;;  %v4770_v59 = vld [vmem:[%s9098_s1 + $0x6b8] sm:$0xf0]  ;;  %v4826_v56 = vld [vmem:[%s9098_s1 + $0x728] sm:$0xf0]  ;;  %v5828_v41 = vld [vmem:[%s9098_s1 + $0x864] sm:$0xf] }
 0x126   :  { %3446 = vmatpush.bf16.msrb.mxu2 %v4805_v15  ;;  %v8312_v12 = vpop.f32.mrf.mxu0  ;;  %v8322_v26 = vadd.f32 %v3025_v34, %v3007_v61  ;;  %v5744_v15 = vld [vmem:[%s9098_s1 + $0x5c4] sm:$0xf]  ;;  %v4698_v34 = vld [vmem:[%s9098_s1 + $0x628] sm:$0xf0]  ;;  %v4637_v61 = vor.u32 %v5740_v19, %v4634_v7  ;;  %v5122_v7 = vld [vmem:[%s9098_s1 + $0x978] sm:$0xf0] }
 0x127   :  { %3465 = vmatpush.bf16.msrb.mxu3 %v4869_v1  ;;  %v8314_v36 = vpop.f32.mrf.mxu1  ;;  %v4717_v1 = vor.u32 %v5760_v57, %v4714_v0  ;;  %v4690_v0 = vld [vmem:[%s9098_s1 + $0x618] sm:$0xf0]  ;;  %v4682_v54 = vld [vmem:[%s9098_s1 + $0x608] sm:$0xf0] }
 0x128   :  { %3409 = vmatpush.bf16.msrb.mxu0 %v4669_v51  ;;  %3378 = vmatmul.bf16.vlgmr.msra.gmra.mxu2 %v6794_v24  ;;  %v5742_v24 = vld [vmem:[%s9098_s1 + $0x5b4] sm:$0xf]  ;;  %v4773_v51 = vor.u32 %v5774_v35, %v4770_v59  ;;  %v5768_v35 = vld [vmem:[%s9098_s1 + $0x684] sm:$0xf]  ;;  %v4986_v48 = vld [vmem:[%s9098_s1 + $0x868] sm:$0xf0] }
 0x129   :  { %3428 = vmatpush.bf16.msrb.mxu1 %v4733_v4  ;;  %3340 = vmatmul.bf16.vlgmr.msra.gmra.mxu0 %v6537_v6  ;;  %v4781_v6 = vor.u32 %v5776_v20, %v4778_v2  ;;  %v4701_v20 = vor.u32 %v5756_v30, %v4698_v34  ;;  %v4829_v2 = vor.u32 %v5788_v60, %v4826_v56 }
 0x12a   :  { %3447 = vmatpush.bf16.msrb.mxu2 %v4797_v32  ;;  %3359 = vmatmul.bf16.vlgmr.msra.gmra.mxu1 %v6792_v23  ;;  %v4653_v23 = vor.u32 %v5744_v15, %v4650_v37  ;;  %v5754_v15 = vld [vmem:[%s9098_s1 + $0x614] sm:$0xf]  ;;  %v4685_v30 = vor.u32 %v5752_v53, %v4682_v54  ;;  %v4914_v54 = vld [vmem:[%s9098_s1 + $0x7d8] sm:$0xf0] }
 0x12b   :  { %3466 = vmatpush.bf16.msrb.mxu3 %v4861_v43  ;;  %v8361_v49 = vpop.f32.mrf.mxu2  ;;  %v5772_v43 = vld [vmem:[%s9098_s1 + $0x6a4] sm:$0xf]  ;;  %v4693_v47 = vor.u32 %v5754_v15, %v4690_v0  ;;  %v4922_v0 = vld [vmem:[%s9098_s1 + $0x7e8] sm:$0xf0]  ;;  %v5810_v53 = vld [vmem:[%s9098_s1 + $0x7d4] sm:$0xf] }
 0x12c   :  { %3397 = vmatmul.bf16.vlgmr.msra.gmra.mxu3 %v6805_v28  ;;  %3410 = vmatpush.bf16.msrb.mxu0 %v4661_v13  ;;  %v4642_v28 = vld [vmem:[%s9098_s1 + $0x5b8] sm:$0xf0]  ;;  %v8363_v44 = vpop.f32.mrf.mxu3  ;;  %v4765_v8 = vor.u32 %v5772_v43, %v4762_v42  ;;  %v5846_v43 = vld [vmem:[%s9098_s1 + $0x8f4] sm:$0xf]  ;;  %v5812_v15 = vld [vmem:[%s9098_s1 + $0x7e4] sm:$0xf] }
 0x12d   :  { %3429 = vmatpush.bf16.msrb.mxu1 %v4725_v16  ;;  %v4645_v4 = vor.u32 %v5742_v24, %v4642_v28  ;;  %v4754_v13 = vld [vmem:[%s9098_s1 + $0x698] sm:$0xf0]  ;;  %v5738_v16 = vld [vmem:[%s9098_s1 + $0x594] sm:$0xf]  ;;  %v5736_v24 = vld [vmem:[%s9098_s1 + $0x584] sm:$0xf] }
 0x12e   :  { %3448 = vmatpush.bf16.msrb.mxu2 %v4789_v9  ;;  %v8374_v50 = vpop.f32.mrf.mxu0  ;;  %v5770_v9 = vld [vmem:[%s9098_s1 + $0x694] sm:$0xf]  ;;  %v4618_v28 = vld [vmem:[%s9098_s1 + $0x588] sm:$0xf0]  ;;  %v5058_v42 = vld [vmem:[%s9098_s1 + $0x8f8] sm:$0xf0] }
 0x12f   :  { %3467 = vmatpush.bf16.msrb.mxu3 %v4853_v33  ;;  %v8376_v32 = vpop.f32.mrf.mxu1  ;;  %v4626_v33 = vld [vmem:[%s9098_s1 + $0x598] sm:$0xf0]  ;;  %v4757_v59 = vor.u32 %v5770_v9, %v4754_v13  ;;  %v4621_v19 = vor.u32 %v5736_v24, %v4618_v28  ;;  %v5844_v9 = vld [vmem:[%s9098_s1 + $0x8e4] sm:$0xf]  ;;  %v5050_v13 = vld [vmem:[%s9098_s1 + $0x8e8] sm:$0xf0]  ;;  %v4989_v24 = vor.u32 %v5828_v41, %v4986_v48 }
 0x130   :  { %3411 = vmatpush.bf16.msrb.mxu0 %v4653_v23 }
 0x131   :  { %3430 = vmatpush.bf16.msrb.mxu1 %v4717_v1  ;;  %v4629_v1 = vor.u32 %v5738_v16, %v4626_v33 }
 0x132   :  { %3449 = vmatpush.bf16.msrb.mxu2 %v4781_v6 }
 0x133   :  { %3468 = vmatpush.bf16.msrb.mxu3 %v4845_v5  ;;  %v8417_v37 = vpop.f32.mrf.mxu2  ;;  %v4746_v5 = vld [vmem:[%s9098_s1 + $0x688] sm:$0xf0] }
 0x134   :  { %3412 = vmatpush.bf16.msrb.mxu0 %v4645_v4  ;;  %v8419_v57 = vpop.f32.mrf.mxu3  ;;  %v4810_v4 = vld [vmem:[%s9098_s1 + $0x708] sm:$0xf0] }
 0x135   :  { %3431 = vmatpush.bf16.msrb.mxu1 %v4709_v21  ;;  %v5830_v21 = vld [vmem:[%s9098_s1 + $0x874] sm:$0xf] }
 0x136   :  { %3450 = vmatpush.bf16.msrb.mxu2 %v4773_v51  ;;  %v8430_v6 = vpop.f32.mrf.mxu0  ;;  %v5784_v51 = vld [vmem:[%s9098_s1 + $0x704] sm:$0xf] }
 0x137   :  { %3469 = vmatpush.bf16.msrb.mxu3 %v4837_v52  ;;  %v8432_v23 = vpop.f32.mrf.mxu1  ;;  %v4749_v52 = vor.u32 %v5768_v35, %v4746_v5  ;;  %v4813_v34 = vor.u32 %v5784_v51, %v4810_v4  ;;  %v5860_v35 = vld [vmem:[%s9098_s1 + $0x964] sm:$0xf]  ;;  %v4925_v5 = vor.u32 %v5812_v15, %v4922_v0  ;;  %v5826_v51 = vld [vmem:[%s9098_s1 + $0x854] sm:$0xf]  ;;  %v5026_v0 = vld [vmem:[%s9098_s1 + $0x8b8] sm:$0xf0] }
 0x138   :  { %3413 = vmatpush.bf16.msrb.mxu0 %v4637_v61  ;;  %3383 = vmatmul.bf16.gmra.mxu2 %v6926_v40  ;;  %v4994_v40 = vld [vmem:[%s9098_s1 + $0x878] sm:$0xf0]  ;;  %v5838_v15 = vld [vmem:[%s9098_s1 + $0x8b4] sm:$0xf] }
 0x139   :  { %3432 = vmatpush.bf16.msrb.mxu1 %v4701_v20  ;;  %3345 = vmatmul.bf16.gmra.mxu0 %v6669_v14  ;;  %v5814_v14 = vld [vmem:[%s9098_s1 + $0x7f4] sm:$0xf]  ;;  %v4997_v16 = vor.u32 %v5830_v21, %v4994_v40  ;;  %v4917_v40 = vor.u32 %v5810_v53, %v4914_v54  ;;  %v3038_v53 = vadd.f32 %v8312_v12, %v8162_v63  ;;  %v5804_v63 = vld [vmem:[%s9098_s1 + $0x7a4] sm:$0xf]  ;;  %v4890_v12 = vld [vmem:[%s9098_s1 + $0x7a8] sm:$0xf0] }
 0x13a   :  { %3451 = vmatpush.bf16.msrb.mxu2 %v4765_v8  ;;  %3364 = vmatmul.bf16.gmra.mxu1 %v6924_v39  ;;  %v4930_v39 = vld [vmem:[%s9098_s1 + $0x7f8] sm:$0xf0]  ;;  %v5061_v8 = vor.u32 %v5846_v43, %v5058_v42  ;;  %v5029_v54 = vor.u32 %v5838_v15, %v5026_v0 }
 0x13b   :  { %3470 = vmatpush.bf16.msrb.mxu3 %v4829_v2  ;;  %v8486_v60 = vpop.f32.mrf.mxu2  ;;  %v4933_v61 = vor.u32 %v5814_v14, %v4930_v39  ;;  %v4978_v42 = vld [vmem:[%s9098_s1 + $0x858] sm:$0xf0]  ;;  %v5858_v14 = vld [vmem:[%s9098_s1 + $0x954] sm:$0xf] }
 0x13c   :  { %3402 = vmatmul.bf16.gmra.mxu3 %v6937_v45  ;;  %3414 = vmatpush.bf16.msrb.mxu0 %v4629_v1  ;;  %v5862_v45 = vld [vmem:[%s9098_s1 + $0x974] sm:$0xf]  ;;  %v8488_v56 = vpop.f32.mrf.mxu3  ;;  %v5053_v1 = vor.u32 %v5844_v9, %v5050_v13  ;;  %v5106_v39 = vld [vmem:[%s9098_s1 + $0x958] sm:$0xf0]  ;;  %v5824_v9 = vld [vmem:[%s9098_s1 + $0x844] sm:$0xf] }
 0x13d   :  { %3433 = vmatpush.bf16.msrb.mxu1 %v4693_v47  ;;  %v5125_v33 = vor.u32 %v5862_v45, %v5122_v7  ;;  %v5842_v47 = vld [vmem:[%s9098_s1 + $0x8d4] sm:$0xf]  ;;  %v5840_v45 = vld [vmem:[%s9098_s1 + $0x8c4] sm:$0xf]  ;;  %v5034_v7 = vld [vmem:[%s9098_s1 + $0x8c8] sm:$0xf0] }
 0x13e   :  { %3452 = vmatpush.bf16.msrb.mxu2 %v4757_v59  ;;  %v8496_v20 = vpop.f32.mrf.mxu0  ;;  %v5114_v59 = vld [vmem:[%s9098_s1 + $0x968] sm:$0xf0] }
 0x13f   :  { %3471 = vmatpush.bf16.msrb.mxu3 %v4821_v3  ;;  %v8498_v2 = vpop.f32.mrf.mxu1  ;;  %v5117_v28 = vor.u32 %v5860_v35, %v5114_v59  ;;  %v5042_v3 = vld [vmem:[%s9098_s1 + $0x8d8] sm:$0xf0]  ;;  %v4970_v13 = vld [vmem:[%s9098_s1 + $0x848] sm:$0xf0]  ;;  %v5822_v35 = vld [vmem:[%s9098_s1 + $0x834] sm:$0xf] }
 0x140   :  { %3415 = vmatpush.bf16.msrb.mxu0 %v4621_v19  ;;  %v5045_v19 = vor.u32 %v5842_v47, %v5042_v3  ;;  %v4973_v41 = vor.u32 %v5824_v9, %v4970_v13  ;;  %v5834_v9 = vld [vmem:[%s9098_s1 + $0x894] sm:$0xf]  ;;  %v5010_v13 = vld [vmem:[%s9098_s1 + $0x898] sm:$0xf0] }
 0x141   :  { %3434 = vmatpush.bf16.msrb.mxu1 %v4685_v30  ;;  %v4981_v30 = vor.u32 %v5826_v51, %v4978_v42  ;;  %v5836_v42 = vld [vmem:[%s9098_s1 + $0x8a4] sm:$0xf] }
 0x142   :  { %3453 = vmatpush.bf16.msrb.mxu2 %v4749_v52 }
 0x143   :  { %3472 = vmatpush.bf16.msrb.mxu3 %v4813_v34  ;;  %v8533_v4 = vpop.f32.mrf.mxu2  ;;  %v5109_v34 = vor.u32 %v5858_v14, %v5106_v39  ;;  %v5018_v14 = vld [vmem:[%s9098_s1 + $0x8a8] sm:$0xf0] }
 0x144   :  { %3484 = vmatpush.bf16.msra.mxu0 %v4933_v61  ;;  %v8535_v43 = vpop.f32.mrf.mxu3  ;;  %v4906_v61 = vld [vmem:[%s9098_s1 + $0x7c8] sm:$0xf0] }
 0x145   :  { %3503 = vmatpush.bf16.msra.mxu1 %v4997_v16  ;;  %v5856_v16 = vld [vmem:[%s9098_s1 + $0x944] sm:$0xf] }
 0x146   :  { %3522 = vmatpush.bf16.msra.mxu2 %v5061_v8  ;;  %v8546_v21 = vpop.f32.mrf.mxu0  ;;  %v5808_v8 = vld [vmem:[%s9098_s1 + $0x7c4] sm:$0xf] }
 0x147   :  { %3541 = vmatpush.bf16.msra.mxu3 %v5125_v33  ;;  %v8548_v52 = vpop.f32.mrf.mxu1  ;;  %v5098_v33 = vld [vmem:[%s9098_s1 + $0x948] sm:$0xf0] }
 0x148   :  { %3485 = vmatpush.bf16.msra.mxu0 %v4925_v5  ;;  %3454 = vmatmul.bf16.vlgmr.msrb.gmra.mxu2 %v7070_v18  ;;  %v5101_v48 = vor.u32 %v5856_v16, %v5098_v33  ;;  %v5806_v18 = vld [vmem:[%s9098_s1 + $0x7b4] sm:$0xf]  ;;  %v4962_v5 = vld [vmem:[%s9098_s1 + $0x838] sm:$0xf0] }
 0x149   :  { %3504 = vmatpush.bf16.msra.mxu1 %v4989_v24  ;;  %3416 = vmatmul.bf16.vlgmr.msrb.gmra.mxu0 %v6807_v29  ;;  %v5037_v29 = vor.u32 %v5840_v45, %v5034_v7  ;;  %v5854_v24 = vld [vmem:[%s9098_s1 + $0x934] sm:$0xf]  ;;  %v4965_v39 = vor.u32 %v5822_v35, %v4962_v5  ;;  %v4954_v45 = vld [vmem:[%s9098_s1 + $0x828] sm:$0xf0]  ;;  %v5852_v7 = vld [vmem:[%s9098_s1 + $0x924] sm:$0xf]  ;;  %v3040_v35 = vadd.f32 %v8374_v50, %v8219_v11 }
 0x14a   :  { %3523 = vmatpush.bf16.msra.mxu2 %v5053_v1  ;;  %3435 = vmatmul.bf16.vlgmr.msrb.gmra.mxu1 %v7068_v17  ;;  %v4909_v17 = vor.u32 %v5808_v8, %v4906_v61  ;;  %v5021_v8 = vor.u32 %v5836_v42, %v5018_v14  ;;  %v4893_v61 = vor.u32 %v5804_v63, %v4890_v12  ;;  %v5800_v11 = vld [vmem:[%s9098_s1 + $0x784] sm:$0xf]  ;;  %v4874_v50 = vld [vmem:[%s9098_s1 + $0x788] sm:$0xf0] }
 0x14b   :  { %3542 = vmatpush.bf16.msra.mxu3 %v5117_v28  ;;  %v8593_v59 = vpop.f32.mrf.mxu2  ;;  %v5090_v28 = vld [vmem:[%s9098_s1 + $0x938] sm:$0xf0]  ;;  %v5816_v14 = vld [vmem:[%s9098_s1 + $0x804] sm:$0xf]  ;;  %v5066_v12 = vld [vmem:[%s9098_s1 + $0x908] sm:$0xf0] }
 0x14c   :  { %3473 = vmatmul.bf16.vlgmr.msrb.gmra.mxu3 %v7081_v22  ;;  %3486 = vmatpush.bf16.msra.mxu0 %v4917_v40  ;;  %v4898_v22 = vld [vmem:[%s9098_s1 + $0x7b8] sm:$0xf0]  ;;  %v5820_v40 = vld [vmem:[%s9098_s1 + $0x824] sm:$0xf] }
 0x14d   :  { %3505 = vmatpush.bf16.msra.mxu1 %v4981_v30  ;;  %v4901_v51 = vor.u32 %v5806_v18, %v4898_v22  ;;  %v5082_v30 = vld [vmem:[%s9098_s1 + $0x928] sm:$0xf0]  ;;  %v4957_v16 = vor.u32 %v5820_v40, %v4954_v45  ;;  %v5850_v18 = vld [vmem:[%s9098_s1 + $0x914] sm:$0xf]  ;;  %v5074_v22 = vld [vmem:[%s9098_s1 + $0x918] sm:$0xf0] }
 0x14e   :  { %3524 = vmatpush.bf16.msra.mxu2 %v5045_v19  ;;  %v8606_v47 = vpop.f32.mrf.mxu0  ;;  %v5093_v19 = vor.u32 %v5854_v24, %v5090_v28  ;;  %v5085_v33 = vor.u32 %v5852_v7, %v5082_v30  ;;  %v5832_v24 = vld [vmem:[%s9098_s1 + $0x884] sm:$0xf]  ;;  %v5013_v28 = vor.u32 %v5834_v9, %v5010_v13  ;;  %v5077_v42 = vor.u32 %v5850_v18, %v5074_v22  ;;  %v5910_v40 = vld [vmem:[%s9098_s1 + $0xaf4] sm:$0xf]  ;;  %v5314_v45 = vld [vmem:[%s9098_s1 + $0xaf8] sm:$0xf0] }
 0x14f   :  { %3543 = vmatpush.bf16.msra.mxu3 %v5109_v34  ;;  %v8595_v1 = vpop.f32.mrf.mxu3  ;;  %v8608_v3 = vpop.f32.mrf.mxu1  ;;  %v3057_v34 = vadd.f32 %v8314_v36, %v3038_v53  ;;  %v5802_v36 = vld [vmem:[%s9098_s1 + $0x794] sm:$0xf]  ;;  %v3059_v7 = vadd.f32 %v8376_v32, %v3040_v35  ;;  %v5876_v35 = vld [vmem:[%s9098_s1 + $0x9e4] sm:$0xf] }
 0x150   :  { %3487 = vmatpush.bf16.msra.mxu0 %v4909_v17  ;;  %v5818_v17 = vld [vmem:[%s9098_s1 + $0x814] sm:$0xf] }
 0x151   :  { %3506 = vmatpush.bf16.msra.mxu1 %v4973_v41  ;;  %v3076_v15 = vadd.f32 %v8361_v49, %v3057_v34  ;;  %v5926_v34 = vld [vmem:[%s9098_s1 + $0xb74] sm:$0xf] }
 0x152   :  { %3525 = vmatpush.bf16.msra.mxu2 %v5037_v29  ;;  %v4882_v29 = vld [vmem:[%s9098_s1 + $0x798] sm:$0xf0] }
 0x153   :  { %3544 = vmatpush.bf16.msra.mxu3 %v5101_v48  ;;  %v8653_v0 = vpop.f32.mrf.mxu2  ;;  %v4946_v48 = vld [vmem:[%s9098_s1 + $0x818] sm:$0xf0]  ;;  %v4885_v53 = vor.u32 %v5802_v36, %v4882_v29  ;;  %v3095_v63 = vadd.f32 %v8363_v44, %v3076_v15  ;;  %v5894_v44 = vld [vmem:[%s9098_s1 + $0xa74] sm:$0xf]  ;;  %v5908_v29 = vld [vmem:[%s9098_s1 + $0xae4] sm:$0xf] }
 0x154   :  { %3488 = vmatpush.bf16.msra.mxu0 %v4901_v51  ;;  %v4949_v51 = vor.u32 %v5818_v17, %v4946_v48  ;;  %v5306_v17 = vld [vmem:[%s9098_s1 + $0xae8] sm:$0xf0] }
 0x155   :  { %3507 = vmatpush.bf16.msra.mxu1 %v4965_v39  ;;  %v4938_v39 = vld [vmem:[%s9098_s1 + $0x808] sm:$0xf0]  ;;  %v3114_v30 = vadd.f32 %v8546_v21, %v3095_v63 }
 0x156   :  { %3526 = vmatpush.bf16.msra.mxu2 %v5029_v54  ;;  %v8668_v49 = vpop.f32.mrf.mxu0  ;;  %v5002_v54 = vld [vmem:[%s9098_s1 + $0x888] sm:$0xf0]  ;;  %v4941_v21 = vor.u32 %v5816_v14, %v4938_v39 }
 0x157   :  { %3545 = vmatpush.bf16.msra.mxu3 %v5093_v19  ;;  %v8655_v41 = vpop.f32.mrf.mxu3  ;;  %v8670_v5 = vpop.f32.mrf.mxu1  ;;  %v5848_v19 = vld [vmem:[%s9098_s1 + $0x904] sm:$0xf]  ;;  %v5005_v32 = vor.u32 %v5832_v24, %v5002_v54  ;;  %v5178_v24 = vld [vmem:[%s9098_s1 + $0x9e8] sm:$0xf0] }
 0x158   :  { %3489 = vmatpush.bf16.msra.mxu0 %v4893_v61  ;;  %3459 = vmatmul.bf16.gmra.mxu2 %v7202_v58  ;;  %v4877_v58 = vor.u32 %v5800_v11, %v4874_v50  ;;  %v3078_v61 = vadd.f32 %v8417_v37, %v3059_v7  ;;  %v5069_v9 = vor.u32 %v5848_v19, %v5066_v12  ;;  %v5370_v54 = vld [vmem:[%s9098_s1 + $0xb68] sm:$0xf0] }
 0x159   :  { %3508 = vmatpush.bf16.msra.mxu1 %v4957_v16  ;;  %3421 = vmatmul.bf16.gmra.mxu0 %v6939_v46  ;;  %v5878_v46 = vld [vmem:[%s9098_s1 + $0x9f4] sm:$0xf]  ;;  %v3043_v37 = vadd.f32 %v8430_v6, %v8286_v10  ;;  %v3133_v10 = vadd.f32 %v8548_v52, %v3114_v30  ;;  %v5242_v6 = vld [vmem:[%s9098_s1 + $0xa68] sm:$0xf0]  ;;  %v5309_v50 = vor.u32 %v5908_v29, %v5306_v17  ;;  %v5888_v17 = vld [vmem:[%s9098_s1 + $0xa44] sm:$0xf] }
 0x15a   :  { %3527 = vmatpush.bf16.msra.mxu2 %v5021_v8  ;;  %3440 = vmatmul.bf16.gmra.mxu1 %v7200_v55  ;;  %v5186_v55 = vld [vmem:[%s9098_s1 + $0x9f8] sm:$0xf0]  ;;  %v3097_v11 = vadd.f32 %v8419_v57, %v3078_v61  ;;  %v5906_v57 = vld [vmem:[%s9098_s1 + $0xad4] sm:$0xf]  ;;  %v3045_v12 = vadd.f32 %v8496_v20, %v8322_v26  ;;  %v5290_v61 = vld [vmem:[%s9098_s1 + $0xac8] sm:$0xf0] }
 0x15b   :  { %3546 = vmatpush.bf16.msra.mxu3 %v5085_v33  ;;  %v5378_v8 = vld [vmem:[%s9098_s1 + $0xb78] sm:$0xf0]  ;;  %v8728_v13 = vpop.f32.mrf.mxu2  ;;  %v5317_v33 = vor.u32 %v5910_v40, %v5314_v45  ;;  %v5189_v36 = vor.u32 %v5878_v46, %v5186_v55  ;;  %v3152_v52 = vadd.f32 %v8593_v59, %v3133_v10  ;;  %v5890_v40 = vld [vmem:[%s9098_s1 + $0xa54] sm:$0xf] }
 0x15c   :  { %3478 = vmatmul.bf16.gmra.mxu3 %v7213_v62  ;;  %3490 = vmatpush.bf16.msra.mxu0 %v4885_v53  ;;  %v5250_v62 = vld [vmem:[%s9098_s1 + $0xa78] sm:$0xf0]  ;;  %v5381_v22 = vor.u32 %v5926_v34, %v5378_v8  ;;  %v5924_v53 = vld [vmem:[%s9098_s1 + $0xb64] sm:$0xf]  ;;  %v3116_v19 = vadd.f32 %v8606_v47, %v3097_v11  ;;  %v5922_v20 = vld [vmem:[%s9098_s1 + $0xb54] sm:$0xf] }
 0x15d   :  { %3509 = vmatpush.bf16.msra.mxu1 %v4949_v51  ;;  %v5253_v18 = vor.u32 %v5894_v44, %v5250_v62  ;;  %v5181_v51 = vor.u32 %v5876_v35, %v5178_v24  ;;  %v5373_v39 = vor.u32 %v5924_v53, %v5370_v54  ;;  %v5298_v59 = vld [vmem:[%s9098_s1 + $0xad8] sm:$0xf0]  ;;  %v3171_v45 = vadd.f32 %v8595_v1, %v3152_v52  ;;  %v5976_v1 = vld [vmem:[%s9100_s2] sm:$0x3]  ;;  %v5354_v35 = vld [vmem:[%s9098_s1 + $0xb48] sm:$0xf0] }
 0x15e   :  { %3528 = vmatpush.bf16.msra.mxu2 %v5013_v28  ;;  %v8740_v15 = vpop.f32.mrf.mxu0  ;;  %v5892_v28 = vld [vmem:[%s9098_s1 + $0xa64] sm:$0xf]  ;;  %v5170_v47 = vld [vmem:[%s9098_s1 + $0x9d8] sm:$0xf0]  ;;  %v8802_v44 = vperm.slane %v5976_v1, 1  ;;  %v5301_v34 = vor.u32 %v5906_v57, %v5298_v59 }
 0x15f   :  { %3547 = vmatpush.bf16.msra.mxu3 %v5077_v42  ;;  %v8730_v16 = vpop.f32.mrf.mxu3  ;;  %v8742_v48 = vpop.f32.mrf.mxu1  ;;  %v3062_v42 = vadd.f32 %v8432_v23, %v3043_v37  ;;  %v5245_v14 = vor.u32 %v5892_v28, %v5242_v6  ;;  %v5874_v23 = vld [vmem:[%s9098_s1 + $0x9d4] sm:$0xf]  ;;  %v5234_v26 = vld [vmem:[%s9098_s1 + $0xa58] sm:$0xf0]  ;;  %v5226_v37 = vld [vmem:[%s9098_s1 + $0xa48] sm:$0xf0] }
 0x160   :  { %3491 = vmatpush.bf16.msra.mxu0 %v4877_v58  ;;  %v5362_v46 = vld [vmem:[%s9098_s1 + $0xb58] sm:$0xf0]  ;;  %v3135_v58 = vadd.f32 %v8608_v3, %v3116_v19  ;;  %v5173_v8 = vor.u32 %v5874_v23, %v5170_v47  ;;  %v5237_v3 = vor.u32 %v5890_v40, %v5234_v26  ;;  %v9135_v6 = vld [vmem:[#allocation4_spill] sm:$0xff] }
 0x161   :  { %3510 = vmatpush.bf16.msra.mxu1 %v4941_v21  ;;  %v3081_v63 = vadd.f32 %v8486_v60, %v3062_v42  ;;  %v5872_v21 = vld [vmem:[%s9098_s1 + $0x9c4] sm:$0xf]  ;;  %v5365_v29 = vor.u32 %v5922_v20, %v5362_v46  ;;  %v9136_v53 = vld [vmem:[#allocation5_spill] sm:$0xff]  ;;  %v5902_v11 = vld [vmem:[%s9098_s1 + $0xab4] sm:$0xf] }
 0x162   :  { %3529 = vmatpush.bf16.msra.mxu2 %v5005_v32  ;;  %v5904_v32 = vld [vmem:[%s9098_s1 + $0xac4] sm:$0xf]  ;;  %v5886_v42 = vld [vmem:[%s9098_s1 + $0xa34] sm:$0xf]  ;;  %v5218_v57 = vld [vmem:[%s9098_s1 + $0xa38] sm:$0xf0] }
 0x163   :  { %3548 = vmatpush.bf16.msra.mxu3 %v5069_v9  ;;  %v8786_v7 = vpop.f32.mrf.mxu2  ;;  %v5162_v9 = vld [vmem:[%s9098_s1 + $0x9c8] sm:$0xf0]  ;;  %v5918_v59 = vld [vmem:[%s9098_s1 + $0xb34] sm:$0xf] }
 0x164   :  { %3560 = vmatpush.bf16.msrb.mxu0 %v5189_v36  ;;  %v3064_v36 = vadd.f32 %v8498_v2, %v3045_v12  ;;  %v9134_v2 = vld [vmem:[#allocation3_spill] sm:$0xff]  ;;  %v5165_v54 = vor.u32 %v5872_v21, %v5162_v9 }
 0x165   :  { %3579 = vmatpush.bf16.msrb.mxu1 %v5253_v18  ;;  %v5920_v18 = vld [vmem:[%s9098_s1 + $0xb44] sm:$0xf]  ;;  %v5338_v21 = vld [vmem:[%s9098_s1 + $0xb28] sm:$0xf0] }
 0x166   :  { %3598 = vmatpush.bf16.msrb.mxu2 %v5317_v33  ;;  %v3189_v55 = vpop.f32.mrf.mxu0  ;;  %v3100_v33 = vadd.f32 %v8488_v56, %v3081_v63  ;;  %v3083_v24 = vadd.f32 %v8533_v4, %v3064_v36  ;;  %v5282_v4 = vld [vmem:[%s9098_s1 + $0xab8] sm:$0xf0]  ;;  %v5357_v52 = vor.u32 %v5920_v18, %v5354_v35 }
 0x167   :  { %3617 = vmatpush.bf16.msrb.mxu3 %v5381_v22  ;;  %v8788_v60 = vpop.f32.mrf.mxu3  ;;  %v3208_v30 = vpop.f32.mrf.mxu1  ;;  %v3190_v62 = vadd.f32 %v3189_v55, %v3171_v45  ;;  %v3154_v22 = vadd.f32 %v8653_v0, %v3135_v58  ;;  %v5346_v63 = vld [vmem:[%s9098_s1 + $0xb38] sm:$0xf0]  ;;  %v5900_v45 = vld [vmem:[%s9098_s1 + $0xaa4] sm:$0xf]  ;;  %v5285_v20 = vor.u32 %v5902_v11, %v5282_v4  ;;  %v5274_v55 = vld [vmem:[%s9098_s1 + $0xaa8] sm:$0xf0] }
 0x168   :  { %3561 = vmatpush.bf16.msrb.mxu0 %v5181_v51  ;;  %v3119_v28 = vadd.f32 %v8668_v49, %v3100_v33  ;;  %v3209_v10 = vadd.f32 %v3208_v30, %v8802_v44  ;;  %3530 = vmatmul.bf16.vlgmr.msra.gmra.mxu2 %v9135_v6  ;;  %v5229_v49 = vor.u32 %v5888_v17, %v5226_v37  ;;  %v5154_v51 = vld [vmem:[%s9098_s1 + $0x9b8] sm:$0xf0]  ;;  %v5884_v58 = vld [vmem:[%s9098_s1 + $0xa24] sm:$0xf]  ;;  %v5866_v17 = vld [vmem:[%s9098_s1 + $0x994] sm:$0xf] }
 0x169   :  { %3580 = vmatpush.bf16.msrb.mxu1 %v5245_v14  ;;  %vm3674_vm0 = vcmp.gt.f32.partialorder %v3190_v62, 0.0  ;;  %v3682_v56 = vmul.f32 0.2, %v3190_v62  ;;  %3492 = vmatmul.bf16.vlgmr.msra.gmra.mxu0 %v7083_v25  ;;  %v5293_v25 = vor.u32 %v5904_v32, %v5290_v61  ;;  %v3173_v14 = vadd.f32 %v8655_v41, %v3154_v22  ;;  %v5138_v22 = vld [vmem:[%s9098_s1 + $0x998] sm:$0xf0] }
 0x16a   :  { %3599 = vmatpush.bf16.msrb.mxu2 %v5309_v50  ;;  %3511 = vmatmul.bf16.vlgmr.msra.gmra.mxu1 %v9134_v2  ;;  %v5870_v50 = vld [vmem:[%s9098_s1 + $0x9b4] sm:$0xf]  ;;  %v3102_v12 = vadd.f32 %v8535_v43, %v3083_v24  ;;  %v3138_v23 = vadd.f32 %v8670_v5, %v3119_v28  ;;  %v5868_v43 = vld [vmem:[%s9098_s1 + $0x9a4] sm:$0xf]  ;;  %v5146_v5 = vld [vmem:[%s9098_s1 + $0x9a8] sm:$0xf0]  ;;  %v5221_v30 = vor.u32 %v5886_v42, %v5218_v57 }
 0x16b   :  { %3618 = vmatpush.bf16.msrb.mxu3 %v5373_v39  ;;  %v3690_v0 = vsel %vm3674_vm0, %v3190_v62, %v3682_v56  ;;  %v3227_v39 = vpop.f32.mrf.mxu2  ;;  %v5157_v46 = vor.u32 %v5870_v50, %v5154_v51  ;;  %v5349_v32 = vor.u32 %v5918_v59, %v5346_v63  ;;  %v5210_v62 = vld [vmem:[%s9098_s1 + $0xa28] sm:$0xf0]  ;;  %v5277_v36 = vor.u32 %v5900_v45, %v5274_v55  ;;  %v5882_v56 = vld [vmem:[%s9098_s1 + $0xa14] sm:$0xf]  ;;  %v5202_v28 = vld [vmem:[%s9098_s1 + $0xa18] sm:$0xf0] }
 0x16c   :  { %3549 = vmatmul.bf16.vlgmr.msra.gmra.mxu3 %v9136_v53  ;;  %3562 = vmatpush.bf16.msrb.mxu0 %v5173_v8  ;;  %3698 = vst [vmem:[%s9101_s3] sm:$0xff] %v3690_v0  ;;  %v3228_v47 = vadd.f32 %v3227_v39, %v3209_v10  ;;  %v3157_v8 = vadd.f32 %v8728_v13, %v3138_v23  ;;  %v5266_v13 = vld [vmem:[%s9098_s1 + $0xa98] sm:$0xf0]  ;;  %v5914_v10 = vld [vmem:[%s9098_s1 + $0xb14] sm:$0xf]  ;;  %v5130_v50 = vld [vmem:[%s9098_s1 + $0x988] sm:$0xf0] }
 0x16d   :  { %3581 = vmatpush.bf16.msrb.mxu1 %v5237_v3  ;;  %v3121_v9 = vadd.f32 %v8740_v15, %v3102_v12  ;;  %v5149_v3 = vor.u32 %v5868_v43, %v5146_v5  ;;  %v5213_v37 = vor.u32 %v5884_v58, %v5210_v62  ;;  %v5330_v6 = vld [vmem:[%s9098_s1 + $0xb18] sm:$0xf0]  ;;  %v5205_v42 = vor.u32 %v5882_v56, %v5202_v28  ;;  %v5880_v39 = vld [vmem:[%s9098_s1 + $0xa04] sm:$0xf]  ;;  %v9138_v23 = vld [vmem:[#allocation7_spill] sm:$0xff] }
 0x16e   :  { %3600 = vmatpush.bf16.msrb.mxu2 %v5301_v34  ;;  %v3191_v41 = vpop.f32.mrf.mxu0  ;;  %v5916_v34 = vld [vmem:[%s9098_s1 + $0xb24] sm:$0xf]  ;;  %v3176_v2 = vadd.f32 %v8730_v16, %v3157_v8  ;;  %v9140_v45 = vld [vmem:[#allocation9_spill] sm:$0xff]  ;;  %v5958_v43 = vld [vmem:[%s9098_s1 + $0xc74] sm:$0xf] }
 0x16f   :  { %3619 = vmatpush.bf16.msrb.mxu3 %v5365_v29  ;;  %v3246_v19 = vpop.f32.mrf.mxu3  ;;  %v3210_v40 = vpop.f32.mrf.mxu1  ;;  %v3192_v26 = vadd.f32 %v3191_v41, %v3173_v14  ;;  %v5898_v29 = vld [vmem:[%s9098_s1 + $0xa94] sm:$0xf]  ;;  %v5341_v18 = vor.u32 %v5916_v34, %v5338_v21  ;;  %v3140_v53 = vadd.f32 %v8742_v48, %v3121_v9  ;;  %v5896_v16 = vld [vmem:[%s9098_s1 + $0xa84] sm:$0xf]  ;;  %v5333_v14 = vor.u32 %v5914_v10, %v5330_v6  ;;  %v5506_v5 = vld [vmem:[%s9098_s1 + $0xc78] sm:$0xf0] }
 0x170   :  { %3563 = vmatpush.bf16.msrb.mxu0 %v5165_v54  ;;  %v8881_v1 = vadd.f32 %v3246_v19, %v3228_v47  ;;  %v3211_v15 = vadd.f32 %v3210_v40, %v8802_v44  ;;  %v5269_v4 = vor.u32 %v5898_v29, %v5266_v13  ;;  %v5864_v48 = vld [vmem:[%s9098_s1 + $0x984] sm:$0xf]  ;;  %v5194_v19 = vld [vmem:[%s9098_s1 + $0xa08] sm:$0xf0]  ;;  %v9139_v40 = vld [vmem:[#allocation8_spill] sm:$0xff] }
 0x171   :  { %3582 = vmatpush.bf16.msrb.mxu1 %v5229_v49  ;;  %vm3676_vm1 = vcmp.gt.f32.partialorder %v3192_v26, 0.0  ;;  %v3684_v61 = vmul.f32 0.2, %v3192_v26  ;;  %v5141_v49 = vor.u32 %v5866_v17, %v5138_v22  ;;  %v5912_v57 = vld [vmem:[%s9098_s1 + $0xb04] sm:$0xf]  ;;  %v3159_v59 = vadd.f32 %v8786_v7, %v3140_v53 }
 0x172   :  { %3601 = vmatpush.bf16.msrb.mxu2 %v5293_v25  ;;  %v9137_v12 = vld [vmem:[#allocation2_spill] sm:$0xff]  ;;  %v5322_v47 = vld [vmem:[%s9098_s1 + $0xb08] sm:$0xf0]  ;;  %v5942_v7 = vld [vmem:[%s9098_s1 + $0xbf4] sm:$0xf]  ;;  %v5133_v55 = vor.u32 %v5864_v48, %v5130_v50 }
 0x173   :  { %3620 = vmatpush.bf16.msrb.mxu3 %v5357_v52  ;;  %v3692_v33 = vsel %vm3676_vm1, %v3192_v26, %v3684_v61  ;;  %v3229_v35 = vpop.f32.mrf.mxu2  ;;  %v5258_v52 = vld [vmem:[%s9098_s1 + $0xa88] sm:$0xf0]  ;;  %v5442_v26 = vld [vmem:[%s9098_s1 + $0xbf8] sm:$0xf0]  ;;  %v3178_v58 = vadd.f32 %v8788_v60, %v3159_v59  ;;  %v5956_v60 = vld [vmem:[%s9098_s1 + $0xc64] sm:$0xf] }
 0x174   :  { %3564 = vmatpush.bf16.msrb.mxu0 %v5157_v46  ;;  %3700 = vst [vmem:[%s9101_s3 + $0x10] sm:$0xff] %v3692_v33  ;;  %v3230_v0 = vadd.f32 %v3229_v35, %v3211_v15  ;;  %v5261_v46 = vor.u32 %v5896_v16, %v5258_v52  ;;  %v5445_v8 = vor.u32 %v5942_v7, %v5442_v26  ;;  %v5498_v13 = vld [vmem:[%s9098_s1 + $0xc68] sm:$0xf0]  ;;  %v5426_v35 = vld [vmem:[%s9098_s1 + $0xbd8] sm:$0xf0]  ;;  %v9141_v48 = vld [vmem:[#allocation6_spill] sm:$0xff] }
 0x175   :  { %3583 = vmatpush.bf16.msrb.mxu1 %v5221_v30  ;;  %v5197_v30 = vor.u32 %v5880_v39, %v5194_v19  ;;  %v5509_v33 = vor.u32 %v5958_v43, %v5506_v5  ;;  %v5954_v10 = vld [vmem:[%s9098_s1 + $0xc54] sm:$0xf]  ;;  %v9142_v50 = vld [vmem:[#allocation11_spill] sm:$0xff]  ;;  %v9144_v39 = vld [vmem:[#allocation13_spill] sm:$0xff] }
 0x176   :  { %3602 = vmatpush.bf16.msrb.mxu2 %v5285_v20  ;;  %v3194_v25 = vpop.f32.mrf.mxu0  ;;  %v5934_v59 = vld [vmem:[%s9098_s1 + $0xbb4] sm:$0xf]  ;;  %v5932_v43 = vld [vmem:[%s9098_s1 + $0xba4] sm:$0xf]  ;;  %v5402_v5 = vld [vmem:[%s9098_s1 + $0xba8] sm:$0xf0] }
 0x177   :  { %3621 = vmatpush.bf16.msrb.mxu3 %v5349_v32  ;;  %v3248_v24 = vpop.f32.mrf.mxu3  ;;  %v3213_v54 = vpop.f32.mrf.mxu1  ;;  %v3195_v11 = vadd.f32 %v3194_v25, %v3176_v2  ;;  %v5325_v32 = vor.u32 %v5912_v57, %v5322_v47  ;;  %v5938_v2 = vld [vmem:[%s9098_s1 + $0xbd4] sm:$0xf] }
 0x178   :  { %3565 = vmatpush.bf16.msrb.mxu0 %v5149_v3  ;;  %v8939_v51 = vadd.f32 %v3248_v24, %v3230_v0  ;;  %v3214_v41 = vadd.f32 %v3213_v54, %v8802_v44  ;;  %3535 = vmatmul.bf16.gmra.mxu2 %v9139_v40  ;;  %v5434_v3 = vld [vmem:[%s9098_s1 + $0xbe8] sm:$0xf0]  ;;  %v5429_v54 = vor.u32 %v5938_v2, %v5426_v35  ;;  %v5950_v47 = vld [vmem:[%s9098_s1 + $0xc34] sm:$0xf]  ;;  %v9145_v2 = vld [vmem:[#allocation10_spill] sm:$0xff] }
 0x179   :  { %3584 = vmatpush.bf16.msrb.mxu1 %v5213_v37  ;;  %vm3678_vm2 = vcmp.gt.f32.partialorder %v3195_v11, 0.0  ;;  %v3686_v63 = vmul.f32 0.2, %v3195_v11  ;;  %3497 = vmatmul.bf16.gmra.mxu0 %v9137_v12  ;;  %v5450_v35 = vld [vmem:[%s9098_s1 + $0xc08] sm:$0xf0] }
 0x17a   :  { %3603 = vmatpush.bf16.msrb.mxu2 %v5277_v36  ;;  %3516 = vmatmul.bf16.gmra.mxu1 %v9138_v23  ;;  %v5940_v36 = vld [vmem:[%s9098_s1 + $0xbe4] sm:$0xf] }
 0x17b   :  { %3622 = vmatpush.bf16.msrb.mxu3 %v5341_v18  ;;  %v3694_v20 = vsel %vm3678_vm2, %v3195_v11, %v3686_v63  ;;  %v3232_v62 = vpop.f32.mrf.mxu2  ;;  %v5437_v37 = vor.u32 %v5940_v36, %v5434_v3  ;;  %v5501_v18 = vor.u32 %v5956_v60, %v5498_v13  ;;  %v5410_v63 = vld [vmem:[%s9098_s1 + $0xbb8] sm:$0xf0] }
 0x17c   :  { %3554 = vmatmul.bf16.gmra.mxu3 %v9140_v45  ;;  %3566 = vmatpush.bf16.msrb.mxu0 %v5141_v49  ;;  %3702 = vst [vmem:[%s9101_s3 + $0x20] sm:$0xff] %v3694_v20  ;;  %v3233_v61 = vadd.f32 %v3232_v62, %v3214_v41  ;;  %v5418_v49 = vld [vmem:[%s9098_s1 + $0xbc8] sm:$0xf0]  ;;  %v5474_v41 = vld [vmem:[%s9098_s1 + $0xc38] sm:$0xf0]  ;;  %v5413_v20 = vor.u32 %v5934_v59, %v5410_v63 }
 0x17d   :  { %3585 = vmatpush.bf16.msrb.mxu1 %v5205_v42  ;;  %v5482_v42 = vld [vmem:[%s9098_s1 + $0xc48] sm:$0xf0] }
 0x17e   :  { %3604 = vmatpush.bf16.msrb.mxu2 %v5269_v4  ;;  %v3196_v21 = vpop.f32.mrf.mxu0  ;;  %v5936_v4 = vld [vmem:[%s9098_s1 + $0xbc4] sm:$0xf] }
 0x17f   :  { %3623 = vmatpush.bf16.msrb.mxu3 %v5333_v14  ;;  %v3251_v34 = vpop.f32.mrf.mxu3  ;;  %v3215_v9 = vpop.f32.mrf.mxu1  ;;  %v3197_v29 = vadd.f32 %v3196_v21, %v3178_v58  ;;  %v9143_v14 = vld [vmem:[#allocation12_spill] sm:$0xff]  ;;  %v5421_v19 = vor.u32 %v5936_v4, %v5418_v49  ;;  %v5405_v58 = vor.u32 %v5932_v43, %v5402_v5 }
 0x180   :  { %3567 = vmatpush.bf16.msrb.mxu0 %v5133_v55  ;;  %v8987_v17 = vadd.f32 %v3251_v34, %v3233_v61  ;;  %v3216_v56 = vadd.f32 %v3215_v9, %v8802_v44  ;;  %v5490_v44 = vld [vmem:[%s9098_s1 + $0xc58] sm:$0xf0]  ;;  %v5477_v55 = vor.u32 %v5950_v47, %v5474_v41  ;;  %v5930_v34 = vld [vmem:[%s9098_s1 + $0xb94] sm:$0xf] }
 0x181   :  { %3586 = vmatpush.bf16.msrb.mxu1 %v5197_v30  ;;  %vm3680_vm3 = vcmp.gt.f32.partialorder %v3197_v29, 0.0  ;;  %v3688_v15 = vmul.f32 0.2, %v3197_v29  ;;  %v5493_v11 = vor.u32 %v5954_v10, %v5490_v44  ;;  %v5946_v9 = vld [vmem:[%s9098_s1 + $0xc14] sm:$0xf] }
 0x182   :  { %3605 = vmatpush.bf16.msrb.mxu2 %v5261_v46 }
 0x183   :  { %3624 = vmatpush.bf16.msrb.mxu3 %v5325_v32  ;;  %v3696_v22 = vsel %vm3680_vm3, %v3197_v29, %v3688_v15  ;;  %v3234_v24 = vpop.f32.mrf.mxu2  ;;  %v5466_v32 = vld [vmem:[%s9098_s1 + $0xc28] sm:$0xf0] }
 0x184   :  { %3636 = vmatpush.bf16.msra.mxu0 %v5445_v8  ;;  %3704 = vst [vmem:[%s9101_s3 + $0x30] sm:$0xff] %v3696_v22  ;;  %v3235_v6 = vadd.f32 %v3234_v24, %v3216_v56  ;;  %v5386_v22 = vld [vmem:[%s9098_s1 + $0xb88] sm:$0xf0] }
 0x185   :  { %3655 = vmatpush.bf16.msra.mxu1 %v5509_v33  ;;  %v9146_v24 = vld [vmem:[#allocation15_spill] sm:$0xff] }
 0x186   :  { %5960 = vmatpush.bf16.msra.mxu2 %v5445_v8  ;;  %v3265_v53 = vpop.f32.mrf.mxu0  ;;  %v5394_v8 = vld [vmem:[%s9098_s1 + $0xb98] sm:$0xf0] }
 0x187   :  { %5968 = vmatpush.bf16.msra.mxu3 %v5509_v33  ;;  %v3253_v28 = vpop.f32.mrf.mxu3  ;;  %v3284_v0 = vpop.f32.mrf.mxu1  ;;  %v3266_v25 = vadd.f32 %v3265_v53, %v8881_v1  ;;  %v5952_v1 = vld [vmem:[%s9098_s1 + $0xc44] sm:$0xf]  ;;  %v5458_v33 = vld [vmem:[%s9098_s1 + $0xc18] sm:$0xf0]  ;;  %v5397_v13 = vor.u32 %v5930_v34, %v5394_v8 }
 0x188   :  { %3637 = vmatpush.bf16.msra.mxu0 %v5437_v37  ;;  %v9006_v16 = vadd.f32 %v3253_v28, %v3235_v6  ;;  %3606 = vmatmul.bf16.vlgmr.msrb.gmra.mxu2 %v9143_v14  ;;  %v5485_v57 = vor.u32 %v5952_v1, %v5482_v42  ;;  %v9147_v28 = vld [vmem:[#allocation16_spill] sm:$0xff] }
 0x189   :  { %3656 = vmatpush.bf16.msra.mxu1 %v5501_v18  ;;  %v3285_v52 = vadd.f32 %v3284_v0, %v3266_v25  ;;  %3568 = vmatmul.bf16.vlgmr.msrb.gmra.mxu0 %v9141_v48 }
 0x18a   :  { %5961 = vmatpush.bf16.msra.mxu2 %v5437_v37  ;;  %3587 = vmatmul.bf16.vlgmr.msrb.gmra.mxu1 %v9142_v50  ;;  %v5461_v37 = vor.u32 %v5946_v9, %v5458_v33 }
 0x18b   :  { %5969 = vmatpush.bf16.msra.mxu3 %v5501_v18  ;;  %v3303_v12 = vpop.f32.mrf.mxu2  ;;  %v5928_v18 = vld [vmem:[%s9098_s1 + $0xb84] sm:$0xf] }
 0x18c   :  { %3625 = vmatmul.bf16.vlgmr.msrb.gmra.mxu3 %v9144_v39  ;;  %3638 = vmatpush.bf16.msra.mxu0 %v5429_v54  ;;  %v3304_v40 = vadd.f32 %v3303_v12, %v3285_v52  ;;  %v5389_v10 = vor.u32 %v5928_v18, %v5386_v22 }
 0x18d   :  { %3657 = vmatpush.bf16.msra.mxu1 %v5493_v11 }
 0x18e   :  { %5962 = vmatpush.bf16.msra.mxu2 %v5429_v54  ;;  %v3267_v45 = vpop.f32.mrf.mxu0 }
 0x18f   :  { %5970 = vmatpush.bf16.msra.mxu3 %v5493_v11  ;;  %v3322_v23 = vpop.f32.mrf.mxu3  ;;  %v3286_v7 = vpop.f32.mrf.mxu1  ;;  %v3268_v26 = vadd.f32 %v3267_v45, %v8939_v51  ;;  %v5948_v51 = vld [vmem:[%s9098_s1 + $0xc24] sm:$0xf] }
 0x190   :  { %3639 = vmatpush.bf16.msra.mxu0 %v5421_v19  ;;  %v9037_v46 = vadd.f32 %v3322_v23, %v3304_v40  ;;  %v5469_v62 = vor.u32 %v5948_v51, %v5466_v32 }
 0x191   :  { %3658 = vmatpush.bf16.msra.mxu1 %v5485_v57  ;;  %v3287_v30 = vadd.f32 %v3286_v7, %v3268_v26 }
 0x192   :  { %5963 = vmatpush.bf16.msra.mxu2 %v5421_v19  ;;  %v9148_v19 = vld [vmem:[#allocation14_spill] sm:$0xff] }
 0x193   :  { %5971 = vmatpush.bf16.msra.mxu3 %v5485_v57  ;;  %v3305_v61 = vpop.f32.mrf.mxu2 }
 0x194   :  { %3640 = vmatpush.bf16.msra.mxu0 %v5413_v20  ;;  %v3306_v36 = vadd.f32 %v3305_v61, %v3287_v30 }
 0x195   :  { %3659 = vmatpush.bf16.msra.mxu1 %v5477_v55 }
 0x196   :  { %5964 = vmatpush.bf16.msra.mxu2 %v5413_v20  ;;  %v3270_v3 = vpop.f32.mrf.mxu0 }
 0x197   :  { %5972 = vmatpush.bf16.msra.mxu3 %v5477_v55  ;;  %v3324_v21 = vpop.f32.mrf.mxu3  ;;  %v3289_v29 = vpop.f32.mrf.mxu1  ;;  %v3271_v60 = vadd.f32 %v3270_v3, %v8987_v17  ;;  %v5944_v17 = vld [vmem:[%s9098_s1 + $0xc04] sm:$0xf] }
 0x198   :  { %3641 = vmatpush.bf16.msra.mxu0 %v5405_v58  ;;  %v3325_v15 = vadd.f32 %v3324_v21, %v3306_v36  ;;  %3611 = vmatmul.bf16.gmra.mxu2 %v9146_v24  ;;  %v5453_v44 = vor.u32 %v5944_v17, %v5450_v35 }
 0x199   :  { %3660 = vmatpush.bf16.msra.mxu1 %v5469_v62  ;;  %v3290_v56 = vadd.f32 %v3289_v29, %v3271_v60  ;;  %3573 = vmatmul.bf16.gmra.mxu0 %v9145_v2 }
 0x19a   :  { %5965 = vmatpush.bf16.msra.mxu2 %v5405_v58  ;;  %3592 = vmatmul.bf16.gmra.mxu1 %v7749_v27 }
 0x19b   :  { %5973 = vmatpush.bf16.msra.mxu3 %v5469_v62  ;;  %v3308_v6 = vpop.f32.mrf.mxu2 }
 0x19c   :  { %3630 = vmatmul.bf16.gmra.mxu3 %v9147_v28  ;;  %3642 = vmatpush.bf16.msra.mxu0 %v5397_v13  ;;  %v3309_v53 = vadd.f32 %v3308_v6, %v3290_v56 }
 0x19d   :  { %3661 = vmatpush.bf16.msra.mxu1 %v5461_v37 }
 0x19e   :  { %5966 = vmatpush.bf16.msra.mxu2 %v5397_v13  ;;  %v3272_v0 = vpop.f32.mrf.mxu0 }
 0x19f   :  { %5974 = vmatpush.bf16.msra.mxu3 %v5461_v37  ;;  %v3327_v27 = vpop.f32.mrf.mxu3  ;;  %v3291_v25 = vpop.f32.mrf.mxu1  ;;  %v3273_v54 = vadd.f32 %v3272_v0, %v9006_v16  ;;  %v9149_v16 = vld [vmem:[#allocation17_spill] sm:$0xff] }
 0x1a0   :  { %3643 = vmatpush.bf16.msra.mxu0 %v5389_v10  ;;  %v3328_v11 = vadd.f32 %v3327_v27, %v3309_v53 }
 0x1a1   :  { %3662 = vmatpush.bf16.msra.mxu1 %v5453_v44  ;;  %v3292_v4 = vadd.f32 %v3291_v25, %v3273_v54 }
 0x1a2   :  { %5967 = vmatpush.bf16.msra.mxu2 %v5389_v10 }
 0x1a3   :  { %5975 = vmatpush.bf16.msra.mxu3 %v5453_v44  ;;  %v3310_v49 = vpop.f32.mrf.mxu2 }
 0x1a4   :  { %v3311_v48 = vadd.f32 %v3310_v49, %v3292_v4 }
 0x1a6   :  { %v3341_v50 = vpop.f32.mrf.mxu0 }
 0x1a7   :  { %v3329_v52 = vpop.f32.mrf.mxu3  ;;  %v3360_v1 = vpop.f32.mrf.mxu1  ;;  %v3342_v42 = vadd.f32 %v3341_v50, %v9037_v46 }
 0x1a8   :  { %v3330_v14 = vadd.f32 %v3329_v52, %v3311_v48  ;;  %3649 = vmatmul.bf16.vlgmr.msra.gmra.mxu2 %v9149_v16 }
 0x1a9   :  { %v3361_v39 = vadd.f32 %v3360_v1, %v3342_v42  ;;  %3644 = vmatmul.bf16.vlgmr.msra.gmra.mxu0 %v9148_v19 }
 0x1aa   :  { %3663 = vmatmul.bf16.vlgmr.msra.gmra.mxu1 %v7869_v38 }
 0x1ab   :  { %v3379_v57 = vpop.f32.mrf.mxu2 }
 0x1ac   :  { %3668 = vmatmul.bf16.vlgmr.msra.gmra.mxu3 %v7983_v31  ;;  %v3380_v63 = vadd.f32 %v3379_v57, %v3361_v39 }
 0x1ae   :  { %v3343_v12 = vpop.f32.mrf.mxu0 }
 0x1af   :  { %v3398_v59 = vpop.f32.mrf.mxu3  ;;  %v3362_v23 = vpop.f32.mrf.mxu1  ;;  %v3344_v47 = vadd.f32 %v3343_v12, %v3325_v15 }
 0x1b0   :  { %v3399_v41 = vadd.f32 %v3398_v59, %v3380_v63 }
 0x1b1   :  { %v3363_v40 = vadd.f32 %v3362_v23, %v3344_v47 }
 0x1b3   :  { %v3381_v45 = vpop.f32.mrf.mxu2 }
 0x1b4   :  { %v3382_v26 = vadd.f32 %v3381_v45, %v3363_v40 }
 0x1b6   :  { %v3346_v20 = vpop.f32.mrf.mxu0 }
 0x1b7   :  { %v3400_v7 = vpop.f32.mrf.mxu3  ;;  %v3365_v46 = vpop.f32.mrf.mxu1  ;;  %v3347_v55 = vadd.f32 %v3346_v20, %v3328_v11 }
 0x1b8   :  { %v3401_v43 = vadd.f32 %v3400_v7, %v3382_v26 }
 0x1b9   :  { %v3366_v38 = vadd.f32 %v3365_v46, %v3347_v55 }
 0x1bb   :  { %v3384_v5 = vpop.f32.mrf.mxu2 }
 0x1bc   :  { %v3385_v51 = vadd.f32 %v3384_v5, %v3366_v38 }
 0x1be   :  { %v3348_v31 = vpop.f32.mrf.mxu0 }
 0x1bf   :  { %v3403_v30 = vpop.f32.mrf.mxu3  ;;  %v3367_v32 = vpop.f32.mrf.mxu1  ;;  %v3349_v58 = vadd.f32 %v3348_v31, %v3330_v14 }
 0x1c0   :  { %v3404_v62 = vadd.f32 %v3403_v30, %v3385_v51 }
 0x1c1   :  { %v3368_v34 = vadd.f32 %v3367_v32, %v3349_v58 }
 0x1c3   :  { %v3386_v8 = vpop.f32.mrf.mxu2 }
 0x1c4   :  { %v3387_v21 = vadd.f32 %v3386_v8, %v3368_v34 }
 0x1c6   :  { %v3417_v9 = vpop.f32.mrf.mxu0 }
 0x1c7   :  { %v3405_v61 = vpop.f32.mrf.mxu3  ;;  %v3436_v33 = vpop.f32.mrf.mxu1  ;;  %v3418_v36 = vadd.f32 %v3417_v9, %v3399_v41 }
 0x1c8   :  { %v3406_v3 = vadd.f32 %v3405_v61, %v3387_v21 }
 0x1c9   :  { %v3437_v29 = vadd.f32 %v3436_v33, %v3418_v36 }
 0x1cb   :  { %v3455_v60 = vpop.f32.mrf.mxu2 }
 0x1cc   :  { %v3456_v15 = vadd.f32 %v3455_v60, %v3437_v29 }
 0x1ce   :  { %v3419_v37 = vpop.f32.mrf.mxu0 }
 0x1cf   :  { %v3474_v13 = vpop.f32.mrf.mxu3  ;;  %v3438_v18 = vpop.f32.mrf.mxu1  ;;  %v3420_v22 = vadd.f32 %v3419_v37, %v3401_v43 }
 0x1d0   :  { %v3475_v56 = vadd.f32 %v3474_v13, %v3456_v15 }
 0x1d1   :  { %v3439_v2 = vadd.f32 %v3438_v18, %v3420_v22 }
 0x1d3   :  { %v3457_v17 = vpop.f32.mrf.mxu2 }
 0x1d4   :  { %v3458_v24 = vadd.f32 %v3457_v17, %v3439_v2 }
 0x1d6   :  { %v3422_v28 = vpop.f32.mrf.mxu0 }
 0x1d7   :  { %v3476_v35 = vpop.f32.mrf.mxu3  ;;  %v3441_v10 = vpop.f32.mrf.mxu1  ;;  %v3423_v41 = vadd.f32 %v3422_v28, %v3404_v62 }
 0x1d8   :  { %v3477_v44 = vadd.f32 %v3476_v35, %v3458_v24 }
 0x1d9   :  { %v3442_v7 = vadd.f32 %v3441_v10, %v3423_v41 }
 0x1db   :  { %v3460_v6 = vpop.f32.mrf.mxu2 }
 0x1dc   :  { %v3461_v55 = vadd.f32 %v3460_v6, %v3442_v7 }
 0x1de   :  { %v3424_v53 = vpop.f32.mrf.mxu0 }
 0x1df   :  { %v3479_v27 = vpop.f32.mrf.mxu3  ;;  %v3443_v0 = vpop.f32.mrf.mxu1  ;;  %v3425_v43 = vadd.f32 %v3424_v53, %v3406_v3 }
 0x1e0   :  { %v3480_v5 = vadd.f32 %v3479_v27, %v3461_v55 }
 0x1e1   :  { %v3444_v32 = vadd.f32 %v3443_v0, %v3425_v43 }
 0x1e3   :  { %v3462_v25 = vpop.f32.mrf.mxu2 }
 0x1e4   :  { %v3463_v21 = vadd.f32 %v3462_v25, %v3444_v32 }
 0x1e6   :  { %v3493_v11 = vpop.f32.mrf.mxu0 }
 0x1e7   :  { %v3481_v54 = vpop.f32.mrf.mxu3  ;;  %v3512_v4 = vpop.f32.mrf.mxu1  ;;  %v3494_v46 = vadd.f32 %v3493_v11, %v3475_v56 }
 0x1e8   :  { %v3482_v29 = vadd.f32 %v3481_v54, %v3463_v21 }
 0x1e9   :  { %v3513_v38 = vadd.f32 %v3512_v4, %v3494_v46 }
 0x1eb   :  { %v3531_v49 = vpop.f32.mrf.mxu2 }
 0x1ec   :  { %v3532_v30 = vadd.f32 %v3531_v49, %v3513_v38 }
 0x1ee   :  { %v3495_v48 = vpop.f32.mrf.mxu0 }
 0x1ef   :  { %v3550_v52 = vpop.f32.mrf.mxu3  ;;  %v3514_v50 = vpop.f32.mrf.mxu1  ;;  %v3496_v61 = vadd.f32 %v3495_v48, %v3477_v44 }
 0x1f0   :  { %v3551_v62 = vadd.f32 %v3550_v52, %v3532_v30 }
 0x1f1   :  { %v3515_v33 = vadd.f32 %v3514_v50, %v3496_v61 }
 0x1f3   :  { %v3533_v1 = vpop.f32.mrf.mxu2 }
 0x1f4   :  { %v3534_v13 = vadd.f32 %v3533_v1, %v3515_v33 }
 0x1f6   :  { %v3498_v14 = vpop.f32.mrf.mxu0 }
 0x1f7   :  { %v3552_v42 = vpop.f32.mrf.mxu3  ;;  %v3517_v39 = vpop.f32.mrf.mxu1  ;;  %v3499_v58 = vadd.f32 %v3498_v14, %v3480_v5 }
 0x1f8   :  { %v3553_v17 = vadd.f32 %v3552_v42, %v3534_v13 }
 0x1f9   :  { %v3518_v9 = vadd.f32 %v3517_v39, %v3499_v58 }
 0x1fb   :  { %v3536_v19 = vpop.f32.mrf.mxu2 }
 0x1fc   :  { %v3537_v60 = vadd.f32 %v3536_v19, %v3518_v9 }
 0x1fe   :  { %v3500_v57 = vpop.f32.mrf.mxu0 }
 0x1ff   :  { %v3555_v16 = vpop.f32.mrf.mxu3  ;;  %v3519_v59 = vpop.f32.mrf.mxu1  ;;  %v3501_v37 = vadd.f32 %v3500_v57, %v3482_v29 }
 0x200   :  { %v3556_v2 = vadd.f32 %v3555_v16, %v3537_v60 }
 0x201   :  { %v3520_v24 = vadd.f32 %v3519_v59, %v3501_v37 }
 0x203   :  { %v3538_v63 = vpop.f32.mrf.mxu2 }
 0x204   :  { %v3539_v44 = vadd.f32 %v3538_v63, %v3520_v24 }
 0x206   :  { %v3569_v23 = vpop.f32.mrf.mxu0 }
 0x207   :  { %v3557_v12 = vpop.f32.mrf.mxu3  ;;  %v3588_v47 = vpop.f32.mrf.mxu1  ;;  %v3570_v36 = vadd.f32 %v3569_v23, %v3551_v62 }
 0x208   :  { %v3558_v49 = vadd.f32 %v3557_v12, %v3539_v44 }
 0x209   :  { %v3589_v56 = vadd.f32 %v3588_v47, %v3570_v36 }
 0x20b   :  { %v3607_v40 = vpop.f32.mrf.mxu2 }
 0x20c   :  { %v3608_v35 = vadd.f32 %v3607_v40, %v3589_v56 }
 0x20e   :  { %v3571_v26 = vpop.f32.mrf.mxu0 }
 0x20f   :  { %v3626_v45 = vpop.f32.mrf.mxu3  ;;  %v3590_v20 = vpop.f32.mrf.mxu1  ;;  %v3572_v10 = vadd.f32 %v3571_v26, %v3553_v17 }
 0x210   :  { %v3627_v6 = vadd.f32 %v3626_v45, %v3608_v35 }
 0x211   :  { %v3591_v11 = vadd.f32 %v3590_v20, %v3572_v10 }
 0x213   :  { %v3609_v51 = vpop.f32.mrf.mxu2 }
 0x214   :  { %v3610_v48 = vadd.f32 %v3609_v51, %v3591_v11 }
 0x216   :  { %v3574_v34 = vpop.f32.mrf.mxu0 }
 0x217   :  { %v3628_v31 = vpop.f32.mrf.mxu3  ;;  %v3593_v8 = vpop.f32.mrf.mxu1  ;;  %v3575_v28 = vadd.f32 %v3574_v34, %v3556_v2 }
 0x218   :  { %v3629_v39 = vadd.f32 %v3628_v31, %v3610_v48 }
 0x219   :  { %v3594_v0 = vadd.f32 %v3593_v8, %v3575_v28 }
 0x21b   :  { %v3612_v15 = vpop.f32.mrf.mxu2 }
 0x21c   :  { %v3613_v52 = vadd.f32 %v3612_v15, %v3594_v0 }
 0x21e   :  { %v3576_v18 = vpop.f32.mrf.mxu0 }
 0x21f   :  { %v3631_v3 = vpop.f32.mrf.mxu3  ;;  %v3595_v22 = vpop.f32.mrf.mxu1  ;;  %v3577_v1 = vadd.f32 %v3576_v18, %v3558_v49 }
 0x220   :  { %v3632_v14 = vadd.f32 %v3631_v3, %v3613_v52 }
 0x221   :  { %v3596_v59 = vadd.f32 %v3595_v22, %v3577_v1 }
 0x223   :  { %v3614_v27 = vpop.f32.mrf.mxu2 }
 0x224   :  { %v3615_v12 = vadd.f32 %v3614_v27, %v3596_v59 }
 0x226   :  { %v3645_v25 = vpop.f32.mrf.mxu0 }
 0x227   :  { %v3633_v53 = vpop.f32.mrf.mxu3  ;;  %v3664_v54 = vpop.f32.mrf.mxu1  ;;  %v3646_v4 = vadd.f32 %v3645_v25, %v3627_v6 }
 0x228   :  { %v3634_v20 = vadd.f32 %v3633_v53, %v3615_v12 }
 0x229   :  { %v3665_v50 = vadd.f32 %v3664_v54, %v3646_v4 }
 0x22b   :  { %vm3675_vm4 = vcmp.gt.f32.partialorder %v3665_v50, 0.0  ;;  %v3683_v42 = vmul.f32 0.2, %v3665_v50  ;;  %v3650_v16 = vpop.f32.mrf.mxu2 }
 0x22c   :  { %v3651_v63 = vadd.f32 %v3650_v16, %v3632_v14 }
 0x22d   :  { %v3691_v19 = vsel %vm3675_vm4, %v3665_v50, %v3683_v42 }
 0x22e   :  { %3699 = vst [vmem:[%s9101_s3 + $0x8] sm:$0xff] %v3691_v19  ;;  %v3647_v23 = vpop.f32.mrf.mxu0 }
 0x22f   :  { %v3669_v57 = vpop.f32.mrf.mxu3  ;;  %v3648_v47 = vadd.f32 %v3647_v23, %v3629_v39  ;;  %v3666_v40 = vpop.f32.mrf.mxu1 }
 0x230   :  { %v3670_v41 = vadd.f32 %v3669_v57, %v3651_v63 }
 0x231   :  { %v3667_v45 = vadd.f32 %v3666_v40, %v3648_v47 }
 0x232   :  { %vm3679_vm5 = vcmp.gt.f32.partialorder %v3670_v41, 0.0  ;;  %v3687_v7 = vmul.f32 0.2, %v3670_v41 }
 0x233   :  { %vm3677_vm6 = vcmp.gt.f32.partialorder %v3667_v45, 0.0  ;;  %v3685_v26 = vmul.f32 0.2, %v3667_v45  ;;  %v3652_v43 = vpop.f32.mrf.mxu2 }
 0x234   :  { %v3695_v46 = vsel %vm3679_vm5, %v3670_v41, %v3687_v7  ;;  %v3653_v38 = vadd.f32 %v3652_v43, %v3634_v20 }
 0x235   :  { %3703 = vst [vmem:[%s9101_s3 + $0x28] sm:$0xff] %v3695_v46  ;;  %v3693_v55 = vsel %vm3677_vm6, %v3667_v45, %v3685_v26 }
 0x236   :  { %3701 = vst [vmem:[%s9101_s3 + $0x18] sm:$0xff] %v3693_v55 }
 0x237   :  { %v3671_v5 = vpop.f32.mrf.mxu3 }
 0x238   :  { %v3672_v30 = vadd.f32 %v3671_v5, %v3653_v38 }
 0x23a   :  { %vm3681_vm7 = vcmp.gt.f32.partialorder %v3672_v30, 0.0  ;;  %v3689_v51 = vmul.f32 0.2, %v3672_v30 }
 0x23c   :  { %v3697_v31 = vsel %vm3681_vm7, %v3672_v30, %v3689_v51 }
 0x23d   :  { %3705 = vst [vmem:[%s9101_s3 + $0x38] sm:$0xff] %v3697_v31 }

// kernel: wassnet_forward.7
= control target key start
LH: loop header
LB: loop body
LE: loop exit
PB: predicated region body
PF: predicated region fallthrough
CT: control target
= control target key end

     0   :  { %s5142_s1 = inlined_call_operand.vmem [shape: bf16[4096,128], index: 1, kind: input, shape index: {}]   ;;  %s5143_s0 = inlined_call_operand.vmem [shape: bf16[16,4096], index: 0, kind: input, shape index: {}]   ;;  %s5144_s2 = inlined_call_operand.vmem [shape: f32[1,128], index: 2, kind: input, shape index: {}]   ;;  %s5145_s3 = inlined_call_operand.vmem [shape: f32[16,128], index: 3, kind: output, shape index: {}]  }
   0x1   :  { %v3903_v0 = vld [vmem:[%s5142_s1 + $0x38] sm:$0xff]  ;;  %v3902_v4 = vld [vmem:[%s5142_s1 + $0x30] sm:$0xff]  ;;  %v3901_v8 = vld [vmem:[%s5142_s1 + $0x28] sm:$0xff] }
   0x2   :  { %v3911_v1 = vld [vmem:[%s5142_s1 + $0x78] sm:$0xff]  ;;  %2258 = vmatpush.bf16.msra.mxu0 %v3903_v0  ;;  %v3910_v5 = vld [vmem:[%s5142_s1 + $0x70] sm:$0xff]  ;;  %v3909_v9 = vld [vmem:[%s5142_s1 + $0x68] sm:$0xff] }
   0x3   :  { %v3919_v2 = vld [vmem:[%s5142_s1 + $0xb8] sm:$0xff]  ;;  %2272 = vmatpush.bf16.msra.mxu1 %v3911_v1  ;;  %v3918_v6 = vld [vmem:[%s5142_s1 + $0xb0] sm:$0xff]  ;;  %v3917_v10 = vld [vmem:[%s5142_s1 + $0xa8] sm:$0xff] }
   0x4   :  { %v3927_v3 = vld [vmem:[%s5142_s1 + $0xf8] sm:$0xff]  ;;  %2286 = vmatpush.bf16.msra.mxu2 %v3919_v2  ;;  %v3926_v7 = vld [vmem:[%s5142_s1 + $0xf0] sm:$0xff]  ;;  %v3925_v11 = vld [vmem:[%s5142_s1 + $0xe8] sm:$0xff] }
   0x5   :  { %2300 = vmatpush.bf16.msra.mxu3 %v3927_v3  ;;  %v3900_v12 = vld [vmem:[%s5142_s1 + $0x20] sm:$0xff]  ;;  %v3899_v16 = vld [vmem:[%s5142_s1 + $0x18] sm:$0xff]  ;;  %v3898_v20 = vld [vmem:[%s5142_s1 + $0x10] sm:$0xff] }
   0x6   :  { %2259 = vmatpush.bf16.msra.mxu0 %v3902_v4  ;;  %v3908_v13 = vld [vmem:[%s5142_s1 + $0x60] sm:$0xff]  ;;  %v3907_v17 = vld [vmem:[%s5142_s1 + $0x58] sm:$0xff]  ;;  %v3906_v21 = vld [vmem:[%s5142_s1 + $0x50] sm:$0xff] }
   0x7   :  { %2273 = vmatpush.bf16.msra.mxu1 %v3910_v5  ;;  %v3916_v14 = vld [vmem:[%s5142_s1 + $0xa0] sm:$0xff]  ;;  %v3915_v18 = vld [vmem:[%s5142_s1 + $0x98] sm:$0xff]  ;;  %v3914_v22 = vld [vmem:[%s5142_s1 + $0x90] sm:$0xff] }
   0x8   :  { %2287 = vmatpush.bf16.msra.mxu2 %v3918_v6  ;;  %v3924_v15 = vld [vmem:[%s5142_s1 + $0xe0] sm:$0xff]  ;;  %v3923_v19 = vld [vmem:[%s5142_s1 + $0xd8] sm:$0xff]  ;;  %v3922_v23 = vld [vmem:[%s5142_s1 + $0xd0] sm:$0xff] }
   0x9   :  { %2301 = vmatpush.bf16.msra.mxu3 %v3926_v7  ;;  %v3897_v24 = vld [vmem:[%s5142_s1 + $0x8] sm:$0xff]  ;;  %v3896_v28 = vld [vmem:[%s5142_s1] sm:$0xff]  ;;  %v3935_v32 = vld [vmem:[%s5142_s1 + $0x138] sm:$0xff] }
   0xa   :  { %2260 = vmatpush.bf16.msra.mxu0 %v3901_v8  ;;  %v3905_v25 = vld [vmem:[%s5142_s1 + $0x48] sm:$0xff]  ;;  %v3904_v29 = vld [vmem:[%s5142_s1 + $0x40] sm:$0xff]  ;;  %v3943_v33 = vld [vmem:[%s5142_s1 + $0x178] sm:$0xff] }
   0xb   :  { %2274 = vmatpush.bf16.msra.mxu1 %v3909_v9  ;;  %v3913_v26 = vld [vmem:[%s5142_s1 + $0x88] sm:$0xff]  ;;  %v3912_v30 = vld [vmem:[%s5142_s1 + $0x80] sm:$0xff]  ;;  %v3951_v42 = vld [vmem:[%s5142_s1 + $0x1b8] sm:$0xff] }
   0xc   :  { %2288 = vmatpush.bf16.msra.mxu2 %v3917_v10  ;;  %v3921_v27 = vld [vmem:[%s5142_s1 + $0xc8] sm:$0xff]  ;;  %v3920_v31 = vld [vmem:[%s5142_s1 + $0xc0] sm:$0xff]  ;;  %v3959_v43 = vld [vmem:[%s5142_s1 + $0x1f8] sm:$0xff] }
   0xd   :  { %2302 = vmatpush.bf16.msra.mxu3 %v3925_v11  ;;  %v2714_v34 = vld [vmem:[%s5143_s0] sm:$0xf]  ;;  %v2722_v36 = vld [vmem:[%s5143_s0 + $0x8] sm:$0xf]  ;;  %v3864_v38 = vld [vmem:[%s5143_s0 + $0x4] sm:$0xf] }
   0xe   :  { %2261 = vmatpush.bf16.msra.mxu0 %v3900_v12  ;;  %v3880_v35 = vld [vmem:[%s5143_s0 + $0x7c] sm:$0xf0]  ;;  %v3881_v37 = vld [vmem:[%s5143_s0 + $0x84] sm:$0xf0]  ;;  %v2716_v39 = vld [vmem:[%s5143_s0 + $0x80] sm:$0xf0] }
   0xf   :  { %2275 = vmatpush.bf16.msra.mxu1 %v3908_v13  ;;  %v3865_v40 = vld [vmem:[%s5143_s0 + $0xc] sm:$0xf]  ;;  %v2715_v44 = vor.u32 %v3880_v35, %v2714_v34  ;;  %v2723_v45 = vor.u32 %v3881_v37, %v2722_v36  ;;  %v2719_v46 = vor.u32 %v3864_v38, %v2716_v39  ;;  %v3934_v48 = vld [vmem:[%s5142_s1 + $0x130] sm:$0xff]  ;;  %v3932_v56 = vld [vmem:[%s5142_s1 + $0x120] sm:$0xff] }
  0x10   :  { %2289 = vmatpush.bf16.msra.mxu2 %v3916_v14  ;;  %v2724_v41 = vld [vmem:[%s5143_s0 + $0x88] sm:$0xf0]  ;;  %v3942_v49 = vld [vmem:[%s5142_s1 + $0x170] sm:$0xff]  ;;  %v3940_v57 = vld [vmem:[%s5142_s1 + $0x160] sm:$0xff] }
  0x11   :  { %2303 = vmatpush.bf16.msra.mxu3 %v3924_v15  ;;  %v2727_v47 = vor.u32 %v3865_v40, %v2724_v41  ;;  %v3950_v50 = vld [vmem:[%s5142_s1 + $0x1b0] sm:$0xff]  ;;  %v3933_v52 = vld [vmem:[%s5142_s1 + $0x128] sm:$0xff]  ;;  %v3948_v58 = vld [vmem:[%s5142_s1 + $0x1a0] sm:$0xff] }
  0x12   :  { %2262 = vmatpush.bf16.msra.mxu0 %v3899_v16  ;;  %v3958_v51 = vld [vmem:[%s5142_s1 + $0x1f0] sm:$0xff]  ;;  %v3941_v53 = vld [vmem:[%s5142_s1 + $0x168] sm:$0xff]  ;;  %v3956_v59 = vld [vmem:[%s5142_s1 + $0x1e0] sm:$0xff] }
  0x13   :  { %2276 = vmatpush.bf16.msra.mxu1 %v3907_v17  ;;  %v3949_v54 = vld [vmem:[%s5142_s1 + $0x1a8] sm:$0xff]  ;;  %v3931_v60 = vld [vmem:[%s5142_s1 + $0x118] sm:$0xff]  ;;  %v3930_v0 = vld [vmem:[%s5142_s1 + $0x110] sm:$0xff] }
  0x14   :  { %2290 = vmatpush.bf16.msra.mxu2 %v3915_v18  ;;  %v3957_v55 = vld [vmem:[%s5142_s1 + $0x1e8] sm:$0xff]  ;;  %v3939_v61 = vld [vmem:[%s5142_s1 + $0x158] sm:$0xff]  ;;  %v3938_v1 = vld [vmem:[%s5142_s1 + $0x150] sm:$0xff] }
  0x15   :  { %2304 = vmatpush.bf16.msra.mxu3 %v3923_v19  ;;  %v3947_v62 = vld [vmem:[%s5142_s1 + $0x198] sm:$0xff]  ;;  %v3946_v2 = vld [vmem:[%s5142_s1 + $0x190] sm:$0xff]  ;;  %v3929_v4 = vld [vmem:[%s5142_s1 + $0x108] sm:$0xff] }
  0x16   :  { %2263 = vmatpush.bf16.msra.mxu0 %v3898_v20  ;;  %v3955_v63 = vld [vmem:[%s5142_s1 + $0x1d8] sm:$0xff]  ;;  %v3954_v3 = vld [vmem:[%s5142_s1 + $0x1d0] sm:$0xff]  ;;  %v3937_v5 = vld [vmem:[%s5142_s1 + $0x148] sm:$0xff] }
  0x17   :  { %2277 = vmatpush.bf16.msra.mxu1 %v3906_v21  ;;  %v3945_v6 = vld [vmem:[%s5142_s1 + $0x188] sm:$0xff]  ;;  %v3928_v8 = vld [vmem:[%s5142_s1 + $0x100] sm:$0xff]  ;;  %v3967_v12 = vld [vmem:[%s5142_s1 + $0x238] sm:$0xff] }
  0x18   :  { %2291 = vmatpush.bf16.msra.mxu2 %v3914_v22  ;;  %v3953_v7 = vld [vmem:[%s5142_s1 + $0x1c8] sm:$0xff]  ;;  %v3936_v9 = vld [vmem:[%s5142_s1 + $0x140] sm:$0xff]  ;;  %v3975_v13 = vld [vmem:[%s5142_s1 + $0x278] sm:$0xff] }
  0x19   :  { %2305 = vmatpush.bf16.msra.mxu3 %v3922_v23  ;;  %v3944_v10 = vld [vmem:[%s5142_s1 + $0x180] sm:$0xff]  ;;  %v2730_v14 = vld [vmem:[%s5143_s0 + $0x10] sm:$0xf]  ;;  %v2738_v16 = vld [vmem:[%s5143_s0 + $0x18] sm:$0xf] }
  0x1a   :  { %2264 = vmatpush.bf16.msra.mxu0 %v3897_v24  ;;  %v3952_v11 = vld [vmem:[%s5142_s1 + $0x1c0] sm:$0xff]  ;;  %v3882_v15 = vld [vmem:[%s5143_s0 + $0x8c] sm:$0xf0]  ;;  %v3883_v17 = vld [vmem:[%s5143_s0 + $0x94] sm:$0xf0] }
  0x1b   :  { %2278 = vmatpush.bf16.msra.mxu1 %v3905_v25  ;;  %v3866_v18 = vld [vmem:[%s5143_s0 + $0x14] sm:$0xf]  ;;  %v3867_v20 = vld [vmem:[%s5143_s0 + $0x1c] sm:$0xf]  ;;  %v2731_v24 = vor.u32 %v3882_v15, %v2730_v14  ;;  %v2739_v25 = vor.u32 %v3883_v17, %v2738_v16  ;;  %v3981_v34 = vld [vmem:[%s5142_s1 + $0x2a8] sm:$0xff] }
  0x1c   :  { %2292 = vmatpush.bf16.msra.mxu2 %v3913_v26  ;;  %v2732_v19 = vld [vmem:[%s5143_s0 + $0x90] sm:$0xf0]  ;;  %v2740_v21 = vld [vmem:[%s5143_s0 + $0x98] sm:$0xf0]  ;;  %v3989_v35 = vld [vmem:[%s5142_s1 + $0x2e8] sm:$0xff] }
  0x1d   :  { %2306 = vmatpush.bf16.msra.mxu3 %v3921_v27  ;;  %v3983_v22 = vld [vmem:[%s5142_s1 + $0x2b8] sm:$0xff]  ;;  %v2735_v26 = vor.u32 %v3866_v18, %v2732_v19  ;;  %v2743_v27 = vor.u32 %v3867_v20, %v2740_v21  ;;  %v3964_v36 = vld [vmem:[%s5142_s1 + $0x220] sm:$0xff]  ;;  %v4013_v14 = vld [vmem:[%s5142_s1 + $0x3a8] sm:$0xff] }
  0x1e   :  { %2265 = vmatpush.bf16.msra.mxu0 %v3896_v28  ;;  %v3991_v23 = vld [vmem:[%s5142_s1 + $0x2f8] sm:$0xff]  ;;  %v3966_v28 = vld [vmem:[%s5142_s1 + $0x230] sm:$0xff]  ;;  %v3972_v37 = vld [vmem:[%s5142_s1 + $0x260] sm:$0xff] }
  0x1f   :  { %2279 = vmatpush.bf16.msra.mxu1 %v3904_v29  ;;  %v3974_v29 = vld [vmem:[%s5142_s1 + $0x270] sm:$0xff]  ;;  %v3980_v38 = vld [vmem:[%s5142_s1 + $0x2a0] sm:$0xff]  ;;  %v3963_v40 = vld [vmem:[%s5142_s1 + $0x218] sm:$0xff] }
  0x20   :  { %2293 = vmatpush.bf16.msra.mxu2 %v3912_v30  ;;  %v3982_v30 = vld [vmem:[%s5142_s1 + $0x2b0] sm:$0xff]  ;;  %v3988_v39 = vld [vmem:[%s5142_s1 + $0x2e0] sm:$0xff]  ;;  %v3971_v41 = vld [vmem:[%s5142_s1 + $0x258] sm:$0xff] }
  0x21   :  { %2307 = vmatpush.bf16.msra.mxu3 %v3920_v31  ;;  %2266 = vmatmul.bf16.vlgmr.msra.gmra.mxu0 %v2715_v44  ;;  %v3990_v31 = vld [vmem:[%s5142_s1 + $0x2f0] sm:$0xff]  ;;  %v4021_v15 = vld [vmem:[%s5142_s1 + $0x3e8] sm:$0xff]  ;;  %v3996_v16 = vld [vmem:[%s5142_s1 + $0x320] sm:$0xff] }
  0x22   :  { %2314 = vmatpush.bf16.msrb.mxu0 %v3935_v32  ;;  %2280 = vmatmul.bf16.vlgmr.msra.gmra.mxu1 %v2719_v46  ;;  %v3965_v32 = vld [vmem:[%s5142_s1 + $0x228] sm:$0xff]  ;;  %v3962_v44 = vld [vmem:[%s5142_s1 + $0x210] sm:$0xff]  ;;  %v4004_v17 = vld [vmem:[%s5142_s1 + $0x360] sm:$0xff] }
  0x23   :  { %2328 = vmatpush.bf16.msrb.mxu1 %v3943_v33  ;;  %2294 = vmatmul.bf16.vlgmr.msra.gmra.mxu2 %v2723_v45  ;;  %v3973_v33 = vld [vmem:[%s5142_s1 + $0x268] sm:$0xff]  ;;  %v3970_v45 = vld [vmem:[%s5142_s1 + $0x250] sm:$0xff]  ;;  %v4012_v18 = vld [vmem:[%s5142_s1 + $0x3a0] sm:$0xff] }
  0x24   :  { %2342 = vmatpush.bf16.msrb.mxu2 %v3951_v42  ;;  %2308 = vmatmul.bf16.vlgmr.msra.gmra.mxu3 %v2727_v47  ;;  %v3979_v42 = vld [vmem:[%s5142_s1 + $0x298] sm:$0xff]  ;;  %v3978_v46 = vld [vmem:[%s5142_s1 + $0x290] sm:$0xff]  ;;  %v4020_v19 = vld [vmem:[%s5142_s1 + $0x3e0] sm:$0xff] }
  0x25   :  { %2356 = vmatpush.bf16.msrb.mxu3 %v3959_v43  ;;  %v3987_v43 = vld [vmem:[%s5142_s1 + $0x2d8] sm:$0xff]  ;;  %v3986_v47 = vld [vmem:[%s5142_s1 + $0x2d0] sm:$0xff] }
  0x26   :  { %2315 = vmatpush.bf16.msrb.mxu0 %v3934_v48  ;;  %v3961_v48 = vld [vmem:[%s5142_s1 + $0x208] sm:$0xff]  ;;  %v3995_v20 = vld [vmem:[%s5142_s1 + $0x318] sm:$0xff] }
  0x27   :  { %2329 = vmatpush.bf16.msrb.mxu1 %v3942_v49  ;;  %v3969_v49 = vld [vmem:[%s5142_s1 + $0x248] sm:$0xff]  ;;  %v4003_v21 = vld [vmem:[%s5142_s1 + $0x358] sm:$0xff] }
  0x28   :  { %2343 = vmatpush.bf16.msrb.mxu2 %v3950_v50  ;;  %v3977_v50 = vld [vmem:[%s5142_s1 + $0x288] sm:$0xff] }
  0x29   :  { %2357 = vmatpush.bf16.msrb.mxu3 %v3958_v51  ;;  %v3985_v51 = vld [vmem:[%s5142_s1 + $0x2c8] sm:$0xff] }
  0x2a   :  { %2316 = vmatpush.bf16.msrb.mxu0 %v3933_v52  ;;  %v3960_v52 = vld [vmem:[%s5142_s1 + $0x200] sm:$0xff] }
  0x2b   :  { %2330 = vmatpush.bf16.msrb.mxu1 %v3941_v53  ;;  %v3968_v53 = vld [vmem:[%s5142_s1 + $0x240] sm:$0xff] }
  0x2c   :  { %2344 = vmatpush.bf16.msrb.mxu2 %v3949_v54  ;;  %v3976_v54 = vld [vmem:[%s5142_s1 + $0x280] sm:$0xff] }
  0x2d   :  { %2358 = vmatpush.bf16.msrb.mxu3 %v3957_v55  ;;  %v3984_v55 = vld [vmem:[%s5142_s1 + $0x2c0] sm:$0xff] }
  0x2e   :  { %2317 = vmatpush.bf16.msrb.mxu0 %v3932_v56  ;;  %v3999_v56 = vld [vmem:[%s5142_s1 + $0x338] sm:$0xff] }
  0x2f   :  { %2331 = vmatpush.bf16.msrb.mxu1 %v3940_v57  ;;  %v4007_v57 = vld [vmem:[%s5142_s1 + $0x378] sm:$0xff] }
  0x30   :  { %2345 = vmatpush.bf16.msrb.mxu2 %v3948_v58  ;;  %v2746_v58 = vld [vmem:[%s5143_s0 + $0x20] sm:$0xf] }
  0x31   :  { %2359 = vmatpush.bf16.msrb.mxu3 %v3956_v59  ;;  %v3884_v59 = vld [vmem:[%s5143_s0 + $0x9c] sm:$0xf0] }
  0x32   :  { %2318 = vmatpush.bf16.msrb.mxu0 %v3931_v60  ;;  %v2754_v60 = vld [vmem:[%s5143_s0 + $0x28] sm:$0xf] }
  0x33   :  { %2332 = vmatpush.bf16.msrb.mxu1 %v3939_v61  ;;  %v3885_v61 = vld [vmem:[%s5143_s0 + $0xa4] sm:$0xf0] }
  0x34   :  { %2346 = vmatpush.bf16.msrb.mxu2 %v3947_v62  ;;  %v3868_v62 = vld [vmem:[%s5143_s0 + $0x24] sm:$0xf] }
  0x35   :  { %2360 = vmatpush.bf16.msrb.mxu3 %v3955_v63  ;;  %v2748_v63 = vld [vmem:[%s5143_s0 + $0xa0] sm:$0xf0] }
  0x36   :  { %2319 = vmatpush.bf16.msrb.mxu0 %v3930_v0  ;;  %v3869_v0 = vld [vmem:[%s5143_s0 + $0x2c] sm:$0xf] }
  0x37   :  { %2333 = vmatpush.bf16.msrb.mxu1 %v3938_v1  ;;  %v2756_v1 = vld [vmem:[%s5143_s0 + $0xa8] sm:$0xf0] }
  0x38   :  { %2347 = vmatpush.bf16.msrb.mxu2 %v3946_v2  ;;  %v4015_v2 = vld [vmem:[%s5142_s1 + $0x3b8] sm:$0xff] }
  0x39   :  { %2361 = vmatpush.bf16.msrb.mxu3 %v3954_v3  ;;  %v4023_v3 = vld [vmem:[%s5142_s1 + $0x3f8] sm:$0xff] }
  0x3a   :  { %2320 = vmatpush.bf16.msrb.mxu0 %v3929_v4  ;;  %v2747_v4 = vor.u32 %v3884_v59, %v2746_v58  ;;  %v4045_v58 = vld [vmem:[%s5142_s1 + $0x4a8] sm:$0xff] }
  0x3b   :  { %2334 = vmatpush.bf16.msrb.mxu1 %v3937_v5  ;;  %v2755_v5 = vor.u32 %v3885_v61, %v2754_v60  ;;  %v4053_v59 = vld [vmem:[%s5142_s1 + $0x4e8] sm:$0xff]  ;;  %v4028_v60 = vld [vmem:[%s5142_s1 + $0x420] sm:$0xff] }
  0x3c   :  { %2348 = vmatpush.bf16.msrb.mxu2 %v3945_v6  ;;  %v2751_v6 = vor.u32 %v3868_v62, %v2748_v63  ;;  %v4036_v61 = vld [vmem:[%s5142_s1 + $0x460] sm:$0xff] }
  0x3d   :  { %2362 = vmatpush.bf16.msrb.mxu3 %v3953_v7  ;;  %v2759_v7 = vor.u32 %v3869_v0, %v2756_v1  ;;  %v4044_v62 = vld [vmem:[%s5142_s1 + $0x4a0] sm:$0xff]  ;;  %v4027_v0 = vld [vmem:[%s5142_s1 + $0x418] sm:$0xff] }
  0x3e   :  { %2321 = vmatpush.bf16.msrb.mxu0 %v3928_v8  ;;  %v3998_v8 = vld [vmem:[%s5142_s1 + $0x330] sm:$0xff]  ;;  %v4052_v63 = vld [vmem:[%s5142_s1 + $0x4e0] sm:$0xff]  ;;  %v4035_v1 = vld [vmem:[%s5142_s1 + $0x458] sm:$0xff] }
  0x3f   :  { %2335 = vmatpush.bf16.msrb.mxu1 %v3936_v9  ;;  %v4006_v9 = vld [vmem:[%s5142_s1 + $0x370] sm:$0xff] }
  0x40   :  { %2349 = vmatpush.bf16.msrb.mxu2 %v3944_v10  ;;  %v4014_v10 = vld [vmem:[%s5142_s1 + $0x3b0] sm:$0xff] }
  0x41   :  { %2363 = vmatpush.bf16.msrb.mxu3 %v3952_v11  ;;  %2322 = vmatmul.bf16.vlgmr.msrb.gmra.mxu0 %v2731_v24  ;;  %v4022_v11 = vld [vmem:[%s5142_s1 + $0x3f0] sm:$0xff] }
  0x42   :  { %2370 = vmatpush.bf16.msra.mxu0 %v3967_v12  ;;  %2336 = vmatmul.bf16.vlgmr.msrb.gmra.mxu1 %v2735_v26  ;;  %v3997_v12 = vld [vmem:[%s5142_s1 + $0x328] sm:$0xff]  ;;  %v3994_v24 = vld [vmem:[%s5142_s1 + $0x310] sm:$0xff] }
  0x43   :  { %2384 = vmatpush.bf16.msra.mxu1 %v3975_v13  ;;  %2350 = vmatmul.bf16.vlgmr.msrb.gmra.mxu2 %v2739_v25  ;;  %v4005_v13 = vld [vmem:[%s5142_s1 + $0x368] sm:$0xff]  ;;  %v4002_v25 = vld [vmem:[%s5142_s1 + $0x350] sm:$0xff] }
  0x44   :  { %2398 = vmatpush.bf16.msra.mxu2 %v3983_v22  ;;  %2364 = vmatmul.bf16.vlgmr.msrb.gmra.mxu3 %v2743_v27  ;;  %v4011_v22 = vld [vmem:[%s5142_s1 + $0x398] sm:$0xff]  ;;  %v4010_v26 = vld [vmem:[%s5142_s1 + $0x390] sm:$0xff] }
  0x45   :  { %2412 = vmatpush.bf16.msra.mxu3 %v3991_v23  ;;  %v4019_v23 = vld [vmem:[%s5142_s1 + $0x3d8] sm:$0xff]  ;;  %v4018_v27 = vld [vmem:[%s5142_s1 + $0x3d0] sm:$0xff] }
  0x46   :  { %2371 = vmatpush.bf16.msra.mxu0 %v3966_v28  ;;  %v3993_v28 = vld [vmem:[%s5142_s1 + $0x308] sm:$0xff] }
  0x47   :  { %2385 = vmatpush.bf16.msra.mxu1 %v3974_v29  ;;  %v4001_v29 = vld [vmem:[%s5142_s1 + $0x348] sm:$0xff] }
  0x48   :  { %2399 = vmatpush.bf16.msra.mxu2 %v3982_v30  ;;  %v4009_v30 = vld [vmem:[%s5142_s1 + $0x388] sm:$0xff] }
  0x49   :  { %2413 = vmatpush.bf16.msra.mxu3 %v3990_v31  ;;  %v4017_v31 = vld [vmem:[%s5142_s1 + $0x3c8] sm:$0xff] }
  0x4a   :  { %2372 = vmatpush.bf16.msra.mxu0 %v3965_v32  ;;  %v3992_v32 = vld [vmem:[%s5142_s1 + $0x300] sm:$0xff] }
  0x4b   :  { %2386 = vmatpush.bf16.msra.mxu1 %v3973_v33  ;;  %v4000_v33 = vld [vmem:[%s5142_s1 + $0x340] sm:$0xff] }
  0x4c   :  { %2400 = vmatpush.bf16.msra.mxu2 %v3981_v34  ;;  %v4008_v34 = vld [vmem:[%s5142_s1 + $0x380] sm:$0xff] }
  0x4d   :  { %2414 = vmatpush.bf16.msra.mxu3 %v3989_v35  ;;  %v4016_v35 = vld [vmem:[%s5142_s1 + $0x3c0] sm:$0xff] }
  0x4e   :  { %2373 = vmatpush.bf16.msra.mxu0 %v3964_v36  ;;  %v4031_v36 = vld [vmem:[%s5142_s1 + $0x438] sm:$0xff] }
  0x4f   :  { %2387 = vmatpush.bf16.msra.mxu1 %v3972_v37  ;;  %v4039_v37 = vld [vmem:[%s5142_s1 + $0x478] sm:$0xff] }
  0x50   :  { %2401 = vmatpush.bf16.msra.mxu2 %v3980_v38  ;;  %v2762_v38 = vld [vmem:[%s5143_s0 + $0x30] sm:$0xf] }
  0x51   :  { %2415 = vmatpush.bf16.msra.mxu3 %v3988_v39  ;;  %v3886_v39 = vld [vmem:[%s5143_s0 + $0xac] sm:$0xf0] }
  0x52   :  { %2374 = vmatpush.bf16.msra.mxu0 %v3963_v40  ;;  %v2770_v40 = vld [vmem:[%s5143_s0 + $0x38] sm:$0xf] }
  0x53   :  { %2388 = vmatpush.bf16.msra.mxu1 %v3971_v41  ;;  %v3887_v41 = vld [vmem:[%s5143_s0 + $0xb4] sm:$0xf0] }
  0x54   :  { %2402 = vmatpush.bf16.msra.mxu2 %v3979_v42  ;;  %v3870_v42 = vld [vmem:[%s5143_s0 + $0x34] sm:$0xf] }
  0x55   :  { %2416 = vmatpush.bf16.msra.mxu3 %v3987_v43  ;;  %v2764_v43 = vld [vmem:[%s5143_s0 + $0xb0] sm:$0xf0] }
  0x56   :  { %2375 = vmatpush.bf16.msra.mxu0 %v3962_v44  ;;  %v3871_v44 = vld [vmem:[%s5143_s0 + $0x3c] sm:$0xf] }
  0x57   :  { %2389 = vmatpush.bf16.msra.mxu1 %v3970_v45  ;;  %v2772_v45 = vld [vmem:[%s5143_s0 + $0xb8] sm:$0xf0] }
  0x58   :  { %2403 = vmatpush.bf16.msra.mxu2 %v3978_v46  ;;  %v4047_v46 = vld [vmem:[%s5142_s1 + $0x4b8] sm:$0xff] }
  0x59   :  { %2417 = vmatpush.bf16.msra.mxu3 %v3986_v47  ;;  %v4055_v47 = vld [vmem:[%s5142_s1 + $0x4f8] sm:$0xff] }
  0x5a   :  { %2376 = vmatpush.bf16.msra.mxu0 %v3961_v48  ;;  %v2763_v48 = vor.u32 %v3886_v39, %v2762_v38  ;;  %v4077_v38 = vld [vmem:[%s5142_s1 + $0x5a8] sm:$0xff] }
  0x5b   :  { %2390 = vmatpush.bf16.msra.mxu1 %v3969_v49  ;;  %v2771_v49 = vor.u32 %v3887_v41, %v2770_v40  ;;  %v4085_v39 = vld [vmem:[%s5142_s1 + $0x5e8] sm:$0xff]  ;;  %v4060_v40 = vld [vmem:[%s5142_s1 + $0x520] sm:$0xff] }
  0x5c   :  { %2404 = vmatpush.bf16.msra.mxu2 %v3977_v50  ;;  %v2767_v50 = vor.u32 %v3870_v42, %v2764_v43  ;;  %v4068_v41 = vld [vmem:[%s5142_s1 + $0x560] sm:$0xff] }
  0x5d   :  { %2418 = vmatpush.bf16.msra.mxu3 %v3985_v51  ;;  %v2775_v51 = vor.u32 %v3871_v44, %v2772_v45  ;;  %v4076_v42 = vld [vmem:[%s5142_s1 + $0x5a0] sm:$0xff]  ;;  %v4059_v44 = vld [vmem:[%s5142_s1 + $0x518] sm:$0xff] }
  0x5e   :  { %2377 = vmatpush.bf16.msra.mxu0 %v3960_v52  ;;  %v4030_v52 = vld [vmem:[%s5142_s1 + $0x430] sm:$0xff]  ;;  %v4084_v43 = vld [vmem:[%s5142_s1 + $0x5e0] sm:$0xff]  ;;  %v4067_v45 = vld [vmem:[%s5142_s1 + $0x558] sm:$0xff] }
  0x5f   :  { %2391 = vmatpush.bf16.msra.mxu1 %v3968_v53  ;;  %v4038_v53 = vld [vmem:[%s5142_s1 + $0x470] sm:$0xff] }
  0x60   :  { %2405 = vmatpush.bf16.msra.mxu2 %v3976_v54  ;;  %v4046_v54 = vld [vmem:[%s5142_s1 + $0x4b0] sm:$0xff] }
  0x61   :  { %2419 = vmatpush.bf16.msra.mxu3 %v3984_v55  ;;  %2378 = vmatmul.bf16.vlgmr.msra.gmra.mxu0 %v2747_v4  ;;  %v4054_v55 = vld [vmem:[%s5142_s1 + $0x4f0] sm:$0xff] }
  0x62   :  { %2426 = vmatpush.bf16.msrb.mxu0 %v3999_v56  ;;  %2392 = vmatmul.bf16.vlgmr.msra.gmra.mxu1 %v2751_v6  ;;  %v4029_v56 = vld [vmem:[%s5142_s1 + $0x428] sm:$0xff]  ;;  %v4026_v4 = vld [vmem:[%s5142_s1 + $0x410] sm:$0xff] }
  0x63   :  { %2440 = vmatpush.bf16.msrb.mxu1 %v4007_v57  ;;  %2406 = vmatmul.bf16.vlgmr.msra.gmra.mxu2 %v2755_v5  ;;  %v4037_v57 = vld [vmem:[%s5142_s1 + $0x468] sm:$0xff]  ;;  %v4034_v5 = vld [vmem:[%s5142_s1 + $0x450] sm:$0xff] }
  0x64   :  { %2454 = vmatpush.bf16.msrb.mxu2 %v4015_v2  ;;  %2420 = vmatmul.bf16.vlgmr.msra.gmra.mxu3 %v2759_v7  ;;  %v4043_v2 = vld [vmem:[%s5142_s1 + $0x498] sm:$0xff]  ;;  %v4042_v6 = vld [vmem:[%s5142_s1 + $0x490] sm:$0xff] }
  0x65   :  { %2468 = vmatpush.bf16.msrb.mxu3 %v4023_v3  ;;  %v4051_v3 = vld [vmem:[%s5142_s1 + $0x4d8] sm:$0xff]  ;;  %v4050_v7 = vld [vmem:[%s5142_s1 + $0x4d0] sm:$0xff] }
  0x66   :  { %2427 = vmatpush.bf16.msrb.mxu0 %v3998_v8  ;;  %v4025_v8 = vld [vmem:[%s5142_s1 + $0x408] sm:$0xff] }
  0x67   :  { %2441 = vmatpush.bf16.msrb.mxu1 %v4006_v9  ;;  %v4033_v9 = vld [vmem:[%s5142_s1 + $0x448] sm:$0xff] }
  0x68   :  { %2455 = vmatpush.bf16.msrb.mxu2 %v4014_v10  ;;  %v4041_v10 = vld [vmem:[%s5142_s1 + $0x488] sm:$0xff] }
  0x69   :  { %2469 = vmatpush.bf16.msrb.mxu3 %v4022_v11  ;;  %v4049_v11 = vld [vmem:[%s5142_s1 + $0x4c8] sm:$0xff] }
  0x6a   :  { %2428 = vmatpush.bf16.msrb.mxu0 %v3997_v12  ;;  %v4024_v12 = vld [vmem:[%s5142_s1 + $0x400] sm:$0xff] }
  0x6b   :  { %2442 = vmatpush.bf16.msrb.mxu1 %v4005_v13  ;;  %v4032_v13 = vld [vmem:[%s5142_s1 + $0x440] sm:$0xff] }
  0x6c   :  { %2456 = vmatpush.bf16.msrb.mxu2 %v4013_v14  ;;  %v4040_v14 = vld [vmem:[%s5142_s1 + $0x480] sm:$0xff] }
  0x6d   :  { %2470 = vmatpush.bf16.msrb.mxu3 %v4021_v15  ;;  %v4048_v15 = vld [vmem:[%s5142_s1 + $0x4c0] sm:$0xff] }
  0x6e   :  { %2429 = vmatpush.bf16.msrb.mxu0 %v3996_v16  ;;  %v4063_v16 = vld [vmem:[%s5142_s1 + $0x538] sm:$0xff] }
  0x6f   :  { %2443 = vmatpush.bf16.msrb.mxu1 %v4004_v17  ;;  %v4071_v17 = vld [vmem:[%s5142_s1 + $0x578] sm:$0xff] }
  0x70   :  { %2457 = vmatpush.bf16.msrb.mxu2 %v4012_v18  ;;  %v2778_v18 = vld [vmem:[%s5143_s0 + $0x40] sm:$0xf] }
  0x71   :  { %2471 = vmatpush.bf16.msrb.mxu3 %v4020_v19  ;;  %v3888_v19 = vld [vmem:[%s5143_s0 + $0xbc] sm:$0xf0] }
  0x72   :  { %2430 = vmatpush.bf16.msrb.mxu0 %v3995_v20  ;;  %v2786_v20 = vld [vmem:[%s5143_s0 + $0x48] sm:$0xf] }
  0x73   :  { %2444 = vmatpush.bf16.msrb.mxu1 %v4003_v21  ;;  %v3889_v21 = vld [vmem:[%s5143_s0 + $0xc4] sm:$0xf0] }
  0x74   :  { %2458 = vmatpush.bf16.msrb.mxu2 %v4011_v22  ;;  %v3872_v22 = vld [vmem:[%s5143_s0 + $0x44] sm:$0xf] }
  0x75   :  { %2472 = vmatpush.bf16.msrb.mxu3 %v4019_v23  ;;  %v2780_v23 = vld [vmem:[%s5143_s0 + $0xc0] sm:$0xf0] }
  0x76   :  { %2431 = vmatpush.bf16.msrb.mxu0 %v3994_v24  ;;  %v3873_v24 = vld [vmem:[%s5143_s0 + $0x4c] sm:$0xf] }
  0x77   :  { %2445 = vmatpush.bf16.msrb.mxu1 %v4002_v25  ;;  %v2788_v25 = vld [vmem:[%s5143_s0 + $0xc8] sm:$0xf0] }
  0x78   :  { %2459 = vmatpush.bf16.msrb.mxu2 %v4010_v26  ;;  %v4079_v26 = vld [vmem:[%s5142_s1 + $0x5b8] sm:$0xff] }
  0x79   :  { %2473 = vmatpush.bf16.msrb.mxu3 %v4018_v27  ;;  %v4087_v27 = vld [vmem:[%s5142_s1 + $0x5f8] sm:$0xff] }
  0x7a   :  { %2432 = vmatpush.bf16.msrb.mxu0 %v3993_v28  ;;  %v2779_v28 = vor.u32 %v3888_v19, %v2778_v18  ;;  %v4109_v18 = vld [vmem:[%s5142_s1 + $0x6a8] sm:$0xff] }
  0x7b   :  { %2446 = vmatpush.bf16.msrb.mxu1 %v4001_v29  ;;  %v2787_v29 = vor.u32 %v3889_v21, %v2786_v20  ;;  %v4117_v19 = vld [vmem:[%s5142_s1 + $0x6e8] sm:$0xff]  ;;  %v4092_v20 = vld [vmem:[%s5142_s1 + $0x620] sm:$0xff] }
  0x7c   :  { %2460 = vmatpush.bf16.msrb.mxu2 %v4009_v30  ;;  %v2783_v30 = vor.u32 %v3872_v22, %v2780_v23  ;;  %v4100_v21 = vld [vmem:[%s5142_s1 + $0x660] sm:$0xff] }
  0x7d   :  { %2474 = vmatpush.bf16.msrb.mxu3 %v4017_v31  ;;  %v2791_v31 = vor.u32 %v3873_v24, %v2788_v25  ;;  %v4108_v22 = vld [vmem:[%s5142_s1 + $0x6a0] sm:$0xff]  ;;  %v4091_v24 = vld [vmem:[%s5142_s1 + $0x618] sm:$0xff] }
  0x7e   :  { %2433 = vmatpush.bf16.msrb.mxu0 %v3992_v32  ;;  %v4062_v32 = vld [vmem:[%s5142_s1 + $0x530] sm:$0xff]  ;;  %v4116_v23 = vld [vmem:[%s5142_s1 + $0x6e0] sm:$0xff]  ;;  %v4099_v25 = vld [vmem:[%s5142_s1 + $0x658] sm:$0xff] }
  0x7f   :  { %2447 = vmatpush.bf16.msrb.mxu1 %v4000_v33  ;;  %v4070_v33 = vld [vmem:[%s5142_s1 + $0x570] sm:$0xff] }
  0x80   :  { %2461 = vmatpush.bf16.msrb.mxu2 %v4008_v34  ;;  %v4078_v34 = vld [vmem:[%s5142_s1 + $0x5b0] sm:$0xff] }
  0x81   :  { %2475 = vmatpush.bf16.msrb.mxu3 %v4016_v35  ;;  %2434 = vmatmul.bf16.vlgmr.msrb.gmra.mxu0 %v2763_v48  ;;  %v4086_v35 = vld [vmem:[%s5142_s1 + $0x5f0] sm:$0xff] }
  0x82   :  { %2482 = vmatpush.bf16.msra.mxu0 %v4031_v36  ;;  %2448 = vmatmul.bf16.vlgmr.msrb.gmra.mxu1 %v2767_v50  ;;  %v4061_v36 = vld [vmem:[%s5142_s1 + $0x528] sm:$0xff]  ;;  %v4058_v48 = vld [vmem:[%s5142_s1 + $0x510] sm:$0xff] }
  0x83   :  { %2496 = vmatpush.bf16.msra.mxu1 %v4039_v37  ;;  %2462 = vmatmul.bf16.vlgmr.msrb.gmra.mxu2 %v2771_v49  ;;  %v4069_v37 = vld [vmem:[%s5142_s1 + $0x568] sm:$0xff]  ;;  %v4066_v49 = vld [vmem:[%s5142_s1 + $0x550] sm:$0xff] }
  0x84   :  { %2510 = vmatpush.bf16.msra.mxu2 %v4047_v46  ;;  %2476 = vmatmul.bf16.vlgmr.msrb.gmra.mxu3 %v2775_v51  ;;  %v4075_v46 = vld [vmem:[%s5142_s1 + $0x598] sm:$0xff]  ;;  %v4074_v50 = vld [vmem:[%s5142_s1 + $0x590] sm:$0xff] }
  0x85   :  { %2524 = vmatpush.bf16.msra.mxu3 %v4055_v47  ;;  %v4083_v47 = vld [vmem:[%s5142_s1 + $0x5d8] sm:$0xff]  ;;  %v4082_v51 = vld [vmem:[%s5142_s1 + $0x5d0] sm:$0xff] }
  0x86   :  { %2483 = vmatpush.bf16.msra.mxu0 %v4030_v52  ;;  %v4057_v52 = vld [vmem:[%s5142_s1 + $0x508] sm:$0xff] }
  0x87   :  { %2497 = vmatpush.bf16.msra.mxu1 %v4038_v53  ;;  %v4065_v53 = vld [vmem:[%s5142_s1 + $0x548] sm:$0xff] }
  0x88   :  { %2511 = vmatpush.bf16.msra.mxu2 %v4046_v54  ;;  %v4073_v54 = vld [vmem:[%s5142_s1 + $0x588] sm:$0xff] }
  0x89   :  { %2525 = vmatpush.bf16.msra.mxu3 %v4054_v55  ;;  %v4081_v55 = vld [vmem:[%s5142_s1 + $0x5c8] sm:$0xff] }
  0x8a   :  { %2484 = vmatpush.bf16.msra.mxu0 %v4029_v56  ;;  %v4056_v56 = vld [vmem:[%s5142_s1 + $0x500] sm:$0xff] }
  0x8b   :  { %2498 = vmatpush.bf16.msra.mxu1 %v4037_v57  ;;  %v4064_v57 = vld [vmem:[%s5142_s1 + $0x540] sm:$0xff] }
  0x8c   :  { %2512 = vmatpush.bf16.msra.mxu2 %v4045_v58  ;;  %v4072_v58 = vld [vmem:[%s5142_s1 + $0x580] sm:$0xff] }
  0x8d   :  { %2526 = vmatpush.bf16.msra.mxu3 %v4053_v59  ;;  %v4080_v59 = vld [vmem:[%s5142_s1 + $0x5c0] sm:$0xff] }
  0x8e   :  { %2485 = vmatpush.bf16.msra.mxu0 %v4028_v60  ;;  %v4095_v60 = vld [vmem:[%s5142_s1 + $0x638] sm:$0xff] }
  0x8f   :  { %2499 = vmatpush.bf16.msra.mxu1 %v4036_v61  ;;  %v4103_v61 = vld [vmem:[%s5142_s1 + $0x678] sm:$0xff] }
  0x90   :  { %2513 = vmatpush.bf16.msra.mxu2 %v4044_v62  ;;  %v2794_v62 = vld [vmem:[%s5143_s0 + $0x50] sm:$0xf] }
  0x91   :  { %2527 = vmatpush.bf16.msra.mxu3 %v4052_v63  ;;  %v3890_v63 = vld [vmem:[%s5143_s0 + $0xcc] sm:$0xf0] }
  0x92   :  { %2486 = vmatpush.bf16.msra.mxu0 %v4027_v0  ;;  %v2802_v0 = vld [vmem:[%s5143_s0 + $0x58] sm:$0xf] }
  0x93   :  { %2500 = vmatpush.bf16.msra.mxu1 %v4035_v1  ;;  %v3891_v1 = vld [vmem:[%s5143_s0 + $0xd4] sm:$0xf0] }
  0x94   :  { %2514 = vmatpush.bf16.msra.mxu2 %v4043_v2  ;;  %v3874_v2 = vld [vmem:[%s5143_s0 + $0x54] sm:$0xf] }
  0x95   :  { %2528 = vmatpush.bf16.msra.mxu3 %v4051_v3  ;;  %v2796_v3 = vld [vmem:[%s5143_s0 + $0xd0] sm:$0xf0] }
  0x96   :  { %2487 = vmatpush.bf16.msra.mxu0 %v4026_v4  ;;  %v3875_v4 = vld [vmem:[%s5143_s0 + $0x5c] sm:$0xf] }
  0x97   :  { %2501 = vmatpush.bf16.msra.mxu1 %v4034_v5  ;;  %v2804_v5 = vld [vmem:[%s5143_s0 + $0xd8] sm:$0xf0] }
  0x98   :  { %2515 = vmatpush.bf16.msra.mxu2 %v4042_v6  ;;  %v4111_v6 = vld [vmem:[%s5142_s1 + $0x6b8] sm:$0xff] }
  0x99   :  { %2529 = vmatpush.bf16.msra.mxu3 %v4050_v7  ;;  %v4119_v7 = vld [vmem:[%s5142_s1 + $0x6f8] sm:$0xff] }
  0x9a   :  { %2488 = vmatpush.bf16.msra.mxu0 %v4025_v8  ;;  %v2795_v8 = vor.u32 %v3890_v63, %v2794_v62  ;;  %v4141_v62 = vld [vmem:[%s5142_s1 + $0x7a8] sm:$0xff] }
  0x9b   :  { %2502 = vmatpush.bf16.msra.mxu1 %v4033_v9  ;;  %v2803_v9 = vor.u32 %v3891_v1, %v2802_v0  ;;  %v4149_v63 = vld [vmem:[%s5142_s1 + $0x7e8] sm:$0xff]  ;;  %v4124_v0 = vld [vmem:[%s5142_s1 + $0x720] sm:$0xff] }
  0x9c   :  { %2516 = vmatpush.bf16.msra.mxu2 %v4041_v10  ;;  %v2799_v10 = vor.u32 %v3874_v2, %v2796_v3  ;;  %v4132_v1 = vld [vmem:[%s5142_s1 + $0x760] sm:$0xff] }
  0x9d   :  { %2530 = vmatpush.bf16.msra.mxu3 %v4049_v11  ;;  %v2807_v11 = vor.u32 %v3875_v4, %v2804_v5  ;;  %v4140_v2 = vld [vmem:[%s5142_s1 + $0x7a0] sm:$0xff]  ;;  %v4123_v4 = vld [vmem:[%s5142_s1 + $0x718] sm:$0xff] }
  0x9e   :  { %2489 = vmatpush.bf16.msra.mxu0 %v4024_v12  ;;  %v4094_v12 = vld [vmem:[%s5142_s1 + $0x630] sm:$0xff]  ;;  %v4148_v3 = vld [vmem:[%s5142_s1 + $0x7e0] sm:$0xff]  ;;  %v4131_v5 = vld [vmem:[%s5142_s1 + $0x758] sm:$0xff] }
  0x9f   :  { %2503 = vmatpush.bf16.msra.mxu1 %v4032_v13  ;;  %v4102_v13 = vld [vmem:[%s5142_s1 + $0x670] sm:$0xff] }
  0xa0   :  { %2517 = vmatpush.bf16.msra.mxu2 %v4040_v14  ;;  %v4110_v14 = vld [vmem:[%s5142_s1 + $0x6b0] sm:$0xff] }
  0xa1   :  { %2531 = vmatpush.bf16.msra.mxu3 %v4048_v15  ;;  %2490 = vmatmul.bf16.vlgmr.msra.gmra.mxu0 %v2779_v28  ;;  %v4118_v15 = vld [vmem:[%s5142_s1 + $0x6f0] sm:$0xff] }
  0xa2   :  { %2538 = vmatpush.bf16.msrb.mxu0 %v4063_v16  ;;  %2504 = vmatmul.bf16.vlgmr.msra.gmra.mxu1 %v2783_v30  ;;  %v4093_v16 = vld [vmem:[%s5142_s1 + $0x628] sm:$0xff]  ;;  %v4090_v28 = vld [vmem:[%s5142_s1 + $0x610] sm:$0xff] }
  0xa3   :  { %2552 = vmatpush.bf16.msrb.mxu1 %v4071_v17  ;;  %2518 = vmatmul.bf16.vlgmr.msra.gmra.mxu2 %v2787_v29  ;;  %v4101_v17 = vld [vmem:[%s5142_s1 + $0x668] sm:$0xff]  ;;  %v4098_v29 = vld [vmem:[%s5142_s1 + $0x650] sm:$0xff] }
  0xa4   :  { %2566 = vmatpush.bf16.msrb.mxu2 %v4079_v26  ;;  %2532 = vmatmul.bf16.vlgmr.msra.gmra.mxu3 %v2791_v31  ;;  %v4107_v26 = vld [vmem:[%s5142_s1 + $0x698] sm:$0xff]  ;;  %v4106_v30 = vld [vmem:[%s5142_s1 + $0x690] sm:$0xff] }
  0xa5   :  { %2580 = vmatpush.bf16.msrb.mxu3 %v4087_v27  ;;  %v4115_v27 = vld [vmem:[%s5142_s1 + $0x6d8] sm:$0xff]  ;;  %v4114_v31 = vld [vmem:[%s5142_s1 + $0x6d0] sm:$0xff] }
  0xa6   :  { %2539 = vmatpush.bf16.msrb.mxu0 %v4062_v32  ;;  %v4089_v32 = vld [vmem:[%s5142_s1 + $0x608] sm:$0xff] }
  0xa7   :  { %2553 = vmatpush.bf16.msrb.mxu1 %v4070_v33  ;;  %v4097_v33 = vld [vmem:[%s5142_s1 + $0x648] sm:$0xff] }
  0xa8   :  { %2567 = vmatpush.bf16.msrb.mxu2 %v4078_v34  ;;  %v4105_v34 = vld [vmem:[%s5142_s1 + $0x688] sm:$0xff] }
  0xa9   :  { %2581 = vmatpush.bf16.msrb.mxu3 %v4086_v35  ;;  %v4113_v35 = vld [vmem:[%s5142_s1 + $0x6c8] sm:$0xff] }
  0xaa   :  { %2540 = vmatpush.bf16.msrb.mxu0 %v4061_v36  ;;  %v4088_v36 = vld [vmem:[%s5142_s1 + $0x600] sm:$0xff] }
  0xab   :  { %2554 = vmatpush.bf16.msrb.mxu1 %v4069_v37  ;;  %v4096_v37 = vld [vmem:[%s5142_s1 + $0x640] sm:$0xff] }
  0xac   :  { %2568 = vmatpush.bf16.msrb.mxu2 %v4077_v38  ;;  %v4104_v38 = vld [vmem:[%s5142_s1 + $0x680] sm:$0xff] }
  0xad   :  { %2582 = vmatpush.bf16.msrb.mxu3 %v4085_v39  ;;  %v4112_v39 = vld [vmem:[%s5142_s1 + $0x6c0] sm:$0xff] }
  0xae   :  { %2541 = vmatpush.bf16.msrb.mxu0 %v4060_v40  ;;  %v4127_v40 = vld [vmem:[%s5142_s1 + $0x738] sm:$0xff] }
  0xaf   :  { %2555 = vmatpush.bf16.msrb.mxu1 %v4068_v41  ;;  %v4135_v41 = vld [vmem:[%s5142_s1 + $0x778] sm:$0xff] }
  0xb0   :  { %2569 = vmatpush.bf16.msrb.mxu2 %v4076_v42  ;;  %v2810_v42 = vld [vmem:[%s5143_s0 + $0x60] sm:$0xf] }
  0xb1   :  { %2583 = vmatpush.bf16.msrb.mxu3 %v4084_v43  ;;  %v3892_v43 = vld [vmem:[%s5143_s0 + $0xdc] sm:$0xf0] }
  0xb2   :  { %2542 = vmatpush.bf16.msrb.mxu0 %v4059_v44  ;;  %v2818_v44 = vld [vmem:[%s5143_s0 + $0x68] sm:$0xf] }
  0xb3   :  { %2556 = vmatpush.bf16.msrb.mxu1 %v4067_v45  ;;  %v3893_v45 = vld [vmem:[%s5143_s0 + $0xe4] sm:$0xf0] }
  0xb4   :  { %2570 = vmatpush.bf16.msrb.mxu2 %v4075_v46  ;;  %v3876_v46 = vld [vmem:[%s5143_s0 + $0x64] sm:$0xf] }
  0xb5   :  { %2584 = vmatpush.bf16.msrb.mxu3 %v4083_v47  ;;  %v2812_v47 = vld [vmem:[%s5143_s0 + $0xe0] sm:$0xf0] }
  0xb6   :  { %2543 = vmatpush.bf16.msrb.mxu0 %v4058_v48  ;;  %v3877_v48 = vld [vmem:[%s5143_s0 + $0x6c] sm:$0xf] }
  0xb7   :  { %2557 = vmatpush.bf16.msrb.mxu1 %v4066_v49  ;;  %v2820_v49 = vld [vmem:[%s5143_s0 + $0xe8] sm:$0xf0] }
  0xb8   :  { %2571 = vmatpush.bf16.msrb.mxu2 %v4074_v50  ;;  %v4143_v50 = vld [vmem:[%s5142_s1 + $0x7b8] sm:$0xff] }
  0xb9   :  { %2585 = vmatpush.bf16.msrb.mxu3 %v4082_v51  ;;  %v4151_v51 = vld [vmem:[%s5142_s1 + $0x7f8] sm:$0xff] }
  0xba   :  { %2544 = vmatpush.bf16.msrb.mxu0 %v4057_v52  ;;  %v2811_v52 = vor.u32 %v3892_v43, %v2810_v42 }
  0xbb   :  { %2558 = vmatpush.bf16.msrb.mxu1 %v4065_v53  ;;  %v2819_v53 = vor.u32 %v3893_v45, %v2818_v44 }
  0xbc   :  { %2572 = vmatpush.bf16.msrb.mxu2 %v4073_v54  ;;  %v2815_v54 = vor.u32 %v3876_v46, %v2812_v47  ;;  %v4152_v46 = vld [vmem:[%s5144_s2] ss:$0 sm:$0xff] }
  0xbd   :  { %2586 = vmatpush.bf16.msrb.mxu3 %v4081_v55  ;;  %v2823_v55 = vor.u32 %v3877_v48, %v2820_v49 }
  0xbe   :  { %2545 = vmatpush.bf16.msrb.mxu0 %v4056_v56  ;;  %v4126_v56 = vld [vmem:[%s5142_s1 + $0x730] sm:$0xff] }
  0xbf   :  { %2559 = vmatpush.bf16.msrb.mxu1 %v4064_v57  ;;  %v4134_v57 = vld [vmem:[%s5142_s1 + $0x770] sm:$0xff] }
  0xc0   :  { %2573 = vmatpush.bf16.msrb.mxu2 %v4072_v58  ;;  %v4142_v58 = vld [vmem:[%s5142_s1 + $0x7b0] sm:$0xff] }
  0xc1   :  { %2587 = vmatpush.bf16.msrb.mxu3 %v4080_v59  ;;  %2546 = vmatmul.bf16.vlgmr.msrb.gmra.mxu0 %v2795_v8  ;;  %v4150_v59 = vld [vmem:[%s5142_s1 + $0x7f0] sm:$0xff] }
  0xc2   :  { %2594 = vmatpush.bf16.msra.mxu0 %v4095_v60  ;;  %2560 = vmatmul.bf16.vlgmr.msrb.gmra.mxu1 %v2799_v10  ;;  %v4125_v60 = vld [vmem:[%s5142_s1 + $0x728] sm:$0xff]  ;;  %v4122_v8 = vld [vmem:[%s5142_s1 + $0x710] sm:$0xff] }
  0xc3   :  { %2608 = vmatpush.bf16.msra.mxu1 %v4103_v61  ;;  %2574 = vmatmul.bf16.vlgmr.msrb.gmra.mxu2 %v2803_v9  ;;  %v4133_v61 = vld [vmem:[%s5142_s1 + $0x768] sm:$0xff]  ;;  %v4130_v9 = vld [vmem:[%s5142_s1 + $0x750] sm:$0xff] }
  0xc4   :  { %2622 = vmatpush.bf16.msra.mxu2 %v4111_v6  ;;  %2588 = vmatmul.bf16.vlgmr.msrb.gmra.mxu3 %v2807_v11  ;;  %v4139_v6 = vld [vmem:[%s5142_s1 + $0x798] sm:$0xff]  ;;  %v4138_v10 = vld [vmem:[%s5142_s1 + $0x790] sm:$0xff] }
  0xc5   :  { %2636 = vmatpush.bf16.msra.mxu3 %v4119_v7  ;;  %v4147_v7 = vld [vmem:[%s5142_s1 + $0x7d8] sm:$0xff]  ;;  %v4146_v11 = vld [vmem:[%s5142_s1 + $0x7d0] sm:$0xff] }
  0xc6   :  { %2595 = vmatpush.bf16.msra.mxu0 %v4094_v12  ;;  %v4121_v12 = vld [vmem:[%s5142_s1 + $0x708] sm:$0xff] }
  0xc7   :  { %2609 = vmatpush.bf16.msra.mxu1 %v4102_v13  ;;  %v4129_v13 = vld [vmem:[%s5142_s1 + $0x748] sm:$0xff] }
  0xc8   :  { %2623 = vmatpush.bf16.msra.mxu2 %v4110_v14  ;;  %v4137_v14 = vld [vmem:[%s5142_s1 + $0x788] sm:$0xff] }
  0xc9   :  { %2637 = vmatpush.bf16.msra.mxu3 %v4118_v15  ;;  %v4145_v15 = vld [vmem:[%s5142_s1 + $0x7c8] sm:$0xff] }
  0xca   :  { %2596 = vmatpush.bf16.msra.mxu0 %v4093_v16  ;;  %v4120_v16 = vld [vmem:[%s5142_s1 + $0x700] sm:$0xff] }
  0xcb   :  { %2610 = vmatpush.bf16.msra.mxu1 %v4101_v17  ;;  %v4128_v17 = vld [vmem:[%s5142_s1 + $0x740] sm:$0xff] }
  0xcc   :  { %2624 = vmatpush.bf16.msra.mxu2 %v4109_v18  ;;  %v4136_v18 = vld [vmem:[%s5142_s1 + $0x780] sm:$0xff] }
  0xcd   :  { %2638 = vmatpush.bf16.msra.mxu3 %v4117_v19  ;;  %v4144_v19 = vld [vmem:[%s5142_s1 + $0x7c0] sm:$0xff] }
  0xce   :  { %2597 = vmatpush.bf16.msra.mxu0 %v4092_v20  ;;  %v2826_v20 = vld [vmem:[%s5143_s0 + $0x70] sm:$0xf] }
  0xcf   :  { %2611 = vmatpush.bf16.msra.mxu1 %v4100_v21  ;;  %v3894_v21 = vld [vmem:[%s5143_s0 + $0xec] sm:$0xf0] }
  0xd0   :  { %2625 = vmatpush.bf16.msra.mxu2 %v4108_v22  ;;  %v3878_v22 = vld [vmem:[%s5143_s0 + $0x74] sm:$0xf] }
  0xd1   :  { %2639 = vmatpush.bf16.msra.mxu3 %v4116_v23  ;;  %v2828_v23 = vld [vmem:[%s5143_s0 + $0xf0] sm:$0xf0] }
  0xd2   :  { %2598 = vmatpush.bf16.msra.mxu0 %v4091_v24  ;;  %v2834_v24 = vld [vmem:[%s5143_s0 + $0x78] sm:$0xf] }
  0xd3   :  { %2612 = vmatpush.bf16.msra.mxu1 %v4099_v25  ;;  %v3895_v25 = vld [vmem:[%s5143_s0 + $0xf4] sm:$0xf0] }
  0xd4   :  { %2626 = vmatpush.bf16.msra.mxu2 %v4107_v26  ;;  %v3879_v26 = vld [vmem:[%s5143_s0 + $0x7c] sm:$0xf] }
  0xd5   :  { %2640 = vmatpush.bf16.msra.mxu3 %v4115_v27  ;;  %v2836_v27 = vld [vmem:[%s5143_s0 + $0xf8] sm:$0xf0] }
  0xd6   :  { %2599 = vmatpush.bf16.msra.mxu0 %v4090_v28  ;;  %v2827_v28 = vor.u32 %v3894_v21, %v2826_v20 }
  0xd7   :  { %2613 = vmatpush.bf16.msra.mxu1 %v4098_v29  ;;  %v2831_v29 = vor.u32 %v3878_v22, %v2828_v23 }
  0xd8   :  { %2627 = vmatpush.bf16.msra.mxu2 %v4106_v30  ;;  %v2267_v30 = vpop.f32.mrf.mxu0 }
  0xd9   :  { %2641 = vmatpush.bf16.msra.mxu3 %v4114_v31  ;;  %v2835_v31 = vor.u32 %v3895_v25, %v2834_v24 }
  0xda   :  { %2600 = vmatpush.bf16.msra.mxu0 %v4089_v32  ;;  %v2839_v32 = vor.u32 %v3879_v26, %v2836_v27 }
  0xdb   :  { %2614 = vmatpush.bf16.msra.mxu1 %v4097_v33  ;;  %v2281_v33 = vpop.f32.mrf.mxu1 }
  0xdc   :  { %2628 = vmatpush.bf16.msra.mxu2 %v4105_v34  ;;  %v2295_v34 = vpop.f32.mrf.mxu2 }
  0xdd   :  { %2642 = vmatpush.bf16.msra.mxu3 %v4113_v35  ;;  %v2309_v35 = vpop.f32.mrf.mxu3 }
  0xde   :  { %2601 = vmatpush.bf16.msra.mxu0 %v4088_v36 }
  0xdf   :  { %2615 = vmatpush.bf16.msra.mxu1 %v4096_v37 }
  0xe0   :  { %2629 = vmatpush.bf16.msra.mxu2 %v4104_v38  ;;  %v2269_v36 = vpop.f32.mrf.mxu0 }
  0xe1   :  { %2643 = vmatpush.bf16.msra.mxu3 %v4112_v39  ;;  %2602 = vmatmul.bf16.vlgmr.msra.gmra.mxu0 %v2811_v52 }
  0xe2   :  { %2650 = vmatpush.bf16.msrb.mxu0 %v4127_v40  ;;  %2616 = vmatmul.bf16.vlgmr.msra.gmra.mxu1 %v2815_v54 }
  0xe3   :  { %2664 = vmatpush.bf16.msrb.mxu1 %v4135_v41  ;;  %2630 = vmatmul.bf16.vlgmr.msra.gmra.mxu2 %v2819_v53  ;;  %v2283_v37 = vpop.f32.mrf.mxu1 }
  0xe4   :  { %2678 = vmatpush.bf16.msrb.mxu2 %v4143_v50  ;;  %2644 = vmatmul.bf16.vlgmr.msra.gmra.mxu3 %v2823_v55  ;;  %v2297_v38 = vpop.f32.mrf.mxu2  ;;  %v2268_v50 = vadd.f32 %v4152_v46, %v2267_v30 }
  0xe5   :  { %2692 = vmatpush.bf16.msrb.mxu3 %v4151_v51  ;;  %v2311_v39 = vpop.f32.mrf.mxu3 }
  0xe6   :  { %2651 = vmatpush.bf16.msrb.mxu0 %v4126_v56  ;;  %v2282_v52 = vadd.f32 %v2281_v33, %v2268_v50 }
  0xe7   :  { %2665 = vmatpush.bf16.msrb.mxu1 %v4134_v57  ;;  %v2270_v57 = vadd.f32 %v4152_v46, %v2269_v36 }
  0xe8   :  { %2679 = vmatpush.bf16.msrb.mxu2 %v4142_v58  ;;  %v2323_v40 = vpop.f32.mrf.mxu0  ;;  %v2296_v55 = vadd.f32 %v2295_v34, %v2282_v52 }
  0xe9   :  { %2693 = vmatpush.bf16.msrb.mxu3 %v4150_v59 }
  0xea   :  { %2652 = vmatpush.bf16.msrb.mxu0 %v4125_v60  ;;  %v2310_v59 = vadd.f32 %v2309_v35, %v2296_v55  ;;  %v2284_v60 = vadd.f32 %v2283_v37, %v2270_v57 }
  0xeb   :  { %2666 = vmatpush.bf16.msrb.mxu1 %v4133_v61  ;;  %v2337_v41 = vpop.f32.mrf.mxu1 }
  0xec   :  { %2680 = vmatpush.bf16.msrb.mxu2 %v4141_v62  ;;  %v2351_v42 = vpop.f32.mrf.mxu2 }
  0xed   :  { %2694 = vmatpush.bf16.msrb.mxu3 %v4149_v63  ;;  %v2365_v43 = vpop.f32.mrf.mxu3  ;;  %v2324_v63 = vadd.f32 %v2323_v40, %v2310_v59 }
  0xee   :  { %2653 = vmatpush.bf16.msrb.mxu0 %v4124_v0 }
  0xef   :  { %2667 = vmatpush.bf16.msrb.mxu1 %v4132_v1  ;;  %v2298_v1 = vadd.f32 %v2297_v38, %v2284_v60 }
  0xf0   :  { %2681 = vmatpush.bf16.msrb.mxu2 %v4140_v2  ;;  %v2325_v44 = vpop.f32.mrf.mxu0 }
  0xf1   :  { %2695 = vmatpush.bf16.msrb.mxu3 %v4148_v3  ;;  %v2338_v3 = vadd.f32 %v2337_v41, %v2324_v63 }
  0xf2   :  { %2654 = vmatpush.bf16.msrb.mxu0 %v4123_v4  ;;  %v2312_v4 = vadd.f32 %v2311_v39, %v2298_v1 }
  0xf3   :  { %2668 = vmatpush.bf16.msrb.mxu1 %v4131_v5  ;;  %v2339_v45 = vpop.f32.mrf.mxu1 }
  0xf4   :  { %2682 = vmatpush.bf16.msrb.mxu2 %v4139_v6  ;;  %v2353_v47 = vpop.f32.mrf.mxu2 }
  0xf5   :  { %2696 = vmatpush.bf16.msrb.mxu3 %v4147_v7  ;;  %v2367_v48 = vpop.f32.mrf.mxu3  ;;  %v2352_v7 = vadd.f32 %v2351_v42, %v2338_v3 }
  0xf6   :  { %2655 = vmatpush.bf16.msrb.mxu0 %v4122_v8  ;;  %v2326_v8 = vadd.f32 %v2325_v44, %v2312_v4 }
  0xf7   :  { %2669 = vmatpush.bf16.msrb.mxu1 %v4130_v9 }
  0xf8   :  { %2683 = vmatpush.bf16.msrb.mxu2 %v4138_v10  ;;  %v2379_v49 = vpop.f32.mrf.mxu0  ;;  %v2366_v10 = vadd.f32 %v2365_v43, %v2352_v7 }
  0xf9   :  { %2697 = vmatpush.bf16.msrb.mxu3 %v4146_v11 }
  0xfa   :  { %2656 = vmatpush.bf16.msrb.mxu0 %v4121_v12  ;;  %v2340_v12 = vadd.f32 %v2339_v45, %v2326_v8 }
  0xfb   :  { %2670 = vmatpush.bf16.msrb.mxu1 %v4129_v13  ;;  %v2393_v51 = vpop.f32.mrf.mxu1  ;;  %v2380_v13 = vadd.f32 %v2379_v49, %v2366_v10 }
  0xfc   :  { %2684 = vmatpush.bf16.msrb.mxu2 %v4137_v14  ;;  %v2407_v53 = vpop.f32.mrf.mxu2  ;;  %v2354_v14 = vadd.f32 %v2353_v47, %v2340_v12 }
  0xfd   :  { %2698 = vmatpush.bf16.msrb.mxu3 %v4145_v15  ;;  %v2421_v54 = vpop.f32.mrf.mxu3 }
  0xfe   :  { %2657 = vmatpush.bf16.msrb.mxu0 %v4120_v16 }
  0xff   :  { %2671 = vmatpush.bf16.msrb.mxu1 %v4128_v17  ;;  %v2394_v17 = vadd.f32 %v2393_v51, %v2380_v13 }
 0x100   :  { %2685 = vmatpush.bf16.msrb.mxu2 %v4136_v18  ;;  %v2381_v56 = vpop.f32.mrf.mxu0 }
 0x101   :  { %2699 = vmatpush.bf16.msrb.mxu3 %v4144_v19  ;;  %2658 = vmatmul.bf16.vlgmr.msrb.gmra.mxu0 %v2827_v28  ;;  %v2368_v19 = vadd.f32 %v2367_v48, %v2354_v14  ;;  %v2408_v20 = vadd.f32 %v2407_v53, %v2394_v17 }
 0x102   :  { %2672 = vmatmul.bf16.vlgmr.msrb.gmra.mxu1 %v2831_v29 }
 0x103   :  { %2686 = vmatmul.bf16.vlgmr.msrb.gmra.mxu2 %v2835_v31  ;;  %v2395_v58 = vpop.f32.mrf.mxu1  ;;  %v2382_v22 = vadd.f32 %v2381_v56, %v2368_v19  ;;  %v2422_v23 = vadd.f32 %v2421_v54, %v2408_v20 }
 0x104   :  { %2700 = vmatmul.bf16.vlgmr.msrb.gmra.mxu3 %v2839_v32  ;;  %v2409_v61 = vpop.f32.mrf.mxu2 }
 0x105   :  { %v2423_v62 = vpop.f32.mrf.mxu3  ;;  %v2396_v26 = vadd.f32 %v2395_v58, %v2382_v22 }
 0x107   :  { %v2410_v28 = vadd.f32 %v2409_v61, %v2396_v26 }
 0x108   :  { %v2435_v0 = vpop.f32.mrf.mxu0 }
 0x109   :  { %v2436_v27 = vadd.f32 %v2435_v0, %v2422_v23  ;;  %v2424_v32 = vadd.f32 %v2423_v62, %v2410_v28 }
 0x10b   :  { %v2449_v2 = vpop.f32.mrf.mxu1 }
 0x10c   :  { %v2463_v5 = vpop.f32.mrf.mxu2  ;;  %v2450_v30 = vadd.f32 %v2449_v2, %v2436_v27 }
 0x10d   :  { %v2477_v6 = vpop.f32.mrf.mxu3 }
 0x10e   :  { %v2464_v33 = vadd.f32 %v2463_v5, %v2450_v30 }
 0x110   :  { %v2437_v9 = vpop.f32.mrf.mxu0  ;;  %v2478_v37 = vadd.f32 %v2477_v6, %v2464_v33 }
 0x111   :  { %v2438_v34 = vadd.f32 %v2437_v9, %v2424_v32 }
 0x113   :  { %v2451_v11 = vpop.f32.mrf.mxu1 }
 0x114   :  { %v2465_v15 = vpop.f32.mrf.mxu2  ;;  %v2452_v39 = vadd.f32 %v2451_v11, %v2438_v34 }
 0x115   :  { %v2479_v16 = vpop.f32.mrf.mxu3 }
 0x116   :  { %v2466_v42 = vadd.f32 %v2465_v15, %v2452_v39 }
 0x118   :  { %v2480_v46 = vadd.f32 %v2479_v16, %v2466_v42 }
 0x11e   :  { %v2491_v18 = vpop.f32.mrf.mxu0 }
 0x11f   :  { %v2505_v21 = vpop.f32.mrf.mxu1  ;;  %v2492_v40 = vadd.f32 %v2491_v18, %v2478_v37 }
 0x121   :  { %v2506_v43 = vadd.f32 %v2505_v21, %v2492_v40 }
 0x126   :  { %v2519_v24 = vpop.f32.mrf.mxu2  ;;  %v2493_v29 = vpop.f32.mrf.mxu0 }
 0x127   :  { %v2533_v25 = vpop.f32.mrf.mxu3  ;;  %v2507_v31 = vpop.f32.mrf.mxu1  ;;  %v2520_v47 = vadd.f32 %v2519_v24, %v2506_v43  ;;  %v2494_v48 = vadd.f32 %v2493_v29, %v2480_v46 }
 0x129   :  { %v2534_v50 = vadd.f32 %v2533_v25, %v2520_v47  ;;  %v2508_v52 = vadd.f32 %v2507_v31, %v2494_v48 }
 0x12e   :  { %v2521_v35 = vpop.f32.mrf.mxu2 }
 0x12f   :  { %v2535_v36 = vpop.f32.mrf.mxu3  ;;  %v2522_v54 = vadd.f32 %v2521_v35, %v2508_v52 }
 0x131   :  { %v2536_v59 = vadd.f32 %v2535_v36, %v2522_v54 }
 0x13e   :  { %v2547_v38 = vpop.f32.mrf.mxu0 }
 0x13f   :  { %v2561_v41 = vpop.f32.mrf.mxu1  ;;  %v2548_v53 = vadd.f32 %v2547_v38, %v2534_v50 }
 0x141   :  { %v2562_v57 = vadd.f32 %v2561_v41, %v2548_v53 }
 0x146   :  { %v2575_v44 = vpop.f32.mrf.mxu2  ;;  %v2549_v49 = vpop.f32.mrf.mxu0 }
 0x147   :  { %v2589_v45 = vpop.f32.mrf.mxu3  ;;  %v2563_v51 = vpop.f32.mrf.mxu1  ;;  %v2576_v60 = vadd.f32 %v2575_v44, %v2562_v57  ;;  %v2550_v62 = vadd.f32 %v2549_v49, %v2536_v59 }
 0x149   :  { %v2590_v63 = vadd.f32 %v2589_v45, %v2576_v60  ;;  %v2564_v2 = vadd.f32 %v2563_v51, %v2550_v62 }
 0x14e   :  { %v2577_v55 = vpop.f32.mrf.mxu2 }
 0x14f   :  { %v2591_v56 = vpop.f32.mrf.mxu3  ;;  %v2578_v4 = vadd.f32 %v2577_v55, %v2564_v2 }
 0x151   :  { %v2592_v8 = vadd.f32 %v2591_v56, %v2578_v4 }
 0x15e   :  { %v2603_v58 = vpop.f32.mrf.mxu0 }
 0x15f   :  { %v2617_v61 = vpop.f32.mrf.mxu1  ;;  %v2604_v3 = vadd.f32 %v2603_v58, %v2590_v63 }
 0x161   :  { %v2618_v6 = vadd.f32 %v2617_v61, %v2604_v3 }
 0x166   :  { %v2631_v0 = vpop.f32.mrf.mxu2  ;;  %v2605_v5 = vpop.f32.mrf.mxu0 }
 0x167   :  { %v2645_v1 = vpop.f32.mrf.mxu3  ;;  %v2619_v7 = vpop.f32.mrf.mxu1  ;;  %v2632_v9 = vadd.f32 %v2631_v0, %v2618_v6  ;;  %v2606_v10 = vadd.f32 %v2605_v5, %v2592_v8 }
 0x169   :  { %v2646_v13 = vadd.f32 %v2645_v1, %v2632_v9  ;;  %v2620_v15 = vadd.f32 %v2619_v7, %v2606_v10 }
 0x16e   :  { %v2633_v11 = vpop.f32.mrf.mxu2 }
 0x16f   :  { %v2647_v12 = vpop.f32.mrf.mxu3  ;;  %v2634_v18 = vadd.f32 %v2633_v11, %v2620_v15 }
 0x171   :  { %v2648_v22 = vadd.f32 %v2647_v12, %v2634_v18 }
 0x17e   :  { %v2659_v14 = vpop.f32.mrf.mxu0 }
 0x17f   :  { %v2660_v16 = vadd.f32 %v2659_v14, %v2646_v13  ;;  %v2673_v17 = vpop.f32.mrf.mxu1 }
 0x181   :  { %v2674_v19 = vadd.f32 %v2673_v17, %v2660_v16 }
 0x186   :  { %v2687_v20 = vpop.f32.mrf.mxu2  ;;  %v2661_v24 = vpop.f32.mrf.mxu0 }
 0x187   :  { %v2701_v21 = vpop.f32.mrf.mxu3  ;;  %v2688_v23 = vadd.f32 %v2687_v20, %v2674_v19  ;;  %v2662_v26 = vadd.f32 %v2661_v24, %v2648_v22  ;;  %v2675_v27 = vpop.f32.mrf.mxu1 }
 0x189   :  { %v2702_v25 = vadd.f32 %v2701_v21, %v2688_v23  ;;  %v2676_v28 = vadd.f32 %v2675_v27, %v2662_v26 }
 0x18b   :  { %2706 = vst [vmem:[%s5145_s3] sm:$0xff] %v2702_v25 }
 0x18e   :  { %v2689_v29 = vpop.f32.mrf.mxu2 }
 0x18f   :  { %v2690_v30 = vadd.f32 %v2689_v29, %v2676_v28  ;;  %v2703_v31 = vpop.f32.mrf.mxu3 }
 0x191   :  { %v2704_v32 = vadd.f32 %v2703_v31, %v2690_v30 }
 0x193   :  { %2707 = vst [vmem:[%s5145_s3 + $0x8] sm:$0xff] %v2704_v32 }

</bundles_post_ra>
